<compile_context>
chip_gen: v7x
topology: tpu7x:2x2x1
jax: 0.10.0
libtpu: 0.0.40
codegen_flags: <defaults>
</compile_context>

<pallas_src>
import jax
import jax.numpy as jnp
from jax.experimental import pallas as pl
from jax.experimental.pallas import tpu as pltpu

MAX_LENGTH = 128
IN_DIM = 768
HID_DIM = 16
OUT_DIM = 768


# ----------------------------------------------------------------------------
# Pallas kernel: full Net forward for a block of Bb batch elements.
# ----------------------------------------------------------------------------
def gcn_net_kernel(head_ref, x_ref, w1_ref, b1_ref, w2_ref, b2_ref, o_ref):
    Bb, L, IN = x_ref.shape
    OUT = o_ref.shape[-1]

    # --- build A = onehot(head) + I  and D^{-1/2}, entirely in VMEM ---------
    head = head_ref[...]                                           # (Bb, 1, L) int32
    iota_t = jax.lax.broadcasted_iota(jnp.int32, (Bb, L, L), 1)    # target (rows)
    iota_s = jax.lax.broadcasted_iota(jnp.int32, (Bb, L, L), 2)    # source (cols)
    # A[b, t, s] = [head[b, s] == t] + [t == s]; head == -1 never matches.
    A = ((iota_t == head).astype(jnp.float32)
         + (iota_t == iota_s).astype(jnp.float32))                 # (Bb, L, L)
    deg = jnp.sum(A, axis=2, keepdims=True)                        # (Bb, L, 1), >= 1
    dinv = jax.lax.rsqrt(deg)                                      # D^{-1/2}
    A = A.astype(jnp.bfloat16)                                     # exact: {0,1,2}

    # Â @ Y  ==  dinv * (A @ (dinv * Y))   (symmetric normalization folded in)

    # --- GCNConv(768, 16):  Â @ (X @ W1) + b1 , ReLU ------------------------
    x2d = x_ref[...].reshape(Bb * L, IN)                           # bf16
    xw = jnp.dot(x2d, w1_ref[...],
                 preferred_element_type=jnp.float32).reshape(Bb, L, HID_DIM)
    agg = jnp.einsum('bts,bsc->btc', A, (dinv * xw).astype(jnp.bfloat16),
                     preferred_element_type=jnp.float32)
    h = jnp.maximum(dinv * agg + b1_ref[...], 0.0)                 # (Bb, L, 16) f32
    # TODO(synk): F.dropout(x, training=self.training) is identity in eval mode;
    #             training-mode random masking is not reproduced here.

    # --- GCNConv(16, 768), reassociated:  (Â @ H) @ W2 + b2 -----------------
    agg2 = jnp.einsum('bts,bsc->btc', A, (dinv * h).astype(jnp.bfloat16),
                      preferred_element_type=jnp.float32)
    ah = (dinv * agg2).astype(jnp.bfloat16).reshape(Bb * L, HID_DIM)
    h2 = (jnp.dot(ah, w2_ref[...], preferred_element_type=jnp.float32)
          .reshape(Bb, L, OUT) + b2_ref[...])                      # f32

    # --- log_softmax over the node axis (PyTorch dim=1) ---------------------
    m = jnp.max(h2, axis=1, keepdims=True)
    z = h2 - m
    lse = jnp.log(jnp.sum(jnp.exp(z), axis=1, keepdims=True))
    o_ref[...] = (z - lse).astype(o_ref.dtype)


def net_forward_pallas(head, x, w1, b1, w2, b2, *, block_b=2):
    B, L, _ = x.shape
    Bb = min(block_b, B)
    assert B % Bb == 0, "batch must be divisible by the batch block size"

    head3 = head.astype(jnp.int32).reshape(B, 1, L)
    xb = x.astype(jnp.bfloat16)
    w1b = w1.astype(jnp.bfloat16)
    w2b = w2.astype(jnp.bfloat16)
    b1f = b1.astype(jnp.float32).reshape(1, HID_DIM)
    b2f = b2.astype(jnp.float32).reshape(1, OUT_DIM)

    return pl.pallas_call(
        gcn_net_kernel,
        out_shape=jax.ShapeDtypeStruct((B, L, OUT_DIM), jnp.float32),
        grid_spec=pltpu.PrefetchScalarGridSpec(
            num_scalar_prefetch=0,
            grid=(B // Bb,),
            in_specs=[
                pl.BlockSpec((Bb, 1, L), lambda b: (b, 0, 0)),         # head
                pl.BlockSpec((Bb, L, IN_DIM), lambda b: (b, 0, 0)),    # x
                pl.BlockSpec((IN_DIM, HID_DIM), lambda b: (0, 0)),     # w1
                pl.BlockSpec((1, HID_DIM), lambda b: (0, 0)),          # b1
                pl.BlockSpec((HID_DIM, OUT_DIM), lambda b: (0, 0)),    # w2
                pl.BlockSpec((1, OUT_DIM), lambda b: (0, 0)),          # b2
            ],
            out_specs=pl.BlockSpec((Bb, L, OUT_DIM), lambda b: (b, 0, 0)),
        ),
        compiler_params=pltpu.CompilerParams(
            dimension_semantics=("parallel",),
        ),
    )(head3, xb, w1b, b1f, w2b, b2f)


# ----------------------------------------------------------------------------
# Plain-JAX reference (dense adjacency path) for correctness sanity check.
# ----------------------------------------------------------------------------
def build_normalized_adj(head):
    """head: (B, L) int32, entries in [-1, L-1]. Returns (B, L, L) float32."""
    B, L = head.shape
    src = jnp.broadcast_to(jnp.arange(L, dtype=jnp.int32)[None, :], (B, L))
    valid = head != -1
    tgt = jnp.where(valid, head, 0).astype(jnp.int32)
    w = jnp.where(valid, 1.0, 0.0).astype(jnp.float32)

    A = jnp.zeros((B, L, L), jnp.float32)
    b_idx = jnp.broadcast_to(jnp.arange(B, dtype=jnp.int32)[:, None], (B, L))
    A = A.at[b_idx, tgt, src].add(w)          # A[b, target, source] = 1
    A = A + jnp.eye(L, dtype=jnp.float32)[None]
    deg = A.sum(axis=2)
    dinv = jnp.where(deg > 0, 1.0 / jnp.sqrt(deg), 0.0)
    return A * dinv[:, :, None] * dinv[:, None, :]


def net_forward_ref(adj, x, w1, b1, w2, b2):
    h = jnp.einsum("bij,bjk->bik", adj, x @ w1) + b1
    h = jnp.maximum(h, 0.0)
    h2 = jnp.einsum("bij,bjk->bik", adj, h @ w2) + b2
    return jax.nn.log_softmax(h2, axis=1)


def glorot(key, shape):
    fan_in, fan_out = shape
    limit = jnp.sqrt(6.0 / (fan_in + fan_out))
    return jax.random.uniform(key, shape, jnp.float32, -limit, limit)


if __name__ == "__main__":
    key = jax.random.PRNGKey(0)
    k_head, k_x, k_w1, k_w2 = jax.random.split(key, 4)

    B = 4
    L = MAX_LENGTH  # 128, hardcoded in the module

    # Dependency heads: -1 means "no edge for this token" (padding / root).
    head = jax.random.randint(k_head, (B, L), -1, L, dtype=jnp.int32)
    x = jax.random.normal(k_x, (B, L, IN_DIM), jnp.float32)

    # Deterministic parameter init (GCNConv: glorot weight, zero bias).
    w1 = glorot(k_w1, (IN_DIM, HID_DIM))
    b1 = jnp.zeros((1, HID_DIM), jnp.float32)
    w2 = glorot(k_w2, (HID_DIM, OUT_DIM))
    b2 = jnp.zeros((1, OUT_DIM), jnp.float32)

    out = net_forward_pallas(head, x, w1, b1, w2, b2, block_b=2)
    out = jax.block_until_ready(out)

    adj = build_normalized_adj(head)
    ref = net_forward_ref(adj, x, w1, b1, w2, b2)
    assert out.shape == (B, L, OUT_DIM)
    # bf16 matmul inputs (f32 accumulation) + layer-2 reassociation -> loosened tol.
    assert jnp.allclose(out, ref, atol=2e-2, rtol=2e-2), (
        "mismatch vs JAX reference: max |diff| = "
        f"{float(jnp.max(jnp.abs(out - ref)))}")

    print("KERNEL_OK")
</pallas_src>

<mosaic_0001>
module attributes {stable_mosaic.version = 11 : i64} {
  func.func @gcn_net_kernel(%arg0: i32, %arg1: memref<2x1x128xi32, #tpu.memory_space<vmem>>, %arg2: memref<2x128x768xbf16, #tpu.memory_space<vmem>>, %arg3: memref<768x16xbf16, #tpu.memory_space<vmem>>, %arg4: memref<1x16xf32, #tpu.memory_space<vmem>>, %arg5: memref<16x768xbf16, #tpu.memory_space<vmem>>, %arg6: memref<1x768xf32, #tpu.memory_space<vmem>>, %arg7: memref<2x128x768xf32, #tpu.memory_space<vmem>>) attributes {dimension_semantics = [#tpu.dimension_semantics<parallel>], iteration_bounds = array<i64: 2>, scalar_prefetch = 0 : i64, scratch_operands = 0 : i64, tpu.core_type = #tpu.core_type<tc>, window_params = [{transform_indices = @transform_0, window_bounds = array<i64: 2, 1, 128>}, {transform_indices = @transform_1, window_bounds = array<i64: 2, 128, 768>}, {pipeline_mode = #tpu.pipeline_mode<synchronous>, transform_indices = @transform_2, window_bounds = array<i64: 768, 16>}, {pipeline_mode = #tpu.pipeline_mode<synchronous>, transform_indices = @transform_3, window_bounds = array<i64: 1, 16>}, {pipeline_mode = #tpu.pipeline_mode<synchronous>, transform_indices = @transform_4, window_bounds = array<i64: 16, 768>}, {pipeline_mode = #tpu.pipeline_mode<synchronous>, transform_indices = @transform_5, window_bounds = array<i64: 1, 768>}, {transform_indices = @transform_6, window_bounds = array<i64: 2, 128, 768>}]} {
    %c0 = arith.constant 0 : index
    %c0_0 = arith.constant 0 : index
    %c0_1 = arith.constant 0 : index
    %0 = vector.load %arg1[%c0, %c0_0, %c0_1] : memref<2x1x128xi32, #tpu.memory_space<vmem>>, vector<2x1x128xi32>
    %1 = tpu.iota {dimensions = array<i32: 1>} : vector<2x128x128xi32>
    %2 = tpu.iota {dimensions = array<i32: 2>} : vector<2x128x128xi32>
    %3 = vector.broadcast %0 : vector<2x1x128xi32> to vector<2x128x128xi32>
    %4 = arith.cmpi eq, %1, %3 : vector<2x128x128xi32>
    %5 = arith.extui %4 : vector<2x128x128xi1> to vector<2x128x128xi32>
    %6 = arith.sitofp %5 : vector<2x128x128xi32> to vector<2x128x128xf32>
    %7 = arith.cmpi eq, %1, %2 : vector<2x128x128xi32>
    %8 = arith.extui %7 : vector<2x128x128xi1> to vector<2x128x128xi32>
    %9 = arith.sitofp %8 : vector<2x128x128xi32> to vector<2x128x128xf32>
    %10 = arith.addf %6, %9 : vector<2x128x128xf32>
    %cst = arith.constant dense<0.000000e+00> : vector<2x128xf32>
    %11 = vector.multi_reduction <add>, %10, %cst [2] : vector<2x128x128xf32> to vector<2x128xf32>
    %12 = vector.shape_cast %11 : vector<2x128xf32> to vector<2x128x1xf32>
    %13 = math.rsqrt %12 : vector<2x128x1xf32>
    %14 = arith.truncf %10 : vector<2x128x128xf32> to vector<2x128x128xbf16>
    %c0_2 = arith.constant 0 : index
    %c0_3 = arith.constant 0 : index
    %c0_4 = arith.constant 0 : index
    %15 = vector.load %arg2[%c0_2, %c0_3, %c0_4] : memref<2x128x768xbf16, #tpu.memory_space<vmem>>, vector<2x128x768xbf16>
    %16 = vector.shape_cast %15 : vector<2x128x768xbf16> to vector<256x768xbf16>
    %c0_5 = arith.constant 0 : index
    %c0_6 = arith.constant 0 : index
    %17 = vector.load %arg3[%c0_5, %c0_6] : memref<768x16xbf16, #tpu.memory_space<vmem>>, vector<768x16xbf16>
    %cst_7 = arith.constant dense<0.000000e+00> : vector<256x16xf32>
    %18 = tpu.matmul %16, %17, %cst_7 {dimension_numbers = #tpu.dot_dimension_numbers<[1], [0], [0], [1], [0, 0, 1, 1], [], []>} : vector<256x768xbf16>, vector<768x16xbf16>, vector<256x16xf32> -> vector<256x16xf32>
    %19 = vector.shape_cast %18 : vector<256x16xf32> to vector<2x128x16xf32>
    %20 = vector.broadcast %13 : vector<2x128x1xf32> to vector<2x128x16xf32>
    %21 = arith.mulf %20, %19 : vector<2x128x16xf32>
    %22 = arith.truncf %21 : vector<2x128x16xf32> to vector<2x128x16xbf16>
    "tpu.trace_start"() <{level = 10 : i32, message = "bts,bsc->btc"}> : () -> ()
    %cst_8 = arith.constant dense<0.000000e+00> : vector<2x128x16xf32>
    %23 = tpu.matmul %14, %22, %cst_8 {dimension_numbers = #tpu.dot_dimension_numbers<[2], [1], [1], [2], [0, 0, 0, 1, 1, 2], [0], [0]>} : vector<2x128x128xbf16>, vector<2x128x16xbf16>, vector<2x128x16xf32> -> vector<2x128x16xf32>
    "tpu.trace_stop"() : () -> ()
    %24 = vector.broadcast %13 : vector<2x128x1xf32> to vector<2x128x16xf32>
    %25 = arith.mulf %24, %23 : vector<2x128x16xf32>
    %c0_9 = arith.constant 0 : index
    %c0_10 = arith.constant 0 : index
    %26 = vector.load %arg4[%c0_9, %c0_10] : memref<1x16xf32, #tpu.memory_space<vmem>>, vector<1x16xf32>
    %27 = vector.shape_cast %26 : vector<1x16xf32> to vector<1x1x16xf32>
    %28 = vector.broadcast %27 : vector<1x1x16xf32> to vector<2x128x16xf32>
    %29 = arith.addf %25, %28 : vector<2x128x16xf32>
    %cst_11 = arith.constant 0.000000e+00 : f32
    %30 = vector.broadcast %cst_11 : f32 to vector<2x128x16xf32>
    %31 = arith.maximumf %29, %30 : vector<2x128x16xf32>
    %32 = vector.broadcast %13 : vector<2x128x1xf32> to vector<2x128x16xf32>
    %33 = arith.mulf %32, %31 : vector<2x128x16xf32>
    %34 = arith.truncf %33 : vector<2x128x16xf32> to vector<2x128x16xbf16>
    "tpu.trace_start"() <{level = 10 : i32, message = "bts,bsc->btc"}> : () -> ()
    %cst_12 = arith.constant dense<0.000000e+00> : vector<2x128x16xf32>
    %35 = tpu.matmul %14, %34, %cst_12 {dimension_numbers = #tpu.dot_dimension_numbers<[2], [1], [1], [2], [0, 0, 0, 1, 1, 2], [0], [0]>} : vector<2x128x128xbf16>, vector<2x128x16xbf16>, vector<2x128x16xf32> -> vector<2x128x16xf32>
    "tpu.trace_stop"() : () -> ()
    %36 = vector.broadcast %13 : vector<2x128x1xf32> to vector<2x128x16xf32>
    %37 = arith.mulf %36, %35 : vector<2x128x16xf32>
    %38 = arith.truncf %37 : vector<2x128x16xf32> to vector<2x128x16xbf16>
    %39 = vector.shape_cast %38 : vector<2x128x16xbf16> to vector<256x16xbf16>
    %c0_13 = arith.constant 0 : index
    %c0_14 = arith.constant 0 : index
    %40 = vector.load %arg5[%c0_13, %c0_14] : memref<16x768xbf16, #tpu.memory_space<vmem>>, vector<16x768xbf16>
    %cst_15 = arith.constant dense<0.000000e+00> : vector<256x768xf32>
    %41 = tpu.matmul %39, %40, %cst_15 {dimension_numbers = #tpu.dot_dimension_numbers<[1], [0], [0], [1], [0, 0, 1, 1], [], []>} : vector<256x16xbf16>, vector<16x768xbf16>, vector<256x768xf32> -> vector<256x768xf32>
    %42 = vector.shape_cast %41 : vector<256x768xf32> to vector<2x128x768xf32>
    %c0_16 = arith.constant 0 : index
    %c0_17 = arith.constant 0 : index
    %43 = vector.load %arg6[%c0_16, %c0_17] : memref<1x768xf32, #tpu.memory_space<vmem>>, vector<1x768xf32>
    %44 = vector.shape_cast %43 : vector<1x768xf32> to vector<1x1x768xf32>
    %45 = vector.broadcast %44 : vector<1x1x768xf32> to vector<2x128x768xf32>
    %46 = arith.addf %42, %45 : vector<2x128x768xf32>
    %cst_18 = arith.constant dense<0xFF800000> : vector<2x768xf32>
    %47 = vector.multi_reduction <maximumf>, %46, %cst_18 [1] : vector<2x128x768xf32> to vector<2x768xf32>
    %48 = vector.shape_cast %47 : vector<2x768xf32> to vector<2x1x768xf32>
    %49 = vector.broadcast %48 : vector<2x1x768xf32> to vector<2x128x768xf32>
    %50 = arith.subf %46, %49 : vector<2x128x768xf32>
    %51 = math.exp %50 : vector<2x128x768xf32>
    %cst_19 = arith.constant dense<0.000000e+00> : vector<2x768xf32>
    %52 = vector.multi_reduction <add>, %51, %cst_19 [1] : vector<2x128x768xf32> to vector<2x768xf32>
    %53 = vector.shape_cast %52 : vector<2x768xf32> to vector<2x1x768xf32>
    %54 = math.log %53 : vector<2x1x768xf32>
    %55 = vector.broadcast %54 : vector<2x1x768xf32> to vector<2x128x768xf32>
    %56 = arith.subf %50, %55 : vector<2x128x768xf32>
    %c0_20 = arith.constant 0 : index
    %c0_21 = arith.constant 0 : index
    %c0_22 = arith.constant 0 : index
    %57 = vector.load %arg7[%c0_20, %c0_21, %c0_22] : memref<2x128x768xf32, #tpu.memory_space<vmem>>, vector<2x128x768xf32>
    tpu.vector_store %arg7[%c0_20, %c0_21, %c0_22], %56 {strides = array<i32>} : memref<2x128x768xf32, #tpu.memory_space<vmem>>, vector<2x128x768xf32>,
    return
  }
  func.func @transform_0(%arg0: i32) -> (i32, i32, i32) {
    %c0_i32 = arith.constant 0 : i32
    %c0_i32_0 = arith.constant 0 : i32
    %c0_i32_1 = arith.constant 0 : i32
    return %arg0, %c0_i32, %c0_i32_0 : i32, i32, i32
  }
  func.func @transform_1(%arg0: i32) -> (i32, i32, i32) {
    %c0_i32 = arith.constant 0 : i32
    %c0_i32_0 = arith.constant 0 : i32
    %c0_i32_1 = arith.constant 0 : i32
    return %arg0, %c0_i32, %c0_i32_0 : i32, i32, i32
  }
  func.func @transform_2(%arg0: i32) -> (i32, i32) {
    %c0_i32 = arith.constant 0 : i32
    %c0_i32_0 = arith.constant 0 : i32
    %c0_i32_1 = arith.constant 0 : i32
    return %c0_i32, %c0_i32_0 : i32, i32
  }
  func.func @transform_3(%arg0: i32) -> (i32, i32) {
    %c0_i32 = arith.constant 0 : i32
    %c0_i32_0 = arith.constant 0 : i32
    %c0_i32_1 = arith.constant 0 : i32
    return %c0_i32, %c0_i32_0 : i32, i32
  }
  func.func @transform_4(%arg0: i32) -> (i32, i32) {
    %c0_i32 = arith.constant 0 : i32
    %c0_i32_0 = arith.constant 0 : i32
    %c0_i32_1 = arith.constant 0 : i32
    return %c0_i32, %c0_i32_0 : i32, i32
  }
  func.func @transform_5(%arg0: i32) -> (i32, i32) {
    %c0_i32 = arith.constant 0 : i32
    %c0_i32_0 = arith.constant 0 : i32
    %c0_i32_1 = arith.constant 0 : i32
    return %c0_i32, %c0_i32_0 : i32, i32
  }
  func.func @transform_6(%arg0: i32) -> (i32, i32, i32) {
    %c0_i32 = arith.constant 0 : i32
    %c0_i32_0 = arith.constant 0 : i32
    %c0_i32_1 = arith.constant 0 : i32
    return %arg0, %c0_i32, %c0_i32_0 : i32, i32, i32
  }
}

</mosaic_0001>

<bundles_post_ra>
// kernel: tpu_custom_call.1
= control target key start
LH: loop header
LB: loop body
LE: loop exit
PB: predicated region body
PF: predicated region fallthrough
CT: control target
= control target key end

     0   :  { %s11420_s0 = inlined_call_operand.hbm [shape: s32[4,1,128], index: 0, kind: input, shape index: {}]   ;;  %s11421_s1 = inlined_call_operand.hbm [shape: bf16[4,128,768], index: 1, kind: input, shape index: {}]   ;;  %s11422_s2 = inlined_call_operand.vmem [shape: bf16[768,16], index: 2, kind: input, shape index: {}]   ;;  %s11423_s3 = inlined_call_operand.hbm [shape: f32[1,16], index: 3, kind: input, shape index: {}]   ;;  %s11424_s4 = inlined_call_operand.hbm [shape: bf16[16,768], index: 4, kind: input, shape index: {}]   ;;  %s11425_s5 = inlined_call_operand.hbm [shape: f32[1,768], index: 5, kind: input, shape index: {}]   ;;  %s11426_s6 = inlined_call_operand.hbm [shape: f32[4,128,768], index: 6, kind: output, shape index: {}]  }
   0x1   :  { %11704 = sst [smem:[#allocation140_spill]] %s11420_s0 }
   0x2   :  { %11705 = sst [smem:[#allocation141_spill]] %s11423_s3 }
   0x3   :  { %11706 = sst [smem:[#allocation142_spill]] %s11424_s4 }
   0x4   :  { %11707 = sst [smem:[#allocation143_spill]] %s11425_s5 }
   0x5   :  { %11 = vsyncpa [#allocation3], 0 }
   0x6   :  { %13 = vsyncpa [#allocation3 + $0x1], 0 }
   0x7   :  { %14 = vsyncpa [#allocation6], 0 }
   0x8   :  { %16 = vsyncpa [#allocation6 + $0x1], 0 }
   0x9   :  { %17 = vsyncpa [#allocation9], 0 }
   0xa   :  { %18 = vsyncpa [#allocation4], 0 }
   0xb   :  { %20 = vsyncpa [#allocation4 + $0x1], 0  ;;  %s7121_s21 = smov 0   ;;  %s7123_s22 = smov 0  }
   0xc   :  { %s7125_s23 = smov 0   ;;  %s7127_s24 = smov 0  }
   0xd LB: > { %s7142_s25 = sadd.s32 4294967295, %s7070_s24   ;;  %s5264_s26 = sadd.s32 4294967294, %s7070_s24   ;;  %s7070_s24 = sphi %s7127_s24, %s12453_s24   ;;  %s7066_s23 = sphi %s7125_s23, %s12452_s23   ;;  %s7062_s22 = sphi %s7123_s22, %s12451_s22   ;;  %s7058_s21 = sphi %s7121_s21, %s12450_s21  }
   0xe   : > { %p46_p0 = scmp.ne.s32.totalorder %s7062_s22, %s7058_s21  ;;  %p11427_p1 = scmp.eq.s32.totalorder %s7142_s25, 0 }
   0xf   : > { %p186_p3 = scmp.eq.s32.totalorder %s5264_s26, 1  ;;  %p5265_p5 = scmp.ge.s32.totalorder %s7070_s24, 1 }
  0x10   : > { %p7151_p4 = por %p11427_p1, %p46_p0  ;;  %p193_p7 = scmp.lt.s32.totalorder %s7070_s24, 3 }
  0x11   : > { %p7156_p6 = por %p186_p3, %p46_p0  ;;  %s7072_s30 = smov [#allocation7]  }
  0x12   : > { %s11708_s27 = scalar_select %p7151_p4, 1, 0 }
  0x13   : > { %s11709_s28 = scalar_select %p7156_p6, 1, 0 }
  0x14   : > { %p7161_p8 = pnand %p5265_p5, %p193_p7  ;;  %s209_s7 = sshll.u32 %s7072_s30, 4  ;;  %s210_s7 = int_to_ptr.vmem [resolvable:$true] %s209_s7 }
  0x15   : > { %s7073_s8 = smov [#allocation8]   ;;  %s7074_s11 = smov [#allocation10]  }
  0x16   : > { %s11710_s29 = scalar_select %p7161_p8, 1, 0 }
  0x17   : > { %p6103_p10 = pneg %p7161_p8  ;;  %s219_s9 = sshll.u32 %s7073_s8, 4  ;;  %s7174_s9 = int_to_ptr.vmem [resolvable:$true] %s219_s9 }
  0x18   : > { %s7176_s12 = sshll.u32 %s7074_s11, 4  ;;  %s11712_s3 = sld [smem:[#allocation141_spill]]  ;;  %s234_s12 = int_to_ptr.vmem [resolvable:$true] %s7176_s12 }
  0x19   : > { %p7170_p11 = pnand %p6103_p10, %p11427_p1 }
  0x1b   : > { %p7186_p13 = pneg %p7170_p11 }
  0x1e   : > { %s6848_s15 = scalar_lea.hbm %s11712_s3, 16 }
  0x1f   : > { %p6849_p12 = scmp.ne.s32.totalorder %s11712_s3, %s6848_s15  ;;  %p6855_p5 = scmp.lt.u32.totalorder %s6848_s15, %s11712_s3 }
  0x21   : > { %p6851_p0 = pnand %p7186_p13, %p6849_p12 }
  0x23   : > { %p6852_p3 = pneg %p6851_p0 }
  0x25   : > { %p6857_p7 = pnand %p6855_p5, %p6852_p3 }
  0x27   : > { %6860 = shalt.err (!%p6857_p7)
}
  0x28   : > { %s6861_s26 = scalar_lea.vmem %s210_s7, 16  ;;  %s6868_s30 = scalar_lea.vmem %s210_s7, 32 }
  0x29   : > { %p6862_p10 = scmp.ne.s32.totalorder %s210_s7, %s6861_s26  ;;  %p6869_p2 = scmp.lt.s32.totalorder %s210_s7, %s210_s7 }
  0x2a   : > { %p6870_p6 = scmp.lt.s32.totalorder %s6868_s30, %s6861_s26 }
  0x2b   : > { %p6864_p9 = pnand %p6862_p10, %p7186_p13 }
  0x2c   : > { %p6871_p4 = por %p6870_p6, %p6869_p2 }
  0x2d   : > { %p6865_p1 = pneg %p6864_p9 }
  0x2f   : > { %p6872_p8 = pnand %p6871_p4, %p6865_p1 }
  0x31   : > { %6875 = shalt.err (!%p6872_p8)
}
  0x32   : > { %6106 = dma.hbm_to_vmem [thread:$0]  (!%p7170_p11), %s11712_s3, 16, %s210_s7, [#allocation6]  }
  0x33   : > { %s11714_s4 = sld [smem:[#allocation142_spill]] }
  0x39   : > { %s6876_s15 = scalar_lea.hbm %s11714_s4, 768 }
  0x3a   : > { %p6877_p9 = scmp.ne.s32.totalorder %s11714_s4, %s6876_s15  ;;  %p6883_p1 = scmp.lt.u32.totalorder %s6876_s15, %s11714_s4 }
  0x3c   : > { %p6879_p12 = pnand %p6877_p9, %p7186_p13 }
  0x3e   : > { %p6880_p2 = pneg %p6879_p12 }
  0x40   : > { %p6885_p4 = pnand %p6883_p1, %p6880_p2 }
  0x42   : > { %6888 = shalt.err (!%p6885_p4)
}
  0x43   : > { %s6889_s7 = scalar_lea.vmem %s7174_s9, 768  ;;  %p6897_p3 = scmp.lt.s32.totalorder %s7174_s9, %s7174_s9 }
  0x44   : > { %p6890_p6 = scmp.ne.s32.totalorder %s7174_s9, %s6889_s7  ;;  %p6898_p5 = scmp.lt.s32.totalorder %s6889_s7, %s6889_s7 }
  0x46   : > { %p6892_p8 = pnand %p6890_p6, %p7186_p13  ;;  %p6899_p7 = por %p6898_p5, %p6897_p3 }
  0x48   : > { %p6893_p0 = pneg %p6892_p8 }
  0x4a   : > { %p6900_p10 = pnand %p6899_p7, %p6893_p0 }
  0x4c   : > { %6903 = shalt.err (!%p6900_p10)
}
  0x4d   : > { %s11430_s26 = smov 384   ;;  %s11431_s30 = smov 24  }
  0x4e   : > { %6109 = dma.hbm_to_vmem [thread:$0]  (!%p7170_p11), %s11714_s4, 768, %s7174_s9, [#allocation9], %s11430_s26, %s11430_s26, %s11431_s30  }
  0x4f   : > { %s11715_s5 = sld [smem:[#allocation143_spill]] }
  0x55   : > { %s6904_s15 = scalar_lea.hbm %s11715_s5, 96 }
  0x56   : > { %p6905_p9 = scmp.ne.s32.totalorder %s11715_s5, %s6904_s15  ;;  %p6911_p1 = scmp.lt.u32.totalorder %s6904_s15, %s11715_s5 }
  0x58   : > { %p6907_p12 = pnand %p6905_p9, %p7186_p13 }
  0x5a   : > { %p6908_p2 = pneg %p6907_p12 }
  0x5c   : > { %p6913_p4 = pnand %p6911_p1, %p6908_p2 }
  0x5e   : > { %6916 = shalt.err (!%p6913_p4)
}
  0x5f   : > { %s6917_s7 = scalar_lea.vmem %s234_s12, 96  ;;  %p6925_p3 = scmp.lt.s32.totalorder %s234_s12, %s234_s12 }
  0x60   : > { %p6918_p6 = scmp.ne.s32.totalorder %s234_s12, %s6917_s7  ;;  %p6926_p5 = scmp.lt.s32.totalorder %s6917_s7, %s6917_s7 }
  0x62   : > { %p6920_p8 = pnand %p6918_p6, %p7186_p13  ;;  %p6927_p7 = por %p6926_p5, %p6925_p3 }
  0x64   : > { %p6921_p0 = pneg %p6920_p8 }
  0x66   : > { %p6928_p10 = pnand %p6927_p7, %p6921_p0 }
  0x68   : > { %6931 = shalt.err (!%p6928_p10)
}
  0x69   : > { %6112 = dma.hbm_to_vmem [thread:$0]  (!%p7170_p11), %s11715_s5, 96, %s234_s12, [#allocation9]  }
  0x6a   : > { %s7248_s18 = sadd.s32 1, %s7070_s24   ;;  %s33_s10 = sadd.s32 1, %s7066_s23 }
  0x6b   : > { %s30_s11 = ssub.s32 %s7070_s24, %s7248_s18  ;;  %p40_p9 = scmp.ne.s32.totalorder %s7066_s23, %s7062_s22 }
  0x6c   : > { %p31_p13 = scmp.eq.s32.totalorder %s30_s11, 0  ;;  %p41_p12 = scmp.eq.s32.totalorder %s7070_s24, 0 }
  0x6d   : > { %p6127_p2 = scmp.lt.s32.totalorder %s7070_s24, 2  ;;  %p11716_p4 = scmp.eq.s32.totalorder %s7142_s25, 1 }
  0x6e   : > { %s7258_s13 = scalar_select %p31_p13, %s7066_s23, %s33_s10  }
  0x6f   : > { %p42_p1 = por %p41_p12, %p40_p9  ;;  %p7262_p6 = por %p11716_p4, %p40_p9 }
  0x70   : > { %s7267_s15 = sand.u32 1, %s7066_s23   ;;  %s5535_s12 = sshll.u32 %s7070_s24, 5 }
  0x71   : > { %s5270_s16 = sshll.u32 %s7267_s15, 1  ;;  %s11718_s0 = sld [smem:[#allocation140_spill]] }
  0x72   : > { %s248_s7 = scalar_lea.vmem [#allocation2], %s5270_s16  ;;  %p7276_p11 = pnand %p6127_p2, %p42_p1 }
  0x73   : > { %s255_s9 = sshll.u32 %s248_s7, 4  ;;  %s245_s11 = scalar_lea.sflag [#allocation3], %s7267_s15  ;;  %s7280_s9 = int_to_ptr.vmem [resolvable:$true] %s255_s9 }
  0x74   : > { %p6934_p0 = pneg %p7276_p11 }
  0x77   : > { %s7274_s20 = scalar_lea.hbm %s11718_s0, %s5535_s12  ;;  %s6937_s17 = scalar_lea.hbm %s11718_s0, 64 }
  0x78   : > { %s6932_s10 = scalar_lea.hbm %s7274_s20, 32  ;;  %p6938_p7 = scmp.lt.u32.totalorder %s7274_s20, %s11718_s0 }
  0x79   : > { %p6933_p8 = scmp.ne.s32.totalorder %s7274_s20, %s6932_s10  ;;  %p6939_p10 = scmp.lt.u32.totalorder %s6937_s17, %s6932_s10 }
  0x7a   : > { %p6941_p9 = scmp.lt.u32.totalorder %s6932_s10, %s7274_s20 }
  0x7b   : > { %p6935_p3 = pnand %p6934_p0, %p6933_p8  ;;  %p6940_p13 = por %p6939_p10, %p6938_p7 }
  0x7d   : > { %p6936_p5 = pneg %p6935_p3  ;;  %p6942_p12 = por %p6941_p9, %p6940_p13 }
  0x7f   : > { %p6943_p2 = pnand %p6942_p12, %p6936_p5 }
  0x81   : > { %6946 = shalt.err (!%p6943_p2)
}
  0x82   : > { %s6947_s26 = scalar_lea.vmem %s7280_s9, 32  ;;  %s7077_s12 = smov [#allocation2]  }
  0x83   : > { %p6948_p1 = scmp.ne.s32.totalorder %s7280_s9, %s6947_s26  ;;  %s6952_s16 = sshll.u32 %s7077_s12, 4  ;;  %s6953_s16 = int_to_ptr.vmem [resolvable:$false] %s6952_s16 }
  0x84   : > { %s6954_s19 = scalar_lea.vmem %s6953_s16, 64  ;;  %p6955_p3 = scmp.lt.s32.totalorder %s7280_s9, %s6953_s16 }
  0x85   : > { %p6950_p4 = pnand %p6948_p1, %p6934_p0  ;;  %p6956_p7 = scmp.lt.s32.totalorder %s6954_s19, %s6947_s26 }
  0x87   : > { %p6951_p8 = pneg %p6950_p4  ;;  %p6957_p10 = por %p6956_p7, %p6955_p3 }
  0x89   : > { %p6958_p13 = pnand %p6957_p10, %p6951_p8 }
  0x8b   : > { %6961 = shalt.err (!%p6958_p13)
}
  0x8c   : > { %s7078_s10 = smov 16   ;;  %s7079_s17 = smov 1  }
  0x8d   : > { %6116 = dma.hbm_to_vmem [thread:$0]  (!%p7276_p11), %s7274_s20, 32, %s7280_s9, %s245_s11, %s7078_s10, %s7078_s10, %s7079_s17  }
  0x8e   : > { %s265_s7 = sand.u32 1, %s7070_s24   ;;  %s6080_s12 = smul.u32 768, %s7267_s15 }
  0x8f   : > { %s6081_s16 = smul.u32 12288, %s7070_s24  ;;  %s7320_s4 = scalar_lea.sflag [#allocation6], %s265_s7 }
  0x90   : > { %s269_s0 = scalar_lea.vmem [#allocation5], %s6080_s12  ;;  %s6967_s9 = scalar_lea.hbm %s11421_s1, 24576 }
  0x91   : > { %s7316_s30 = scalar_lea.hbm %s11421_s1, %s6081_s16  ;;  %s277_s3 = sshll.u32 %s269_s0, 4  ;;  %s7318_s3 = int_to_ptr.vmem [resolvable:$true] %s277_s3 }
  0x92   : > { %s6962_s5 = scalar_lea.hbm %s7316_s30, 12288  ;;  %p6968_p2 = scmp.lt.u32.totalorder %s7316_s30, %s11421_s1 }
  0x93   : > { %p6963_p5 = scmp.ne.s32.totalorder %s7316_s30, %s6962_s5  ;;  %p6969_p1 = scmp.lt.u32.totalorder %s6967_s9, %s6962_s5 }
  0x94   : > { %p6971_p8 = scmp.lt.u32.totalorder %s6962_s5, %s7316_s30 }
  0x95   : > { %p6965_p9 = pnand %p6963_p5, %p6934_p0  ;;  %p6970_p4 = por %p6969_p1, %p6968_p2 }
  0x97   : > { %p6966_p12 = pneg %p6965_p9  ;;  %p6972_p3 = por %p6971_p8, %p6970_p4 }
  0x99   : > { %p6973_p7 = pnand %p6972_p3, %p6966_p12 }
  0x9b   : > { %6976 = shalt.err (!%p6973_p7)
}
  0x9c   : > { %s6977_s0 = scalar_lea.vmem %s7318_s3, 12288  ;;  %s7080_s17 = smov [#allocation5]  }
  0x9d   : > { %p6978_p10 = scmp.ne.s32.totalorder %s7318_s3, %s6977_s0  ;;  %s6982_s7 = sshll.u32 %s7080_s17, 4  ;;  %s6983_s7 = int_to_ptr.vmem [resolvable:$false] %s6982_s7 }
  0x9e   : > { %s6984_s12 = scalar_lea.vmem %s6983_s7, 24576  ;;  %p6985_p9 = scmp.lt.s32.totalorder %s7318_s3, %s6983_s7 }
  0x9f   : > { %p6980_p13 = pnand %p6978_p10, %p6934_p0  ;;  %p6986_p2 = scmp.lt.s32.totalorder %s6984_s12, %s6977_s0 }
  0xa1   : > { %p6981_p5 = pneg %p6980_p13  ;;  %p6987_p1 = por %p6986_p2, %p6985_p9 }
  0xa3   : > { %p6988_p4 = pnand %p6987_p1, %p6981_p5 }
  0xa5   : > { %6991 = shalt.err (!%p6988_p4)
}
  0xa6   : > { %s11720_s5 = smov 24   ;;  %s11721_s16 = smov 384  }
  0xa7   : > { %6119 = dma.hbm_to_vmem [thread:$0]  (!%p7276_p11), %s7316_s30, 12288, %s7318_s3, %s7320_s4, %s11721_s16, %s11721_s16, %s11720_s5  }
  0xa8   : > { %p11722_p0 = scmp.ne.s32.totalorder %s11710_s29, 0 }
  0xaa   : > { %289 = sbr.rel (%p11722_p0) target bundleno = 1768 (0x6e8), region = 44 }
  0xb1   : > { %s7352_s26 = sand.u32 1, %s7062_s22   ;;  %p11723_p12 = scmp.ne.s32.totalorder %s11708_s27, 0 }
  0xb2   : > { %s5277_s19 = sshll.u32 %s7352_s26, 1  ;;  %s292_s15 = scalar_lea.sflag [#allocation3], %s7352_s26 }
  0xb3   : > { %s7356_s20 = scalar_lea.vmem [#allocation2], %s5277_s19 }
  0xb4   : > { %7037 = dma.done.wait (%p11723_p12), %s292_s15, 32  }
  0xb5   : > { %7039 = vsyncadd (%p11723_p12), %s292_s15, 4294967264  ;;  %s300_s3 = sand.u32 1, %s7142_s25   ;;  %s6082_s4 = smul.u32 768, %s7352_s26 }
  0xb6   : > { %s301_s29 = scalar_lea.sflag [#allocation6], %s300_s3 }
  0xb7   : > { %s7364_s30 = scalar_lea.vmem [#allocation5], %s6082_s4 }
  0xb8   : > { %7041 = dma.done.wait (%p11723_p12), %s301_s29, 12288  }
  0xb9   : > { %7043 = vsyncadd (%p11723_p12), %s301_s29, 4294955008  ;;  %p11724_p11 = scmp.eq.s32.totalorder %s7142_s25, 0 }
  0xbb   : > { %7045 = dma.done.wait (%p11724_p11), [#allocation6], 16   ;;  %p11725_p8 = pmov %p11724_p11 }
  0xbd   : > { %7047 = vsyncadd (%p11725_p8), [#allocation6], 4294967280  ;;  %p11726_p3 = pmov %p11725_p8 }
  0xbf   : > { %7049 = dma.done.wait (%p11726_p3), [#allocation9], 864   ;;  %p11727_p7 = pmov %p11726_p3 }
  0xc0   : > { %v6175_v0 = vld [vmem:[%s11422_s2 + $0x40] sm:$0xff]   ;;  %v6177_v2 = vld [vmem:[%s11422_s2 + $0x48] sm:$0xff]   ;;  %v6179_v4 = vld [vmem:[%s11422_s2 + $0x50] sm:$0xff]   ;;  %s6084_s8 = smul.u32 24576, %s7142_s25  ;;  %s5126_s27 = scalar_lea.sflag [#allocation4], %s7352_s26 }
  0xc1   : > { %7051 = vsyncadd (%p11727_p7), [#allocation9], 4294966432  ;;  %v6176_v1 = vld [vmem:[%s11422_s2] sm:$0xff]   ;;  %5536 = vmatprep.subr.bf16.mxu0 %v6175_v0  ;;  %6064 = vmatprep.subr.bf16.mxu1 %v6175_v0  ;;  %v6178_v3 = vld [vmem:[%s11422_s2 + $0x8] sm:$0xff]   ;;  %s7083_s17 = smov [#allocation11]  }
  0xc2   : > { %5537 = vmatpush3.bf16.msra.mxu0 %v6176_v1  ;;  %6072 = vmatpush3.bf16.msra.mxu1 %v6176_v1  ;;  %v6180_v5 = vld [vmem:[%s11422_s2 + $0x10] sm:$0xff]   ;;  %v6181_v6 = vld [vmem:[%s11422_s2 + $0x58] sm:$0xff]   ;;  %v6183_v8 = vld [vmem:[%s11422_s2 + $0x60] sm:$0xff]   ;;  %s11358_s10 = scalar_lea.hbm %s11426_s6, %s6084_s8  ;;  %s6996_s7 = sshll.u32 %s7083_s17, 4  ;;  %s6997_s7 = int_to_ptr.vmem [resolvable:$false] %s6996_s7 }
  0xc3   : > { %5538 = vmatprep.subr.bf16.mxu0 %v6177_v2  ;;  %6065 = vmatprep.subr.bf16.mxu1 %v6177_v2  ;;  %v6182_v7 = vld [vmem:[%s11422_s2 + $0x18] sm:$0xff]   ;;  %v6184_v9 = vld [vmem:[%s11422_s2 + $0x20] sm:$0xff]   ;;  %v6185_v10 = vld [vmem:[%s11422_s2 + $0x68] sm:$0xff]   ;;  %s6998_s12 = scalar_lea.vmem %s6997_s7, 49152 }
  0xc4   : > { %v6193_v11 = vld [vmem:[%s7364_s30 + $0x4] ss:$24 sps:$4 sm:$0xff]   ;;  %v6187_v14 = vld [vmem:[%s11422_s2 + $0x70] sm:$0xff]   ;;  %v6189_v16 = vld [vmem:[%s11422_s2 + $0x78] sm:$0xff]  }
  0xc5   : > { %v6196_v12 = vld [vmem:[%s7364_s30 + $0x184] ss:$24 sps:$4 sm:$0xff]   ;;  %1663 = vmatprep.mubr.bf16.mxu0 %v6193_v11  ;;  %v6188_v15 = vld [vmem:[%s11422_s2 + $0x30] sm:$0xff]   ;;  %v6190_v17 = vld [vmem:[%s11422_s2 + $0x38] sm:$0xff]  }
  0xc6   : > { %5539 = vmatpush3.bf16.msra.mxu0 %v6178_v3  ;;  %6073 = vmatpush3.bf16.msra.mxu1 %v6178_v3  ;;  %v6186_v13 = vld [vmem:[%s11422_s2 + $0x28] sm:$0xff]   ;;  %v6191_v18 = vld [vmem:[%s7364_s30] ss:$24 sps:$4 sm:$0xff]   ;;  %v6197_v20 = vld [vmem:[%s7364_s30 + $0x34] ss:$24 sps:$4 sm:$0xff]  }
  0xc7   : > { %5540 = vmatprep.subr.bf16.mxu0 %v6179_v4  ;;  %6066 = vmatprep.subr.bf16.mxu1 %v6179_v4  ;;  %v6194_v19 = vld [vmem:[%s7364_s30 + $0x180] ss:$24 sps:$4 sm:$0xff]   ;;  %v6199_v21 = vld [vmem:[%s7364_s30 + $0x1b4] ss:$24 sps:$4 sm:$0xff]   ;;  %v6225_v26 = vld [vmem:[%s11422_s2 + $0xc8] sm:$0xff]  }
  0xc8   : > { %1727 = vmatprep.mubr.bf16.mxu1 %v6196_v12  ;;  %v6221_v22 = vld [vmem:[%s11422_s2 + $0xc0] sm:$0xff]   ;;  %v6226_v27 = vld [vmem:[%s11422_s2 + $0x148] sm:$0xff]   ;;  %v6235_v34 = vld [vmem:[%s11422_s2 + $0xd0] sm:$0xff]  }
  0xc9   : > { %v6222_v23 = vld [vmem:[%s11422_s2 + $0x140] sm:$0xff]   ;;  %v6201_v28 = vld [vmem:[%s7364_s30 + $0x30] ss:$24 sps:$4 sm:$0xff]   ;;  %v6239_v40 = vld [vmem:[%s11422_s2 + $0xd8] sm:$0xff]  }
  0xca   : > { %5541 = vmatpush3.bf16.msra.mxu0 %v6180_v5  ;;  %6074 = vmatpush3.bf16.msra.mxu1 %v6180_v5  ;;  %v6223_v24 = vld [vmem:[%s11422_s2 + $0x80] sm:$0xff]   ;;  %v6227_v29 = vld [vmem:[%s11422_s2 + $0x88] sm:$0xff]   ;;  %v6236_v35 = vld [vmem:[%s11422_s2 + $0x150] sm:$0xff]  }
  0xcb   : > { %5542 = vmatprep.subr.bf16.mxu0 %v6181_v6  ;;  %6067 = vmatprep.subr.bf16.mxu1 %v6181_v6  ;;  %v6224_v25 = vld [vmem:[%s11422_s2 + $0x100] sm:$0xff]   ;;  %v6228_v30 = vld [vmem:[%s11422_s2 + $0x108] sm:$0xff]   ;;  %v6237_v36 = vld [vmem:[%s11422_s2 + $0x90] sm:$0xff]  }
  0xcc   : > { %v6202_v31 = vld [vmem:[%s7364_s30 + $0x1b0] ss:$24 sps:$4 sm:$0xff]   ;;  %v6203_v32 = vld [vmem:[%s7364_s30 + $0x64] ss:$24 sps:$4 sm:$0xff]   ;;  %v6207_v38 = vld [vmem:[%s7364_s30 + $0x60] ss:$24 sps:$4 sm:$0xff]  }
  0xcd   : > { %v6205_v33 = vld [vmem:[%s7364_s30 + $0x1e4] ss:$24 sps:$4 sm:$0xff]   ;;  %v6238_v37 = vld [vmem:[%s11422_s2 + $0x110] sm:$0xff]   ;;  %v6208_v39 = vld [vmem:[%s7364_s30 + $0x1e0] ss:$24 sps:$4 sm:$0xff]  }
  0xce   : > { %5543 = vmatpush3.bf16.msra.mxu0 %v6182_v7  ;;  %6075 = vmatpush3.bf16.msra.mxu1 %v6182_v7  ;;  %v6209_v41 = vld [vmem:[%s7364_s30 + $0x94] ss:$24 sps:$4 sm:$0xff]   ;;  %v6249_v46 = vld [vmem:[%s11422_s2 + $0xe0] sm:$0xff]   ;;  %v6213_v47 = vld [vmem:[%s7364_s30 + $0x90] ss:$24 sps:$4 sm:$0xff]  }
  0xcf   : > { %5544 = vmatprep.subr.bf16.mxu0 %v6183_v8  ;;  %6068 = vmatprep.subr.bf16.mxu1 %v6183_v8  ;;  %v6211_v42 = vld [vmem:[%s7364_s30 + $0x214] ss:$24 sps:$4 sm:$0xff]   ;;  %v6214_v48 = vld [vmem:[%s7364_s30 + $0x210] ss:$24 sps:$4 sm:$0xff]   ;;  %v6250_v49 = vld [vmem:[%s11422_s2 + $0x160] sm:$0xff]  }
  0xd0   : > { %v6240_v43 = vld [vmem:[%s11422_s2 + $0x158] sm:$0xff]   ;;  %v6215_v50 = vld [vmem:[%s7364_s30 + $0xc4] ss:$24 sps:$4 sm:$0xff]   ;;  %v6263_v62 = vld [vmem:[%s11422_s2 + $0xf0] sm:$0xff]  }
  0xd1   : > { %v6241_v44 = vld [vmem:[%s11422_s2 + $0x98] sm:$0xff]   ;;  %v6217_v51 = vld [vmem:[%s7364_s30 + $0x244] ss:$24 sps:$4 sm:$0xff]   ;;  %v6264_v63 = vld [vmem:[%s11422_s2 + $0x170] sm:$0xff]  }
  0xd2   : > { %5545 = vmatpush3.bf16.msra.mxu0 %v6184_v9  ;;  %6076 = vmatpush3.bf16.msra.mxu1 %v6184_v9  ;;  %v6242_v45 = vld [vmem:[%s11422_s2 + $0x118] sm:$0xff]   ;;  %v6251_v52 = vld [vmem:[%s11422_s2 + $0xa0] sm:$0xff]   ;;  %v6253_v54 = vld [vmem:[%s11422_s2 + $0xe8] sm:$0xff]  }
  0xd3   : > { %5546 = vmatprep.subr.bf16.mxu0 %v6185_v10  ;;  %6069 = vmatprep.subr.bf16.mxu1 %v6185_v10  ;;  %v6252_v53 = vld [vmem:[%s11422_s2 + $0x120] sm:$0xff]   ;;  %v6254_v55 = vld [vmem:[%s11422_s2 + $0x168] sm:$0xff]   ;;  %v6229_v60 = vld [vmem:[%s7364_s30 + $0xf4] ss:$24 sps:$4 sm:$0xff]   ;;  %v356_v10 = vlaneseq }
  0xd4   : > { %v6255_v56 = vld [vmem:[%s11422_s2 + $0xa8] sm:$0xff]   ;;  %v6219_v58 = vld [vmem:[%s7364_s30 + $0xc0] ss:$24 sps:$4 sm:$0xff]   ;;  %v6231_v61 = vld [vmem:[%s7364_s30 + $0x274] ss:$24 sps:$4 sm:$0xff]  }
  0xd5   : > { %v6256_v57 = vld [vmem:[%s11422_s2 + $0x128] sm:$0xff]   ;;  %v6220_v59 = vld [vmem:[%s7364_s30 + $0x240] ss:$24 sps:$4 sm:$0xff]   ;;  %v6265_v0 = vld [vmem:[%s11422_s2 + $0xb0] sm:$0xff]   ;;  %v7548_v11 = vshrl.u32 %v356_v10, 7  ;;  %v7550_v12 = vand.u32 127, %v356_v10 }
  0xd6   : > { %5547 = vmatpush3.bf16.msra.mxu0 %v6186_v13  ;;  %6077 = vmatpush3.bf16.msra.mxu1 %v6186_v13  ;;  %v6266_v1 = vld [vmem:[%s11422_s2 + $0x130] sm:$0xff]   ;;  %v6267_v2 = vld [vmem:[%s11422_s2 + $0xf8] sm:$0xff]   ;;  %v6243_v8 = vld [vmem:[%s7364_s30 + $0x124] ss:$24 sps:$4 sm:$0xff]  }
  0xd7   : > { %5548 = vmatprep.subr.bf16.mxu0 %v6187_v14  ;;  %6070 = vmatprep.subr.bf16.mxu1 %v6187_v14  ;;  %v6268_v3 = vld [vmem:[%s11422_s2 + $0x178] sm:$0xff]   ;;  %v6233_v6 = vld [vmem:[%s7364_s30 + $0xf0] ss:$24 sps:$4 sm:$0xff]   ;;  %v6245_v9 = vld [vmem:[%s7364_s30 + $0x2a4] ss:$24 sps:$4 sm:$0xff]   ;;  %11728 = vst [vmem:[#allocation17_spill] sm:$0xff] %v7548_v11  ;;  %vm479_vm0 = vcmp.eq.s32.totalorder %v7548_v11, %v7550_v12 }
  0xd8   : > { %v6269_v4 = vld [vmem:[%s11422_s2 + $0xb8] sm:$0xff]   ;;  %v6234_v7 = vld [vmem:[%s7364_s30 + $0x270] ss:$24 sps:$4 sm:$0xff]  }
  0xd9   : > { %v6270_v5 = vld [vmem:[%s11422_s2 + $0x138] sm:$0xff]  }
  0xda   : > { %5549 = vmatpush3.bf16.msra.mxu0 %v6188_v15  ;;  %6078 = vmatpush3.bf16.msra.mxu1 %v6188_v15  ;;  %v6247_v13 = vld [vmem:[%s7364_s30 + $0x120] ss:$24 sps:$4 sm:$0xff]   ;;  %v6257_v15 = vld [vmem:[%s7364_s30 + $0x154] ss:$24 sps:$4 sm:$0xff]  }
  0xdb   : > { %5550 = vmatprep.subr.bf16.mxu0 %v6189_v16  ;;  %6071 = vmatprep.subr.bf16.mxu1 %v6189_v16  ;;  %v6248_v14 = vld [vmem:[%s7364_s30 + $0x2a0] ss:$24 sps:$4 sm:$0xff]   ;;  %v6259_v16 = vld [vmem:[%s7364_s30 + $0x2d4] ss:$24 sps:$4 sm:$0xff]  }
  0xde   : > { %5551 = vmatpush3.bf16.msra.mxu0 %v6190_v17  ;;  %6079 = vmatpush3.bf16.msra.mxu1 %v6190_v17  ;;  %v7557_v17 = vadd.s32 8, %v7548_v11 }
  0xdf   : > { %5648 = vmatprep.subr.bf16.mxu1 %v6221_v22  ;;  %5760 = vmatprep.subr.bf16.mxu0 %v6222_v23  ;;  %v7574_v22 = vadd.s32 48, %v7548_v11  ;;  %v7577_v23 = vadd.s32 56, %v7548_v11 }
  0xe0   : > { %vm480_vm1 = vcmp.eq.s32.totalorder %v7557_v17, %v7550_v12 }
  0xe1   : > { %1664 = vmatmul.mubr.bf16.vlgmr.msra.gmra.mrb[0].mxu0 %v6191_v18  ;;  %1728 = vmatmul.mubr.bf16.vlgmr.msra.gmra.mrb[0].mxu1 %v6194_v19  ;;  %v7560_v18 = vadd.s32 16, %v7548_v11  ;;  %v7565_v19 = vadd.s32 24, %v7548_v11  ;;  %vm485_vm6 = vcmp.eq.s32.totalorder %v7574_v22, %v7550_v12  ;;  %vm486_vm7 = vcmp.eq.s32.totalorder %v7577_v23, %v7550_v12 }
  0xe2   : > { %1671 = vmatprep.mubr.bf16.mxu0 %v6197_v20  ;;  %1735 = vmatprep.mubr.bf16.mxu1 %v6199_v21  ;;  %v7568_v20 = vadd.s32 32, %v7548_v11  ;;  %v7571_v21 = vadd.s32 40, %v7548_v11 }
  0xe3   : > { %5649 = vmatpush3.bf16.msra.mxu1 %v6223_v24  ;;  %5761 = vmatpush3.bf16.msra.mxu0 %v6224_v25  ;;  %v6261_v24 = vld [vmem:[%s7364_s30 + $0x150] ss:$24 sps:$4 sm:$0xff]   ;;  %v7081_v25 = vmov 0.0   ;;  %vm481_vm2 = vcmp.eq.s32.totalorder %v7560_v18, %v7550_v12  ;;  %vm482_vm3 = vcmp.eq.s32.totalorder %v7565_v19, %v7550_v12 }
  0xe4   : > { %5650 = vmatprep.subr.bf16.mxu1 %v6225_v26  ;;  %5762 = vmatprep.subr.bf16.mxu0 %v6226_v27  ;;  %v7581_v26 = vsel %vm479_vm0, 1.0, %v7081_v25  ;;  %v7588_v27 = vadd.s32 64, %v7548_v11  ;;  %vm483_vm4 = vcmp.eq.s32.totalorder %v7568_v20, %v7550_v12  ;;  %vm484_vm5 = vcmp.eq.s32.totalorder %v7571_v21, %v7550_v12 }
  0xe6   : > { %vm487_vm8 = vcmp.eq.s32.totalorder %v7588_v27, %v7550_v12 }
  0xe7   : > { %5651 = vmatpush3.bf16.msra.mxu1 %v6227_v29  ;;  %5763 = vmatpush3.bf16.msra.mxu0 %v6228_v30  ;;  %v7598_v29 = vadd.s32 72, %v7548_v11  ;;  %v6273_v30 = vld [vmem:[%s7364_s30 + $0xc] ss:$24 sps:$4 sm:$0xff]  }
  0xe8   : > { %5652 = vmatprep.subr.bf16.mxu1 %v6235_v34  ;;  %5764 = vmatprep.subr.bf16.mxu0 %v6236_v35  ;;  %v6276_v34 = vld [vmem:[%s7364_s30 + $0x14] ss:$24 sps:$4 sm:$0xff]   ;;  %v7614_v35 = vsel %vm480_vm1, 1.0, %v7081_v25 }
  0xe9   : > { %1672 = vmatmul.mubr.bf16.gmra.mrb[4].mxu0 %v6201_v28  ;;  %1736 = vmatmul.mubr.bf16.gmra.mrb[4].mxu1 %v6202_v31  ;;  %v6262_v28 = vld [vmem:[%s7364_s30 + $0x2d0] ss:$24 sps:$4 sm:$0xff]   ;;  %v7604_v31 = vadd.s32 80, %v7548_v11  ;;  %vm488_vm9 = vcmp.eq.s32.totalorder %v7598_v29, %v7550_v12 }
  0xea   : > { %1679 = vmatprep.mubr.bf16.mxu0 %v6203_v32  ;;  %1743 = vmatprep.mubr.bf16.mxu1 %v6205_v33  ;;  %v7607_v32 = vadd.s32 88, %v7548_v11  ;;  %v7610_v33 = vadd.s32 96, %v7548_v11 }
  0xeb   : > { %5653 = vmatpush3.bf16.msra.mxu1 %v6237_v36  ;;  %5765 = vmatpush3.bf16.msra.mxu0 %v6238_v37  ;;  %v7619_v36 = vadd.s32 104, %v7548_v11  ;;  %v7622_v37 = vadd.s32 112, %v7548_v11  ;;  %vm489_vm10 = vcmp.eq.s32.totalorder %v7604_v31, %v7550_v12 }
  0xec   : > { %5654 = vmatprep.subr.bf16.mxu1 %v6239_v40  ;;  %5766 = vmatprep.subr.bf16.mxu0 %v6240_v43  ;;  %v7636_v40 = vadd.s32 120, %v7548_v11  ;;  %v7651_v43 = vsel %vm485_vm6, 1.0, %v7081_v25  ;;  %vm490_vm11 = vcmp.eq.s32.totalorder %v7607_v32, %v7550_v12  ;;  %vm491_vm12 = vcmp.eq.s32.totalorder %v7610_v33, %v7550_v12 }
  0xed   : > { %vm492_vm13 = vcmp.eq.s32.totalorder %v7619_v36, %v7550_v12  ;;  %vm493_vm14 = vcmp.eq.s32.totalorder %v7622_v37, %v7550_v12 }
  0xee   : > { %vm494_vm15 = vcmp.eq.s32.totalorder %v7636_v40, %v7550_v12  ;;  %v6279_v12 = vld [vmem:[%s7364_s30 + $0x38] ss:$24 sps:$4 sm:$0xff]  }
  0xef   : > { %5655 = vmatpush3.bf16.msra.mxu1 %v6241_v44  ;;  %5767 = vmatpush3.bf16.msra.mxu0 %v6242_v45  ;;  %v7656_v44 = vsel %vm486_vm7, 1.0, %v7081_v25  ;;  %v7665_v45 = vsel %vm487_vm8, 1.0, %v7081_v25 }
  0xf0   : > { %5656 = vmatprep.subr.bf16.mxu1 %v6249_v46  ;;  %5768 = vmatprep.subr.bf16.mxu0 %v6250_v49  ;;  %v6271_v46 = vld [vmem:[%s7364_s30 + $0x8] ss:$24 sps:$4 sm:$0xff]   ;;  %v7682_v49 = vsel %vm488_vm9, 1.0, %v7081_v25 }
  0xf1   : > { %1680 = vmatmul.mubr.bf16.gmra.mrb[8].mxu0 %v6207_v38  ;;  %1744 = vmatmul.mubr.bf16.gmra.mrb[8].mxu1 %v6208_v39  ;;  %v7628_v38 = vsel %vm481_vm2, 1.0, %v7081_v25  ;;  %v7631_v39 = vsel %vm482_vm3, 1.0, %v7081_v25 }
  0xf2   : > { %1687 = vmatprep.mubr.bf16.mxu0 %v6209_v41  ;;  %1751 = vmatprep.mubr.bf16.mxu1 %v6211_v42  ;;  %v7642_v41 = vsel %vm483_vm4, 1.0, %v7081_v25  ;;  %v7648_v42 = vsel %vm484_vm5, 1.0, %v7081_v25 }
  0xf3   : > { %5657 = vmatpush3.bf16.msra.mxu1 %v6251_v52  ;;  %5769 = vmatpush3.bf16.msra.mxu0 %v6252_v53  ;;  %v7691_v52 = vsel %vm490_vm11, 1.0, %v7081_v25  ;;  %v7694_v53 = vsel %vm491_vm12, 1.0, %v7081_v25 }
  0xf4   : > { %5658 = vmatprep.subr.bf16.mxu1 %v6253_v54  ;;  %5770 = vmatprep.subr.bf16.mxu0 %v6254_v55  ;;  %v7698_v55 = vsel %vm492_vm13, 1.0, %v7081_v25 }
  0xf7   : > { %5659 = vmatpush3.bf16.msra.mxu1 %v6255_v56  ;;  %5771 = vmatpush3.bf16.msra.mxu0 %v6256_v57  ;;  %v7701_v56 = vsel %vm493_vm14, 1.0, %v7081_v25  ;;  %v7704_v57 = vsel %vm494_vm15, 1.0, %v7081_v25 }
  0xf8   : > { %5660 = vmatprep.subr.bf16.mxu1 %v6263_v62  ;;  %5772 = vmatprep.subr.bf16.mxu0 %v6264_v63 }
  0xf9   : > { %1688 = vmatmul.mubr.bf16.gmra.mrb[12].mxu0 %v6213_v47  ;;  %1752 = vmatmul.mubr.bf16.gmra.mrb[12].mxu1 %v6214_v48  ;;  %v6274_v47 = vld [vmem:[%s7364_s30 + $0x10] ss:$24 sps:$4 sm:$0xff]   ;;  %v7676_v48 = vld [vmem:[%s7356_s20] ss:$0 sm:$0xff] }
  0xfa   : > { %1695 = vmatprep.mubr.bf16.mxu0 %v6215_v50  ;;  %1759 = vmatprep.mubr.bf16.mxu1 %v6217_v51  ;;  %v6277_v50 = vld [vmem:[%s7364_s30 + $0x3c] ss:$24 sps:$4 sm:$0xff]   ;;  %vm383_vm0 = vcmp.eq.s32.totalorder %v7548_v11, %v7676_v48  ;;  %v7688_v51 = vsel %vm489_vm10, 1.0, %v7081_v25  ;;  %vm384_vm1 = vcmp.eq.s32.totalorder %v7557_v17, %v7676_v48  ;;  %vm385_vm2 = vcmp.eq.s32.totalorder %v7560_v18, %v7676_v48 }
  0xfb   : > { %5661 = vmatpush3.bf16.msra.mxu1 %v6265_v0  ;;  %5773 = vmatpush3.bf16.msra.mxu0 %v6266_v1  ;;  %v5283_v54 = vsel %vm383_vm0, 1.0, %v7081_v25  ;;  %vm386_vm3 = vcmp.eq.s32.totalorder %v7565_v19, %v7676_v48  ;;  %vm387_vm4 = vcmp.eq.s32.totalorder %v7568_v20, %v7676_v48  ;;  %vm388_vm5 = vcmp.eq.s32.totalorder %v7571_v21, %v7676_v48 }
  0xfc   : > { %5662 = vmatprep.subr.bf16.mxu1 %v6267_v2  ;;  %5774 = vmatprep.subr.bf16.mxu0 %v6268_v3  ;;  %v5286_v0 = vsel %vm386_vm3, 1.0, %v7081_v25  ;;  %v5287_v1 = vsel %vm387_vm4, 1.0, %v7081_v25  ;;  %vm389_vm6 = vcmp.eq.s32.totalorder %v7574_v22, %v7676_v48  ;;  %vm390_vm7 = vcmp.eq.s32.totalorder %v7577_v23, %v7676_v48 }
  0xfd   : > { %v530_v2 = vadd.f32 %v7631_v39, %v5286_v0  ;;  %v531_v3 = vadd.f32 %v7642_v41, %v5287_v1  ;;  %v5290_v10 = vsel %vm390_vm7, 1.0, %v7081_v25  ;;  %vm391_vm8 = vcmp.eq.s32.totalorder %v7588_v27, %v7676_v48 }
  0xfe   : > { %vm392_vm9 = vcmp.eq.s32.totalorder %v7598_v29, %v7676_v48  ;;  %vm393_vm10 = vcmp.eq.s32.totalorder %v7604_v31, %v7676_v48  ;;  %vm394_vm11 = vcmp.eq.s32.totalorder %v7607_v32, %v7676_v48  ;;  %vm395_vm12 = vcmp.eq.s32.totalorder %v7610_v33, %v7676_v48 }
  0xff   : > { %5663 = vmatpush3.bf16.msra.mxu1 %v6269_v4  ;;  %5775 = vmatpush3.bf16.msra.mxu0 %v6270_v5  ;;  %v5288_v4 = vsel %vm388_vm5, 1.0, %v7081_v25  ;;  %vm396_vm13 = vcmp.eq.s32.totalorder %v7619_v36, %v7676_v48  ;;  %vm397_vm14 = vcmp.eq.s32.totalorder %v7622_v37, %v7676_v48  ;;  %vm398_vm15 = vcmp.eq.s32.totalorder %v7636_v40, %v7676_v48  ;;  %v6289_v48 = vld [vmem:[%s7364_s30 + $0x9c] ss:$24 sps:$4 sm:$0xff]  }
 0x100   : > { %v5297_v1 = vsel %vm397_vm14, 1.0, %v7081_v25 }
 0x101   : > { %1696 = vmatmul.mubr.bf16.gmra.mrb[16].mxu0 %v6219_v58  ;;  %1760 = vmatmul.mubr.bf16.gmra.mrb[16].mxu1 %v6220_v59  ;;  %v6280_v58 = vld [vmem:[%s7364_s30 + $0x44] ss:$24 sps:$4 sm:$0xff]   ;;  %v527_v59 = vadd.f32 %v7581_v26, %v5283_v54 }
 0x102   : > { %1703 = vmatprep.mubr.bf16.mxu0 %v6229_v60  ;;  %1767 = vmatprep.mubr.bf16.mxu1 %v6231_v61  ;;  %v5284_v60 = vsel %vm384_vm1, 1.0, %v7081_v25  ;;  %v5285_v61 = vsel %vm385_vm2, 1.0, %v7081_v25 }
 0x103   : > { %559 = vadd.xlane.f32.xlu0 %v527_v59  ;;  %v528_v62 = vadd.f32 %v7614_v35, %v5284_v60  ;;  %v529_v63 = vadd.f32 %v7628_v38, %v5285_v61  ;;  %v5295_v61 = vsel %vm395_vm12, 1.0, %v7081_v25 }
 0x105   : > { %v7729_v5 = vpack.c.bf16 %v528_v62, %v527_v59  ;;  %563 = vadd.xlane.f32.xlu1 %v529_v63 }
 0x107   : > { %11729 = vst [vmem:[#allocation18_spill] sm:$0xff] %v7729_v5  ;;  %561 = vadd.xlane.f32.xlu0 %v528_v62  ;;  %v5296_v62 = vsel %vm396_vm13, 1.0, %v7081_v25 }
 0x108   : > { %v540_v0 = vadd.f32 %v7698_v55, %v5296_v62 }
 0x109   : > { %1704 = vmatmul.mubr.bf16.gmra.mrb[20].mxu0 %v6233_v6  ;;  %1768 = vmatmul.mubr.bf16.gmra.mrb[20].mxu1 %v6234_v7  ;;  %v532_v6 = vadd.f32 %v7648_v42, %v5288_v4  ;;  %v5289_v7 = vsel %vm389_vm6, 1.0, %v7081_v25 }
 0x10a   : > { %1711 = vmatprep.mubr.bf16.mxu0 %v6243_v8  ;;  %1775 = vmatprep.mubr.bf16.mxu1 %v6245_v9  ;;  %v7735_v8 = vpack.c.bf16 %v530_v2, %v529_v63  ;;  %v533_v9 = vadd.f32 %v7651_v43, %v5289_v7  ;;  %v539_v63 = vadd.f32 %v7694_v53, %v5295_v61  ;;  %v6295_v61 = vld [vmem:[%s7364_s30 + $0xcc] ss:$24 sps:$4 sm:$0xff]  }
 0x10b   : > { %565 = vadd.xlane.f32.xlu1 %v530_v2  ;;  %567 = vadd.xlane.f32.xlu0 %v531_v3  ;;  %v541_v7 = vadd.f32 %v7701_v56, %v5297_v1  ;;  %v6301_v1 = vld [vmem:[%s7364_s30 + $0xfc] ss:$24 sps:$4 sm:$0xff]  }
 0x10c   : > { %v7782_v4 = vpack.c.bf16 %v540_v0, %v539_v63 }
 0x10f   : > { %569 = vadd.xlane.f32.xlu1 %v532_v6  ;;  %571 = vadd.xlane.f32.xlu0 %v533_v9 }
 0x111   : > { %1712 = vmatmul.mubr.bf16.gmra.mrb[24].mxu0 %v6247_v13  ;;  %1776 = vmatmul.mubr.bf16.gmra.mrb[24].mxu1 %v6248_v14  ;;  %v7742_v13 = vpack.c.bf16 %v532_v6, %v531_v3  ;;  %v534_v14 = vadd.f32 %v7656_v44, %v5290_v10  ;;  %v5298_v3 = vsel %vm398_vm15, 1.0, %v7081_v25 }
 0x112   : > { %1719 = vmatprep.mubr.bf16.mxu0 %v6257_v15  ;;  %1783 = vmatprep.mubr.bf16.mxu1 %v6259_v16  ;;  %v5291_v15 = vsel %vm391_vm8, 1.0, %v7081_v25  ;;  %v6282_v16 = vld [vmem:[%s7364_s30 + $0x40] ss:$24 sps:$4 sm:$0xff]   ;;  %v542_v10 = vadd.f32 %v7704_v57, %v5298_v3  ;;  %v6304_v3 = vld [vmem:[%s7364_s30 + $0x104] ss:$24 sps:$4 sm:$0xff]  }
 0x113   : > { %573 = vadd.xlane.f32.xlu1 %v534_v14 }
 0x119   : > { %1720 = vmatmul.mubr.bf16.gmra.mrb[28].mxu0 %v6261_v24  ;;  %1784 = vmatmul.mubr.bf16.gmra.mrb[28].mxu1 %v6262_v28  ;;  %v535_v24 = vadd.f32 %v7665_v45, %v5291_v15  ;;  %v5292_v28 = vsel %vm392_vm9, 1.0, %v7081_v25  ;;  %v6288_v15 = vld [vmem:[%s7364_s30 + $0x70] ss:$24 sps:$4 sm:$0xff]  }
 0x11a   : > { %1824 = vmatprep.mubr.bf16.mxu1 %v6273_v30  ;;  %1985 = vmatprep.mubr.bf16.mxu0 %v6276_v34  ;;  %v6283_v30 = vld [vmem:[%s7364_s30 + $0x6c] ss:$24 sps:$4 sm:$0xff]  }
 0x11b   : > { %v6286_v34 = vld [vmem:[%s7364_s30 + $0x74] ss:$24 sps:$4 sm:$0xff]   ;;  %575 = vadd.xlane.f32.xlu0 %v535_v24 }
 0x121   : > { %1825 = vmatmul.mubr.bf16.vlgmr.msra.gmra.mrb[32].mxu1 %v6271_v46  ;;  %1986 = vmatmul.mubr.bf16.vlgmr.msra.gmra.mrb[32].mxu0 %v6274_v47  ;;  %v7757_v46 = vpack.c.bf16 %v534_v14, %v533_v9  ;;  %v536_v47 = vadd.f32 %v7682_v49, %v5292_v28  ;;  %v6292_v28 = vld [vmem:[%s7364_s30 + $0xa4] ss:$24 sps:$4 sm:$0xff]  }
 0x122   : > { %1832 = vmatprep.mubr.bf16.mxu1 %v6277_v50  ;;  %1993 = vmatprep.mubr.bf16.mxu0 %v6280_v58  ;;  %v5293_v50 = vsel %vm393_vm10, 1.0, %v7081_v25  ;;  %v5294_v58 = vsel %vm394_vm11, 1.0, %v7081_v25 }
 0x123   : > { %v537_v54 = vadd.f32 %v7688_v51, %v5293_v50  ;;  %v7769_v59 = vpack.c.bf16 %v536_v47, %v535_v24  ;;  %v538_v60 = vadd.f32 %v7691_v52, %v5294_v58  ;;  %577 = vadd.xlane.f32.xlu1 %v536_v47  ;;  %v6294_v58 = vld [vmem:[%s7364_s30 + $0xa0] ss:$24 sps:$4 sm:$0xff]  }
 0x125   : > { %v7779_v2 = vpack.c.bf16 %v538_v60, %v537_v54  ;;  %579 = vadd.xlane.f32.xlu0 %v537_v54  ;;  %v6298_v54 = vld [vmem:[%s7364_s30 + $0xd4] ss:$24 sps:$4 sm:$0xff]  }
 0x127   : > { %581 = vadd.xlane.f32.xlu1 %v538_v60  ;;  %v6297_v60 = vld [vmem:[%s7364_s30 + $0xc8] ss:$24 sps:$4 sm:$0xff]  }
 0x129   : > { %1833 = vmatmul.mubr.bf16.gmra.mrb[36].mxu1 %v6279_v12  ;;  %1994 = vmatmul.mubr.bf16.gmra.mrb[36].mxu0 %v6282_v16  ;;  %v6285_v12 = vld [vmem:[%s7364_s30 + $0x68] ss:$24 sps:$4 sm:$0xff]   ;;  %v7788_v16 = vpack.c.bf16 %v542_v10, %v541_v7 }
 0x12a   : > { %1840 = vmatprep.mubr.bf16.mxu1 %v6283_v30  ;;  %2001 = vmatprep.mubr.bf16.mxu0 %v6286_v34  ;;  %v7793_v30 = vld [vmem:[%s7356_s20 + $0x1] ss:$0 sm:$0xff]  ;;  %s6083_s20 = smul.u32 1536, %s7352_s26 }
 0x12b   : > { %vm399_vm0 = vcmp.eq.s32.totalorder %v7548_v11, %v7793_v30  ;;  %vm400_vm1 = vcmp.eq.s32.totalorder %v7557_v17, %v7793_v30  ;;  %vm401_vm2 = vcmp.eq.s32.totalorder %v7560_v18, %v7793_v30  ;;  %vm402_vm3 = vcmp.eq.s32.totalorder %v7565_v19, %v7793_v30  ;;  %v6291_v19 = vld [vmem:[%s7364_s30 + $0x98] ss:$24 sps:$4 sm:$0xff]   ;;  %583 = vadd.xlane.f32.xlu0 %v539_v63 }
 0x12c   : > { %v5299_v6 = vsel %vm399_vm0, 1.0, %v7081_v25  ;;  %v5300_v9 = vsel %vm400_vm1, 1.0, %v7081_v25  ;;  %v5301_v14 = vsel %vm401_vm2, 1.0, %v7081_v25  ;;  %v5302_v24 = vsel %vm402_vm3, 1.0, %v7081_v25  ;;  %585 = vadd.xlane.f32.xlu1 %v540_v0  ;;  %v6300_v63 = vld [vmem:[%s7364_s30 + $0xd0] ss:$24 sps:$4 sm:$0xff]  }
 0x12d   : > { %v543_v17 = vadd.f32 %v7581_v26, %v5299_v6  ;;  %v544_v18 = vadd.f32 %v7614_v35, %v5300_v9  ;;  %v545_v34 = vadd.f32 %v7628_v38, %v5301_v14  ;;  %v546_v50 = vadd.f32 %v7631_v39, %v5302_v24  ;;  %v6312_v6 = vld [vmem:[%s7364_s30 + $0x130] ss:$24 sps:$4 sm:$0xff]   ;;  %v6313_v9 = vld [vmem:[%s7364_s30 + $0x15c] ss:$24 sps:$4 sm:$0xff]   ;;  %v6318_v24 = vld [vmem:[%s7364_s30 + $0x160] ss:$24 sps:$4 sm:$0xff]  }
 0x12e   : > { %vm403_vm4 = vcmp.eq.s32.totalorder %v7568_v20, %v7793_v30  ;;  %vm404_vm5 = vcmp.eq.s32.totalorder %v7571_v21, %v7793_v30  ;;  %vm405_vm6 = vcmp.eq.s32.totalorder %v7574_v22, %v7793_v30  ;;  %vm406_vm7 = vcmp.eq.s32.totalorder %v7577_v23, %v7793_v30  ;;  %v6316_v14 = vld [vmem:[%s7364_s30 + $0x164] ss:$24 sps:$4 sm:$0xff]  }
 0x12f   : > { %v7817_v47 = vpack.c.bf16 %v544_v18, %v543_v17  ;;  %v5303_v26 = vsel %vm403_vm4, 1.0, %v7081_v25  ;;  %v5304_v35 = vsel %vm404_vm5, 1.0, %v7081_v25  ;;  %v7823_v62 = vpack.c.bf16 %v546_v50, %v545_v34  ;;  %587 = vadd.xlane.f32.xlu0 %v541_v7  ;;  %v6306_v7 = vld [vmem:[%s7364_s30 + $0x100] ss:$24 sps:$4 sm:$0xff]  }
 0x130   : > { %v547_v38 = vadd.f32 %v7642_v41, %v5303_v26  ;;  %v548_v39 = vadd.f32 %v7648_v42, %v5304_v35  ;;  %v5305_v21 = vsel %vm405_vm6, 1.0, %v7081_v25  ;;  %v5306_v41 = vsel %vm406_vm7, 1.0, %v7081_v25  ;;  %589 = vadd.xlane.f32.xlu1 %v542_v10  ;;  %v6307_v10 = vld [vmem:[%s7364_s30 + $0x12c] ss:$24 sps:$4 sm:$0xff]   ;;  %v6324_v26 = vld [vmem:[%s7364_s30 + $0x190] ss:$24 sps:$4 sm:$0xff]  }
 0x131   : > { %1841 = vmatmul.mubr.bf16.gmra.mrb[40].mxu1 %v6285_v12  ;;  %2002 = vmatmul.mubr.bf16.gmra.mrb[40].mxu0 %v6288_v15  ;;  %v549_v22 = vadd.f32 %v7651_v43, %v5305_v21  ;;  %v550_v42 = vadd.f32 %v7656_v44, %v5306_v41  ;;  %vm407_vm8 = vcmp.eq.s32.totalorder %v7588_v27, %v7793_v30  ;;  %v6303_v27 = vld [vmem:[%s7364_s30 + $0xf8] ss:$24 sps:$4 sm:$0xff]   ;;  %v6310_v15 = vld [vmem:[%s7364_s30 + $0x134] ss:$24 sps:$4 sm:$0xff]   ;;  %v6340_v21 = vld [vmem:[%s7364_s30 + $0x224] ss:$24 sps:$4 sm:$0xff]  }
 0x132   : > { %1848 = vmatprep.mubr.bf16.mxu1 %v6289_v48  ;;  %2009 = vmatprep.mubr.bf16.mxu0 %v6292_v28  ;;  %v7829_v20 = vpack.c.bf16 %v548_v39, %v547_v38  ;;  %v5307_v23 = vsel %vm407_vm8, 1.0, %v7081_v25  ;;  %vm408_vm9 = vcmp.eq.s32.totalorder %v7598_v29, %v7793_v30  ;;  %vm409_vm10 = vcmp.eq.s32.totalorder %v7604_v31, %v7793_v30  ;;  %v6309_v31 = vld [vmem:[%s7364_s30 + $0x128] ss:$24 sps:$4 sm:$0xff]   ;;  %v6325_v35 = vld [vmem:[%s7364_s30 + $0x1bc] ss:$24 sps:$4 sm:$0xff]  }
 0x133   : > { %v7841_v12 = vpack.c.bf16 %v550_v42, %v549_v22  ;;  %591 = vadd.xlane.f32.xlu0 %v543_v17  ;;  %v5308_v43 = vsel %vm408_vm9, 1.0, %v7081_v25  ;;  %v551_v44 = vadd.f32 %v7665_v45, %v5307_v23  ;;  %v5309_v29 = vsel %vm409_vm10, 1.0, %v7081_v25  ;;  %v6339_v41 = vld [vmem:[%s7364_s30 + $0x218] ss:$24 sps:$4 sm:$0xff]   ;;  %v6352_v23 = vld [vmem:[%s7364_s30 + $0x284] ss:$24 sps:$4 sm:$0xff]  }
 0x134   : > { %593 = vadd.xlane.f32.xlu1 %v544_v18  ;;  %v552_v0 = vadd.f32 %v7682_v49, %v5308_v43  ;;  %vm410_vm11 = vcmp.eq.s32.totalorder %v7607_v32, %v7793_v30  ;;  %v553_v49 = vadd.f32 %v7688_v51, %v5309_v29  ;;  %vm411_vm12 = vcmp.eq.s32.totalorder %v7610_v33, %v7793_v30  ;;  %v6315_v33 = vld [vmem:[%s7364_s30 + $0x158] ss:$24 sps:$4 sm:$0xff]   ;;  %v6364_v29 = vld [vmem:[%s7364_s30 + $0x2e4] ss:$24 sps:$4 sm:$0xff]  }
 0x135   : > { %11730 = vst [vmem:[#allocation19_spill] sm:$0xff] %v7841_v12  ;;  %v5310_v45 = vsel %vm410_vm11, 1.0, %v7081_v25  ;;  %v5311_v32 = vsel %vm411_vm12, 1.0, %v7081_v25  ;;  %vm412_vm13 = vcmp.eq.s32.totalorder %v7619_v36, %v7793_v30  ;;  %vm413_vm14 = vcmp.eq.s32.totalorder %v7622_v37, %v7793_v30  ;;  %v6351_v43 = vld [vmem:[%s7364_s30 + $0x278] ss:$24 sps:$4 sm:$0xff]  }
 0x136   : > { %v7855_v48 = vpack.c.bf16 %v552_v0, %v551_v44  ;;  %v554_v28 = vadd.f32 %v7691_v52, %v5310_v45  ;;  %v5312_v51 = vsel %vm412_vm13, 1.0, %v7081_v25  ;;  %v555_v52 = vadd.f32 %v7694_v53, %v5311_v32  ;;  %v6363_v45 = vld [vmem:[%s7364_s30 + $0x2d8] ss:$24 sps:$4 sm:$0xff]  }
 0x137   : > { %595 = vadd.xlane.f32.xlu0 %v545_v34  ;;  %v556_v18 = vadd.f32 %v7698_v55, %v5312_v51  ;;  %v6319_v34 = vld [vmem:[%s7364_s30 + $0x18c] ss:$24 sps:$4 sm:$0xff]   ;;  %v5313_v36 = vsel %vm413_vm14, 1.0, %v7081_v25  ;;  %vm414_vm15 = vcmp.eq.s32.totalorder %v7636_v40, %v7793_v30  ;;  %v6330_v40 = vld [vmem:[%s7364_s30 + $0x1c0] ss:$24 sps:$4 sm:$0xff]   ;;  %vm2785_vm0 = vcmask 130048  }
 0x138   : > { %11731 = vst [vmem:[#allocation20_spill] sm:$0xff] %v7855_v48  ;;  %597 = vadd.xlane.f32.xlu1 %v546_v50  ;;  %v7869_v17 = vpack.c.bf16 %v554_v28, %v553_v49  ;;  %v6322_v50 = vld [vmem:[%s7364_s30 + $0x194] ss:$24 sps:$4 sm:$0xff]   ;;  %v557_v53 = vadd.f32 %v7701_v56, %v5313_v36  ;;  %v5314_v55 = vsel %vm414_vm15, 1.0, %v7081_v25  ;;  %v6328_v56 = vld [vmem:[%s7364_s30 + $0x1c4] ss:$24 sps:$4 sm:$0xff]  }
 0x139   : > { %1849 = vmatmul.mubr.bf16.gmra.mrb[44].mxu1 %v6291_v19  ;;  %2010 = vmatmul.mubr.bf16.gmra.mrb[44].mxu0 %v6294_v58  ;;  %v7883_v19 = vpack.c.bf16 %v556_v18, %v555_v52  ;;  %v558_v37 = vadd.f32 %v7704_v57, %v5314_v55  ;;  %v6321_v58 = vld [vmem:[%s7364_s30 + $0x188] ss:$24 sps:$4 sm:$0xff]   ;;  %v6327_v25 = vld [vmem:[%s7364_s30 + $0x1b8] ss:$24 sps:$4 sm:$0xff]   ;;  %v6331_v57 = vld [vmem:[%s7364_s30 + $0x1ec] ss:$24 sps:$4 sm:$0xff]  }
 0x13a   : > { %1856 = vmatprep.mubr.bf16.mxu1 %v6295_v61  ;;  %2017 = vmatprep.mubr.bf16.mxu0 %v6298_v54  ;;  %11732 = vst [vmem:[#allocation21_spill] sm:$0xff] %v7869_v17  ;;  %v6334_v30 = vld [vmem:[%s7364_s30 + $0x1f4] ss:$24 sps:$4 sm:$0xff]   ;;  %v6333_v54 = vld [vmem:[%s7364_s30 + $0x1e8] ss:$24 sps:$4 sm:$0xff]  }
 0x13b   : > { %599 = vadd.xlane.f32.xlu0 %v547_v38  ;;  %11733 = vst [vmem:[#allocation22_spill] sm:$0xff] %v7883_v19  ;;  %v7897_v61 = vpack.c.bf16 %v558_v37, %v557_v53  ;;  %v6336_v38 = vld [vmem:[%s7364_s30 + $0x1f0] ss:$24 sps:$4 sm:$0xff]  }
 0x13c   : > { %601 = vadd.xlane.f32.xlu1 %v548_v39  ;;  %v6337_v39 = vld [vmem:[%s7364_s30 + $0x21c] ss:$24 sps:$4 sm:$0xff]  }
 0x13d   : > { %11734 = vst [vmem:[#allocation23_spill] sm:$0xff] %v7897_v61 }
 0x13f   : > { %603 = vadd.xlane.f32.xlu0 %v549_v22  ;;  %v6342_v22 = vld [vmem:[%s7364_s30 + $0x220] ss:$24 sps:$4 sm:$0xff]  }
 0x140   : > { %605 = vadd.xlane.f32.xlu1 %v550_v42  ;;  %v6343_v42 = vld [vmem:[%s7364_s30 + $0x24c] ss:$24 sps:$4 sm:$0xff]  }
 0x141   : > { %1857 = vmatmul.mubr.bf16.gmra.mrb[48].mxu1 %v6297_v60  ;;  %2018 = vmatmul.mubr.bf16.gmra.mrb[48].mxu0 %v6300_v63  ;;  %v6346_v60 = vld [vmem:[%s7364_s30 + $0x254] ss:$24 sps:$4 sm:$0xff]   ;;  %v6345_v63 = vld [vmem:[%s7364_s30 + $0x248] ss:$24 sps:$4 sm:$0xff]  }
 0x142   : > { %1864 = vmatprep.mubr.bf16.mxu1 %v6301_v1  ;;  %2025 = vmatprep.mubr.bf16.mxu0 %v6304_v3  ;;  %v6348_v1 = vld [vmem:[%s7364_s30 + $0x250] ss:$24 sps:$4 sm:$0xff]   ;;  %v6349_v3 = vld [vmem:[%s7364_s30 + $0x27c] ss:$24 sps:$4 sm:$0xff]  }
 0x143   : > { %607 = vadd.xlane.f32.xlu0 %v551_v44  ;;  %v6354_v44 = vld [vmem:[%s7364_s30 + $0x280] ss:$24 sps:$4 sm:$0xff]  }
 0x144   : > { %609 = vadd.xlane.f32.xlu1 %v552_v0  ;;  %v6355_v0 = vld [vmem:[%s7364_s30 + $0x2ac] ss:$24 sps:$4 sm:$0xff]  }
 0x147   : > { %611 = vadd.xlane.f32.xlu0 %v553_v49  ;;  %v6366_v49 = vld [vmem:[%s7364_s30 + $0x2e0] ss:$24 sps:$4 sm:$0xff]  }
 0x148   : > { %613 = vadd.xlane.f32.xlu1 %v554_v28 }
 0x149   : > { %1865 = vmatmul.mubr.bf16.gmra.mrb[52].mxu1 %v6303_v27  ;;  %2026 = vmatmul.mubr.bf16.gmra.mrb[52].mxu0 %v6306_v7  ;;  %v6358_v27 = vld [vmem:[%s7364_s30 + $0x2b4] ss:$24 sps:$4 sm:$0xff]   ;;  %v6357_v7 = vld [vmem:[%s7364_s30 + $0x2a8] ss:$24 sps:$4 sm:$0xff]  }
 0x14a   : > { %1872 = vmatprep.mubr.bf16.mxu1 %v6307_v10  ;;  %2033 = vmatprep.mubr.bf16.mxu0 %v6310_v15  ;;  %v6360_v10 = vld [vmem:[%s7364_s30 + $0x2b0] ss:$24 sps:$4 sm:$0xff]   ;;  %v6361_v15 = vld [vmem:[%s7364_s30 + $0x2dc] ss:$24 sps:$4 sm:$0xff]   ;;  %s9552_s30 = scalar_lea.vmem [#allocation11], %s6083_s20 }
 0x14b   : > { %615 = vadd.xlane.f32.xlu0 %v555_v52  ;;  %s5140_s9 = sshll.u32 %s9552_s30, 4  ;;  %s11368_s9 = int_to_ptr.vmem [resolvable:$true] %s5140_s9 }
 0x14c   : > { %617 = vadd.xlane.f32.xlu1 %v556_v18  ;;  %s6992_s0 = scalar_lea.vmem %s11368_s9, 24576  ;;  %p6999_p9 = scmp.lt.s32.totalorder %s11368_s9, %s6997_s7 }
 0x14d   : > { %p6993_p10 = scmp.ne.s32.totalorder %s11368_s9, %s6992_s0  ;;  %p7000_p2 = scmp.lt.s32.totalorder %s6998_s12, %s6992_s0 }
 0x14f   : > { %619 = vadd.xlane.f32.xlu0 %v557_v53  ;;  %p6994_p13 = pnand %p6993_p10, %p7262_p6  ;;  %p7001_p1 = por %p7000_p2, %p6999_p9 }
 0x150   : > { %621 = vadd.xlane.f32.xlu1 %v558_v37 }
 0x151   : > { %1873 = vmatmul.mubr.bf16.gmra.mrb[56].mxu1 %v6309_v31  ;;  %2034 = vmatmul.mubr.bf16.gmra.mrb[56].mxu0 %v6312_v6  ;;  %p6995_p5 = pneg %p6994_p13 }
 0x152   : > { %1880 = vmatprep.mubr.bf16.mxu1 %v6313_v9  ;;  %2041 = vmatprep.mubr.bf16.mxu0 %v6316_v14 }
 0x153   : > { %p7002_p4 = pnand %p7001_p1, %p6995_p5 }
 0x159   : > { %1881 = vmatmul.mubr.bf16.gmra.mrb[60].mxu1 %v6315_v33  ;;  %2042 = vmatmul.mubr.bf16.gmra.mrb[60].mxu0 %v6318_v24 }
 0x15a   : > { %1888 = vmatprep.mubr.bf16.mxu1 %v6319_v34  ;;  %2049 = vmatprep.mubr.bf16.mxu0 %v6322_v50 }
 0x161   : > { %1889 = vmatmul.mubr.bf16.gmra.mrb[64].mxu1 %v6321_v58  ;;  %2050 = vmatmul.mubr.bf16.gmra.mrb[64].mxu0 %v6324_v26 }
 0x162   : > { %1896 = vmatprep.mubr.bf16.mxu1 %v6325_v35  ;;  %2057 = vmatprep.mubr.bf16.mxu0 %v6328_v56 }
 0x169   : > { %1897 = vmatmul.mubr.bf16.gmra.mrb[68].mxu1 %v6327_v25  ;;  %2058 = vmatmul.mubr.bf16.gmra.mrb[68].mxu0 %v6330_v40 }
 0x16a   : > { %1904 = vmatprep.mubr.bf16.mxu1 %v6331_v57  ;;  %2065 = vmatprep.mubr.bf16.mxu0 %v6334_v30 }
 0x171   : > { %1905 = vmatmul.mubr.bf16.gmra.mrb[72].mxu1 %v6333_v54  ;;  %2066 = vmatmul.mubr.bf16.gmra.mrb[72].mxu0 %v6336_v38 }
 0x172   : > { %1912 = vmatprep.mubr.bf16.mxu1 %v6337_v39  ;;  %2073 = vmatprep.mubr.bf16.mxu0 %v6340_v21 }
 0x179   : > { %1913 = vmatmul.mubr.bf16.gmra.mrb[76].mxu1 %v6339_v41  ;;  %2074 = vmatmul.mubr.bf16.gmra.mrb[76].mxu0 %v6342_v22 }
 0x17a   : > { %1920 = vmatprep.mubr.bf16.mxu1 %v6343_v42  ;;  %2081 = vmatprep.mubr.bf16.mxu0 %v6346_v60 }
 0x181   : > { %1921 = vmatmul.mubr.bf16.gmra.mrb[80].mxu1 %v6345_v63  ;;  %2082 = vmatmul.mubr.bf16.gmra.mrb[80].mxu0 %v6348_v1 }
 0x182   : > { %1928 = vmatprep.mubr.bf16.mxu1 %v6349_v3  ;;  %2089 = vmatprep.mubr.bf16.mxu0 %v6352_v23 }
 0x189   : > { %1929 = vmatmul.mubr.bf16.gmra.mrb[84].mxu1 %v6351_v43  ;;  %2090 = vmatmul.mubr.bf16.gmra.mrb[84].mxu0 %v6354_v44 }
 0x18a   : > { %1936 = vmatprep.mubr.bf16.mxu1 %v6355_v0  ;;  %2097 = vmatprep.mubr.bf16.mxu0 %v6358_v27 }
 0x191   : > { %1937 = vmatmul.mubr.bf16.gmra.mrb[88].mxu1 %v6357_v7  ;;  %2098 = vmatmul.mubr.bf16.gmra.mrb[88].mxu0 %v6360_v10 }
 0x192   : > { %1944 = vmatprep.mubr.bf16.mxu1 %v6361_v15  ;;  %2105 = vmatprep.mubr.bf16.mxu0 %v6364_v29 }
 0x199   : > { %1945 = vmatmul.mubr.bf16.gmra.mrb[92].mxu1 %v6363_v45  ;;  %2106 = vmatmul.mubr.bf16.gmra.mrb[92].mxu0 %v6366_v49 }
 0x19a   : > { %5952 = vmatprep.mubr.bf16.mxu1 %v7729_v5 }
 0x1b4   : > { %v5552_v28 = vpop.f32.mrb[0].mxu0  ;;  %v5600_v31 = vpop.f32.mrb[0].mxu1 }
 0x1b5   : > { %v5553_v6 = vpop.f32.mrb[1].mxu0  ;;  %v5601_v9 = vpop.f32.mrb[1].mxu1 }
 0x1b6   : > { %v7926_v14 = vadd.f32 %v5553_v6, %v5552_v28  ;;  %v7928_v32 = vadd.f32 %v5601_v9, %v5600_v31  ;;  %v5555_v51 = vpop.f32.mrb[2].mxu0  ;;  %v5603_v52 = vpop.f32.mrb[2].mxu1 }
 0x1b7   : > { %v5556_v18 = vpop.f32.mrb[3].mxu0  ;;  %v5604_v33 = vpop.f32.mrb[3].mxu1 }
 0x1b8   : > { %v7930_v24 = vadd.f32 %v5556_v18, %v5555_v51  ;;  %v7932_v34 = vadd.f32 %v5604_v33, %v5603_v52 }
 0x1bc   : > { %v5558_v50 = vpop.f32.mrb[4].mxu0  ;;  %v5606_v36 = vpop.f32.mrb[4].mxu1 }
 0x1bd   : > { %v5559_v53 = vpop.f32.mrb[5].mxu0  ;;  %v5607_v55 = vpop.f32.mrb[5].mxu1 }
 0x1be   : > { %v7934_v37 = vadd.f32 %v5559_v53, %v5558_v50  ;;  %v7936_v58 = vadd.f32 %v5607_v55, %v5606_v36  ;;  %v5561_v26 = vpop.f32.mrb[6].mxu0  ;;  %v5609_v35 = vpop.f32.mrb[6].mxu1 }
 0x1bf   : > { %v5562_v56 = vpop.f32.mrb[7].mxu0  ;;  %v5610_v25 = vpop.f32.mrb[7].mxu1 }
 0x1c0   : > { %v7938_v40 = vadd.f32 %v5562_v56, %v5561_v26  ;;  %v7940_v57 = vadd.f32 %v5610_v25, %v5609_v35 }
 0x1c4   : > { %v5564_v30 = vpop.f32.mrb[8].mxu0  ;;  %v5612_v54 = vpop.f32.mrb[8].mxu1 }
 0x1c5   : > { %v5565_v38 = vpop.f32.mrb[9].mxu0  ;;  %v5613_v39 = vpop.f32.mrb[9].mxu1 }
 0x1c6   : > { %v7942_v21 = vadd.f32 %v5565_v38, %v5564_v30  ;;  %v7944_v41 = vadd.f32 %v5613_v39, %v5612_v54  ;;  %v5567_v22 = vpop.f32.mrb[10].mxu0  ;;  %v5615_v42 = vpop.f32.mrb[10].mxu1 }
 0x1c7   : > { %v5568_v60 = vpop.f32.mrb[11].mxu0  ;;  %v5616_v63 = vpop.f32.mrb[11].mxu1 }
 0x1c8   : > { %v7946_v1 = vadd.f32 %v5568_v60, %v5567_v22  ;;  %v7948_v3 = vadd.f32 %v5616_v63, %v5615_v42 }
 0x1cc   : > { %v5570_v23 = vpop.f32.mrb[12].mxu0  ;;  %v5618_v43 = vpop.f32.mrb[12].mxu1 }
 0x1cd   : > { %v5571_v44 = vpop.f32.mrb[13].mxu0  ;;  %v5619_v0 = vpop.f32.mrb[13].mxu1 }
 0x1ce   : > { %v7950_v27 = vadd.f32 %v5571_v44, %v5570_v23  ;;  %v7952_v7 = vadd.f32 %v5619_v0, %v5618_v43  ;;  %v5573_v10 = vpop.f32.mrb[14].mxu0  ;;  %v5621_v15 = vpop.f32.mrb[14].mxu1 }
 0x1cf   : > { %v5574_v29 = vpop.f32.mrb[15].mxu0  ;;  %v5622_v45 = vpop.f32.mrb[15].mxu1 }
 0x1d0   : > { %v7954_v49 = vadd.f32 %v5574_v29, %v5573_v10  ;;  %v7956_v28 = vadd.f32 %v5622_v45, %v5621_v15  ;;  %v560_v43 = vpop.xlane.xlu0 %559 }
 0x1d1   : > { %6376 = vrsqrt.f32 %v560_v43 }
 0x1d4   : > { %v5576_v31 = vpop.f32.mrb[16].mxu0  ;;  %v5624_v6 = vpop.f32.mrb[16].mxu1 }
 0x1d5   : > { %v5577_v9 = vpop.f32.mrb[17].mxu0  ;;  %v5625_v51 = vpop.f32.mrb[17].mxu1 }
 0x1d6   : > { %v7958_v52 = vadd.f32 %v5577_v9, %v5576_v31  ;;  %v7960_v18 = vadd.f32 %v5625_v51, %v5624_v6  ;;  %v5579_v33 = vpop.f32.mrb[18].mxu0  ;;  %v5627_v50 = vpop.f32.mrb[18].mxu1 }
 0x1d7   : > { %v5580_v36 = vpop.f32.mrb[19].mxu0  ;;  %v5628_v53 = vpop.f32.mrb[19].mxu1 }
 0x1d8   : > { %v7962_v55 = vadd.f32 %v5580_v36, %v5579_v33  ;;  %v7964_v26 = vadd.f32 %v5628_v53, %v5627_v50  ;;  %v562_v36 = vpop.xlane.xlu0 %561  ;;  %v564_v53 = vpop.xlane.xlu1 %563 }
 0x1d9   : > { %6378 = vrsqrt.f32 %v562_v36 }
 0x1da   : > { %6380 = vrsqrt.f32 %v564_v53 }
 0x1dc   : > { %v5582_v35 = vpop.f32.mrb[20].mxu0  ;;  %v5630_v56 = vpop.f32.mrb[20].mxu1 }
 0x1dd   : > { %v5583_v25 = vpop.f32.mrb[21].mxu0  ;;  %v5631_v30 = vpop.f32.mrb[21].mxu1 }
 0x1de   : > { %v7966_v54 = vadd.f32 %v5583_v25, %v5582_v35  ;;  %v7968_v38 = vadd.f32 %v5631_v30, %v5630_v56  ;;  %v5585_v39 = vpop.f32.mrb[22].mxu0  ;;  %v5633_v22 = vpop.f32.mrb[22].mxu1 }
 0x1df   : > { %v5586_v42 = vpop.f32.mrb[23].mxu0  ;;  %v5634_v60 = vpop.f32.mrb[23].mxu1 }
 0x1e0   : > { %v7970_v63 = vadd.f32 %v5586_v42, %v5585_v39  ;;  %v7972_v23 = vadd.f32 %v5634_v60, %v5633_v22  ;;  %v568_v17 = vpop.xlane.xlu0 %567 }
 0x1e4   : > { %v5588_v44 = vpop.f32.mrb[24].mxu0  ;;  %v5636_v0 = vpop.f32.mrb[24].mxu1 }
 0x1e5   : > { %v5589_v10 = vpop.f32.mrb[25].mxu0  ;;  %v5637_v15 = vpop.f32.mrb[25].mxu1 }
 0x1e6   : > { %v7974_v29 = vadd.f32 %v5589_v10, %v5588_v44  ;;  %v7976_v45 = vadd.f32 %v5637_v15, %v5636_v0  ;;  %v5591_v31 = vpop.f32.mrb[26].mxu0  ;;  %v5639_v6 = vpop.f32.mrb[26].mxu1 }
 0x1e7   : > { %v5592_v9 = vpop.f32.mrb[27].mxu0  ;;  %v5640_v51 = vpop.f32.mrb[27].mxu1 }
 0x1e8   : > { %v7978_v33 = vadd.f32 %v5592_v9, %v5591_v31  ;;  %v7980_v50 = vadd.f32 %v5640_v51, %v5639_v6  ;;  %v566_v31 = vpop.xlane.xlu1 %565 }
 0x1e9   : > { %6382 = vrsqrt.f32 %v566_v31 }
 0x1ea   : > { %6384 = vrsqrt.f32 %v568_v17 }
 0x1ec   : > { %v5594_v35 = vpop.f32.mrb[28].mxu0  ;;  %v5642_v56 = vpop.f32.mrb[28].mxu1 }
 0x1ed   : > { %v5595_v25 = vpop.f32.mrb[29].mxu0  ;;  %v5643_v30 = vpop.f32.mrb[29].mxu1 }
 0x1ee   : > { %v7982_v39 = vadd.f32 %v5595_v25, %v5594_v35  ;;  %v7984_v22 = vadd.f32 %v5643_v30, %v5642_v56  ;;  %v5597_v42 = vpop.f32.mrb[30].mxu0  ;;  %v5645_v60 = vpop.f32.mrb[30].mxu1 }
 0x1ef   : > { %v5598_v44 = vpop.f32.mrb[31].mxu0  ;;  %v5646_v0 = vpop.f32.mrb[31].mxu1 }
 0x1f0   : > { %v7986_v10 = vadd.f32 %v5598_v44, %v5597_v42  ;;  %v7988_v15 = vadd.f32 %v5646_v0, %v5645_v60  ;;  %v7991_v60 = vpop.eup %6376 }
 0x1f1   : > { %v7994_v0 = vpop.eup %6378 }
 0x1f2   : > { %11735 = vst [vmem:[#allocation24_spill] sm:$0xff] %v7994_v0 }
 0x1f4   : > { %v5664_v6 = vpop.f32.mrb[32].mxu1  ;;  %v5776_v9 = vpop.f32.mrb[32].mxu0 }
 0x1f5   : > { %v5665_v51 = vpop.f32.mrb[33].mxu1  ;;  %v5777_v11 = vpop.f32.mrb[33].mxu0 }
 0x1f6   : > { %v5666_v5 = vadd.f32 %v5665_v51, %v5664_v6  ;;  %v5778_v35 = vadd.f32 %v5777_v11, %v5776_v9  ;;  %v5667_v25 = vpop.f32.mrb[34].mxu1  ;;  %v5779_v56 = vpop.f32.mrb[34].mxu0 }
 0x1f7   : > { %v5668_v30 = vpop.f32.mrb[35].mxu1  ;;  %v5780_v61 = vpop.f32.mrb[35].mxu0 }
 0x1f8   : > { %v1827_v19 = vadd.f32 %v5666_v5, %v7926_v14  ;;  %v5669_v43 = vadd.f32 %v5668_v30, %v5667_v25  ;;  %v5781_v42 = vadd.f32 %v5780_v61, %v5779_v56  ;;  %v570_v6 = vpop.xlane.xlu1 %569 }
 0x1f9   : > { %6386 = vrsqrt.f32 %v570_v6 }
 0x1fa   : > { %v1988_v36 = vadd.f32 %v5778_v35, %v1827_v19  ;;  %v1830_v44 = vadd.f32 %v5669_v43, %v7930_v24 }
 0x1fc   : > { %v1991_v11 = vadd.f32 %v5781_v42, %v1830_v44  ;;  %v5670_v9 = vpop.f32.mrb[36].mxu1  ;;  %v5782_v51 = vpop.f32.mrb[36].mxu0  ;;  %v2114_v5 = vmul.f32 %v7991_v60, %v1988_v36 }
 0x1fd   : > { %v5671_v48 = vpop.f32.mrb[37].mxu1  ;;  %v5783_v12 = vpop.f32.mrb[37].mxu0 }
 0x1fe   : > { %v2115_v14 = vmul.f32 %v7994_v0, %v1991_v11  ;;  %v5672_v61 = vadd.f32 %v5671_v48, %v5670_v9  ;;  %v5673_v53 = vpop.f32.mrb[38].mxu1  ;;  %v5784_v31 = vadd.f32 %v5783_v12, %v5782_v51  ;;  %v5785_v25 = vpop.f32.mrb[38].mxu0 }
 0x1ff   : > { %v5674_v19 = vpop.f32.mrb[39].mxu1  ;;  %v5786_v24 = vpop.f32.mrb[39].mxu0 }
 0x200   : > { %v1835_v35 = vadd.f32 %v5672_v61, %v7934_v37  ;;  %v5675_v56 = vadd.f32 %v5674_v19, %v5673_v53  ;;  %v5787_v30 = vadd.f32 %v5786_v24, %v5785_v25  ;;  %v2146_v43 = vpack.c.bf16 %v2115_v14, %v2114_v5  ;;  %v7999_v42 = vpop.eup %6380  ;;  %v572_v12 = vpop.xlane.xlu0 %571 }
 0x201   : > { %v8002_v11 = vpop.eup %6382  ;;  %v574_v48 = vpop.xlane.xlu1 %573  ;;  %6388 = vrsqrt.f32 %v572_v12 }
 0x202   : > { %v1838_v44 = vadd.f32 %v5675_v56, %v7938_v40  ;;  %v1996_v36 = vadd.f32 %v5784_v31, %v1835_v35  ;;  %5936 = vmatprep.subr.bf16.mxu1 %v2146_v43  ;;  %11736 = vst [vmem:[#allocation25_spill] sm:$0xff] %v8002_v11  ;;  %6390 = vrsqrt.f32 %v574_v48 }
 0x203   : > { %5937 = vmatpush3.bf16.msra.mxu1 %v2146_v43 }
 0x204   : > { %v1999_v9 = vadd.f32 %v5787_v30, %v1838_v44  ;;  %v5676_v17 = vpop.f32.mrb[40].mxu1  ;;  %v5788_v51 = vpop.f32.mrb[40].mxu0  ;;  %v2116_v61 = vmul.f32 %v7999_v42, %v1996_v36 }
 0x205   : > { %v5677_v0 = vpop.f32.mrb[41].mxu1  ;;  %v5789_v37 = vpop.f32.mrb[41].mxu0 }
 0x206   : > { %v2117_v6 = vmul.f32 %v8002_v11, %v1999_v9  ;;  %v5678_v5 = vadd.f32 %v5677_v0, %v5676_v17  ;;  %v5679_v14 = vpop.f32.mrb[42].mxu1  ;;  %v5790_v53 = vadd.f32 %v5789_v37, %v5788_v51  ;;  %v5791_v40 = vpop.f32.mrb[42].mxu0 }
 0x207   : > { %v5680_v31 = vpop.f32.mrb[43].mxu1  ;;  %v5792_v25 = vpop.f32.mrb[43].mxu0 }
 0x208   : > { %v1843_v19 = vadd.f32 %v5678_v5, %v7942_v21  ;;  %v5681_v24 = vadd.f32 %v5680_v31, %v5679_v14  ;;  %v5793_v35 = vadd.f32 %v5792_v25, %v5791_v40  ;;  %v2147_v56 = vpack.c.bf16 %v2117_v6, %v2116_v61  ;;  %v8007_v30 = vpop.eup %6384  ;;  %v576_v0 = vpop.xlane.xlu0 %575 }
 0x209   : > { %v8010_v36 = vpop.eup %6386  ;;  %v578_v9 = vpop.xlane.xlu1 %577  ;;  %6392 = vrsqrt.f32 %v576_v0 }
 0x20a   : > { %v1846_v43 = vadd.f32 %v5681_v24, %v7946_v1  ;;  %v2004_v44 = vadd.f32 %v5790_v53, %v1843_v19  ;;  %5938 = vmatprep.subr.bf16.mxu1 %v2147_v56  ;;  %11737 = vst [vmem:[#allocation26_spill] sm:$0xff] %v8010_v36  ;;  %6394 = vrsqrt.f32 %v578_v9 }
 0x20b   : > { %5939 = vmatpush3.bf16.msra.mxu1 %v2147_v56 }
 0x20c   : > { %v2007_v17 = vadd.f32 %v5793_v35, %v1846_v43  ;;  %v5682_v12 = vpop.f32.mrb[44].mxu1  ;;  %v5794_v51 = vpop.f32.mrb[44].mxu0  ;;  %v2118_v5 = vmul.f32 %v8007_v30, %v2004_v44 }
 0x20d   : > { %v5683_v37 = vpop.f32.mrb[45].mxu1  ;;  %v5795_v21 = vpop.f32.mrb[45].mxu0 }
 0x20e   : > { %v2119_v61 = vmul.f32 %v8010_v36, %v2007_v17  ;;  %v5684_v6 = vadd.f32 %v5683_v37, %v5682_v12  ;;  %v5685_v48 = vpop.f32.mrb[46].mxu1  ;;  %v5796_v14 = vadd.f32 %v5795_v21, %v5794_v51  ;;  %v5797_v1 = vpop.f32.mrb[46].mxu0 }
 0x20f   : > { %v5686_v53 = vpop.f32.mrb[47].mxu1  ;;  %v5798_v40 = vpop.f32.mrb[47].mxu0 }
 0x210   : > { %v1851_v31 = vadd.f32 %v5684_v6, %v7950_v27  ;;  %v5687_v25 = vadd.f32 %v5686_v53, %v5685_v48  ;;  %v5799_v19 = vadd.f32 %v5798_v40, %v5797_v1  ;;  %v2148_v24 = vpack.c.bf16 %v2119_v61, %v2118_v5  ;;  %v8015_v35 = vpop.eup %6388  ;;  %v580_v17 = vpop.xlane.xlu0 %579 }
 0x211   : > { %v8018_v44 = vpop.eup %6390  ;;  %v582_v12 = vpop.xlane.xlu1 %581  ;;  %6396 = vrsqrt.f32 %v580_v17 }
 0x212   : > { %v1854_v56 = vadd.f32 %v5687_v25, %v7954_v49  ;;  %v2012_v43 = vadd.f32 %v5796_v14, %v1851_v31  ;;  %5940 = vmatprep.subr.bf16.mxu1 %v2148_v24  ;;  %6398 = vrsqrt.f32 %v582_v12 }
 0x213   : > { %5941 = vmatpush3.bf16.msra.mxu1 %v2148_v24 }
 0x214   : > { %v2015_v51 = vadd.f32 %v5799_v19, %v1854_v56  ;;  %v5688_v0 = vpop.f32.mrb[48].mxu1  ;;  %v5800_v37 = vpop.f32.mrb[48].mxu0  ;;  %v2120_v6 = vmul.f32 %v8015_v35, %v2012_v43 }
 0x215   : > { %v5689_v21 = vpop.f32.mrb[49].mxu1  ;;  %v5801_v27 = vpop.f32.mrb[49].mxu0 }
 0x216   : > { %v2121_v5 = vmul.f32 %v8018_v44, %v2015_v51  ;;  %v5690_v61 = vadd.f32 %v5689_v21, %v5688_v0  ;;  %v5691_v9 = vpop.f32.mrb[50].mxu1  ;;  %v5802_v48 = vadd.f32 %v5801_v27, %v5800_v37  ;;  %v5803_v49 = vpop.f32.mrb[50].mxu0 }
 0x217   : > { %v5692_v14 = vpop.f32.mrb[51].mxu1  ;;  %v5804_v1 = vpop.f32.mrb[51].mxu0 }
 0x218   : > { %v1859_v53 = vadd.f32 %v5690_v61, %v7958_v52  ;;  %v5693_v40 = vadd.f32 %v5692_v14, %v5691_v9  ;;  %v5805_v31 = vadd.f32 %v5804_v1, %v5803_v49  ;;  %v2149_v25 = vpack.c.bf16 %v2121_v5, %v2120_v6  ;;  %v8023_v19 = vpop.eup %6392  ;;  %v584_v51 = vpop.xlane.xlu0 %583 }
 0x219   : > { %v8026_v43 = vpop.eup %6394  ;;  %v586_v0 = vpop.xlane.xlu1 %585  ;;  %6400 = vrsqrt.f32 %v584_v51 }
 0x21a   : > { %v1862_v24 = vadd.f32 %v5693_v40, %v7962_v55  ;;  %v2020_v56 = vadd.f32 %v5802_v48, %v1859_v53  ;;  %5942 = vmatprep.subr.bf16.mxu1 %v2149_v25  ;;  %6402 = vrsqrt.f32 %v586_v0 }
 0x21b   : > { %5943 = vmatpush3.bf16.msra.mxu1 %v2149_v25 }
 0x21c   : > { %v2023_v37 = vadd.f32 %v5805_v31, %v1862_v24  ;;  %v5694_v17 = vpop.f32.mrb[52].mxu1  ;;  %v5806_v21 = vpop.f32.mrb[52].mxu0  ;;  %v2122_v61 = vmul.f32 %v8023_v19, %v2020_v56 }
 0x21d   : > { %v5695_v27 = vpop.f32.mrb[53].mxu1  ;;  %v5807_v52 = vpop.f32.mrb[53].mxu0 }
 0x21e   : > { %v2123_v6 = vmul.f32 %v8026_v43, %v2023_v37  ;;  %v5696_v5 = vadd.f32 %v5695_v27, %v5694_v17  ;;  %v5697_v12 = vpop.f32.mrb[54].mxu1  ;;  %v5808_v9 = vadd.f32 %v5807_v52, %v5806_v21  ;;  %v5809_v55 = vpop.f32.mrb[54].mxu0 }
 0x21f   : > { %v5698_v48 = vpop.f32.mrb[55].mxu1  ;;  %v5810_v49 = vpop.f32.mrb[55].mxu0 }
 0x220   : > { %v1867_v14 = vadd.f32 %v5696_v5, %v7966_v54  ;;  %v5699_v1 = vadd.f32 %v5698_v48, %v5697_v12  ;;  %v5811_v53 = vadd.f32 %v5810_v49, %v5809_v55  ;;  %v2150_v40 = vpack.c.bf16 %v2123_v6, %v2122_v61  ;;  %v8031_v31 = vpop.eup %6396  ;;  %v588_v37 = vpop.xlane.xlu0 %587 }
 0x221   : > { %v8034_v56 = vpop.eup %6398  ;;  %v590_v17 = vpop.xlane.xlu1 %589  ;;  %6404 = vrsqrt.f32 %v588_v37 }
 0x222   : > { %v1870_v25 = vadd.f32 %v5699_v1, %v7970_v63  ;;  %v2028_v24 = vadd.f32 %v5808_v9, %v1867_v14  ;;  %5944 = vmatprep.subr.bf16.mxu1 %v2150_v40  ;;  %6406 = vrsqrt.f32 %v590_v17 }
 0x223   : > { %5945 = vmatpush3.bf16.msra.mxu1 %v2150_v40 }
 0x224   : > { %v2031_v21 = vadd.f32 %v5811_v53, %v1870_v25  ;;  %v5700_v51 = vpop.f32.mrb[56].mxu1  ;;  %v5812_v27 = vpop.f32.mrb[56].mxu0  ;;  %v2124_v5 = vmul.f32 %v8031_v31, %v2028_v24 }
 0x225   : > { %v5701_v52 = vpop.f32.mrb[57].mxu1  ;;  %v5813_v54 = vpop.f32.mrb[57].mxu0 }
 0x226   : > { %v2125_v61 = vmul.f32 %v8034_v56, %v2031_v21  ;;  %v5702_v6 = vadd.f32 %v5701_v52, %v5700_v51  ;;  %v5703_v0 = vpop.f32.mrb[58].mxu1  ;;  %v5814_v12 = vadd.f32 %v5813_v54, %v5812_v27  ;;  %v5815_v63 = vpop.f32.mrb[58].mxu0 }
 0x227   : > { %v5704_v9 = vpop.f32.mrb[59].mxu1  ;;  %v5816_v55 = vpop.f32.mrb[59].mxu0 }
 0x228   : > { %v1875_v48 = vadd.f32 %v5702_v6, %v7974_v29  ;;  %v5705_v49 = vadd.f32 %v5704_v9, %v5703_v0  ;;  %v5817_v14 = vadd.f32 %v5816_v55, %v5815_v63  ;;  %v2151_v1 = vpack.c.bf16 %v2125_v61, %v2124_v5  ;;  %v8039_v53 = vpop.eup %6400  ;;  %v592_v21 = vpop.xlane.xlu0 %591 }
 0x229   : > { %v8042_v24 = vpop.eup %6402  ;;  %v594_v51 = vpop.xlane.xlu1 %593  ;;  %6408 = vrsqrt.f32 %v592_v21 }
 0x22a   : > { %v1878_v40 = vadd.f32 %v5705_v49, %v7978_v33  ;;  %v2036_v25 = vadd.f32 %v5814_v12, %v1875_v48  ;;  %5946 = vmatprep.subr.bf16.mxu1 %v2151_v1  ;;  %6410 = vrsqrt.f32 %v594_v51 }
 0x22b   : > { %5947 = vmatpush3.bf16.msra.mxu1 %v2151_v1 }
 0x22c   : > { %v2039_v27 = vadd.f32 %v5817_v14, %v1878_v40  ;;  %v5706_v37 = vpop.f32.mrb[60].mxu1  ;;  %v5818_v52 = vpop.f32.mrb[60].mxu0  ;;  %v2126_v6 = vmul.f32 %v8039_v53, %v2036_v25 }
 0x22d   : > { %v5707_v54 = vpop.f32.mrb[61].mxu1  ;;  %v5819_v29 = vpop.f32.mrb[61].mxu0 }
 0x22e   : > { %v2127_v5 = vmul.f32 %v8042_v24, %v2039_v27  ;;  %v5708_v61 = vadd.f32 %v5707_v54, %v5706_v37  ;;  %v5709_v17 = vpop.f32.mrb[62].mxu1  ;;  %v5820_v0 = vadd.f32 %v5819_v29, %v5818_v52  ;;  %v5821_v33 = vpop.f32.mrb[62].mxu0 }
 0x22f   : > { %v5710_v12 = vpop.f32.mrb[63].mxu1  ;;  %v5822_v63 = vpop.f32.mrb[63].mxu0 }
 0x230   : > { %v1883_v9 = vadd.f32 %v5708_v61, %v7982_v39  ;;  %v5711_v55 = vadd.f32 %v5710_v12, %v5709_v17  ;;  %v5823_v48 = vadd.f32 %v5822_v63, %v5821_v33  ;;  %v2152_v49 = vpack.c.bf16 %v2127_v5, %v2126_v6  ;;  %v8047_v14 = vpop.eup %6404  ;;  %v596_v27 = vpop.xlane.xlu0 %595 }
 0x231   : > { %v8050_v25 = vpop.eup %6406  ;;  %v598_v37 = vpop.xlane.xlu1 %597  ;;  %6412 = vrsqrt.f32 %v596_v27 }
 0x232   : > { %v1886_v1 = vadd.f32 %v5711_v55, %v7986_v10  ;;  %v2044_v40 = vadd.f32 %v5820_v0, %v1883_v9  ;;  %5948 = vmatprep.subr.bf16.mxu1 %v2152_v49  ;;  %6414 = vrsqrt.f32 %v598_v37 }
 0x233   : > { %5949 = vmatpush3.bf16.msra.mxu1 %v2152_v49 }
 0x234   : > { %v2047_v52 = vadd.f32 %v5823_v48, %v1886_v1  ;;  %v5712_v21 = vpop.f32.mrb[64].mxu1  ;;  %v5824_v54 = vpop.f32.mrb[64].mxu0  ;;  %v2128_v61 = vmul.f32 %v8047_v14, %v2044_v40 }
 0x235   : > { %v5713_v29 = vpop.f32.mrb[65].mxu1  ;;  %v5825_v39 = vpop.f32.mrb[65].mxu0 }
 0x236   : > { %v2129_v6 = vmul.f32 %v8050_v25, %v2047_v52  ;;  %v5714_v5 = vadd.f32 %v5713_v29, %v5712_v21  ;;  %v5715_v51 = vpop.f32.mrb[66].mxu1  ;;  %v5826_v17 = vadd.f32 %v5825_v39, %v5824_v54  ;;  %v5827_v10 = vpop.f32.mrb[66].mxu0 }
 0x237   : > { %v5716_v0 = vpop.f32.mrb[67].mxu1  ;;  %v5828_v33 = vpop.f32.mrb[67].mxu0 }
 0x238   : > { %v1891_v12 = vadd.f32 %v5714_v5, %v7928_v32  ;;  %v5717_v63 = vadd.f32 %v5716_v0, %v5715_v51  ;;  %v5829_v9 = vadd.f32 %v5828_v33, %v5827_v10  ;;  %v2153_v55 = vpack.c.bf16 %v2129_v6, %v2128_v61  ;;  %v8055_v48 = vpop.eup %6408  ;;  %v600_v52 = vpop.xlane.xlu0 %599 }
 0x239   : > { %v8058_v40 = vpop.eup %6410  ;;  %v602_v21 = vpop.xlane.xlu1 %601  ;;  %6416 = vrsqrt.f32 %v600_v52 }
 0x23a   : > { %v1894_v49 = vadd.f32 %v5717_v63, %v7932_v34  ;;  %v2052_v1 = vadd.f32 %v5826_v17, %v1891_v12  ;;  %5950 = vmatprep.subr.bf16.mxu1 %v2153_v55  ;;  %6418 = vrsqrt.f32 %v602_v21 }
 0x23b   : > { %5951 = vmatpush3.bf16.msra.mxu1 %v2153_v55 }
 0x23c   : > { %v2055_v54 = vadd.f32 %v5829_v9, %v1894_v49  ;;  %v5718_v27 = vpop.f32.mrb[68].mxu1  ;;  %v5830_v29 = vpop.f32.mrb[68].mxu0  ;;  %v2130_v5 = vmul.f32 %v8055_v48, %v2052_v1 }
 0x23d   : > { %v5719_v39 = vpop.f32.mrb[69].mxu1  ;;  %v5831_v32 = vpop.f32.mrb[69].mxu0 }
 0x23e   : > { %v2131_v61 = vmul.f32 %v8058_v40, %v2055_v54  ;;  %v5720_v6 = vadd.f32 %v5719_v39, %v5718_v27  ;;  %v5721_v37 = vpop.f32.mrb[70].mxu1  ;;  %5953 = vmatmul.mubr.bf16.vlgmr.msra.gmra.mrb[96].mxu1 %v7735_v8  ;;  %v5832_v34 = vadd.f32 %v5831_v32, %v5830_v29  ;;  %v5833_v51 = vpop.f32.mrb[70].mxu0 }
 0x23f   : > { %v5722_v17 = vpop.f32.mrb[71].mxu1  ;;  %v5834_v10 = vpop.f32.mrb[71].mxu0  ;;  %5956 = vmatprep.mubr.bf16.mxu1 %v7742_v13 }
 0x240   : > { %v1899_v0 = vadd.f32 %v5720_v6, %v7936_v58  ;;  %v5723_v33 = vadd.f32 %v5722_v17, %v5721_v37  ;;  %v5835_v12 = vadd.f32 %v5834_v10, %v5833_v51  ;;  %v2154_v63 = vpack.c.bf16 %v2131_v61, %v2130_v5  ;;  %v8065_v9 = vpop.eup %6412  ;;  %v604_v54 = vpop.xlane.xlu0 %603 }
 0x241   : > { %v8068_v1 = vpop.eup %6414  ;;  %v606_v52 = vpop.xlane.xlu1 %605  ;;  %6420 = vrsqrt.f32 %v604_v54 }
 0x242   : > { %v1902_v55 = vadd.f32 %v5723_v33, %v7940_v57  ;;  %v2060_v49 = vadd.f32 %v5832_v34, %v1899_v0  ;;  %5968 = vmatprep.subr.bf16.mxu1 %v2154_v63  ;;  %6422 = vrsqrt.f32 %v606_v52 }
 0x243   : > { %5969 = vmatpush3.bf16.msra.mxu1 %v2154_v63 }
 0x244   : > { %v2063_v27 = vadd.f32 %v5835_v12, %v1902_v55  ;;  %v5724_v29 = vpop.f32.mrb[72].mxu1  ;;  %v5836_v39 = vpop.f32.mrb[72].mxu0  ;;  %v2132_v6 = vmul.f32 %v8065_v9, %v2060_v49 }
 0x245   : > { %v5725_v32 = vpop.f32.mrb[73].mxu1  ;;  %v5837_v58 = vpop.f32.mrb[73].mxu0 }
 0x246   : > { %v2133_v5 = vmul.f32 %v8068_v1, %v2063_v27  ;;  %v5726_v61 = vadd.f32 %v5725_v32, %v5724_v29  ;;  %v5727_v21 = vpop.f32.mrb[74].mxu1  ;;  %5957 = vmatmul.mubr.bf16.gmra.mrb[100].mxu1 %v7757_v46  ;;  %v5838_v57 = vadd.f32 %v5837_v58, %v5836_v39  ;;  %v5839_v37 = vpop.f32.mrb[74].mxu0 }
 0x247   : > { %v5728_v34 = vpop.f32.mrb[75].mxu1  ;;  %v5840_v51 = vpop.f32.mrb[75].mxu0  ;;  %5960 = vmatprep.mubr.bf16.mxu1 %v7769_v59 }
 0x248   : > { %v1907_v17 = vadd.f32 %v5726_v61, %v7944_v41  ;;  %v5729_v10 = vadd.f32 %v5728_v34, %v5727_v21  ;;  %v5841_v0 = vadd.f32 %v5840_v51, %v5839_v37  ;;  %v2155_v33 = vpack.c.bf16 %v2133_v5, %v2132_v6  ;;  %v8075_v12 = vpop.eup %6416  ;;  %v608_v27 = vpop.xlane.xlu0 %607 }
 0x249   : > { %v8078_v49 = vpop.eup %6418  ;;  %v610_v54 = vpop.xlane.xlu1 %609  ;;  %6424 = vrsqrt.f32 %v608_v27 }
 0x24a   : > { %v1910_v63 = vadd.f32 %v5729_v10, %v7948_v3  ;;  %v2068_v55 = vadd.f32 %v5838_v57, %v1907_v17  ;;  %5970 = vmatprep.subr.bf16.mxu1 %v2155_v33  ;;  %6426 = vrsqrt.f32 %v610_v54 }
 0x24b   : > { %5971 = vmatpush3.bf16.msra.mxu1 %v2155_v33 }
 0x24c   : > { %v2071_v29 = vadd.f32 %v5841_v0, %v1910_v63  ;;  %v5730_v39 = vpop.f32.mrb[76].mxu1  ;;  %v5842_v32 = vpop.f32.mrb[76].mxu0  ;;  %v2134_v61 = vmul.f32 %v8075_v12, %v2068_v55 }
 0x24d   : > { %v5731_v58 = vpop.f32.mrb[77].mxu1  ;;  %v5843_v41 = vpop.f32.mrb[77].mxu0 }
 0x24e   : > { %v2135_v6 = vmul.f32 %v8078_v49, %v2071_v29  ;;  %v5732_v5 = vadd.f32 %v5731_v58, %v5730_v39  ;;  %v5733_v52 = vpop.f32.mrb[78].mxu1  ;;  %5961 = vmatmul.mubr.bf16.gmra.mrb[104].mxu1 %v7779_v2  ;;  %v5844_v3 = vadd.f32 %v5843_v41, %v5842_v32  ;;  %v5845_v21 = vpop.f32.mrb[78].mxu0 }
 0x24f   : > { %v5734_v57 = vpop.f32.mrb[79].mxu1  ;;  %v5846_v37 = vpop.f32.mrb[79].mxu0  ;;  %5964 = vmatprep.mubr.bf16.mxu1 %v7782_v4 }
 0x250   : > { %v1915_v34 = vadd.f32 %v5732_v5, %v7952_v7  ;;  %v5735_v51 = vadd.f32 %v5734_v57, %v5733_v52  ;;  %v5847_v17 = vadd.f32 %v5846_v37, %v5845_v21  ;;  %v2156_v10 = vpack.c.bf16 %v2135_v6, %v2134_v61  ;;  %v8085_v0 = vpop.eup %6420  ;;  %v612_v29 = vpop.xlane.xlu0 %611 }
 0x251   : > { %v8088_v55 = vpop.eup %6422  ;;  %v614_v27 = vpop.xlane.xlu1 %613  ;;  %6428 = vrsqrt.f32 %v612_v29 }
 0x252   : > { %v1918_v33 = vadd.f32 %v5735_v51, %v7956_v28  ;;  %v2076_v63 = vadd.f32 %v5844_v3, %v1915_v34  ;;  %5972 = vmatprep.subr.bf16.mxu1 %v2156_v10  ;;  %6430 = vrsqrt.f32 %v614_v27 }
 0x253   : > { %5973 = vmatpush3.bf16.msra.mxu1 %v2156_v10 }
 0x254   : > { %v2079_v39 = vadd.f32 %v5847_v17, %v1918_v33  ;;  %v5736_v32 = vpop.f32.mrb[80].mxu1  ;;  %v5848_v58 = vpop.f32.mrb[80].mxu0  ;;  %v2136_v5 = vmul.f32 %v8085_v0, %v2076_v63 }
 0x255   : > { %v5737_v41 = vpop.f32.mrb[81].mxu1  ;;  %v5849_v7 = vpop.f32.mrb[81].mxu0 }
 0x256   : > { %v2137_v61 = vmul.f32 %v8088_v55, %v2079_v39  ;;  %v5738_v6 = vadd.f32 %v5737_v41, %v5736_v32  ;;  %v5739_v54 = vpop.f32.mrb[82].mxu1  ;;  %5965 = vmatmul.mubr.bf16.gmra.mrb[108].mxu1 %v7788_v16  ;;  %v5850_v28 = vadd.f32 %v5849_v7, %v5848_v58  ;;  %v5851_v52 = vpop.f32.mrb[82].mxu0 }
 0x257   : > { %v5740_v3 = vpop.f32.mrb[83].mxu1  ;;  %v5852_v21 = vpop.f32.mrb[83].mxu0  ;;  %5984 = vmatprep.mubr.bf16.mxu1 %v7817_v47 }
 0x258   : > { %v1923_v57 = vadd.f32 %v5738_v6, %v7960_v18  ;;  %v5741_v37 = vadd.f32 %v5740_v3, %v5739_v54  ;;  %v5853_v34 = vadd.f32 %v5852_v21, %v5851_v52  ;;  %v2157_v51 = vpack.c.bf16 %v2137_v61, %v2136_v5  ;;  %v8095_v17 = vpop.eup %6424  ;;  %v616_v39 = vpop.xlane.xlu0 %615 }
 0x259   : > { %v8098_v63 = vpop.eup %6426  ;;  %v618_v29 = vpop.xlane.xlu1 %617  ;;  %6432 = vrsqrt.f32 %v616_v39 }
 0x25a   : > { %v1926_v10 = vadd.f32 %v5741_v37, %v7964_v26  ;;  %v2084_v33 = vadd.f32 %v5850_v28, %v1923_v57  ;;  %5974 = vmatprep.subr.bf16.mxu1 %v2157_v51  ;;  %6434 = vrsqrt.f32 %v618_v29 }
 0x25b   : > { %5975 = vmatpush3.bf16.msra.mxu1 %v2157_v51 }
 0x25c   : > { %v2087_v32 = vadd.f32 %v5853_v34, %v1926_v10  ;;  %v5742_v58 = vpop.f32.mrb[84].mxu1  ;;  %v5854_v41 = vpop.f32.mrb[84].mxu0  ;;  %v2138_v6 = vmul.f32 %v8095_v17, %v2084_v33 }
 0x25d   : > { %v5743_v7 = vpop.f32.mrb[85].mxu1  ;;  %v5855_v18 = vpop.f32.mrb[85].mxu0 }
 0x25e   : > { %v2139_v5 = vmul.f32 %v8098_v63, %v2087_v32  ;;  %v5744_v61 = vadd.f32 %v5743_v7, %v5742_v58  ;;  %v5745_v27 = vpop.f32.mrb[86].mxu1  ;;  %v5856_v54 = vadd.f32 %v5855_v18, %v5854_v41  ;;  %v5857_v26 = vpop.f32.mrb[86].mxu0 }
 0x25f   : > { %v5746_v28 = vpop.f32.mrb[87].mxu1  ;;  %v5858_v52 = vpop.f32.mrb[87].mxu0 }
 0x260   : > { %v1931_v3 = vadd.f32 %v5744_v61, %v7968_v38  ;;  %v5747_v21 = vadd.f32 %v5746_v28, %v5745_v27  ;;  %v5859_v57 = vadd.f32 %v5858_v52, %v5857_v26  ;;  %v2158_v37 = vpack.c.bf16 %v2139_v5, %v2138_v6  ;;  %v8103_v34 = vpop.eup %6428  ;;  %v620_v32 = vpop.xlane.xlu0 %619 }
 0x261   : > { %v8106_v33 = vpop.eup %6430  ;;  %v622_v58 = vpop.xlane.xlu1 %621  ;;  %6436 = vrsqrt.f32 %v620_v32 }
 0x262   : > { %v1934_v51 = vadd.f32 %v5747_v21, %v7972_v23  ;;  %v2092_v10 = vadd.f32 %v5856_v54, %v1931_v3  ;;  %5976 = vmatprep.subr.bf16.mxu1 %v2158_v37  ;;  %6438 = vrsqrt.f32 %v622_v58 }
 0x263   : > { %5977 = vmatpush3.bf16.msra.mxu1 %v2158_v37 }
 0x264   : > { %v2095_v41 = vadd.f32 %v5859_v57, %v1934_v51  ;;  %v5748_v39 = vpop.f32.mrb[88].mxu1  ;;  %v5860_v7 = vpop.f32.mrb[88].mxu0  ;;  %v2140_v61 = vmul.f32 %v8103_v34, %v2092_v10 }
 0x265   : > { %v5749_v18 = vpop.f32.mrb[89].mxu1  ;;  %v5861_v38 = vpop.f32.mrb[89].mxu0 }
 0x266   : > { %v2141_v6 = vmul.f32 %v8106_v33, %v2095_v41  ;;  %v5750_v5 = vadd.f32 %v5749_v18, %v5748_v39  ;;  %v5751_v29 = vpop.f32.mrb[90].mxu1  ;;  %v5862_v27 = vadd.f32 %v5861_v38, %v5860_v7  ;;  %v5863_v23 = vpop.f32.mrb[90].mxu0 }
 0x267   : > { %v5752_v54 = vpop.f32.mrb[91].mxu1  ;;  %v5864_v26 = vpop.f32.mrb[91].mxu0 }
 0x268   : > { %v1939_v28 = vadd.f32 %v5750_v5, %v7976_v45  ;;  %v5753_v52 = vadd.f32 %v5752_v54, %v5751_v29  ;;  %v5865_v3 = vadd.f32 %v5864_v26, %v5863_v23  ;;  %v2159_v21 = vpack.c.bf16 %v2141_v6, %v2140_v61  ;;  %v8111_v57 = vpop.eup %6432 }
 0x269   : > { %v8114_v10 = vpop.eup %6434 }
 0x26a   : > { %v1942_v37 = vadd.f32 %v5753_v52, %v7980_v50  ;;  %v2100_v51 = vadd.f32 %v5862_v27, %v1939_v28  ;;  %5978 = vmatprep.subr.bf16.mxu1 %v2159_v21 }
 0x26b   : > { %5979 = vmatpush3.bf16.msra.mxu1 %v2159_v21  ;;  %v8119_v28 = vpop.eup %6436 }
 0x26c   : > { %v2103_v41 = vadd.f32 %v5865_v3, %v1942_v37  ;;  %v5754_v39 = vpop.f32.mrb[92].mxu1  ;;  %v5866_v7 = vpop.f32.mrb[92].mxu0  ;;  %v2142_v45 = vmul.f32 %v8111_v57, %v2100_v51 }
 0x26d   : > { %v5755_v32 = vpop.f32.mrb[93].mxu1  ;;  %v5867_v18 = vpop.f32.mrb[93].mxu0 }
 0x26e   : > { %v2143_v38 = vmul.f32 %v8114_v10, %v2103_v41  ;;  %v5756_v61 = vadd.f32 %v5755_v32, %v5754_v39  ;;  %v5757_v6 = vpop.f32.mrb[94].mxu1  ;;  %v5868_v5 = vadd.f32 %v5867_v18, %v5866_v7  ;;  %v5869_v58 = vpop.f32.mrb[94].mxu0  ;;  %v11740_v7 = vld [vmem:[#allocation21_spill] sm:$0xff]  ;;  %v11741_v32 = vld [vmem:[#allocation22_spill] sm:$0xff]  ;;  %v11742_v18 = vld [vmem:[#allocation23_spill] sm:$0xff] }
 0x26f   : > { %v5758_v29 = vpop.f32.mrb[95].mxu1  ;;  %v5870_v50 = vpop.f32.mrb[95].mxu0 }
 0x270   : > { %v1947_v27 = vadd.f32 %v5756_v61, %v7984_v22  ;;  %v5759_v23 = vadd.f32 %v5758_v29, %v5757_v6  ;;  %v5871_v54 = vadd.f32 %v5870_v50, %v5869_v58  ;;  %v2160_v26 = vpack.c.bf16 %v2143_v38, %v2142_v45  ;;  %v8122_v21 = vpop.eup %6438  ;;  %v11738_v22 = vld [vmem:[#allocation19_spill] sm:$0xff]  ;;  %v11743_v45 = vld [vmem:[#allocation18_spill] sm:$0xff] }
 0x271   : > { %v8134_v61 = vld [vmem:[#allocation7] ss:$0 sm:$0xff] }
 0x272   : > { %v1950_v52 = vadd.f32 %v5759_v23, %v7988_v15  ;;  %v2108_v3 = vadd.f32 %v5868_v5, %v1947_v27  ;;  %5980 = vmatprep.subr.bf16.mxu1 %v2160_v26  ;;  %v11739_v15 = vld [vmem:[#allocation20_spill] sm:$0xff] }
 0x273   : > { %5981 = vmatpush3.bf16.msra.mxu1 %v2160_v26  ;;  %v11744_v26 = vld [vmem:[#allocation24_spill] sm:$0xff] }
 0x274   : > { %v2111_v37 = vadd.f32 %v5871_v54, %v1950_v52  ;;  %v2144_v51 = vmul.f32 %v8119_v28, %v2108_v3 }
 0x276   : > { %v2145_v41 = vmul.f32 %v8122_v21, %v2111_v37 }
 0x278   : > { %v2161_v39 = vpack.c.bf16 %v2145_v41, %v2144_v51 }
 0x27a   : > { %5982 = vmatprep.subr.bf16.mxu1 %v2161_v39 }
 0x27b   : > { %5983 = vmatpush3.bf16.msra.mxu1 %v2161_v39  ;;  %v6367_v39 = vld [vmem:[#allocation8] ss:$24 sps:$4 sm:$0xff]  }
 0x27e   : > { %5985 = vmatmul.mubr.bf16.vlgmr.msra.gmra.mrb[112].mxu1 %v7823_v62 }
 0x27f   : > { %5988 = vmatprep.mubr.bf16.mxu1 %v7829_v20 }
 0x286   : > { %5989 = vmatmul.mubr.bf16.gmra.mrb[116].mxu1 %v11738_v22 }
 0x287   : > { %5992 = vmatprep.mubr.bf16.mxu1 %v11739_v15 }
 0x28e   : > { %5993 = vmatmul.mubr.bf16.gmra.mrb[120].mxu1 %v11740_v7 }
 0x28f   : > { %5996 = vmatprep.mubr.bf16.mxu1 %v11741_v32 }
 0x296   : > { %5997 = vmatmul.mubr.bf16.gmra.mrb[124].mxu1 %v11742_v18 }
 0x297   : > { %6016 = vmatprep.mubr.bf16.mxu1 %v11743_v45  ;;  %v6369_v45 = vld [vmem:[#allocation8 + $0x4] ss:$24 sps:$4 sm:$0xff]  }
 0x298   : > { %2834 = vmatprep.subr.bf16.mxu0 %v6369_v45 }
 0x299   : > { %2835 = vmatpush1.bf16.msra.mxu0 %v6367_v39 }
 0x311   : > { %v5954_v38 = vpop.f32.mrb[96].mxu1 }
 0x312   : > { %v2358_v6 = vmul.f32 %v7999_v42, %v5954_v38  ;;  %v2196_v5 = vpop.f32.mrb[97].mxu1 }
 0x313   : > { %v2356_v58 = vmul.f32 %v7991_v60, %v2196_v5  ;;  %v5955_v29 = vpop.f32.mrb[98].mxu1 }
 0x314   : > { %v2397_v50 = vadd.f32 %v8134_v61, %v2358_v6  ;;  %v2359_v27 = vmul.f32 %v8002_v11, %v5955_v29  ;;  %v2199_v23 = vpop.f32.mrb[99].mxu1 }
 0x315   : > { %v2395_v54 = vadd.f32 %v8134_v61, %v2356_v58  ;;  %v2357_v52 = vmul.f32 %v11744_v26, %v2199_v23 }
 0x316   : > { %v2429_v3 = vmax.f32 %v2397_v50, 0.0  ;;  %v2398_v37 = vadd.f32 %v8134_v61, %v2359_v27 }
 0x317   : > { %v2427_v51 = vmax.f32 %v2395_v54, 0.0  ;;  %v2396_v41 = vadd.f32 %v8134_v61, %v2357_v52 }
 0x318   : > { %v2430_v38 = vmax.f32 %v2398_v37, 0.0  ;;  %v2461_v6 = vmul.f32 %v7999_v42, %v2429_v3 }
 0x319   : > { %v2428_v5 = vmax.f32 %v2396_v41, 0.0  ;;  %v5958_v18 = vpop.f32.mrb[100].mxu1  ;;  %v2459_v50 = vmul.f32 %v7991_v60, %v2427_v51 }
 0x31a   : > { %v2462_v29 = vmul.f32 %v8002_v11, %v2430_v38  ;;  %v2362_v58 = vmul.f32 %v8015_v35, %v5958_v18  ;;  %v2212_v32 = vpop.f32.mrb[101].mxu1 }
 0x31b   : > { %v2460_v27 = vmul.f32 %v11744_v26, %v2428_v5  ;;  %v2360_v23 = vmul.f32 %v8007_v30, %v2212_v32  ;;  %v5959_v54 = vpop.f32.mrb[102].mxu1 }
 0x31c   : > { %v2401_v52 = vadd.f32 %v8134_v61, %v2362_v58  ;;  %v2363_v37 = vmul.f32 %v8018_v44, %v5959_v54  ;;  %v2215_v41 = vpop.f32.mrb[103].mxu1  ;;  %v2492_v45 = vpack.c.bf16 %v2462_v29, %v2461_v6 }
 0x31d   : > { %v2399_v3 = vadd.f32 %v8134_v61, %v2360_v23  ;;  %v2361_v38 = vmul.f32 %v8010_v36, %v2215_v41  ;;  %v2491_v18 = vpack.c.bf16 %v2460_v27, %v2459_v50 }
 0x31e   : > { %v2433_v11 = vmax.f32 %v2401_v52, 0.0  ;;  %v2402_v39 = vadd.f32 %v8134_v61, %v2363_v37 }
 0x31f   : > { %v2431_v51 = vmax.f32 %v2399_v3, 0.0  ;;  %v2400_v5 = vadd.f32 %v8134_v61, %v2361_v38  ;;  %6000 = vmatprep.subr.bf16.mxu1 %v2491_v18 }
 0x320   : > { %v2434_v32 = vmax.f32 %v2402_v39, 0.0  ;;  %6001 = vmatpush3.bf16.msra.mxu1 %v2491_v18  ;;  %v2465_v54 = vmul.f32 %v8015_v35, %v2433_v11 }
 0x321   : > { %v2432_v26 = vmax.f32 %v2400_v5, 0.0  ;;  %v5962_v58 = vpop.f32.mrb[104].mxu1  ;;  %6002 = vmatprep.subr.bf16.mxu1 %v2492_v45  ;;  %v2463_v50 = vmul.f32 %v8007_v30, %v2431_v51 }
 0x322   : > { %v2466_v6 = vmul.f32 %v8018_v44, %v2434_v32  ;;  %v2366_v29 = vmul.f32 %v8031_v31, %v5962_v58  ;;  %v2228_v23 = vpop.f32.mrb[105].mxu1 }
 0x323   : > { %v2464_v27 = vmul.f32 %v8010_v36, %v2432_v26  ;;  %v2364_v52 = vmul.f32 %v8023_v19, %v2228_v23  ;;  %v5963_v37 = vpop.f32.mrb[106].mxu1 }
 0x324   : > { %v2405_v41 = vadd.f32 %v8134_v61, %v2366_v29  ;;  %v2367_v3 = vmul.f32 %v8034_v56, %v5963_v37  ;;  %v2231_v38 = vpop.f32.mrb[107].mxu1  ;;  %6003 = vmatpush3.bf16.msra.mxu1 %v2492_v45  ;;  %v2494_v18 = vpack.c.bf16 %v2466_v6, %v2465_v54 }
 0x325   : > { %v2403_v11 = vadd.f32 %v8134_v61, %v2364_v52  ;;  %v2365_v39 = vmul.f32 %v8026_v43, %v2231_v38  ;;  %v2493_v5 = vpack.c.bf16 %v2464_v27, %v2463_v50 }
 0x326   : > { %v2437_v32 = vmax.f32 %v2405_v41, 0.0  ;;  %v2406_v51 = vadd.f32 %v8134_v61, %v2367_v3 }
 0x327   : > { %v2435_v58 = vmax.f32 %v2403_v11, 0.0  ;;  %v2404_v26 = vadd.f32 %v8134_v61, %v2365_v39  ;;  %6004 = vmatprep.subr.bf16.mxu1 %v2493_v5 }
 0x328   : > { %v2438_v23 = vmax.f32 %v2406_v51, 0.0  ;;  %6005 = vmatpush3.bf16.msra.mxu1 %v2493_v5  ;;  %v2469_v45 = vmul.f32 %v8031_v31, %v2437_v32 }
 0x329   : > { %v2436_v29 = vmax.f32 %v2404_v26, 0.0  ;;  %v5966_v36 = vpop.f32.mrb[108].mxu1  ;;  %6006 = vmatprep.subr.bf16.mxu1 %v2494_v18  ;;  %v2467_v50 = vmul.f32 %v8023_v19, %v2435_v58 }
 0x32a   : > { %v2470_v54 = vmul.f32 %v8034_v56, %v2438_v23  ;;  %v2370_v6 = vmul.f32 %v8047_v14, %v5966_v36  ;;  %v2244_v52 = vpop.f32.mrb[109].mxu1 }
 0x32b   : > { %v2468_v27 = vmul.f32 %v8026_v43, %v2436_v29  ;;  %v2368_v37 = vmul.f32 %v8039_v53, %v2244_v52  ;;  %v5967_v41 = vpop.f32.mrb[110].mxu1 }
 0x32c   : > { %v2409_v3 = vadd.f32 %v8134_v61, %v2370_v6  ;;  %v2371_v38 = vmul.f32 %v8050_v25, %v5967_v41  ;;  %v2247_v11 = vpop.f32.mrb[111].mxu1  ;;  %6007 = vmatpush3.bf16.msra.mxu1 %v2494_v18  ;;  %v2496_v39 = vpack.c.bf16 %v2470_v54, %v2469_v45 }
 0x32d   : > { %v2407_v5 = vadd.f32 %v8134_v61, %v2368_v37  ;;  %v2369_v32 = vmul.f32 %v8042_v24, %v2247_v11  ;;  %v2495_v36 = vpack.c.bf16 %v2468_v27, %v2467_v50 }
 0x32e   : > { %v2441_v51 = vmax.f32 %v2409_v3, 0.0  ;;  %v2410_v58 = vadd.f32 %v8134_v61, %v2371_v38 }
 0x32f   : > { %v2439_v26 = vmax.f32 %v2407_v5, 0.0  ;;  %v2408_v23 = vadd.f32 %v8134_v61, %v2369_v32  ;;  %6008 = vmatprep.subr.bf16.mxu1 %v2495_v36 }
 0x330   : > { %v2442_v29 = vmax.f32 %v2410_v58, 0.0  ;;  %6009 = vmatpush3.bf16.msra.mxu1 %v2495_v36  ;;  %v2473_v52 = vmul.f32 %v8047_v14, %v2441_v51 }
 0x331   : > { %v2440_v6 = vmax.f32 %v2408_v23, 0.0  ;;  %6010 = vmatprep.subr.bf16.mxu1 %v2496_v39  ;;  %v2471_v45 = vmul.f32 %v8039_v53, %v2439_v26 }
 0x332   : > { %v2474_v18 = vmul.f32 %v8050_v25, %v2442_v29 }
 0x333   : > { %v2472_v54 = vmul.f32 %v8042_v24, %v2440_v6 }
 0x334   : > { %6011 = vmatpush3.bf16.msra.mxu1 %v2496_v39  ;;  %v2498_v50 = vpack.c.bf16 %v2474_v18, %v2473_v52 }
 0x335   : > { %v2497_v27 = vpack.c.bf16 %v2472_v54, %v2471_v45 }
 0x337   : > { %6012 = vmatprep.subr.bf16.mxu1 %v2497_v27 }
 0x338   : > { %6013 = vmatpush3.bf16.msra.mxu1 %v2497_v27 }
 0x339   : > { %6014 = vmatprep.subr.bf16.mxu1 %v2498_v50 }
 0x33c   : > { %6015 = vmatpush3.bf16.msra.mxu1 %v2498_v50 }
 0x33f   : > { %6017 = vmatmul.mubr.bf16.vlgmr.msra.gmra.mrb[128].mxu1 %v7735_v8 }
 0x340   : > { %6020 = vmatprep.mubr.bf16.mxu1 %v7742_v13 }
 0x347   : > { %6021 = vmatmul.mubr.bf16.gmra.mrb[132].mxu1 %v7757_v46 }
 0x348   : > { %6024 = vmatprep.mubr.bf16.mxu1 %v7769_v59 }
 0x34f   : > { %6025 = vmatmul.mubr.bf16.gmra.mrb[136].mxu1 %v7779_v2 }
 0x350   : > { %6028 = vmatprep.mubr.bf16.mxu1 %v7782_v4 }
 0x351   : > { %v5986_v37 = vpop.f32.mrb[112].mxu1 }
 0x352   : > { %v2374_v41 = vmul.f32 %v8065_v9, %v5986_v37  ;;  %v2293_v3 = vpop.f32.mrb[113].mxu1 }
 0x353   : > { %v2372_v38 = vmul.f32 %v8055_v48, %v2293_v3  ;;  %v5987_v11 = vpop.f32.mrb[114].mxu1 }
 0x354   : > { %v2413_v39 = vadd.f32 %v8134_v61, %v2374_v41  ;;  %v2375_v8 = vmul.f32 %v8068_v1, %v5987_v11  ;;  %v2296_v13 = vpop.f32.mrb[115].mxu1 }
 0x355   : > { %v2411_v46 = vadd.f32 %v8134_v61, %v2372_v38  ;;  %v2373_v59 = vmul.f32 %v8058_v40, %v2296_v13 }
 0x356   : > { %v2445_v5 = vmax.f32 %v2413_v39, 0.0  ;;  %v2414_v2 = vadd.f32 %v8134_v61, %v2375_v8 }
 0x357   : > { %v2443_v4 = vmax.f32 %v2411_v46, 0.0  ;;  %v2412_v32 = vadd.f32 %v8134_v61, %v2373_v59  ;;  %6029 = vmatmul.mubr.bf16.gmra.mrb[140].mxu1 %v7788_v16 }
 0x358   : > { %v2446_v36 = vmax.f32 %v2414_v2, 0.0  ;;  %6048 = vmatprep.mubr.bf16.mxu1 %v7817_v47  ;;  %v2477_v26 = vmul.f32 %v8065_v9, %v2445_v5 }
 0x359   : > { %v2444_v51 = vmax.f32 %v2412_v32, 0.0  ;;  %v5990_v58 = vpop.f32.mrb[116].mxu1  ;;  %v2475_v52 = vmul.f32 %v8055_v48, %v2443_v4 }
 0x35a   : > { %v2478_v23 = vmul.f32 %v8068_v1, %v2446_v36  ;;  %v2378_v29 = vmul.f32 %v8085_v0, %v5990_v58  ;;  %v2309_v6 = vpop.f32.mrb[117].mxu1 }
 0x35b   : > { %v2476_v18 = vmul.f32 %v8058_v40, %v2444_v51  ;;  %v2376_v45 = vmul.f32 %v8075_v12, %v2309_v6  ;;  %v5991_v54 = vpop.f32.mrb[118].mxu1 }
 0x35c   : > { %v2417_v16 = vadd.f32 %v8134_v61, %v2378_v29  ;;  %v2379_v47 = vmul.f32 %v8088_v55, %v5991_v54  ;;  %v2312_v50 = vpop.f32.mrb[119].mxu1  ;;  %v2500_v27 = vpack.c.bf16 %v2478_v23, %v2477_v26 }
 0x35d   : > { %v2415_v37 = vadd.f32 %v8134_v61, %v2376_v45  ;;  %v2377_v41 = vmul.f32 %v8078_v49, %v2312_v50  ;;  %v2499_v3 = vpack.c.bf16 %v2476_v18, %v2475_v52 }
 0x35e   : > { %v2449_v38 = vmax.f32 %v2417_v16, 0.0  ;;  %v2418_v11 = vadd.f32 %v8134_v61, %v2379_v47 }
 0x35f   : > { %v2447_v39 = vmax.f32 %v2415_v37, 0.0  ;;  %v2416_v8 = vadd.f32 %v8134_v61, %v2377_v41  ;;  %6032 = vmatprep.subr.bf16.mxu1 %v2499_v3 }
 0x360   : > { %v2450_v13 = vmax.f32 %v2418_v11, 0.0  ;;  %6033 = vmatpush3.bf16.msra.mxu1 %v2499_v3  ;;  %v2481_v5 = vmul.f32 %v8085_v0, %v2449_v38 }
 0x361   : > { %v2448_v46 = vmax.f32 %v2416_v8, 0.0  ;;  %v5994_v59 = vpop.f32.mrb[120].mxu1  ;;  %6034 = vmatprep.subr.bf16.mxu1 %v2500_v27  ;;  %v2479_v36 = vmul.f32 %v8075_v12, %v2447_v39 }
 0x362   : > { %v2482_v2 = vmul.f32 %v8088_v55, %v2450_v13  ;;  %v2382_v4 = vmul.f32 %v8103_v34, %v5994_v59  ;;  %v2325_v32 = vpop.f32.mrb[121].mxu1 }
 0x363   : > { %v2480_v51 = vmul.f32 %v8078_v49, %v2448_v46  ;;  %v2380_v58 = vmul.f32 %v8095_v17, %v2325_v32  ;;  %v5995_v26 = vpop.f32.mrb[122].mxu1 }
 0x364   : > { %v2421_v23 = vadd.f32 %v8134_v61, %v2382_v4  ;;  %v2383_v29 = vmul.f32 %v8106_v33, %v5995_v26  ;;  %v2328_v6 = vpop.f32.mrb[123].mxu1  ;;  %6035 = vmatpush3.bf16.msra.mxu1 %v2500_v27  ;;  %v2502_v52 = vpack.c.bf16 %v2482_v2, %v2481_v5 }
 0x365   : > { %v2419_v18 = vadd.f32 %v8134_v61, %v2380_v58  ;;  %v2381_v45 = vmul.f32 %v8098_v63, %v2328_v6  ;;  %v2501_v54 = vpack.c.bf16 %v2480_v51, %v2479_v36 }
 0x366   : > { %v2453_v16 = vmax.f32 %v2421_v23, 0.0  ;;  %v2422_v47 = vadd.f32 %v8134_v61, %v2383_v29 }
 0x367   : > { %v2451_v50 = vmax.f32 %v2419_v18, 0.0  ;;  %v2420_v37 = vadd.f32 %v8134_v61, %v2381_v45  ;;  %6036 = vmatprep.subr.bf16.mxu1 %v2501_v54 }
 0x368   : > { %v2454_v41 = vmax.f32 %v2422_v47, 0.0  ;;  %6037 = vmatpush3.bf16.msra.mxu1 %v2501_v54  ;;  %v2485_v27 = vmul.f32 %v8103_v34, %v2453_v16 }
 0x369   : > { %v2452_v3 = vmax.f32 %v2420_v37, 0.0  ;;  %v5998_v38 = vpop.f32.mrb[124].mxu1  ;;  %6038 = vmatprep.subr.bf16.mxu1 %v2502_v52  ;;  %v2483_v13 = vmul.f32 %v8095_v17, %v2451_v50 }
 0x36a   : > { %v2486_v11 = vmul.f32 %v8106_v33, %v2454_v41  ;;  %v2386_v39 = vmul.f32 %v8119_v28, %v5998_v38  ;;  %v2341_v8 = vpop.f32.mrb[125].mxu1  ;;  %v6370_v38 = vld [vmem:[#allocation8 + $0x8] ss:$24 sps:$4 sm:$0xff]  }
 0x36b   : > { %v2484_v46 = vmul.f32 %v8098_v63, %v2452_v3  ;;  %v2384_v59 = vmul.f32 %v8111_v57, %v2341_v8  ;;  %v5999_v5 = vpop.f32.mrb[126].mxu1  ;;  %v6372_v3 = vld [vmem:[#allocation8 + $0xc] ss:$24 sps:$4 sm:$0xff]  }
 0x36c   : > { %v2425_v2 = vadd.f32 %v8134_v61, %v2386_v39  ;;  %v2387_v4 = vmul.f32 %v8122_v21, %v5999_v5  ;;  %v2344_v32 = vpop.f32.mrb[127].mxu1  ;;  %6039 = vmatpush3.bf16.msra.mxu1 %v2502_v52  ;;  %v2504_v36 = vpack.c.bf16 %v2486_v11, %v2485_v27  ;;  %v11746_v27 = vld [vmem:[#allocation23_spill] sm:$0xff]  ;;  %v7082_v11 = vmov 0   ;;  %v11747_v39 = vld [vmem:[#allocation25_spill] sm:$0xff] }
 0x36d   : > { %v2423_v51 = vadd.f32 %v8134_v61, %v2384_v59  ;;  %v2385_v58 = vmul.f32 %v8114_v10, %v2344_v32  ;;  %v2503_v26 = vpack.c.bf16 %v2484_v46, %v2483_v13  ;;  %2866 = vmatprep.mubr.bf16.mxu0 %v7082_v11  ;;  %v11748_v59 = vld [vmem:[#allocation24_spill] sm:$0xff] }
 0x36e   : > { %v2457_v23 = vmax.f32 %v2425_v2, 0.0  ;;  %v2426_v29 = vadd.f32 %v8134_v61, %v2387_v4  ;;  %v6373_v32 = vld [vmem:[#allocation8 + $0x10] ss:$24 sps:$4 sm:$0xff]  }
 0x36f   : > { %v2455_v6 = vmax.f32 %v2423_v51, 0.0  ;;  %v2424_v18 = vadd.f32 %v8134_v61, %v2385_v58  ;;  %6040 = vmatprep.subr.bf16.mxu1 %v2503_v26  ;;  %v11745_v61 = vld [vmem:[#allocation22_spill] sm:$0xff] }
 0x370   : > { %v2458_v45 = vmax.f32 %v2426_v29, 0.0  ;;  %6041 = vmatpush3.bf16.msra.mxu1 %v2503_v26  ;;  %v2489_v16 = vmul.f32 %v8119_v28, %v2457_v23  ;;  %v11749_v29 = vld [vmem:[#allocation26_spill] sm:$0xff] }
 0x371   : > { %v2456_v54 = vmax.f32 %v2424_v18, 0.0  ;;  %6042 = vmatprep.subr.bf16.mxu1 %v2504_v36  ;;  %v2487_v47 = vmul.f32 %v8111_v57, %v2455_v6 }
 0x372   : > { %v2490_v52 = vmul.f32 %v8122_v21, %v2458_v45 }
 0x373   : > { %v2488_v50 = vmul.f32 %v8114_v10, %v2456_v54 }
 0x374   : > { %6043 = vmatpush3.bf16.msra.mxu1 %v2504_v36  ;;  %v2506_v37 = vpack.c.bf16 %v2490_v52, %v2489_v16 }
 0x375   : > { %v2505_v41 = vpack.c.bf16 %v2488_v50, %v2487_v47 }
 0x377   : > { %6044 = vmatprep.subr.bf16.mxu1 %v2505_v41 }
 0x378   : > { %6045 = vmatpush3.bf16.msra.mxu1 %v2505_v41 }
 0x379   : > { %6046 = vmatprep.subr.bf16.mxu1 %v2506_v37 }
 0x37c   : > { %6047 = vmatpush3.bf16.msra.mxu1 %v2506_v37 }
 0x37d   : > { %3027 = vmatprep.subr.bf16.mxu1 %v6372_v3 }
 0x37f   : > { %6049 = vmatmul.mubr.bf16.vlgmr.msra.gmra.mrb[144].mxu1 %v7823_v62  ;;  %v6375_v62 = vld [vmem:[#allocation8 + $0x14] ss:$24 sps:$4 sm:$0xff]  }
 0x380   : > { %6052 = vmatprep.mubr.bf16.mxu1 %v7829_v20  ;;  %3028 = vmatpush1.bf16.msra.mxu1 %v6370_v38 }
 0x381   : > { %3220 = vmatprep.subr.bf16.mxu0 %v6375_v62 }
 0x387   : > { %6053 = vmatmul.mubr.bf16.gmra.mrb[148].mxu1 %v11738_v22 }
 0x388   : > { %6056 = vmatprep.mubr.bf16.mxu1 %v11739_v15 }
 0x38f   : > { %6057 = vmatmul.mubr.bf16.gmra.mrb[152].mxu1 %v11740_v7 }
 0x390   : > { %6060 = vmatprep.mubr.bf16.mxu1 %v11745_v61 }
 0x397   : > { %6061 = vmatmul.mubr.bf16.gmra.mrb[156].mxu1 %v11746_v27 }
 0x398   : > { %3059 = vmatprep.mubr.bf16.mxu1 %v7082_v11 }
 0x412   : > { %v6018_v20 = vpop.f32.mrb[128].mxu1 }
 0x413   : > { %v2541_v22 = vpop.f32.mrb[129].mxu1  ;;  %v2703_v7 = vmul.f32 %v7999_v42, %v6018_v20 }
 0x414   : > { %v6019_v15 = vpop.f32.mrb[130].mxu1  ;;  %v2701_v46 = vmul.f32 %v7991_v60, %v2541_v22 }
 0x415   : > { %v2704_v8 = vmul.f32 %v11747_v39, %v6019_v15  ;;  %v2544_v13 = vpop.f32.mrb[131].mxu1 }
 0x416   : > { %v2702_v5 = vmul.f32 %v11748_v59, %v2544_v13 }
 0x417   : > { %v8253_v2 = vpack.c.bf16 %v2704_v8, %v2703_v7 }
 0x418   : > { %v8255_v4 = vpack.c.bf16 %v2702_v5, %v2701_v46 }
 0x41a   : > { %v6022_v36 = vpop.f32.mrb[132].mxu1  ;;  %5482 = vmatmul.mubr.msk.bf16.vlgmr.msra.gmra.mrb[96].mxu0 %vm2785_vm0, %v8255_v4  ;;  %5498 = vmatmul.mubr.msk.bf16.vlgmr.msra.gmra.mrb[160].mxu1 %vm2785_vm0, %v8255_v4 }
 0x41b   : > { %v2557_v42 = vpop.f32.mrb[133].mxu1  ;;  %2876 = vmatprep.mubr.bf16.mxu0 %v7082_v11  ;;  %3069 = vmatprep.mubr.bf16.mxu1 %v7082_v11  ;;  %v2707_v51 = vmul.f32 %v8015_v35, %v6022_v36 }
 0x41c   : > { %v6023_v60 = vpop.f32.mrb[134].mxu1  ;;  %3221 = vmatpush1.bf16.msra.mxu0 %v6373_v32  ;;  %v2705_v23 = vmul.f32 %v8007_v30, %v2557_v42 }
 0x41d   : > { %v2708_v58 = vmul.f32 %v8018_v44, %v6023_v60  ;;  %v2560_v26 = vpop.f32.mrb[135].mxu1 }
 0x41e   : > { %v2706_v6 = vmul.f32 %v11749_v29, %v2560_v26 }
 0x41f   : > { %v8267_v18 = vpack.c.bf16 %v2708_v58, %v2707_v51 }
 0x420   : > { %v8269_v45 = vpack.c.bf16 %v2706_v6, %v2705_v23 }
 0x422   : > { %v6026_v54 = vpop.f32.mrb[136].mxu1  ;;  %5483 = vmatmul.mubr.msk.bf16.gmra.mrb[100].mxu0 %vm2785_vm0, %v8253_v2  ;;  %5499 = vmatmul.mubr.msk.bf16.gmra.mrb[164].mxu1 %vm2785_vm0, %v8253_v2 }
 0x423   : > { %v2573_v16 = vpop.f32.mrb[137].mxu1  ;;  %2886 = vmatprep.mubr.bf16.mxu0 %v7082_v11  ;;  %3079 = vmatprep.mubr.bf16.mxu1 %v7082_v11  ;;  %v2711_v30 = vmul.f32 %v8031_v31, %v6026_v54 }
 0x424   : > { %v6027_v35 = vpop.f32.mrb[138].mxu1  ;;  %v2709_v47 = vmul.f32 %v8023_v19, %v2573_v16 }
 0x425   : > { %v2712_v44 = vmul.f32 %v8034_v56, %v6027_v35  ;;  %v2576_v52 = vpop.f32.mrb[139].mxu1 }
 0x426   : > { %v2710_v50 = vmul.f32 %v8026_v43, %v2576_v52 }
 0x427   : > { %v8281_v37 = vpack.c.bf16 %v2712_v44, %v2711_v30 }
 0x428   : > { %v8283_v41 = vpack.c.bf16 %v2710_v50, %v2709_v47 }
 0x42a   : > { %v6030_v61 = vpop.f32.mrb[140].mxu1  ;;  %5484 = vmatmul.mubr.msk.bf16.gmra.mrb[104].mxu0 %vm2785_vm0, %v8269_v45  ;;  %5500 = vmatmul.mubr.msk.bf16.gmra.mrb[168].mxu1 %vm2785_vm0, %v8269_v45 }
 0x42b   : > { %v2589_v3 = vpop.f32.mrb[141].mxu1  ;;  %2896 = vmatprep.mubr.bf16.mxu0 %v7082_v11  ;;  %3089 = vmatprep.mubr.bf16.mxu1 %v7082_v11  ;;  %v2715_v19 = vmul.f32 %v8047_v14, %v6030_v61 }
 0x42c   : > { %v6031_v31 = vpop.f32.mrb[142].mxu1  ;;  %v2713_v38 = vmul.f32 %v8039_v53, %v2589_v3 }
 0x42d   : > { %v2716_v43 = vmul.f32 %v8050_v25, %v6031_v31  ;;  %v2592_v56 = vpop.f32.mrb[143].mxu1 }
 0x42e   : > { %v2714_v27 = vmul.f32 %v8042_v24, %v2592_v56 }
 0x42f   : > { %v8295_v62 = vpack.c.bf16 %v2716_v43, %v2715_v19 }
 0x430   : > { %v8297_v20 = vpack.c.bf16 %v2714_v27, %v2713_v38 }
 0x432   : > { %5485 = vmatmul.mubr.msk.bf16.gmra.mrb[108].mxu0 %vm2785_vm0, %v8267_v18  ;;  %5501 = vmatmul.mubr.msk.bf16.gmra.mrb[172].mxu1 %vm2785_vm0, %v8267_v18 }
 0x433   : > { %2906 = vmatprep.mubr.bf16.mxu0 %v7082_v11  ;;  %3099 = vmatprep.mubr.bf16.mxu1 %v7082_v11 }
 0x43a   : > { %5486 = vmatmul.mubr.msk.bf16.gmra.mrb[112].mxu0 %vm2785_vm0, %v8283_v41  ;;  %5502 = vmatmul.mubr.msk.bf16.gmra.mrb[176].mxu1 %vm2785_vm0, %v8283_v41 }
 0x43b   : > { %2916 = vmatprep.mubr.bf16.mxu0 %v7082_v11  ;;  %3109 = vmatprep.mubr.bf16.mxu1 %v7082_v11 }
 0x442   : > { %5487 = vmatmul.mubr.msk.bf16.gmra.mrb[116].mxu0 %vm2785_vm0, %v8281_v37  ;;  %5503 = vmatmul.mubr.msk.bf16.gmra.mrb[180].mxu1 %vm2785_vm0, %v8281_v37 }
 0x443   : > { %2926 = vmatprep.mubr.bf16.mxu0 %v7082_v11  ;;  %3119 = vmatprep.mubr.bf16.mxu1 %v7082_v11 }
 0x44a   : > { %5488 = vmatmul.mubr.msk.bf16.gmra.mrb[120].mxu0 %vm2785_vm0, %v8297_v20  ;;  %5504 = vmatmul.mubr.msk.bf16.gmra.mrb[184].mxu1 %vm2785_vm0, %v8297_v20 }
 0x44b   : > { %2936 = vmatprep.mubr.bf16.mxu0 %v7082_v11  ;;  %3129 = vmatprep.mubr.bf16.mxu1 %v7082_v11 }
 0x452   : > { %v6050_v53 = vpop.f32.mrb[144].mxu1  ;;  %5489 = vmatmul.mubr.msk.bf16.gmra.mrb[124].mxu0 %vm2785_vm0, %v8295_v62  ;;  %5505 = vmatmul.mubr.msk.bf16.gmra.mrb[188].mxu1 %vm2785_vm0, %v8295_v62 }
 0x453   : > { %v2638_v24 = vpop.f32.mrb[145].mxu1  ;;  %2946 = vmatprep.mubr.bf16.mxu0 %v7082_v11  ;;  %3139 = vmatprep.mubr.bf16.mxu1 %v7082_v11  ;;  %v2719_v25 = vmul.f32 %v8065_v9, %v6050_v53 }
 0x454   : > { %v6051_v14 = vpop.f32.mrb[146].mxu1  ;;  %v2717_v7 = vmul.f32 %v8055_v48, %v2638_v24 }
 0x455   : > { %v2720_v22 = vmul.f32 %v8068_v1, %v6051_v14  ;;  %v2641_v15 = vpop.f32.mrb[147].mxu1 }
 0x456   : > { %v2718_v39 = vmul.f32 %v8058_v40, %v2641_v15 }
 0x457   : > { %v8333_v8 = vpack.c.bf16 %v2720_v22, %v2719_v25 }
 0x458   : > { %v8335_v13 = vpack.c.bf16 %v2718_v39, %v2717_v7 }
 0x45a   : > { %v6054_v46 = vpop.f32.mrb[148].mxu1  ;;  %5490 = vmatmul.mubr.msk.bf16.gmra.mrb[128].mxu0 %vm2785_vm0, %v8335_v13  ;;  %5506 = vmatmul.mubr.msk.bf16.gmra.mrb[192].mxu1 %vm2785_vm0, %v8335_v13 }
 0x45b   : > { %v2654_v59 = vpop.f32.mrb[149].mxu1  ;;  %2956 = vmatprep.mubr.bf16.mxu0 %v7082_v11  ;;  %3149 = vmatprep.mubr.bf16.mxu1 %v7082_v11  ;;  %v2723_v48 = vmul.f32 %v8085_v0, %v6054_v46 }
 0x45c   : > { %v6055_v9 = vpop.f32.mrb[150].mxu1  ;;  %v2721_v5 = vmul.f32 %v8075_v12, %v2654_v59 }
 0x45d   : > { %v2724_v40 = vmul.f32 %v8088_v55, %v6055_v9  ;;  %v2657_v1 = vpop.f32.mrb[151].mxu1 }
 0x45e   : > { %v2722_v32 = vmul.f32 %v8078_v49, %v2657_v1 }
 0x45f   : > { %v8347_v36 = vpack.c.bf16 %v2724_v40, %v2723_v48 }
 0x460   : > { %v8349_v42 = vpack.c.bf16 %v2722_v32, %v2721_v5 }
 0x462   : > { %v6058_v60 = vpop.f32.mrb[152].mxu1  ;;  %5491 = vmatmul.mubr.msk.bf16.gmra.mrb[132].mxu0 %vm2785_vm0, %v8333_v8  ;;  %5507 = vmatmul.mubr.msk.bf16.gmra.mrb[196].mxu1 %vm2785_vm0, %v8333_v8 }
 0x463   : > { %v2670_v51 = vpop.f32.mrb[153].mxu1  ;;  %2966 = vmatprep.mubr.bf16.mxu0 %v7082_v11  ;;  %3159 = vmatprep.mubr.bf16.mxu1 %v7082_v11  ;;  %v2727_v12 = vmul.f32 %v8103_v34, %v6058_v60 }
 0x464   : > { %v6059_v0 = vpop.f32.mrb[154].mxu1  ;;  %v2725_v58 = vmul.f32 %v8095_v17, %v2670_v51 }
 0x465   : > { %v2728_v49 = vmul.f32 %v8106_v33, %v6059_v0  ;;  %v2673_v55 = vpop.f32.mrb[155].mxu1 }
 0x466   : > { %v2726_v26 = vmul.f32 %v8098_v63, %v2673_v55 }
 0x467   : > { %v8361_v23 = vpack.c.bf16 %v2728_v49, %v2727_v12 }
 0x468   : > { %v8363_v29 = vpack.c.bf16 %v2726_v26, %v2725_v58 }
 0x46a   : > { %v6062_v6 = vpop.f32.mrb[156].mxu1  ;;  %5492 = vmatmul.mubr.msk.bf16.gmra.mrb[136].mxu0 %vm2785_vm0, %v8349_v42  ;;  %5508 = vmatmul.mubr.msk.bf16.gmra.mrb[200].mxu1 %vm2785_vm0, %v8349_v42 }
 0x46b   : > { %v2686_v54 = vpop.f32.mrb[157].mxu1  ;;  %2976 = vmatprep.mubr.bf16.mxu0 %v7082_v11  ;;  %3169 = vmatprep.mubr.bf16.mxu1 %v7082_v11  ;;  %v2731_v17 = vmul.f32 %v8119_v28, %v6062_v6 }
 0x46c   : > { %v6063_v34 = vpop.f32.mrb[158].mxu1  ;;  %v2729_v16 = vmul.f32 %v8111_v57, %v2686_v54  ;;  %v11750_v57 = vld [vmem:[#allocation17_spill] sm:$0xff] }
 0x46d   : > { %v2732_v63 = vmul.f32 %v8122_v21, %v6063_v34  ;;  %v2689_v33 = vpop.f32.mrb[159].mxu1  ;;  %v3425_v28 = vsub.s32 2, %v11750_v57  ;;  %v8440_v21 = vld [vmem:[#allocation10] sm:$0x3f] }
 0x46e   : > { %v2730_v35 = vmul.f32 %v8114_v10, %v2689_v33  ;;  %v3417_v10 = vsub.s32 0, %v11750_v57 }
 0x46f   : > { %v8375_v30 = vpack.c.bf16 %v2732_v63, %v2731_v17 }
 0x470   : > { %v8377_v44 = vpack.c.bf16 %v2730_v35, %v2729_v16 }
 0x472   : > { %5493 = vmatmul.mubr.msk.bf16.gmra.mrb[140].mxu0 %vm2785_vm0, %v8347_v36  ;;  %5509 = vmatmul.mubr.msk.bf16.gmra.mrb[204].mxu1 %vm2785_vm0, %v8347_v36 }
 0x473   : > { %2986 = vmatprep.mubr.bf16.mxu0 %v7082_v11  ;;  %3179 = vmatprep.mubr.bf16.mxu1 %v7082_v11 }
 0x47a   : > { %5494 = vmatmul.mubr.msk.bf16.gmra.mrb[144].mxu0 %vm2785_vm0, %v8363_v29  ;;  %5510 = vmatmul.mubr.msk.bf16.gmra.mrb[208].mxu1 %vm2785_vm0, %v8363_v29 }
 0x47b   : > { %2996 = vmatprep.mubr.bf16.mxu0 %v7082_v11  ;;  %3189 = vmatprep.mubr.bf16.mxu1 %v7082_v11 }
 0x482   : > { %5495 = vmatmul.mubr.msk.bf16.gmra.mrb[148].mxu0 %vm2785_vm0, %v8361_v23  ;;  %5511 = vmatmul.mubr.msk.bf16.gmra.mrb[212].mxu1 %vm2785_vm0, %v8361_v23 }
 0x483   : > { %3006 = vmatprep.mubr.bf16.mxu0 %v7082_v11  ;;  %3199 = vmatprep.mubr.bf16.mxu1 %v7082_v11 }
 0x48a   : > { %5496 = vmatmul.mubr.msk.bf16.gmra.mrb[152].mxu0 %vm2785_vm0, %v8377_v44  ;;  %5512 = vmatmul.mubr.msk.bf16.gmra.mrb[216].mxu1 %vm2785_vm0, %v8377_v44 }
 0x48b   : > { %3016 = vmatprep.mubr.bf16.mxu0 %v7082_v11  ;;  %3209 = vmatprep.mubr.bf16.mxu1 %v7082_v11 }
 0x492   : > { %5497 = vmatmul.mubr.msk.bf16.gmra.mrb[156].mxu0 %vm2785_vm0, %v8375_v30  ;;  %5513 = vmatmul.mubr.msk.bf16.gmra.mrb[220].mxu1 %vm2785_vm0, %v8375_v30 }
 0x493   : > { %3252 = vmatprep.mubr.bf16.mxu0 %v7082_v11 }
 0x49a   : > { %5514 = vmatmul.mubr.msk.bf16.vlgmr.msra.gmra.mrb[160].mxu0 %vm2785_vm0, %v8255_v4  ;;  %v3429_v4 = vsub.s32 3, %v11750_v57 }
 0x49b   : > { %3262 = vmatprep.mubr.bf16.mxu0 %v7082_v11 }
 0x49c   : > { %v8457_v47 = vrot.slane %v8440_v21, %v3429_v4 }
 0x49e   : > { %11753 = vst [vmem:[#allocation21_spill] sm:$0xff] %v8457_v47 }
 0x4a2   : > { %5515 = vmatmul.mubr.msk.bf16.gmra.mrb[164].mxu0 %vm2785_vm0, %v8253_v2  ;;  %v3421_v2 = vsub.s32 1, %v11750_v57 }
 0x4a3   : > { %3272 = vmatprep.mubr.bf16.mxu0 %v7082_v11 }
 0x4a4   : > { %v8454_v52 = vrot.slane %v8440_v21, %v3421_v2 }
 0x4a6   : > { %11752 = vst [vmem:[#allocation20_spill] sm:$0xff] %v8454_v52 }
 0x4aa   : > { %5516 = vmatmul.mubr.msk.bf16.gmra.mrb[168].mxu0 %vm2785_vm0, %v8269_v45  ;;  %v8451_v45 = vrot.slane %v8440_v21, %v3425_v28 }
 0x4ab   : > { %3282 = vmatprep.mubr.bf16.mxu0 %v7082_v11 }
 0x4ac   : > { %11751 = vst [vmem:[#allocation19_spill] sm:$0xff] %v8451_v45 }
 0x4b2   : > { %5517 = vmatmul.mubr.msk.bf16.gmra.mrb[172].mxu0 %vm2785_vm0, %v8267_v18  ;;  %v8448_v18 = vrot.slane %v8440_v21, %v3417_v10 }
 0x4b3   : > { %3292 = vmatprep.mubr.bf16.mxu0 %v7082_v11 }
 0x4ba   : > { %5518 = vmatmul.mubr.msk.bf16.gmra.mrb[176].mxu0 %vm2785_vm0, %v8283_v41 }
 0x4bb   : > { %3302 = vmatprep.mubr.bf16.mxu0 %v7082_v11 }
 0x4c2   : > { %5519 = vmatmul.mubr.msk.bf16.gmra.mrb[180].mxu0 %vm2785_vm0, %v8281_v37 }
 0x4c3   : > { %3312 = vmatprep.mubr.bf16.mxu0 %v7082_v11 }
 0x4ca   : > { %5520 = vmatmul.mubr.msk.bf16.gmra.mrb[184].mxu0 %vm2785_vm0, %v8297_v20 }
 0x4cb   : > { %3322 = vmatprep.mubr.bf16.mxu0 %v7082_v11 }
 0x4d2   : > { %5521 = vmatmul.mubr.msk.bf16.gmra.mrb[188].mxu0 %vm2785_vm0, %v8295_v62 }
 0x4d3   : > { %3332 = vmatprep.mubr.bf16.mxu0 %v7082_v11 }
 0x4da   : > { %5522 = vmatmul.mubr.msk.bf16.gmra.mrb[192].mxu0 %vm2785_vm0, %v8335_v13 }
 0x4db   : > { %3342 = vmatprep.mubr.bf16.mxu0 %v7082_v11 }
 0x4e2   : > { %5523 = vmatmul.mubr.msk.bf16.gmra.mrb[196].mxu0 %vm2785_vm0, %v8333_v8 }
 0x4e3   : > { %3352 = vmatprep.mubr.bf16.mxu0 %v7082_v11 }
 0x4ea   : > { %5524 = vmatmul.mubr.msk.bf16.gmra.mrb[200].mxu0 %vm2785_vm0, %v8349_v42 }
 0x4eb   : > { %3362 = vmatprep.mubr.bf16.mxu0 %v7082_v11 }
 0x4ed   : > { %v2868_v50 = vpop.f32.mrb[96].mxu0  ;;  %v3061_v37 = vpop.f32.mrb[160].mxu1 }
 0x4ee   : > { %v2870_v41 = vpop.f32.mrb[97].mxu0  ;;  %v3063_v61 = vpop.f32.mrb[161].mxu1  ;;  %v8460_v19 = vadd.f32 %v8448_v18, %v2868_v50  ;;  %v8463_v43 = vadd.f32 %v8451_v45, %v3061_v37 }
 0x4ef   : > { %v2872_v3 = vpop.f32.mrb[98].mxu0  ;;  %v3065_v31 = vpop.f32.mrb[162].mxu1  ;;  %v8472_v20 = vadd.f32 %v8454_v52, %v2870_v41  ;;  %v8475_v53 = vadd.f32 %v8457_v47, %v3063_v61 }
 0x4f0   : > { %v8466_v56 = vadd.f32 %v8448_v18, %v2872_v3  ;;  %v8469_v38 = vadd.f32 %v8451_v45, %v3065_v31  ;;  %v2874_v27 = vpop.f32.mrb[99].mxu0  ;;  %v3067_v62 = vpop.f32.mrb[163].mxu1 }
 0x4f1   : > { %11754 = vst [vmem:[#allocation18_spill] sm:$0xff] %v8472_v20  ;;  %11755 = vst [vmem:[#allocation22_spill] sm:$0xff] %v8475_v53  ;;  %v8478_v24 = vadd.f32 %v8454_v52, %v2874_v27  ;;  %v8481_v14 = vadd.f32 %v8457_v47, %v3067_v62 }
 0x4f2   : > { %v3637_v25 = vmax.f32 %v8460_v19, %v8466_v56  ;;  %v3679_v22 = vmax.f32 %v8463_v43, %v8469_v38  ;;  %5525 = vmatmul.mubr.msk.bf16.gmra.mrb[204].mxu0 %vm2785_vm0, %v8347_v36 }
 0x4f3   : > { %11756 = vst [vmem:[#allocation23_spill] sm:$0xff] %v8478_v24  ;;  %11757 = vst [vmem:[#allocation25_spill] sm:$0xff] %v8481_v14  ;;  %v3658_v15 = vmax.f32 %v8472_v20, %v8478_v24  ;;  %v3700_v7 = vmax.f32 %v8475_v53, %v8481_v14  ;;  %3372 = vmatprep.mubr.bf16.mxu0 %v7082_v11 }
 0x4f5   : > { %v2878_v39 = vpop.f32.mrb[100].mxu0  ;;  %v3071_v8 = vpop.f32.mrb[164].mxu1 }
 0x4f6   : > { %v8495_v13 = vadd.f32 %v8448_v18, %v2878_v39  ;;  %v8498_v46 = vadd.f32 %v8451_v45, %v3071_v8  ;;  %v2880_v59 = vpop.f32.mrb[101].mxu0  ;;  %v3073_v9 = vpop.f32.mrb[165].mxu1 }
 0x4f7   : > { %v8501_v48 = vadd.f32 %v8454_v52, %v2880_v59  ;;  %v8504_v40 = vadd.f32 %v8457_v47, %v3073_v9  ;;  %v2882_v1 = vpop.f32.mrb[102].mxu0  ;;  %v3075_v5 = vpop.f32.mrb[166].mxu1 }
 0x4f8   : > { %v3638_v32 = vmax.f32 %v3637_v25, %v8495_v13  ;;  %v3680_v36 = vmax.f32 %v3679_v22, %v8498_v46  ;;  %v8509_v42 = vadd.f32 %v8448_v18, %v2882_v1  ;;  %v8512_v60 = vadd.f32 %v8451_v45, %v3075_v5  ;;  %v2884_v51 = vpop.f32.mrb[103].mxu0  ;;  %v3077_v0 = vpop.f32.mrb[167].mxu1 }
 0x4f9   : > { %11758 = vst [vmem:[#allocation24_spill] sm:$0xff] %v8501_v48  ;;  %11759 = vst [vmem:[#allocation26_spill] sm:$0xff] %v8504_v40  ;;  %v3659_v12 = vmax.f32 %v3658_v15, %v8501_v48  ;;  %v3701_v49 = vmax.f32 %v3700_v7, %v8504_v40  ;;  %v8517_v55 = vadd.f32 %v8454_v52, %v2884_v51 }
 0x4fa   : > { %v8520_v58 = vadd.f32 %v8457_v47, %v3077_v0  ;;  %v3639_v26 = vmax.f32 %v3638_v32, %v8509_v42  ;;  %v3681_v6 = vmax.f32 %v3680_v36, %v8512_v60  ;;  %5526 = vmatmul.mubr.msk.bf16.gmra.mrb[208].mxu0 %vm2785_vm0, %v8363_v29 }
 0x4fb   : > { %11760 = vst [vmem:[#allocation17_spill] sm:$0xff] %v8517_v55  ;;  %v3660_v54 = vmax.f32 %v3659_v12, %v8517_v55  ;;  %3382 = vmatprep.mubr.bf16.mxu0 %v7082_v11 }
 0x4fc   : > { %11761 = vst [vmem:[#allocation27_spill] sm:$0xff] %v8520_v58  ;;  %v3702_v34 = vmax.f32 %v3701_v49, %v8520_v58 }
 0x4fd   : > { %v2888_v17 = vpop.f32.mrb[104].mxu0  ;;  %v3081_v63 = vpop.f32.mrb[168].mxu1 }
 0x4fe   : > { %v8530_v33 = vadd.f32 %v8448_v18, %v2888_v17  ;;  %v8533_v16 = vadd.f32 %v8451_v45, %v3081_v63  ;;  %v2890_v35 = vpop.f32.mrb[105].mxu0  ;;  %v3083_v10 = vpop.f32.mrb[169].mxu1 }
 0x4ff   : > { %v8536_v28 = vadd.f32 %v8454_v52, %v2890_v35  ;;  %v8539_v29 = vadd.f32 %v8457_v47, %v3083_v10  ;;  %v2892_v2 = vpop.f32.mrb[106].mxu0  ;;  %v3085_v4 = vpop.f32.mrb[170].mxu1 }
 0x500   : > { %v3640_v50 = vmax.f32 %v3639_v26, %v8530_v33  ;;  %v3682_v37 = vmax.f32 %v3681_v6, %v8533_v16  ;;  %v8544_v41 = vadd.f32 %v8448_v18, %v2892_v2  ;;  %v8547_v61 = vadd.f32 %v8451_v45, %v3085_v4  ;;  %v2894_v3 = vpop.f32.mrb[107].mxu0  ;;  %v3087_v31 = vpop.f32.mrb[171].mxu1 }
 0x501   : > { %11762 = vst [vmem:[#allocation28_spill] sm:$0xff] %v8536_v28  ;;  %11763 = vst [vmem:[#allocation29_spill] sm:$0xff] %v8539_v29  ;;  %v3661_v27 = vmax.f32 %v3660_v54, %v8536_v28  ;;  %v3703_v62 = vmax.f32 %v3702_v34, %v8539_v29  ;;  %v8552_v25 = vadd.f32 %v8454_v52, %v2894_v3 }
 0x502   : > { %v8555_v22 = vadd.f32 %v8457_v47, %v3087_v31  ;;  %v3641_v15 = vmax.f32 %v3640_v50, %v8544_v41  ;;  %v3683_v7 = vmax.f32 %v3682_v37, %v8547_v61  ;;  %5527 = vmatmul.mubr.msk.bf16.gmra.mrb[212].mxu0 %vm2785_vm0, %v8361_v23 }
 0x503   : > { %11764 = vst [vmem:[#allocation30_spill] sm:$0xff] %v8552_v25  ;;  %v3662_v39 = vmax.f32 %v3661_v27, %v8552_v25  ;;  %3392 = vmatprep.mubr.bf16.mxu0 %v7082_v11 }
 0x504   : > { %11765 = vst [vmem:[#allocation31_spill] sm:$0xff] %v8555_v22  ;;  %v3704_v8 = vmax.f32 %v3703_v62, %v8555_v22 }
 0x505   : > { %v2898_v59 = vpop.f32.mrb[108].mxu0  ;;  %v3091_v9 = vpop.f32.mrb[172].mxu1 }
 0x506   : > { %v8565_v1 = vadd.f32 %v8448_v18, %v2898_v59  ;;  %v8568_v5 = vadd.f32 %v8451_v45, %v3091_v9  ;;  %v2900_v32 = vpop.f32.mrb[109].mxu0  ;;  %v3093_v36 = vpop.f32.mrb[173].mxu1 }
 0x507   : > { %v8571_v51 = vadd.f32 %v8454_v52, %v2900_v32  ;;  %v8574_v23 = vadd.f32 %v8457_v47, %v3093_v36  ;;  %v2902_v0 = vpop.f32.mrb[110].mxu0  ;;  %v3095_v12 = vpop.f32.mrb[174].mxu1 }
 0x508   : > { %v3642_v49 = vmax.f32 %v3641_v15, %v8565_v1  ;;  %v3684_v26 = vmax.f32 %v3683_v7, %v8568_v5  ;;  %v8579_v6 = vadd.f32 %v8448_v18, %v2902_v0  ;;  %v8582_v54 = vadd.f32 %v8451_v45, %v3095_v12  ;;  %v2904_v34 = vpop.f32.mrb[111].mxu0  ;;  %v3097_v17 = vpop.f32.mrb[175].mxu1 }
 0x509   : > { %11766 = vst [vmem:[#allocation32_spill] sm:$0xff] %v8571_v51  ;;  %11767 = vst [vmem:[#allocation33_spill] sm:$0xff] %v8574_v23  ;;  %v3663_v63 = vmax.f32 %v3662_v39, %v8571_v51  ;;  %v3705_v35 = vmax.f32 %v3704_v8, %v8574_v23  ;;  %v8587_v10 = vadd.f32 %v8454_v52, %v2904_v34 }
 0x50a   : > { %v8590_v2 = vadd.f32 %v8457_v47, %v3097_v17  ;;  %v3643_v4 = vmax.f32 %v3642_v49, %v8579_v6  ;;  %v3685_v50 = vmax.f32 %v3684_v26, %v8582_v54  ;;  %5528 = vmatmul.mubr.msk.bf16.gmra.mrb[216].mxu0 %vm2785_vm0, %v8377_v44 }
 0x50b   : > { %11768 = vst [vmem:[#allocation34_spill] sm:$0xff] %v8587_v10  ;;  %v3664_v37 = vmax.f32 %v3663_v63, %v8587_v10  ;;  %3402 = vmatprep.mubr.bf16.mxu0 %v7082_v11 }
 0x50c   : > { %11769 = vst [vmem:[#allocation35_spill] sm:$0xff] %v8590_v2  ;;  %v3706_v3 = vmax.f32 %v3705_v35, %v8590_v2 }
 0x50d   : > { %v2908_v31 = vpop.f32.mrb[112].mxu0  ;;  %v3101_v27 = vpop.f32.mrb[176].mxu1 }
 0x50e   : > { %v8600_v62 = vadd.f32 %v8448_v18, %v2908_v31  ;;  %v8603_v15 = vadd.f32 %v8451_v45, %v3101_v27  ;;  %v2910_v7 = vpop.f32.mrb[113].mxu0  ;;  %v3103_v39 = vpop.f32.mrb[177].mxu1 }
 0x50f   : > { %v8606_v8 = vadd.f32 %v8454_v52, %v2910_v7  ;;  %v8609_v44 = vadd.f32 %v8457_v47, %v3103_v39  ;;  %v2912_v59 = vpop.f32.mrb[114].mxu0  ;;  %v3105_v9 = vpop.f32.mrb[178].mxu1 }
 0x510   : > { %v3644_v11 = vmax.f32 %v3643_v4, %v8600_v62  ;;  %v3686_v32 = vmax.f32 %v3685_v50, %v8603_v15  ;;  %v8614_v36 = vadd.f32 %v8448_v18, %v2912_v59  ;;  %v8617_v0 = vadd.f32 %v8451_v45, %v3105_v9  ;;  %v2914_v12 = vpop.f32.mrb[115].mxu0  ;;  %v3107_v49 = vpop.f32.mrb[179].mxu1 }
 0x511   : > { %11770 = vst [vmem:[#allocation36_spill] sm:$0xff] %v8606_v8  ;;  %11771 = vst [vmem:[#allocation37_spill] sm:$0xff] %v8609_v44  ;;  %v3665_v26 = vmax.f32 %v3664_v37, %v8606_v8  ;;  %v3707_v34 = vmax.f32 %v3706_v3, %v8609_v44  ;;  %v8622_v17 = vadd.f32 %v8454_v52, %v2914_v12 }
 0x512   : > { %v8625_v63 = vadd.f32 %v8457_v47, %v3107_v49  ;;  %v3645_v35 = vmax.f32 %v3644_v11, %v8614_v36  ;;  %v3687_v4 = vmax.f32 %v3686_v32, %v8617_v0  ;;  %5529 = vmatmul.mubr.msk.bf16.gmra.mrb[220].mxu0 %vm2785_vm0, %v8375_v30 }
 0x513   : > { %11772 = vst [vmem:[#allocation38_spill] sm:$0xff] %v8622_v17  ;;  %v3666_v50 = vmax.f32 %v3665_v26, %v8622_v17 }
 0x514   : > { %11773 = vst [vmem:[#allocation39_spill] sm:$0xff] %v8625_v63  ;;  %v3708_v31 = vmax.f32 %v3707_v34, %v8625_v63 }
 0x515   : > { %v2918_v37 = vpop.f32.mrb[116].mxu0  ;;  %v3111_v27 = vpop.f32.mrb[180].mxu1 }
 0x516   : > { %v8634_v3 = vadd.f32 %v8448_v18, %v2918_v37  ;;  %v8637_v7 = vadd.f32 %v8451_v45, %v3111_v27  ;;  %v2920_v39 = vpop.f32.mrb[117].mxu0  ;;  %v3113_v59 = vpop.f32.mrb[181].mxu1 }
 0x517   : > { %v8640_v9 = vadd.f32 %v8454_v52, %v2920_v39  ;;  %v8643_v11 = vadd.f32 %v8457_v47, %v3113_v59  ;;  %v2922_v30 = vpop.f32.mrb[118].mxu0  ;;  %v3115_v32 = vpop.f32.mrb[182].mxu1 }
 0x518   : > { %v3646_v12 = vmax.f32 %v3645_v35, %v8634_v3  ;;  %v3688_v49 = vmax.f32 %v3687_v4, %v8637_v7  ;;  %v8648_v26 = vadd.f32 %v8448_v18, %v2922_v30  ;;  %v8651_v34 = vadd.f32 %v8451_v45, %v3115_v32  ;;  %v2924_v37 = vpop.f32.mrb[119].mxu0  ;;  %v3117_v27 = vpop.f32.mrb[183].mxu1 }
 0x519   : > { %11774 = vst [vmem:[#allocation40_spill] sm:$0xff] %v8640_v9  ;;  %11775 = vst [vmem:[#allocation41_spill] sm:$0xff] %v8643_v11  ;;  %v3667_v39 = vmax.f32 %v3666_v50, %v8640_v9  ;;  %v3709_v63 = vmax.f32 %v3708_v31, %v8643_v11  ;;  %v8656_v59 = vadd.f32 %v8454_v52, %v2924_v37 }
 0x51a   : > { %v8659_v44 = vadd.f32 %v8457_v47, %v3117_v27  ;;  %v3647_v35 = vmax.f32 %v3646_v12, %v8648_v26  ;;  %v3689_v4 = vmax.f32 %v3688_v49, %v8651_v34 }
 0x51b   : > { %11776 = vst [vmem:[#allocation42_spill] sm:$0xff] %v8656_v59  ;;  %v3668_v30 = vmax.f32 %v3667_v39, %v8656_v59 }
 0x51c   : > { %11777 = vst [vmem:[#allocation43_spill] sm:$0xff] %v8659_v44  ;;  %v3710_v32 = vmax.f32 %v3709_v63, %v8659_v44 }
 0x51d   : > { %v2928_v2 = vpop.f32.mrb[120].mxu0  ;;  %v3121_v23 = vpop.f32.mrb[184].mxu1 }
 0x51e   : > { %v8666_v50 = vadd.f32 %v8448_v18, %v2928_v2  ;;  %v8669_v31 = vadd.f32 %v8451_v45, %v3121_v23  ;;  %v2930_v37 = vpop.f32.mrb[121].mxu0  ;;  %v3123_v11 = vpop.f32.mrb[185].mxu1 }
 0x51f   : > { %v8672_v27 = vadd.f32 %v8454_v52, %v2930_v37  ;;  %v8675_v12 = vadd.f32 %v8457_v47, %v3123_v11  ;;  %v2932_v49 = vpop.f32.mrb[122].mxu0  ;;  %v3125_v39 = vpop.f32.mrb[186].mxu1 }
 0x520   : > { %v3648_v63 = vmax.f32 %v3647_v35, %v8666_v50  ;;  %v3690_v44 = vmax.f32 %v3689_v4, %v8669_v31  ;;  %v8680_v2 = vadd.f32 %v8448_v18, %v2932_v49  ;;  %v8683_v23 = vadd.f32 %v8451_v45, %v3125_v39  ;;  %v2934_v22 = vpop.f32.mrb[123].mxu0  ;;  %v3127_v29 = vpop.f32.mrb[187].mxu1 }
 0x521   : > { %11778 = vst [vmem:[#allocation44_spill] sm:$0xff] %v8672_v27  ;;  %11779 = vst [vmem:[#allocation45_spill] sm:$0xff] %v8675_v12  ;;  %v3669_v37 = vmax.f32 %v3668_v30, %v8672_v27  ;;  %v3711_v58 = vmax.f32 %v3710_v32, %v8675_v12  ;;  %v8688_v11 = vadd.f32 %v8454_v52, %v2934_v22 }
 0x522   : > { %v8691_v40 = vadd.f32 %v8457_v47, %v3127_v29  ;;  %v3649_v35 = vmax.f32 %v3648_v63, %v8680_v2  ;;  %v3691_v4 = vmax.f32 %v3690_v44, %v8683_v23 }
 0x523   : > { %11780 = vst [vmem:[#allocation46_spill] sm:$0xff] %v8688_v11  ;;  %v3670_v49 = vmax.f32 %v3669_v37, %v8688_v11 }
 0x524   : > { %11781 = vst [vmem:[#allocation47_spill] sm:$0xff] %v8691_v40  ;;  %v3712_v39 = vmax.f32 %v3711_v58, %v8691_v40 }
 0x525   : > { %v2938_v14 = vpop.f32.mrb[124].mxu0  ;;  %v3131_v53 = vpop.f32.mrb[188].mxu1 }
 0x526   : > { %v8698_v30 = vadd.f32 %v8448_v18, %v2938_v14  ;;  %v8701_v32 = vadd.f32 %v8451_v45, %v3131_v53  ;;  %v2940_v22 = vpop.f32.mrb[125].mxu0  ;;  %v3133_v12 = vpop.f32.mrb[189].mxu1 }
 0x527   : > { %v8704_v29 = vadd.f32 %v8454_v52, %v2940_v22  ;;  %v8707_v63 = vadd.f32 %v8457_v47, %v3133_v12  ;;  %v2942_v44 = vpop.f32.mrb[126].mxu0  ;;  %v3135_v37 = vpop.f32.mrb[190].mxu1 }
 0x528   : > { %11782 = vst [vmem:[#allocation48_spill] sm:$0xff] %v8701_v32  ;;  %v3650_v58 = vmax.f32 %v3649_v35, %v8698_v30  ;;  %v3692_v40 = vmax.f32 %v3691_v4, %v8701_v32  ;;  %v8712_v14 = vadd.f32 %v8448_v18, %v2942_v44  ;;  %v8715_v53 = vadd.f32 %v8451_v45, %v3135_v37  ;;  %v2944_v11 = vpop.f32.mrb[127].mxu0  ;;  %v3137_v27 = vpop.f32.mrb[191].mxu1 }
 0x529   : > { %11783 = vst [vmem:[#allocation49_spill] sm:$0xff] %v8704_v29  ;;  %11784 = vst [vmem:[#allocation50_spill] sm:$0xff] %v8707_v63  ;;  %v3671_v22 = vmax.f32 %v3670_v49, %v8704_v29  ;;  %v3713_v59 = vmax.f32 %v3712_v39, %v8707_v63  ;;  %v8720_v12 = vadd.f32 %v8454_v52, %v2944_v11  ;;  %v3433_v49 = vsub.s32 4, %v11750_v57 }
 0x52a   : > { %11785 = vst [vmem:[#allocation51_spill] sm:$0xff] %v8715_v53  ;;  %v8723_v9 = vadd.f32 %v8457_v47, %v3137_v27  ;;  %v3651_v35 = vmax.f32 %v3650_v58, %v8712_v14  ;;  %v3693_v4 = vmax.f32 %v3692_v40, %v8715_v53  ;;  %v3437_v39 = vsub.s32 5, %v11750_v57 }
 0x52b   : > { %11786 = vst [vmem:[#allocation52_spill] sm:$0xff] %v8720_v12  ;;  %v3672_v44 = vmax.f32 %v3671_v22, %v8720_v12 }
 0x52c   : > { %11787 = vst [vmem:[#allocation53_spill] sm:$0xff] %v8723_v9  ;;  %v3714_v37 = vmax.f32 %v3713_v59, %v8723_v9  ;;  %v3652_v17 = vrot.slane %v3651_v35, 4  ;;  %v3694_v8 = vrot.slane %v3693_v4, 4 }
 0x52d   : > { %v3673_v63 = vrot.slane %v3672_v44, 4  ;;  %v2948_v29 = vpop.f32.mrb[128].mxu0  ;;  %v3141_v10 = vpop.f32.mrb[192].mxu1 }
 0x52e   : > { %v3715_v11 = vrot.slane %v3714_v37, 4  ;;  %v3653_v27 = vmax.f32 %v3651_v35, %v3652_v17  ;;  %v3695_v51 = vmax.f32 %v3693_v4, %v3694_v8  ;;  %v8732_v58 = vadd.f32 %v8448_v18, %v2948_v29  ;;  %v2950_v22 = vpop.f32.mrb[129].mxu0  ;;  %v3143_v59 = vpop.f32.mrb[193].mxu1 }
 0x52f   : > { %v8735_v40 = vadd.f32 %v8451_v45, %v3141_v10  ;;  %v3674_v9 = vmax.f32 %v3672_v44, %v3673_v63  ;;  %v8738_v25 = vadd.f32 %v8454_v52, %v2950_v22  ;;  %v8741_v57 = vadd.f32 %v8457_v47, %v3143_v59  ;;  %v2952_v28 = vpop.f32.mrb[130].mxu0  ;;  %v3145_v55 = vpop.f32.mrb[194].mxu1 }
 0x530   : > { %11788 = vst [vmem:[#allocation54_spill] sm:$0xff] %v8732_v58  ;;  %v3716_v12 = vmax.f32 %v3714_v37, %v3715_v11  ;;  %v3654_v17 = vrot.slane %v3653_v27, 2  ;;  %v3696_v8 = vrot.slane %v3695_v51, 2  ;;  %v8744_v29 = vadd.f32 %v8448_v18, %v2952_v28  ;;  %v2954_v35 = vpop.f32.mrb[131].mxu0  ;;  %v3147_v4 = vpop.f32.mrb[195].mxu1 }
 0x531   : > { %11789 = vst [vmem:[#allocation55_spill] sm:$0xff] %v8735_v40  ;;  %11790 = vst [vmem:[#allocation56_spill] sm:$0xff] %v8738_v25  ;;  %v8747_v10 = vadd.f32 %v8451_v45, %v3145_v55  ;;  %v3675_v63 = vrot.slane %v3674_v9, 2  ;;  %v8750_v37 = vadd.f32 %v8454_v52, %v2954_v35  ;;  %v8753_v11 = vadd.f32 %v8457_v47, %v3147_v4 }
 0x532   : > { %11791 = vst [vmem:[#allocation57_spill] sm:$0xff] %v8741_v57  ;;  %11792 = vst [vmem:[#allocation58_spill] sm:$0xff] %v8744_v29  ;;  %v3717_v44 = vrot.slane %v3716_v12, 2  ;;  %v3655_v22 = vmax.f32 %v3653_v27, %v3654_v17  ;;  %v3697_v59 = vmax.f32 %v3695_v51, %v3696_v8  ;;  %v8764_v4 = vrot.slane %v8440_v21, %v3433_v49 }
 0x533   : > { %11793 = vst [vmem:[#allocation59_spill] sm:$0xff] %v8747_v10  ;;  %11794 = vst [vmem:[#allocation60_spill] sm:$0xff] %v8750_v37  ;;  %v3676_v55 = vmax.f32 %v3674_v9, %v3675_v63  ;;  %v8767_v51 = vrot.slane %v8440_v21, %v3437_v39 }
 0x534   : > { %11795 = vst [vmem:[#allocation61_spill] sm:$0xff] %v8753_v11  ;;  %v3718_v24 = vmax.f32 %v3716_v12, %v3717_v44  ;;  %v3656_v53 = vrot.slane %v3655_v22, 1  ;;  %v3698_v32 = vrot.slane %v3697_v59, 1  ;;  %11796 = vst [vmem:[#allocation62_spill] sm:$0xff] %v8764_v4 }
 0x535   : > { %11797 = vst [vmem:[#allocation63_spill] sm:$0xff] %v8767_v51  ;;  %v3677_v27 = vrot.slane %v3676_v55, 1  ;;  %v2958_v8 = vpop.f32.mrb[132].mxu0  ;;  %v3151_v28 = vpop.f32.mrb[196].mxu1 }
 0x536   : > { %v3719_v17 = vrot.slane %v3718_v24, 1  ;;  %v3657_v9 = vmax.f32 %v3655_v22, %v3656_v53  ;;  %v8769_v12 = vmax.f32 %v3697_v59, %v3698_v32  ;;  %v8772_v63 = vadd.f32 %v8448_v18, %v2958_v8  ;;  %v2960_v35 = vpop.f32.mrb[133].mxu0  ;;  %v3153_v20 = vpop.f32.mrb[197].mxu1 }
 0x537   : > { %v8775_v44 = vadd.f32 %v8451_v45, %v3151_v28  ;;  %v8777_v49 = vmax.f32 %v3676_v55, %v3677_v27  ;;  %v8782_v21 = vadd.f32 %v8454_v52, %v2960_v35  ;;  %v8785_v39 = vadd.f32 %v8457_v47, %v3153_v20  ;;  %v8787_v32 = vpop.f32.mrb[134].mxu0  ;;  %v8789_v53 = vpop.f32.mrb[198].mxu1 }
 0x538   : > { %11798 = vst [vmem:[#allocation64_spill] sm:$0xff] %v8772_v63  ;;  %v8779_v48 = vmax.f32 %v3718_v24, %v3719_v17  ;;  %v8792_v22 = vsub.f32 %v8460_v19, %v3657_v9  ;;  %v8795_v59 = vsub.f32 %v8466_v56, %v3657_v9  ;;  %v8798_v28 = vsub.f32 %v8495_v13, %v3657_v9  ;;  %v8803_v55 = vpop.f32.mrb[135].mxu0  ;;  %v8805_v20 = vpop.f32.mrb[199].mxu1 }
 0x539   : > { %11799 = vst [vmem:[#allocation65_spill] sm:$0xff] %v8775_v44  ;;  %11800 = vst [vmem:[#allocation66_spill] sm:$0xff] %v8782_v21  ;;  %v8801_v24 = vsub.f32 %v8509_v42, %v3657_v9  ;;  %v8808_v35 = vsub.f32 %v8530_v33, %v3657_v9  ;;  %v8811_v27 = vsub.f32 %v8544_v41, %v3657_v9 }
 0x53a   : > { %11801 = vst [vmem:[#allocation67_spill] sm:$0xff] %v8785_v39  ;;  %11802 = vst [vmem:[#allocation68_spill] sm:$0xff] %v8792_v22  ;;  %v8814_v19 = vsub.f32 %v8565_v1, %v3657_v9  ;;  %v8817_v56 = vsub.f32 %v8579_v6, %v3657_v9  ;;  %v8820_v13 = vsub.f32 %v8600_v62, %v3657_v9  ;;  %v4105_v8 = vmul.f32 1.442695, %v8798_v28 }
 0x53b   : > { %11803 = vst [vmem:[#allocation69_spill] sm:$0xff] %v8795_v59  ;;  %11804 = vst [vmem:[#allocation70_spill] sm:$0xff] %v8798_v28  ;;  %v8823_v42 = vsub.f32 %v8614_v36, %v3657_v9  ;;  %v8826_v17 = vsub.f32 %v8634_v3, %v3657_v9  ;;  %v8829_v33 = vsub.f32 %v8648_v26, %v3657_v9  ;;  %v4081_v36 = vmul.f32 1.442695, %v8792_v22 }
 0x53c   : > { %11805 = vst [vmem:[#allocation71_spill] sm:$0xff] %v8801_v24  ;;  %11806 = vst [vmem:[#allocation72_spill] sm:$0xff] %v8803_v55  ;;  %v8832_v41 = vsub.f32 %v8666_v50, %v3657_v9  ;;  %v8835_v1 = vsub.f32 %v8680_v2, %v3657_v9  ;;  %v8838_v6 = vsub.f32 %v8698_v30, %v3657_v9  ;;  %v4093_v3 = vmul.f32 1.442695, %v8795_v59 }
 0x53d   : > { %11807 = vst [vmem:[#allocation73_spill] sm:$0xff] %v8805_v20  ;;  %11808 = vst [vmem:[#allocation74_spill] sm:$0xff] %v8808_v35  ;;  %v8841_v62 = vsub.f32 %v8712_v14, %v3657_v9  ;;  %v8848_v26 = vsub.f32 %v8463_v43, %v8769_v12  ;;  %v4117_v50 = vmul.f32 1.442695, %v8801_v24  ;;  %v4129_v2 = vmul.f32 1.442695, %v8808_v35 }
 0x53e   : > { %11809 = vst [vmem:[#allocation75_spill] sm:$0xff] %v8811_v27  ;;  %11810 = vst [vmem:[#allocation76_spill] sm:$0xff] %v8814_v19  ;;  %v4141_v30 = vmul.f32 1.442695, %v8811_v27  ;;  %v8855_v14 = vsub.f32 %v8469_v38, %v8769_v12  ;;  %6440 = vpow2.f32 %v4081_v36  ;;  %v4153_v9 = vmul.f32 1.442695, %v8814_v19 }
 0x53f   : > { %11811 = vst [vmem:[#allocation77_spill] sm:$0xff] %v8817_v56  ;;  %11812 = vst [vmem:[#allocation78_spill] sm:$0xff] %v8820_v13  ;;  %v4165_v51 = vmul.f32 1.442695, %v8817_v56  ;;  %v4177_v4 = vmul.f32 1.442695, %v8820_v13  ;;  %6442 = vpow2.f32 %v4093_v3  ;;  %v8873_v3 = vsub.f32 %v8498_v46, %v8769_v12 }
 0x540   : > { %11813 = vst [vmem:[#allocation79_spill] sm:$0xff] %v8823_v42  ;;  %11814 = vst [vmem:[#allocation80_spill] sm:$0xff] %v8826_v17  ;;  %v4189_v43 = vmul.f32 1.442695, %v8823_v42  ;;  %v4201_v24 = vmul.f32 1.442695, %v8826_v17  ;;  %6444 = vpow2.f32 %v4105_v8  ;;  %v8877_v17 = vsub.f32 %v8512_v60, %v8769_v12 }
 0x541   : > { %11815 = vst [vmem:[#allocation81_spill] sm:$0xff] %v8829_v33  ;;  %11816 = vst [vmem:[#allocation82_spill] sm:$0xff] %v8832_v41  ;;  %v4213_v35 = vmul.f32 1.442695, %v8829_v33  ;;  %v4225_v27 = vmul.f32 1.442695, %v8832_v41  ;;  %6446 = vpow2.f32 %v4117_v50  ;;  %v8889_v50 = vsub.f32 %v8547_v61, %v8769_v12 }
 0x542   : > { %11817 = vst [vmem:[#allocation83_spill] sm:$0xff] %v8835_v1  ;;  %11818 = vst [vmem:[#allocation84_spill] sm:$0xff] %v8838_v6  ;;  %v4237_v38 = vmul.f32 1.442695, %v8835_v1  ;;  %v8866_v36 = vmul.f32 1.442695, %v8838_v6  ;;  %6448 = vpow2.f32 %v4129_v2  ;;  %v8885_v6 = vsub.f32 %v8533_v16, %v8769_v12 }
 0x543   : > { %11819 = vst [vmem:[#allocation85_spill] sm:$0xff] %v8841_v62  ;;  %11820 = vst [vmem:[#allocation86_spill] sm:$0xff] %v8848_v26  ;;  %v8869_v56 = vmul.f32 1.442695, %v8841_v62  ;;  %v8879_v8 = vpop.f32.mrb[136].mxu0  ;;  %v8881_v41 = vpop.f32.mrb[200].mxu1  ;;  %v8893_v46 = vsub.f32 %v8568_v5, %v8769_v12  ;;  %6450 = vpow2.f32 %v4141_v30  ;;  %v8901_v2 = vsub.f32 %v8582_v54, %v8769_v12 }
 0x544   : > { %11821 = vst [vmem:[#allocation87_spill] sm:$0xff] %v8855_v14  ;;  %11822 = vst [vmem:[#allocation88_spill] sm:$0xff] %v8873_v3  ;;  %v8895_v62 = vpop.f32.mrb[137].mxu0  ;;  %v8897_v60 = vpop.f32.mrb[201].mxu1  ;;  %v8905_v16 = vsub.f32 %v8603_v15, %v8769_v12  ;;  %v8909_v61 = vsub.f32 %v8617_v0, %v8769_v12  ;;  %6452 = vpow2.f32 %v4153_v9  ;;  %v8917_v30 = vsub.f32 %v8637_v7, %v8769_v12  ;;  %v11842_v7 = vld [vmem:[#allocation48_spill] sm:$0xff] }
 0x545   : > { %11823 = vst [vmem:[#allocation89_spill] sm:$0xff] %v8877_v17  ;;  %11824 = vst [vmem:[#allocation90_spill] sm:$0xff] %v8879_v8  ;;  %v8911_v1 = vpop.f32.mrb[138].mxu0  ;;  %v8913_v5 = vpop.f32.mrb[202].mxu1  ;;  %v8921_v54 = vsub.f32 %v8651_v34, %v8769_v12  ;;  %v8925_v15 = vsub.f32 %v8669_v31, %v8769_v12  ;;  %6454 = vpow2.f32 %v4165_v51  ;;  %v8933_v9 = vsub.f32 %v8683_v23, %v8769_v12  ;;  %v11844_v34 = vld [vmem:[#allocation51_spill] sm:$0xff] }
 0x546   : > { %11825 = vst [vmem:[#allocation91_spill] sm:$0xff] %v8881_v41  ;;  %11826 = vst [vmem:[#allocation92_spill] sm:$0xff] %v8885_v6  ;;  %v8927_v33 = vpop.f32.mrb[139].mxu0  ;;  %v8929_v0 = vpop.f32.mrb[203].mxu1  ;;  %v8937_v42 = vsub.f32 %v11842_v7, %v8769_v12  ;;  %v8941_v13 = vsub.f32 %v11844_v34, %v8769_v12  ;;  %6456 = vpow2.f32 %v4177_v4  ;;  %v4085_v28 = vmul.f32 1.442695, %v8848_v26 }
 0x547   : > { %11827 = vst [vmem:[#allocation93_spill] sm:$0xff] %v8889_v50  ;;  %11828 = vst [vmem:[#allocation94_spill] sm:$0xff] %v8893_v46  ;;  %v8943_v19 = vpop.f32.mrb[140].mxu0  ;;  %v8945_v31 = vpop.f32.mrb[204].mxu1  ;;  %v4097_v51 = vmul.f32 1.442695, %v8855_v14  ;;  %6458 = vpow2.f32 %v4189_v43 }
 0x548   : > { %11829 = vst [vmem:[#allocation95_spill] sm:$0xff] %v8895_v62  ;;  %11830 = vst [vmem:[#allocation96_spill] sm:$0xff] %v8897_v60  ;;  %v4109_v23 = vmul.f32 1.442695, %v8873_v3  ;;  %v4121_v59 = vmul.f32 1.442695, %v8877_v17  ;;  %v6441_v34 = vpop.eup %6440  ;;  %6460 = vpow2.f32 %v4201_v24 }
 0x549   : > { %11831 = vst [vmem:[#allocation97_spill] sm:$0xff] %v8901_v2  ;;  %11832 = vst [vmem:[#allocation98_spill] sm:$0xff] %v8905_v16  ;;  %v8952_v7 = vmul.f32 1.442695, %v8885_v6  ;;  %v8955_v12 = vmul.f32 1.442695, %v8889_v50  ;;  %v6443_v43 = vpop.eup %6442  ;;  %6462 = vpow2.f32 %v4213_v35 }
 0x54a   : > { %11833 = vst [vmem:[#allocation99_spill] sm:$0xff] %v8909_v61  ;;  %11834 = vst [vmem:[#allocation100_spill] sm:$0xff] %v8911_v1  ;;  %v8958_v22 = vmul.f32 1.442695, %v8893_v46  ;;  %v8961_v4 = vmul.f32 1.442695, %v8901_v2  ;;  %v6445_v24 = vpop.eup %6444  ;;  %6464 = vpow2.f32 %v4225_v27  ;;  %v4465_v46 = vadd.f32 %v6443_v43, %v6441_v34 }
 0x54b   : > { %11835 = vst [vmem:[#allocation101_spill] sm:$0xff] %v8913_v5  ;;  %11836 = vst [vmem:[#allocation102_spill] sm:$0xff] %v8917_v30  ;;  %v8964_v14 = vmul.f32 1.442695, %v8905_v16  ;;  %v8967_v17 = vmul.f32 1.442695, %v8909_v61  ;;  %v6447_v61 = vpop.eup %6446  ;;  %6466 = vpow2.f32 %v4237_v38 }
 0x54c   : > { %11837 = vst [vmem:[#allocation103_spill] sm:$0xff] %v8921_v54  ;;  %11838 = vst [vmem:[#allocation104_spill] sm:$0xff] %v8925_v15  ;;  %v8970_v6 = vmul.f32 1.442695, %v8917_v30  ;;  %v8973_v50 = vmul.f32 1.442695, %v8921_v54  ;;  %6468 = vpow2.f32 %v8866_v36  ;;  %v4466_v26 = vadd.f32 %v6445_v24, %v4465_v46 }
 0x54d   : > { %11839 = vst [vmem:[#allocation105_spill] sm:$0xff] %v8927_v33  ;;  %11840 = vst [vmem:[#allocation106_spill] sm:$0xff] %v8929_v0  ;;  %v8976_v2 = vmul.f32 1.442695, %v8925_v15  ;;  %v8979_v16 = vmul.f32 1.442695, %v8933_v9  ;;  %v6449_v15 = vpop.eup %6448  ;;  %6470 = vpow2.f32 %v8869_v56 }
 0x54e   : > { %11841 = vst [vmem:[#allocation107_spill] sm:$0xff] %v8933_v9  ;;  %11843 = vst [vmem:[#allocation48_spill] sm:$0xff] %v8937_v42  ;;  %v8981_v3 = vpop.f32.mrb[141].mxu0  ;;  %v8983_v35 = vpop.f32.mrb[205].mxu1  ;;  %v8986_v30 = vmul.f32 1.442695, %v8937_v42  ;;  %6472 = vpow2.f32 %v4085_v28 }
 0x54f   : > { %11845 = vst [vmem:[#allocation51_spill] sm:$0xff] %v8941_v13  ;;  %11846 = vst [vmem:[#allocation108_spill] sm:$0xff] %v8943_v19  ;;  %v8989_v54 = vmul.f32 1.442695, %v8941_v13  ;;  %v11850_v27 = vld [vmem:[#allocation18_spill] sm:$0xff]  ;;  %v8995_v43 = vpop.f32.mrb[142].mxu0  ;;  %v4467_v19 = vadd.f32 %v6447_v61, %v4466_v26  ;;  %6474 = vpow2.f32 %v4097_v51 }
 0x550   : > { %11847 = vst [vmem:[#allocation109_spill] sm:$0xff] %v8945_v31  ;;  %11848 = vst [vmem:[#allocation110_spill] sm:$0xff] %v8981_v3  ;;  %v8993_v34 = vsub.f32 %v11850_v27, %v8777_v49  ;;  %v8997_v9 = vpop.f32.mrb[206].mxu1  ;;  %v11854_v38 = vld [vmem:[#allocation23_spill] sm:$0xff]  ;;  %v11856_v42 = vld [vmem:[#allocation24_spill] sm:$0xff]  ;;  %v9008_v3 = vpop.f32.mrb[143].mxu0  ;;  %6476 = vpow2.f32 %v4109_v23 }
 0x551   : > { %11849 = vst [vmem:[#allocation111_spill] sm:$0xff] %v8983_v35  ;;  %11852 = vst [vmem:[#allocation112_spill] sm:$0xff] %v8995_v43  ;;  %v9002_v35 = vsub.f32 %v11854_v38, %v8777_v49  ;;  %v9006_v13 = vsub.f32 %v11856_v42, %v8777_v49  ;;  %v9010_v27 = vpop.f32.mrb[207].mxu1  ;;  %v6451_v31 = vpop.eup %6450  ;;  %v11862_v36 = vld [vmem:[#allocation28_spill] sm:$0xff]  ;;  %v11864_v24 = vld [vmem:[#allocation30_spill] sm:$0xff]  ;;  %6478 = vpow2.f32 %v4121_v59 }
 0x552   : > { %11851 = vst [vmem:[#allocation18_spill] sm:$0xff] %v8993_v34  ;;  %11853 = vst [vmem:[#allocation113_spill] sm:$0xff] %v8997_v9  ;;  %v11860_v9 = vld [vmem:[#allocation17_spill] sm:$0xff]  ;;  %v9019_v46 = vsub.f32 %v11862_v36, %v8777_v49  ;;  %v9023_v38 = vsub.f32 %v11864_v24, %v8777_v49  ;;  %v9025_v42 = vpop.f32.mrb[144].mxu0  ;;  %v11868_v56 = vld [vmem:[#allocation32_spill] sm:$0xff]  ;;  %6480 = vpow2.f32 %v8952_v7 }
 0x553   : > { %11855 = vst [vmem:[#allocation23_spill] sm:$0xff] %v9002_v35  ;;  %11857 = vst [vmem:[#allocation24_spill] sm:$0xff] %v9006_v13  ;;  %v9015_v43 = vsub.f32 %v11860_v9, %v8777_v49  ;;  %v9031_v0 = vsub.f32 %v11868_v56, %v8777_v49  ;;  %v11870_v9 = vld [vmem:[#allocation34_spill] sm:$0xff]  ;;  %v9037_v36 = vpop.f32.mrb[145].mxu0  ;;  %v11878_v61 = vld [vmem:[#allocation40_spill] sm:$0xff]  ;;  %6482 = vpow2.f32 %v8955_v12 }
 0x554   : > { %11858 = vst [vmem:[#allocation114_spill] sm:$0xff] %v9008_v3  ;;  %11859 = vst [vmem:[#allocation115_spill] sm:$0xff] %v9010_v27  ;;  %v9027_v3 = vpop.f32.mrb[208].mxu1  ;;  %v6453_v27 = vpop.eup %6452  ;;  %v9035_v33 = vsub.f32 %v11870_v9, %v8777_v49  ;;  %v11876_v28 = vld [vmem:[#allocation38_spill] sm:$0xff]  ;;  %v9051_v56 = vsub.f32 %v11878_v61, %v8777_v49  ;;  %v11892_v23 = vld [vmem:[#allocation52_spill] sm:$0xff]  ;;  %6484 = vpow2.f32 %v8958_v22 }
 0x555   : > { %11861 = vst [vmem:[#allocation17_spill] sm:$0xff] %v9015_v43  ;;  %11863 = vst [vmem:[#allocation28_spill] sm:$0xff] %v9019_v46  ;;  %v9039_v5 = vpop.f32.mrb[209].mxu1  ;;  %v6455_v24 = vpop.eup %6454  ;;  %v9047_v26 = vsub.f32 %v11876_v28, %v8777_v49  ;;  %v11882_v51 = vld [vmem:[#allocation42_spill] sm:$0xff]  ;;  %v9086_v59 = vmul.f32 1.442695, %v9002_v35  ;;  %6486 = vpow2.f32 %v8961_v4 }
 0x556   : > { %11865 = vst [vmem:[#allocation30_spill] sm:$0xff] %v9023_v38  ;;  %11866 = vst [vmem:[#allocation116_spill] sm:$0xff] %v9025_v42  ;;  %v11874_v42 = vld [vmem:[#allocation36_spill] sm:$0xff]  ;;  %v9053_v9 = vpop.f32.mrb[146].mxu0  ;;  %v9055_v1 = vpop.f32.mrb[210].mxu1  ;;  %v9059_v60 = vsub.f32 %v11882_v51, %v8777_v49  ;;  %v9079_v51 = vsub.f32 %v11892_v23, %v8777_v49 }
 0x557   : > { %11867 = vst [vmem:[#allocation117_spill] sm:$0xff] %v9027_v3  ;;  %11869 = vst [vmem:[#allocation32_spill] sm:$0xff] %v9031_v0  ;;  %v9043_v3 = vsub.f32 %v11874_v42, %v8777_v49  ;;  %v11884_v42 = vld [vmem:[#allocation44_spill] sm:$0xff]  ;;  %v9065_v28 = vpop.f32.mrb[147].mxu0  ;;  %v9067_v41 = vpop.f32.mrb[211].mxu1 }
 0x558   : > { %11871 = vst [vmem:[#allocation34_spill] sm:$0xff] %v9035_v33  ;;  %11872 = vst [vmem:[#allocation118_spill] sm:$0xff] %v9037_v36  ;;  %v6457_v36 = vpop.eup %6456  ;;  %v9063_v62 = vsub.f32 %v11884_v42, %v8777_v49  ;;  %v9104_v23 = vmul.f32 1.442695, %v9023_v38  ;;  %v9107_v35 = vmul.f32 1.442695, %v9031_v0  ;;  %6488 = vpow2.f32 %v8964_v14 }
 0x559   : > { %11873 = vst [vmem:[#allocation119_spill] sm:$0xff] %v9039_v5  ;;  %11875 = vst [vmem:[#allocation36_spill] sm:$0xff] %v9043_v3  ;;  %v4468_v5 = vadd.f32 %v6449_v15, %v4467_v19  ;;  %v6459_v61 = vpop.eup %6458  ;;  %v11890_v19 = vld [vmem:[#allocation49_spill] sm:$0xff]  ;;  %v9125_v0 = vmul.f32 1.442695, %v9051_v56  ;;  %v9130_v4 = vpop.f32.mrb[148].mxu0  ;;  %6490 = vpow2.f32 %v8967_v17 }
 0x55a   : > { %11877 = vst [vmem:[#allocation38_spill] sm:$0xff] %v9047_v26  ;;  %11879 = vst [vmem:[#allocation40_spill] sm:$0xff] %v9051_v56  ;;  %v9075_v15 = vsub.f32 %v11890_v19, %v8777_v49  ;;  %v6461_v42 = vpop.eup %6460  ;;  %v9092_v19 = vmul.f32 1.442695, %v9006_v13  ;;  %v9128_v38 = vmul.f32 1.442695, %v9059_v60  ;;  %6492 = vpow2.f32 %v8970_v6 }
 0x55b   : > { %11880 = vst [vmem:[#allocation120_spill] sm:$0xff] %v9053_v9  ;;  %11881 = vst [vmem:[#allocation121_spill] sm:$0xff] %v9055_v1  ;;  %v11888_v9 = vld [vmem:[#allocation46_spill] sm:$0xff]  ;;  %v4469_v8 = vadd.f32 %v6451_v31, %v4468_v5  ;;  %v9098_v5 = vmul.f32 1.442695, %v9019_v46  ;;  %v9154_v17 = vpop.f32.mrb[149].mxu0 }
 0x55c   : > { %11883 = vst [vmem:[#allocation42_spill] sm:$0xff] %v9059_v60  ;;  %11885 = vst [vmem:[#allocation44_spill] sm:$0xff] %v9063_v62  ;;  %v9071_v1 = vsub.f32 %v11888_v9, %v8777_v49  ;;  %v9088_v9 = vpop.eup %6462  ;;  %v9095_v49 = vmul.f32 1.442695, %v9015_v43  ;;  %v9113_v43 = vmul.f32 1.442695, %v9035_v33  ;;  %6494 = vpow2.f32 %v8973_v50 }
 0x55d   : > { %11886 = vst [vmem:[#allocation122_spill] sm:$0xff] %v9065_v28  ;;  %11887 = vst [vmem:[#allocation123_spill] sm:$0xff] %v9067_v41  ;;  %v9083_v41 = vmul.f32 1.442695, %v8993_v34  ;;  %v9100_v31 = vpop.eup %6464  ;;  %v4470_v7 = vadd.f32 %v6453_v27, %v4469_v8  ;;  %v9116_v46 = vmul.f32 1.442695, %v9043_v3  ;;  %6496 = vpow2.f32 %v8976_v2 }
 0x55e   : > { %11889 = vst [vmem:[#allocation46_spill] sm:$0xff] %v9071_v1  ;;  %11891 = vst [vmem:[#allocation49_spill] sm:$0xff] %v9075_v15  ;;  %v9109_v12 = vpop.eup %6466  ;;  %v9119_v8 = vmul.f32 1.442695, %v9047_v26  ;;  %v9132_v33 = vpop.f32.mrb[212].mxu1  ;;  %v11898_v13 = vld [vmem:[#allocation22_spill] sm:$0xff]  ;;  %6498 = vpow2.f32 %v8979_v16 }
 0x55f   : > { %11893 = vst [vmem:[#allocation52_spill] sm:$0xff] %v9079_v51  ;;  %v9121_v22 = vpop.eup %6468  ;;  %v4471_v27 = vadd.f32 %v6455_v24, %v4470_v7  ;;  %11894 = vst [vmem:[#allocation124_spill] sm:$0xff] %v9130_v4  ;;  %v9138_v26 = vmul.f32 1.442695, %v9063_v62  ;;  %v9141_v24 = vmul.f32 1.442695, %v9071_v1  ;;  %v9152_v34 = vsub.f32 %v11898_v13, %v8779_v48 }
 0x560   : > { %11895 = vst [vmem:[#allocation125_spill] sm:$0xff] %v9132_v33  ;;  %v9134_v3 = vpop.eup %6470  ;;  %v9144_v14 = vmul.f32 1.442695, %v9075_v15  ;;  %v9148_v56 = vmul.f32 1.442695, %v9079_v51  ;;  %11900 = vst [vmem:[#allocation128_spill] sm:$0xff] %v9154_v17  ;;  %6500 = vpow2.f32 %v8986_v30 }
 0x561   : > { %v6473_v7 = vpop.eup %6472  ;;  %v4472_v60 = vadd.f32 %v6457_v36, %v4471_v27  ;;  %11899 = vst [vmem:[#allocation22_spill] sm:$0xff] %v9152_v34  ;;  %v9156_v62 = vpop.f32.mrb[213].mxu1  ;;  %v11902_v15 = vld [vmem:[#allocation25_spill] sm:$0xff]  ;;  %v11904_v6 = vld [vmem:[#allocation26_spill] sm:$0xff]  ;;  %v11906_v27 = vld [vmem:[#allocation27_spill] sm:$0xff]  ;;  %6502 = vpow2.f32 %v8989_v54 }
 0x562   : > { %11896 = vst [vmem:[#allocation126_spill] sm:$0xff] %v9144_v14  ;;  %11897 = vst [vmem:[#allocation127_spill] sm:$0xff] %v9148_v56  ;;  %v6475_v1 = vpop.eup %6474  ;;  %v9161_v33 = vsub.f32 %v11902_v15, %v8779_v48  ;;  %v9165_v36 = vsub.f32 %v11904_v6, %v8779_v48  ;;  %v9169_v51 = vsub.f32 %v11906_v27, %v8779_v48  ;;  %v9171_v13 = vpop.f32.mrb[150].mxu0  ;;  %v11910_v15 = vld [vmem:[#allocation29_spill] sm:$0xff]  ;;  %v11914_v27 = vld [vmem:[#allocation31_spill] sm:$0xff]  ;;  %6504 = vpow2.f32 %v9083_v41 }
 0x563   : > { %11901 = vst [vmem:[#allocation129_spill] sm:$0xff] %v9156_v62  ;;  %11908 = vst [vmem:[#allocation130_spill] sm:$0xff] %v9171_v13  ;;  %v9173_v17 = vpop.f32.mrb[214].mxu1  ;;  %v6477_v62 = vpop.eup %6476  ;;  %v4473_v4 = vadd.f32 %v6459_v61, %v4472_v60  ;;  %v4507_v50 = vadd.f32 %v6475_v1, %v6473_v7  ;;  %v9178_v28 = vsub.f32 %v11910_v15, %v8779_v48  ;;  %v11916_v60 = vld [vmem:[#allocation33_spill] sm:$0xff]  ;;  %v11918_v1 = vld [vmem:[#allocation35_spill] sm:$0xff]  ;;  %6506 = vpow2.f32 %v9086_v59 }
 0x564   : > { %11903 = vst [vmem:[#allocation25_spill] sm:$0xff] %v9161_v33  ;;  %11905 = vst [vmem:[#allocation26_spill] sm:$0xff] %v9165_v36  ;;  %v9180_v47 = vpop.f32.mrb[151].mxu0  ;;  %v9182_v6 = vpop.f32.mrb[215].mxu1  ;;  %v9187_v13 = vsub.f32 %v11914_v27, %v8779_v48  ;;  %v9191_v61 = vsub.f32 %v11916_v60, %v8779_v48  ;;  %v9195_v2 = vsub.f32 %v11918_v1, %v8779_v48  ;;  %v11922_v27 = vld [vmem:[#allocation39_spill] sm:$0xff]  ;;  %v11924_v56 = vld [vmem:[#allocation41_spill] sm:$0xff]  ;;  %6508 = vpow2.f32 %v9092_v19 }
 0x565   : > { %11907 = vst [vmem:[#allocation27_spill] sm:$0xff] %v9169_v51  ;;  %11909 = vst [vmem:[#allocation131_spill] sm:$0xff] %v9173_v17  ;;  %v6479_v20 = vpop.eup %6478  ;;  %v4474_v15 = vadd.f32 %v6461_v42, %v4473_v4  ;;  %v9205_v60 = vsub.f32 %v11922_v27, %v8779_v48  ;;  %v9209_v1 = vsub.f32 %v11924_v56, %v8779_v48  ;;  %v11926_v42 = vld [vmem:[#allocation43_spill] sm:$0xff]  ;;  %v9217_v30 = vpop.f32.mrb[216].mxu1  ;;  %v11930_v27 = vld [vmem:[#allocation45_spill] sm:$0xff]  ;;  %6510 = vpow2.f32 %v9095_v49 }
 0x566   : > { %11911 = vst [vmem:[#allocation29_spill] sm:$0xff] %v9178_v28  ;;  %11912 = vst [vmem:[#allocation132_spill] sm:$0xff] %v9180_v47  ;;  %v6481_v7 = vpop.eup %6480  ;;  %v11920_v47 = vld [vmem:[#allocation37_spill] sm:$0xff]  ;;  %v9213_v4 = vsub.f32 %v11926_v42, %v8779_v48  ;;  %v9223_v14 = vsub.f32 %v11930_v27, %v8779_v48  ;;  %v9227_v52 = vpop.f32.mrb[217].mxu1  ;;  %6512 = vpow2.f32 %v9098_v5  ;;  %v9274_v49 = vmul.f32 1.442695, %v9187_v13 }
 0x567   : > { %11913 = vst [vmem:[#allocation133_spill] sm:$0xff] %v9182_v6  ;;  %11915 = vst [vmem:[#allocation31_spill] sm:$0xff] %v9187_v13  ;;  %v4508_v6 = vadd.f32 %v6477_v62, %v4507_v50  ;;  %v9200_v16 = vsub.f32 %v11920_v47, %v8779_v48  ;;  %v6483_v17 = vpop.eup %6482  ;;  %v9215_v62 = vpop.f32.mrb[152].mxu0  ;;  %v4475_v50 = vadd.f32 %v9088_v9, %v4474_v15  ;;  %v11936_v9 = vld [vmem:[#allocation50_spill] sm:$0xff]  ;;  %v11938_v41 = vld [vmem:[#allocation53_spill] sm:$0xff]  ;;  %6514 = vpow2.f32 %v9104_v23 }
 0x568   : > { %11917 = vst [vmem:[#allocation33_spill] sm:$0xff] %v9191_v61  ;;  %11919 = vst [vmem:[#allocation35_spill] sm:$0xff] %v9195_v2  ;;  %v6485_v47 = vpop.eup %6484  ;;  %v9225_v56 = vpop.f32.mrb[153].mxu0  ;;  %6516 = vpow2.f32 %v9107_v35 }
 0x569   : > { %11921 = vst [vmem:[#allocation37_spill] sm:$0xff] %v9200_v16  ;;  %11923 = vst [vmem:[#allocation39_spill] sm:$0xff] %v9205_v60  ;;  %v4509_v54 = vadd.f32 %v6479_v20, %v4508_v6  ;;  %v6487_v42 = vpop.eup %6486  ;;  %v9236_v20 = vsub.f32 %v11936_v9, %v8779_v48  ;;  %v9240_v6 = vsub.f32 %v11938_v41, %v8779_v48  ;;  %v9242_v15 = vpop.f32.mrb[154].mxu0  ;;  %v9260_v41 = vmul.f32 1.442695, %v9165_v36 }
 0x56a   : > { %11925 = vst [vmem:[#allocation41_spill] sm:$0xff] %v9209_v1  ;;  %11927 = vst [vmem:[#allocation43_spill] sm:$0xff] %v9213_v4  ;;  %v9244_v27 = vpop.f32.mrb[218].mxu1  ;;  %v9251_v55 = vpop.f32.mrb[155].mxu0  ;;  %v9277_v36 = vmul.f32 1.442695, %v9191_v61  ;;  %6518 = vpow2.f32 %v9113_v43 }
 0x56b   : > { %11928 = vst [vmem:[#allocation134_spill] sm:$0xff] %v9215_v62  ;;  %11929 = vst [vmem:[#allocation135_spill] sm:$0xff] %v9217_v30  ;;  %v11934_v62 = vld [vmem:[#allocation47_spill] sm:$0xff]  ;;  %v4510_v59 = vadd.f32 %v6481_v7, %v4509_v54  ;;  %v9253_v9 = vpop.f32.mrb[219].mxu1  ;;  %v9268_v54 = vmul.f32 1.442695, %v9178_v28 }
 0x56c   : > { %11931 = vst [vmem:[#allocation45_spill] sm:$0xff] %v9223_v14  ;;  %11932 = vst [vmem:[#allocation136_spill] sm:$0xff] %v9225_v56  ;;  %v9232_v30 = vsub.f32 %v11934_v62, %v8779_v48  ;;  %v4476_v56 = vadd.f32 %v9100_v31, %v4475_v50  ;;  %v9249_v62 = vmul.f32 1.442695, %v9152_v34  ;;  %v9257_v48 = vmul.f32 1.442695, %v9161_v33 }
 0x56d   : > { %11933 = vst [vmem:[#allocation137_spill] sm:$0xff] %v9227_v52  ;;  %11937 = vst [vmem:[#allocation50_spill] sm:$0xff] %v9236_v20  ;;  %v6489_v52 = vpop.eup %6488  ;;  %v9263_v31 = vmul.f32 1.442695, %v9169_v51  ;;  %v4511_v50 = vadd.f32 %v6483_v17, %v4510_v59  ;;  %v9280_v51 = vmul.f32 1.442695, %v9195_v2  ;;  %6520 = vpow2.f32 %v9116_v46 }
 0x56e   : > { %11935 = vst [vmem:[#allocation47_spill] sm:$0xff] %v9232_v30  ;;  %11939 = vst [vmem:[#allocation53_spill] sm:$0xff] %v9240_v6  ;;  %v6491_v45 = vpop.eup %6490  ;;  %v4477_v7 = vadd.f32 %v9109_v12, %v4476_v56  ;;  %v9287_v56 = vmul.f32 1.442695, %v9200_v16  ;;  %v9293_v59 = vmul.f32 1.442695, %v9205_v60  ;;  %6522 = vpow2.f32 %v9119_v8 }
 0x56f   : > { %v6493_v19 = vpop.eup %6492  ;;  %v4512_v17 = vadd.f32 %v6485_v47, %v4511_v50  ;;  %v9296_v2 = vmul.f32 1.442695, %v9209_v1  ;;  %v9299_v61 = vmul.f32 1.442695, %v9213_v4  ;;  %v9308_v43 = vpop.f32.mrb[156].mxu0  ;;  %6524 = vpow2.f32 %v9125_v0 }
 0x570   : > { %v9270_v34 = vpop.eup %6494  ;;  %v4478_v5 = vadd.f32 %v9121_v22, %v4477_v7  ;;  %v9306_v7 = vmul.f32 1.442695, %v9223_v14  ;;  %v9310_v50 = vpop.f32.mrb[220].mxu1  ;;  %v9316_v4 = vmul.f32 1.442695, %v9232_v30  ;;  %6526 = vpow2.f32 %v9128_v38 }
 0x571   : > { %v9282_v12 = vpop.eup %6496  ;;  %v4513_v47 = vadd.f32 %v6487_v42, %v4512_v17  ;;  %v9319_v1 = vmul.f32 1.442695, %v9236_v20  ;;  %v11940_v17 = vmax.f32 %v8732_v58, %v8744_v29  ;;  %v9329_v8 = vpop.f32.mrb[157].mxu0  ;;  %6528 = vpow2.f32 %v9138_v26  ;;  %v11999_v58 = vld [vmem:[#allocation77_spill] sm:$0xff] }
 0x572   : > { %v9289_v23 = vpop.eup %6498  ;;  %v4479_v35 = vadd.f32 %v9134_v3, %v4478_v5  ;;  %v9322_v3 = vmul.f32 1.442695, %v9240_v6  ;;  %v9331_v30 = vpop.f32.mrb[221].mxu1  ;;  %v11941_v6 = vmax.f32 %v8735_v40, %v8747_v10  ;;  %6530 = vpow2.f32 %v9141_v24  ;;  %v11951_v24 = vld [vmem:[#allocation127_spill] sm:$0xff] }
 0x573   : > { %v9301_v22 = vpop.eup %6500  ;;  %v4514_v5 = vadd.f32 %v6489_v52, %v4513_v47  ;;  %v3764_v14 = vmax.f32 %v11940_v17, %v8772_v63  ;;  %v11942_v52 = vmax.f32 %v8738_v25, %v8750_v37  ;;  %v11943_v47 = vmax.f32 %v8741_v57, %v8753_v11  ;;  %v9350_v13 = vpop.f32.mrb[158].mxu0 }
 0x574   : > { %v9312_v60 = vpop.eup %6502  ;;  %v4480_v42 = vrot.slane %v4479_v35, 4  ;;  %v3806_v20 = vmax.f32 %v11941_v6, %v8775_v44  ;;  %v9352_v38 = vpop.f32.mrb[222].mxu1 }
 0x575   : > { %v6505_v46 = vpop.eup %6504  ;;  %v9342_v0 = vmax.f32 %v11942_v52, %v8782_v21  ;;  %v9348_v17 = vmax.f32 %v11943_v47, %v8785_v39  ;;  %v4515_v10 = vadd.f32 %v6491_v45, %v4514_v5  ;;  %v9355_v44 = vpop.f32.mrb[159].mxu0  ;;  %v9362_v47 = vadd.f32 %v8448_v18, %v8787_v32  ;;  %v11945_v39 = vld [vmem:[#allocation19_spill] sm:$0xff]  ;;  %v11948_v45 = vld [vmem:[#allocation20_spill] sm:$0xff]  ;;  %v11950_v5 = vld [vmem:[#allocation126_spill] sm:$0xff] }
 0x576   : > { %v6507_v16 = vpop.eup %6506  ;;  %v4481_v33 = vadd.f32 %v4480_v42, %v4479_v35  ;;  %v9357_v52 = vpop.f32.mrb[223].mxu1  ;;  %v9366_v11 = vadd.f32 %v11945_v39, %v8789_v53  ;;  %v11947_v35 = vld [vmem:[#allocation72_spill] sm:$0xff]  ;;  %6532 = vpow2.f32 %v11950_v5  ;;  %v11955_v5 = vld [vmem:[#allocation90_spill] sm:$0xff] }
 0x577   : > { %v6509_v28 = vpop.eup %6508  ;;  %v4486_v6 = vadd.f32 %v6507_v16, %v6505_v46  ;;  %11944 = vst [vmem:[#allocation138_spill] sm:$0xff] %v9362_v47  ;;  %v9370_v42 = vadd.f32 %v11948_v45, %v11947_v35  ;;  %v4516_v46 = vadd.f32 %v6493_v19, %v4515_v10  ;;  %6534 = vpow2.f32 %v11951_v24  ;;  %v9378_v40 = vpop.f32.mrb[160].mxu0  ;;  %v11957_v24 = vld [vmem:[#allocation91_spill] sm:$0xff] }
 0x578   : > { %v6511_v21 = vpop.eup %6510  ;;  %11946 = vst [vmem:[#allocation19_spill] sm:$0xff] %v9366_v11  ;;  %v4482_v16 = vrot.slane %v4481_v33, 2  ;;  %v3765_v32 = vmax.f32 %v3764_v14, %v9362_v47  ;;  %v3807_v25 = vmax.f32 %v3806_v20, %v9366_v11  ;;  %6536 = vpow2.f32 %v9249_v62  ;;  %v11952_v14 = vld [vmem:[#allocation73_spill] sm:$0xff] }
 0x579   : > { %11949 = vst [vmem:[#allocation72_spill] sm:$0xff] %v9370_v42  ;;  %v6513_v26 = vpop.eup %6512  ;;  %v4487_v57 = vadd.f32 %v6509_v28, %v4486_v6  ;;  %v3786_v53 = vmax.f32 %v9342_v0, %v9370_v42  ;;  %v4517_v29 = vadd.f32 %v9270_v34, %v4516_v46  ;;  %v9382_v28 = vpop.f32.mrb[161].mxu0  ;;  %6538 = vpow2.f32 %v9257_v48  ;;  %v11953_v6 = vld [vmem:[#allocation21_spill] sm:$0xff] }
 0x57a   : > { %v6515_v37 = vpop.eup %6514  ;;  %v4483_v63 = vadd.f32 %v4482_v16, %v4481_v33  ;;  %v9387_v20 = vadd.f32 %v11953_v6, %v11952_v14  ;;  %v9391_v0 = vadd.f32 %v8448_v18, %v11955_v5  ;;  %v9395_v33 = vadd.f32 %v11945_v39, %v11957_v24 }
 0x57b   : > { %v6517_v35 = vpop.eup %6516  ;;  %v4488_v10 = vadd.f32 %v6511_v21, %v4487_v57  ;;  %v9397_v57 = vpop.f32.mrb[162].mxu0  ;;  %v4518_v62 = vadd.f32 %v9282_v12, %v4517_v29  ;;  %6540 = vpow2.f32 %v9260_v41  ;;  %v11959_v12 = vld [vmem:[#allocation95_spill] sm:$0xff] }
 0x57c   : > { %v6519_v19 = vpop.eup %6518  ;;  %11954 = vst [vmem:[#allocation20_spill] sm:$0xff] %v9387_v20  ;;  %11956 = vst [vmem:[#allocation126_spill] sm:$0xff] %v9391_v0  ;;  %v4484_v34 = vrot.slane %v4483_v63, 1  ;;  %v9401_v48 = vpop.f32.mrb[163].mxu0  ;;  %6542 = vpow2.f32 %v9263_v31  ;;  %v3828_v14 = vmax.f32 %v9348_v17, %v9387_v20  ;;  %v3766_v5 = vmax.f32 %v3765_v32, %v9391_v0  ;;  %v11961_v17 = vld [vmem:[#allocation96_spill] sm:$0xff]  ;;  %v11965_v32 = vld [vmem:[#allocation101_spill] sm:$0xff] }
 0x57d   : > { %11958 = vst [vmem:[#allocation127_spill] sm:$0xff] %v9395_v33  ;;  %v6521_v21 = vpop.eup %6520  ;;  %v4489_v16 = vadd.f32 %v6513_v26, %v4488_v10  ;;  %v3808_v24 = vmax.f32 %v3807_v25, %v9395_v33  ;;  %v4519_v47 = vadd.f32 %v9289_v23, %v4518_v62  ;;  %6544 = vpow2.f32 %v9268_v54  ;;  %v11963_v25 = vld [vmem:[#allocation100_spill] sm:$0xff]  ;;  %v11995_v33 = vld [vmem:[#allocation71_spill] sm:$0xff] }
 0x57e   : > { %v6523_v46 = vpop.eup %6522  ;;  %v4485_v11 = vadd.f32 %v4484_v34, %v4483_v63  ;;  %6546 = vpow2.f32 %v9274_v49  ;;  %v9415_v31 = vadd.f32 %v11948_v45, %v11959_v12  ;;  %v9419_v26 = vadd.f32 %v11953_v6, %v11961_v17  ;;  %v9438_v12 = vpop.f32.mrb[164].mxu0 }
 0x57f   : > { %v6525_v42 = vpop.eup %6524  ;;  %v4490_v29 = vadd.f32 %v6515_v37, %v4489_v16  ;;  %v9423_v63 = vadd.f32 %v8448_v18, %v11963_v25  ;;  %v4520_v37 = vadd.f32 %v9301_v22, %v4519_v47  ;;  %v9430_v49 = vadd.f32 %v11945_v39, %v11965_v32 }
 0x580   : > { %v9410_v41 = vpop.eup %6526  ;;  %11960 = vst [vmem:[#allocation73_spill] sm:$0xff] %v9415_v31  ;;  %11962 = vst [vmem:[#allocation21_spill] sm:$0xff] %v9419_v26  ;;  %6548 = vlog2.f32 %v4485_v11  ;;  %v3787_v34 = vmax.f32 %v3786_v53, %v9415_v31  ;;  %v3829_v62 = vmax.f32 %v3828_v14, %v9419_v26  ;;  %v11968_v53 = vld [vmem:[#allocation105_spill] sm:$0xff] }
 0x581   : > { %11964 = vst [vmem:[#allocation90_spill] sm:$0xff] %v9423_v63  ;;  %v9425_v23 = vpop.eup %6528  ;;  %v4491_v54 = vadd.f32 %v6517_v35, %v4490_v29  ;;  %11966 = vst [vmem:[#allocation91_spill] sm:$0xff] %v9430_v49  ;;  %6550 = vpow2.f32 %v9277_v36  ;;  %v3767_v16 = vmax.f32 %v3766_v5, %v9423_v63  ;;  %v4521_v22 = vadd.f32 %v9312_v60, %v4520_v37  ;;  %v9445_v29 = vpop.f32.mrb[165].mxu0  ;;  %v11970_v5 = vld [vmem:[#allocation106_spill] sm:$0xff]  ;;  %v11972_v60 = vld [vmem:[#allocation108_spill] sm:$0xff] }
 0x582   : > { %v9432_v10 = vpop.eup %6530  ;;  %6552 = vpow2.f32 %v9280_v51  ;;  %v3809_v35 = vmax.f32 %v3808_v24, %v9430_v49  ;;  %11967 = vst [vmem:[#allocation95_spill] sm:$0xff] %v9445_v29  ;;  %v9452_v14 = vadd.f32 %v11948_v45, %v11968_v53  ;;  %v9456_v17 = vadd.f32 %v11953_v6, %v11970_v5  ;;  %v9462_v51 = vpop.f32.mrb[166].mxu0 }
 0x583   : > { %v9440_v11 = vpop.eup %6532  ;;  %v4492_v47 = vadd.f32 %v6519_v19, %v4491_v54  ;;  %6554 = vpow2.f32 %v9287_v56  ;;  %v9460_v19 = vadd.f32 %v8448_v18, %v11972_v60  ;;  %11974 = vst [vmem:[#allocation105_spill] sm:$0xff] %v9462_v51  ;;  %v4522_v25 = vrot.slane %v4521_v22, 4  ;;  %v11975_v56 = vld [vmem:[#allocation109_spill] sm:$0xff]  ;;  %v9469_v32 = vpop.f32.mrb[167].mxu0 }
 0x584   : > { %v9447_v36 = vpop.eup %6534  ;;  %11969 = vst [vmem:[#allocation96_spill] sm:$0xff] %v9452_v14  ;;  %11971 = vst [vmem:[#allocation100_spill] sm:$0xff] %v9456_v17  ;;  %6556 = vpow2.f32 %v9293_v59  ;;  %v9467_v54 = vadd.f32 %v11945_v39, %v11975_v56  ;;  %v3788_v5 = vmax.f32 %v3787_v34, %v9452_v14  ;;  %v3830_v60 = vmax.f32 %v3829_v62, %v9456_v17  ;;  %v11980_v62 = vld [vmem:[#allocation111_spill] sm:$0xff]  ;;  %v12003_v51 = vld [vmem:[#allocation81_spill] sm:$0xff] }
 0x585   : > { %11973 = vst [vmem:[#allocation101_spill] sm:$0xff] %v9460_v19  ;;  %v6537_v24 = vpop.eup %6536  ;;  %v4493_v37 = vadd.f32 %v6521_v21, %v4492_v47  ;;  %11977 = vst [vmem:[#allocation108_spill] sm:$0xff] %v9469_v32  ;;  %6558 = vpow2.f32 %v9296_v2  ;;  %v9475_v26 = vmax.f32 %v3767_v16, %v9460_v19  ;;  %v4523_v47 = vadd.f32 %v4522_v25, %v4521_v22  ;;  %v11978_v2 = vld [vmem:[#allocation110_spill] sm:$0xff]  ;;  %v11982_v25 = vld [vmem:[#allocation112_spill] sm:$0xff] }
 0x586   : > { %11976 = vst [vmem:[#allocation106_spill] sm:$0xff] %v9467_v54  ;;  %v6539_v53 = vpop.eup %6538  ;;  %6560 = vpow2.f32 %v9299_v61  ;;  %v9480_v31 = vmax.f32 %v3809_v35, %v9467_v54  ;;  %v9484_v34 = vadd.f32 %v11948_v45, %v11978_v2  ;;  %v9488_v16 = vadd.f32 %v11953_v6, %v11980_v62  ;;  %v11994_v54 = vld [vmem:[#allocation70_spill] sm:$0xff]  ;;  %v12002_v32 = vld [vmem:[#allocation80_spill] sm:$0xff] }
 0x587   : > { %v6541_v21 = vpop.eup %6540  ;;  %v4494_v59 = vadd.f32 %v6523_v46, %v4493_v37  ;;  %v4528_v56 = vadd.f32 %v6539_v53, %v6537_v24  ;;  %6562 = vpow2.f32 %v9306_v7  ;;  %v4524_v46 = vrot.slane %v4523_v47, 2  ;;  %v9503_v53 = vpop.f32.mrb[168].mxu0 }
 0x588   : > { %v6543_v20 = vpop.eup %6542  ;;  %11979 = vst [vmem:[#allocation109_spill] sm:$0xff] %v9484_v34  ;;  %11981 = vst [vmem:[#allocation110_spill] sm:$0xff] %v9488_v16  ;;  %6564 = vpow2.f32 %v9316_v4  ;;  %v9494_v7 = vmax.f32 %v3788_v5, %v9484_v34  ;;  %v9497_v35 = vmax.f32 %v3830_v60, %v9488_v16  ;;  %v9501_v37 = vadd.f32 %v8448_v18, %v11982_v25  ;;  %v11986_v25 = vld [vmem:[#allocation114_spill] sm:$0xff]  ;;  %v11992_v16 = vld [vmem:[#allocation68_spill] sm:$0xff] }
 0x589   : > { %v6545_v17 = vpop.eup %6544  ;;  %v4495_v22 = vadd.f32 %v6525_v42, %v4494_v59  ;;  %v4529_v61 = vadd.f32 %v6541_v21, %v4528_v56  ;;  %6566 = vpow2.f32 %v9319_v1  ;;  %11983 = vst [vmem:[#allocation111_spill] sm:$0xff] %v9503_v53  ;;  %v4525_v42 = vadd.f32 %v4524_v46, %v4523_v47  ;;  %v9507_v1 = vpop.f32.mrb[169].mxu0  ;;  %v11985_v56 = vld [vmem:[#allocation113_spill] sm:$0xff]  ;;  %v12001_v53 = vld [vmem:[#allocation79_spill] sm:$0xff] }
 0x58a   : > { %v6547_v24 = vpop.eup %6546  ;;  %6568 = vpow2.f32 %v9322_v3  ;;  %11984 = vst [vmem:[#allocation112_spill] sm:$0xff] %v9507_v1  ;;  %v9515_v62 = vadd.f32 %v11945_v39, %v11985_v56  ;;  %v9519_v47 = vadd.f32 %v11948_v45, %v11986_v25  ;;  %v11993_v34 = vld [vmem:[#allocation69_spill] sm:$0xff]  ;;  %v12000_v1 = vld [vmem:[#allocation78_spill] sm:$0xff] }
 0x58b   : > { %v6549_v2 = vpop.eup %6548  ;;  %v4496_v4 = vadd.f32 %v9410_v41, %v4495_v22  ;;  %v4530_v21 = vadd.f32 %v6543_v20, %v4529_v61  ;;  %v9521_v41 = vpop.f32.mrb[170].mxu0  ;;  %v4526_v20 = vrot.slane %v4525_v42, 1  ;;  %v11989_v61 = vld [vmem:[#allocation115_spill] sm:$0xff] }
 0x58c   : > { %v9509_v5 = vpop.eup %6550  ;;  %v4718_v59 = vmul.f32 0.6931472, %v6549_v2  ;;  %11987 = vst [vmem:[#allocation113_spill] sm:$0xff] %v9519_v47  ;;  %11988 = vst [vmem:[#allocation114_spill] sm:$0xff] %v9521_v41  ;;  %v9528_v2 = vadd.f32 %v11953_v6, %v11989_v61  ;;  %v9530_v60 = vpop.f32.mrb[171].mxu0  ;;  %v11998_v61 = vld [vmem:[#allocation76_spill] sm:$0xff] }
 0x58d   : > { %v9523_v3 = vpop.eup %6552  ;;  %v4497_v46 = vadd.f32 %v9425_v23, %v4496_v4  ;;  %v4531_v22 = vadd.f32 %v6545_v17, %v4530_v21  ;;  %11991 = vst [vmem:[#allocation139_spill] sm:$0xff] %v9530_v60  ;;  %v11996_v23 = vld [vmem:[#allocation74_spill] sm:$0xff]  ;;  %v11997_v4 = vld [vmem:[#allocation75_spill] sm:$0xff] }
 0x58e   : > { %11990 = vst [vmem:[#allocation115_spill] sm:$0xff] %v9528_v2  ;;  %v9532_v56 = vpop.eup %6554  ;;  %v4741_v25 = vsub.f32 %v11992_v16, %v4718_v59  ;;  %v4747_v14 = vsub.f32 %v11993_v34, %v4718_v59  ;;  %v4753_v49 = vsub.f32 %v11994_v54, %v4718_v59  ;;  %v4759_v19 = vsub.f32 %v11995_v33, %v4718_v59 }
 0x58f   : > { %v9538_v63 = vpop.eup %6556  ;;  %v4765_v17 = vsub.f32 %v11996_v23, %v4718_v59  ;;  %v4771_v21 = vsub.f32 %v11997_v4, %v4718_v59  ;;  %v4777_v0 = vsub.f32 %v11998_v61, %v4718_v59  ;;  %v4783_v60 = vsub.f32 %v11999_v58, %v4718_v59  ;;  %v12006_v23 = vld [vmem:[#allocation84_spill] sm:$0xff]  ;;  %v12007_v61 = vld [vmem:[#allocation85_spill] sm:$0xff] }
 0x590   : > { %v9544_v41 = vpop.eup %6558  ;;  %v4789_v16 = vsub.f32 %v12000_v1, %v4718_v59  ;;  %v4795_v34 = vsub.f32 %v12001_v53, %v4718_v59  ;;  %v4801_v54 = vsub.f32 %v12002_v32, %v4718_v59  ;;  %v4807_v33 = vsub.f32 %v12003_v51, %v4718_v59  ;;  %4933 = vst [vmem:[%s9552_s30] sm:$0xff] %v4741_v25  ;;  %v12004_v51 = vld [vmem:[#allocation82_spill] sm:$0xff]  ;;  %v12005_v53 = vld [vmem:[#allocation83_spill] sm:$0xff] }
 0x591   : > { %4939 = vst [vmem:[%s9552_s30 + $0x30] sm:$0xff] %v4747_v14  ;;  %4945 = vst [vmem:[%s9552_s30 + $0x60] sm:$0xff] %v4753_v49  ;;  %v9558_v58 = vpop.eup %6560  ;;  %v4813_v32 = vsub.f32 %v12004_v51, %v4718_v59  ;;  %v4819_v1 = vsub.f32 %v12005_v53, %v4718_v59  ;;  %v4825_v4 = vsub.f32 %v12006_v23, %v4718_v59 }
 0x592   : > { %4951 = vst [vmem:[%s9552_s30 + $0x90] sm:$0xff] %v4759_v19  ;;  %v4831_v29 = vsub.f32 %v12007_v61, %v4718_v59  ;;  %4957 = vst [vmem:[%s9552_s30 + $0xc0] sm:$0xff] %v4765_v17  ;;  %v9568_v49 = vpop.eup %6562  ;;  %v4527_v14 = vadd.f32 %v4526_v20, %v4525_v42  ;;  %v4498_v19 = vadd.f32 %v9432_v10, %v4497_v46  ;;  %v9577_v17 = vpop.f32.mrb[172].mxu0 }
 0x593   : > { %4963 = vst [vmem:[%s9552_s30 + $0xf0] sm:$0xff] %v4771_v21  ;;  %4969 = vst [vmem:[%s9552_s30 + $0x120] sm:$0xff] %v4777_v0  ;;  %v4532_v25 = vadd.f32 %v6547_v24, %v4531_v22  ;;  %v3811_v59 = vmax.f32 %v9480_v31, %v9515_v62  ;;  %v9579_v21 = vpop.eup %6564  ;;  %v3790_v0 = vmax.f32 %v9494_v7, %v9519_v47  ;;  %v12009_v24 = vld [vmem:[#allocation117_spill] sm:$0xff]  ;;  %v9597_v20 = vpop.f32.mrb[173].mxu0  ;;  %v12012_v22 = vld [vmem:[#allocation118_spill] sm:$0xff] }
 0x594   : > { %4975 = vst [vmem:[%s9552_s30 + $0x150] sm:$0xff] %v4783_v60  ;;  %4981 = vst [vmem:[%s9552_s30 + $0x180] sm:$0xff] %v4789_v16  ;;  %v3832_v42 = vmax.f32 %v9497_v35, %v9528_v2  ;;  %v12008_v60 = vld [vmem:[#allocation116_spill] sm:$0xff]  ;;  %v9595_v31 = vadd.f32 %v11945_v39, %v12009_v24  ;;  %v9599_v46 = vpop.eup %6566  ;;  %6570 = vlog2.f32 %v4527_v14  ;;  %v9605_v35 = vadd.f32 %v11948_v45, %v12012_v22  ;;  %v9607_v16 = vpop.f32.mrb[174].mxu0  ;;  %v12024_v24 = vld [vmem:[#allocation123_spill] sm:$0xff] }
 0x595   : > { %4987 = vst [vmem:[%s9552_s30 + $0x1b0] sm:$0xff] %v4795_v34  ;;  %4993 = vst [vmem:[%s9552_s30 + $0x1e0] sm:$0xff] %v4801_v54  ;;  %v9591_v10 = vadd.f32 %v8448_v18, %v12008_v60  ;;  %v4533_v7 = vadd.f32 %v9509_v5, %v4532_v25  ;;  %v9609_v34 = vpop.eup %6568  ;;  %v12015_v54 = vmax.f32 %v9475_v26, %v9501_v37  ;;  %v12018_v5 = vld [vmem:[#allocation120_spill] sm:$0xff]  ;;  %v12020_v26 = vld [vmem:[#allocation121_spill] sm:$0xff] }
 0x596   : > { %4999 = vst [vmem:[%s9552_s30 + $0x210] sm:$0xff] %v4807_v33  ;;  %5005 = vst [vmem:[%s9552_s30 + $0x240] sm:$0xff] %v4813_v32  ;;  %v3812_v51 = vmax.f32 %v3811_v59, %v9595_v31  ;;  %v12016_v32 = vld [vmem:[#allocation119_spill] sm:$0xff]  ;;  %v9622_v53 = vadd.f32 %v8448_v18, %v12018_v5  ;;  %v3791_v61 = vmax.f32 %v3790_v0, %v9605_v35  ;;  %v12022_v59 = vld [vmem:[#allocation122_spill] sm:$0xff] }
 0x597   : > { %5011 = vst [vmem:[%s9552_s30 + $0x270] sm:$0xff] %v4819_v1  ;;  %5017 = vst [vmem:[%s9552_s30 + $0x2a0] sm:$0xff] %v4825_v4  ;;  %v3770_v33 = vmax.f32 %v12015_v54, %v9591_v10  ;;  %v9624_v1 = vpop.f32.mrb[175].mxu0  ;;  %v4534_v4 = vadd.f32 %v9523_v3, %v4533_v7  ;;  %v9631_v14 = vadd.f32 %v11945_v39, %v12020_v26  ;;  %v12029_v5 = vld [vmem:[#allocation128_spill] sm:$0xff] }
 0x598   : > { %5023 = vst [vmem:[%s9552_s30 + $0x2d0] sm:$0xff] %v4831_v29  ;;  %12010 = vst [vmem:[#allocation68_spill] sm:$0xff] %v9595_v31  ;;  %v4499_v29 = vadd.f32 %v9440_v11, %v4498_v19  ;;  %v9618_v11 = vadd.f32 %v11953_v6, %v12016_v32  ;;  %v9637_v60 = vadd.f32 %v11948_v45, %v12022_v59  ;;  %v12065_v31 = vld [vmem:[#allocation51_spill] sm:$0xff] }
 0x599   : > { %12011 = vst [vmem:[#allocation69_spill] sm:$0xff] %v9597_v20  ;;  %12013 = vst [vmem:[#allocation70_spill] sm:$0xff] %v9605_v35  ;;  %v3771_v25 = vmax.f32 %v3770_v33, %v9622_v53  ;;  %v9641_v22 = vadd.f32 %v11953_v6, %v12024_v24  ;;  %v4535_v3 = vadd.f32 %v9532_v56, %v4534_v4  ;;  %v12027_v33 = vld [vmem:[#allocation125_spill] sm:$0xff] }
 0x59a   : > { %12014 = vst [vmem:[#allocation71_spill] sm:$0xff] %v9607_v16  ;;  %12017 = vst [vmem:[#allocation74_spill] sm:$0xff] %v9618_v11  ;;  %v4500_v23 = vadd.f32 %v9447_v36, %v4499_v29  ;;  %v3833_v19 = vmax.f32 %v3832_v42, %v9618_v11  ;;  %v3813_v0 = vmax.f32 %v3812_v51, %v9631_v14  ;;  %v12026_v29 = vld [vmem:[#allocation124_spill] sm:$0xff]  ;;  %v12031_v4 = vld [vmem:[#allocation129_spill] sm:$0xff] }
 0x59b   : > { %12019 = vst [vmem:[#allocation75_spill] sm:$0xff] %v9624_v1  ;;  %12021 = vst [vmem:[#allocation76_spill] sm:$0xff] %v9631_v14  ;;  %v9647_v7 = vadd.f32 %v8448_v18, %v12026_v29  ;;  %v3792_v42 = vmax.f32 %v3791_v61, %v9637_v60  ;;  %v9653_v32 = vadd.f32 %v11945_v39, %v12027_v33  ;;  %v9665_v61 = vpop.f32.mrb[176].mxu0  ;;  %v12034_v33 = vld [vmem:[#allocation130_spill] sm:$0xff]  ;;  %v12041_v16 = vld [vmem:[#allocation133_spill] sm:$0xff] }
 0x59c   : > { %12023 = vst [vmem:[#allocation77_spill] sm:$0xff] %v9637_v60  ;;  %12025 = vst [vmem:[#allocation78_spill] sm:$0xff] %v9641_v22  ;;  %v4501_v36 = vrot.slane %v4500_v23, 4  ;;  %v3834_v54 = vmax.f32 %v3833_v19, %v9641_v22  ;;  %v9657_v26 = vadd.f32 %v11948_v45, %v12029_v5  ;;  %v4536_v56 = vadd.f32 %v9538_v63, %v4535_v3  ;;  %v12035_v5 = vld [vmem:[#allocation131_spill] sm:$0xff]  ;;  %v9677_v63 = vpop.f32.mrb[177].mxu0  ;;  %v12056_v35 = vld [vmem:[#allocation97_spill] sm:$0xff] }
 0x59d   : > { %12028 = vst [vmem:[#allocation79_spill] sm:$0xff] %v9653_v32  ;;  %v3772_v51 = vmax.f32 %v3771_v25, %v9647_v7  ;;  %v9663_v24 = vadd.f32 %v11953_v6, %v12031_v4  ;;  %12033 = vst [vmem:[#allocation82_spill] sm:$0xff] %v9665_v61  ;;  %v3814_v19 = vmax.f32 %v3813_v0, %v9653_v32  ;;  %v12038_v4 = vld [vmem:[#allocation132_spill] sm:$0xff]  ;;  %v12061_v32 = vld [vmem:[#allocation103_spill] sm:$0xff] }
 0x59e   : > { %12030 = vst [vmem:[#allocation80_spill] sm:$0xff] %v9657_v26  ;;  %v4502_v59 = vadd.f32 %v4501_v36, %v4500_v23  ;;  %v3793_v29 = vmax.f32 %v3792_v42, %v9657_v26  ;;  %v9671_v1 = vadd.f32 %v8448_v18, %v12034_v33  ;;  %v9675_v23 = vadd.f32 %v11945_v39, %v12035_v5  ;;  %v9685_v42 = vpop.f32.mrb[178].mxu0  ;;  %v12064_v14 = vld [vmem:[#allocation48_spill] sm:$0xff] }
 0x59f   : > { %12032 = vst [vmem:[#allocation81_spill] sm:$0xff] %v9663_v24  ;;  %12037 = vst [vmem:[#allocation84_spill] sm:$0xff] %v9677_v63  ;;  %v4537_v36 = vadd.f32 %v9544_v41, %v4536_v56  ;;  %v3835_v3 = vmax.f32 %v3834_v54, %v9663_v24  ;;  %v9683_v0 = vadd.f32 %v11948_v45, %v12038_v4  ;;  %v12043_v63 = vld [vmem:[#allocation134_spill] sm:$0xff]  ;;  %v9697_v41 = vpop.f32.mrb[179].mxu0  ;;  %v6571_v54 = vpop.eup %6570  ;;  %v12045_v24 = vld [vmem:[#allocation135_spill] sm:$0xff] }
 0x5a0   : > { %12036 = vst [vmem:[#allocation83_spill] sm:$0xff] %v9675_v23  ;;  %v4503_v25 = vrot.slane %v4502_v59, 2  ;;  %12040 = vst [vmem:[#allocation116_spill] sm:$0xff] %v9685_v42  ;;  %v3773_v33 = vmax.f32 %v3772_v51, %v9671_v1  ;;  %v3815_v61 = vmax.f32 %v3814_v19, %v9675_v23  ;;  %v9691_v5 = vadd.f32 %v11953_v6, %v12041_v16  ;;  %v9727_v47 = vpop.f32.mrb[180].mxu0  ;;  %v12060_v23 = vld [vmem:[#allocation102_spill] sm:$0xff] }
 0x5a1   : > { %12039 = vst [vmem:[#allocation85_spill] sm:$0xff] %v9683_v0  ;;  %v9695_v20 = vadd.f32 %v8448_v18, %v12043_v63  ;;  %12044 = vst [vmem:[#allocation118_spill] sm:$0xff] %v9697_v41  ;;  %v4538_v4 = vadd.f32 %v9558_v58, %v4537_v36  ;;  %v3794_v42 = vmax.f32 %v3793_v29, %v9683_v0  ;;  %v4722_v19 = vmul.f32 0.6931472, %v6571_v54  ;;  %v12047_v63 = vld [vmem:[#allocation136_spill] sm:$0xff]  ;;  %v12048_v29 = vld [vmem:[#allocation137_spill] sm:$0xff] }
 0x5a2   : > { %12042 = vst [vmem:[#allocation117_spill] sm:$0xff] %v9691_v5  ;;  %v4504_v56 = vadd.f32 %v4503_v25, %v4502_v59  ;;  %v9703_v51 = vadd.f32 %v11945_v39, %v12045_v24  ;;  %v3836_v16 = vmax.f32 %v3835_v3, %v9691_v5  ;;  %v9711_v11 = vadd.f32 %v11948_v45, %v12047_v63  ;;  %v12049_v25 = vld [vmem:[#allocation86_spill] sm:$0xff]  ;;  %v12050_v3 = vld [vmem:[#allocation87_spill] sm:$0xff]  ;;  %v12051_v54 = vld [vmem:[#allocation88_spill] sm:$0xff] }
 0x5a3   : > { %v9707_v22 = vmax.f32 %v3773_v33, %v9695_v20  ;;  %v4539_v59 = vadd.f32 %v9568_v49, %v4538_v4  ;;  %v9717_v24 = vadd.f32 %v11953_v6, %v12048_v29  ;;  %v4743_v36 = vsub.f32 %v12049_v25, %v4722_v19  ;;  %v12052_v5 = vld [vmem:[#allocation89_spill] sm:$0xff]  ;;  %v12053_v0 = vld [vmem:[#allocation92_spill] sm:$0xff]  ;;  %12057 = vst [vmem:[#allocation120_spill] sm:$0xff] %v9727_v47  ;;  %v12058_v25 = vld [vmem:[#allocation98_spill] sm:$0xff] }
 0x5a4   : > { %12046 = vst [vmem:[#allocation119_spill] sm:$0xff] %v9703_v51  ;;  %v4505_v41 = vrot.slane %v4504_v56, 1  ;;  %v3816_v58 = vmax.f32 %v3815_v61, %v9703_v51  ;;  %v4749_v33 = vsub.f32 %v12050_v3, %v4722_v19  ;;  %v4755_v63 = vsub.f32 %v12051_v54, %v4722_v19  ;;  %v12054_v4 = vld [vmem:[#allocation93_spill] sm:$0xff]  ;;  %v12055_v61 = vld [vmem:[#allocation94_spill] sm:$0xff]  ;;  %v12059_v3 = vld [vmem:[#allocation99_spill] sm:$0xff] }
 0x5a5   : > { %v4761_v2 = vsub.f32 %v12052_v5, %v4722_v19  ;;  %v4767_v49 = vsub.f32 %v12053_v0, %v4722_v19  ;;  %v4773_v26 = vsub.f32 %v12054_v4, %v4722_v19  ;;  %v4779_v60 = vsub.f32 %v12055_v61, %v4722_v19  ;;  %4935 = vst [vmem:[%s9552_s30 + $0x10] sm:$0xff] %v4743_v36  ;;  %v12062_v4 = vld [vmem:[#allocation104_spill] sm:$0xff] }
 0x5a6   : > { %v4785_v29 = vsub.f32 %v12056_v35, %v4722_v19  ;;  %v4791_v51 = vsub.f32 %v12058_v25, %v4722_v19  ;;  %v4797_v54 = vsub.f32 %v12059_v3, %v4722_v19  ;;  %v4803_v5 = vsub.f32 %v12060_v23, %v4722_v19  ;;  %4941 = vst [vmem:[%s9552_s30 + $0x40] sm:$0xff] %v4749_v33  ;;  %v9737_v35 = vpop.f32.mrb[181].mxu0  ;;  %v12063_v25 = vld [vmem:[#allocation107_spill] sm:$0xff] }
 0x5a7   : > { %v4809_v0 = vsub.f32 %v12061_v32, %v4722_v19  ;;  %4947 = vst [vmem:[%s9552_s30 + $0x70] sm:$0xff] %v4755_v63  ;;  %4953 = vst [vmem:[%s9552_s30 + $0xa0] sm:$0xff] %v4761_v2  ;;  %v4815_v61 = vsub.f32 %v12062_v4, %v4722_v19  ;;  %v4821_v47 = vsub.f32 %v12063_v25, %v4722_v19  ;;  %v9747_v32 = vpop.f32.mrb[182].mxu0  ;;  %v12069_v63 = vld [vmem:[#allocation63_spill] sm:$0xff] }
 0x5a8   : > { %v4827_v3 = vsub.f32 %v12064_v14, %v4722_v19  ;;  %v4833_v23 = vsub.f32 %v12065_v31, %v4722_v19  ;;  %4959 = vst [vmem:[%s9552_s30 + $0xd0] sm:$0xff] %v4767_v49  ;;  %4965 = vst [vmem:[%s9552_s30 + $0x100] sm:$0xff] %v4773_v26  ;;  %v4506_v2 = vadd.f32 %v4505_v41, %v4504_v56  ;;  %v9756_v19 = vpop.f32.mrb[183].mxu0 }
 0x5a9   : > { %4971 = vst [vmem:[%s9552_s30 + $0x130] sm:$0xff] %v4779_v60  ;;  %4977 = vst [vmem:[%s9552_s30 + $0x160] sm:$0xff] %v4785_v29  ;;  %v4540_v36 = vadd.f32 %v9579_v21, %v4539_v59  ;;  %v3795_v14 = vmax.f32 %v3794_v42, %v9711_v11  ;;  %v3837_v31 = vmax.f32 %v3836_v16, %v9717_v24 }
 0x5aa   : > { %4983 = vst [vmem:[%s9552_s30 + $0x190] sm:$0xff] %v4791_v51  ;;  %4989 = vst [vmem:[%s9552_s30 + $0x1c0] sm:$0xff] %v4797_v54  ;;  %v9764_v60 = vadd.f32 %v8448_v18, %v9242_v15  ;;  %v9768_v26 = vadd.f32 %v11945_v39, %v9244_v27  ;;  %v9772_v21 = vadd.f32 %v11948_v45, %v9251_v55  ;;  %6572 = vlog2.f32 %v4506_v2 }
 0x5ab   : > { %4995 = vst [vmem:[%s9552_s30 + $0x1f0] sm:$0xff] %v4803_v5  ;;  %5001 = vst [vmem:[%s9552_s30 + $0x220] sm:$0xff] %v4809_v0  ;;  %v9776_v42 = vadd.f32 %v11953_v6, %v9253_v9  ;;  %v9781_v41 = vadd.f32 %v8448_v18, %v9308_v43  ;;  %v9785_v15 = vadd.f32 %v11945_v39, %v9310_v50 }
 0x5ac   : > { %5007 = vst [vmem:[%s9552_s30 + $0x250] sm:$0xff] %v4815_v61  ;;  %5013 = vst [vmem:[%s9552_s30 + $0x280] sm:$0xff] %v4821_v47  ;;  %v4541_v47 = vadd.f32 %v9599_v46, %v4540_v36  ;;  %v3775_v27 = vmax.f32 %v9707_v22, %v9764_v60  ;;  %v3817_v55 = vmax.f32 %v3816_v58, %v9768_v26 }
 0x5ad   : > { %5019 = vst [vmem:[%s9552_s30 + $0x2b0] sm:$0xff] %v4827_v3  ;;  %5025 = vst [vmem:[%s9552_s30 + $0x2e0] sm:$0xff] %v4833_v23  ;;  %v3796_v56 = vmax.f32 %v3795_v14, %v9772_v21  ;;  %v3838_v9 = vmax.f32 %v3837_v31, %v9776_v42  ;;  %v9795_v46 = vadd.f32 %v11948_v45, %v9329_v8  ;;  %v12076_v31 = vld [vmem:[#allocation95_spill] sm:$0xff] }
 0x5ae   : > { %v4542_v51 = vadd.f32 %v9609_v34, %v4541_v47  ;;  %v9799_v43 = vadd.f32 %v11953_v6, %v9331_v30  ;;  %v9803_v50 = vadd.f32 %v8448_v18, %v9350_v13  ;;  %v3776_v22 = vmax.f32 %v3775_v27, %v9781_v41  ;;  %v9815_v34 = vpop.f32.mrb[184].mxu0 }
 0x5af   : > { %v3818_v16 = vmax.f32 %v3817_v55, %v9785_v15  ;;  %v9809_v59 = vadd.f32 %v11945_v39, %v9352_v38  ;;  %v9813_v8 = vadd.f32 %v11948_v45, %v9355_v44  ;;  %v3797_v58 = vmax.f32 %v3796_v56, %v9795_v46  ;;  %v9823_v33 = vpop.f32.mrb[185].mxu0  ;;  %v12067_v44 = vld [vmem:[#allocation62_spill] sm:$0xff] }
 0x5b0   : > { %v4543_v30 = vrot.slane %v4542_v51, 4  ;;  %v3839_v18 = vmax.f32 %v3838_v9, %v9799_v43  ;;  %v9821_v13 = vadd.f32 %v11953_v6, %v9357_v52  ;;  %12066 = vst [vmem:[#allocation121_spill] sm:$0xff] %v9823_v33  ;;  %v3777_v39 = vmax.f32 %v3776_v22, %v9803_v50  ;;  %v9835_v29 = vpop.f32.mrb[186].mxu0 }
 0x5b1   : > { %v3819_v38 = vmax.f32 %v3818_v16, %v9809_v59  ;;  %v9829_v45 = vadd.f32 %v12067_v44, %v9378_v40  ;;  %v9833_v49 = vadd.f32 %v12069_v63, %v9382_v28  ;;  %12071 = vst [vmem:[#allocation124_spill] sm:$0xff] %v9835_v29  ;;  %v3798_v52 = vmax.f32 %v3797_v58, %v9813_v8  ;;  %v9843_v0 = vpop.f32.mrb[187].mxu0 }
 0x5b2   : > { %v4544_v54 = vadd.f32 %v4543_v30, %v4542_v51  ;;  %v3840_v6 = vmax.f32 %v3839_v18, %v9821_v13  ;;  %v9841_v5 = vadd.f32 %v12067_v44, %v9397_v57  ;;  %12073 = vst [vmem:[#allocation128_spill] sm:$0xff] %v9843_v0  ;;  %v3778_v4 = vrot.slane %v3777_v39, 4  ;;  %v9863_v30 = vpop.f32.mrb[188].mxu0 }
 0x5b3   : > { %12068 = vst [vmem:[#allocation122_spill] sm:$0xff] %v9829_v45  ;;  %12070 = vst [vmem:[#allocation123_spill] sm:$0xff] %v9833_v49  ;;  %v3820_v40 = vrot.slane %v3819_v38, 4  ;;  %v9847_v61 = vadd.f32 %v12069_v63, %v9401_v48  ;;  %v9851_v28 = vadd.f32 %v12067_v44, %v9438_v12  ;;  %v3799_v3 = vrot.slane %v3798_v52, 4 }
 0x5b4   : > { %12072 = vst [vmem:[#allocation125_spill] sm:$0xff] %v9841_v5  ;;  %v4545_v25 = vrot.slane %v4544_v54, 2  ;;  %v3841_v23 = vrot.slane %v3840_v6, 4  ;;  %v3721_v2 = vmax.f32 %v9829_v45, %v9841_v5  ;;  %v3779_v57 = vmax.f32 %v3777_v39, %v3778_v4  ;;  %v6573_v48 = vpop.eup %6572  ;;  %12078 = vst [vmem:[#allocation132_spill] sm:$0xff] %v9863_v30  ;;  %v12090_v5 = vld [vmem:[#allocation34_spill] sm:$0xff] }
 0x5b5   : > { %12074 = vst [vmem:[#allocation129_spill] sm:$0xff] %v9847_v61  ;;  %12075 = vst [vmem:[#allocation130_spill] sm:$0xff] %v9851_v28  ;;  %v3821_v36 = vmax.f32 %v3819_v38, %v3820_v40  ;;  %v3742_v14 = vmax.f32 %v9833_v49, %v9847_v61  ;;  %v9859_v47 = vadd.f32 %v12069_v63, %v12076_v31  ;;  %v4720_v9 = vmul.f32 0.6931472, %v6573_v48  ;;  %v12079_v38 = vld [vmem:[#allocation105_spill] sm:$0xff]  ;;  %v12083_v40 = vld [vmem:[#allocation23_spill] sm:$0xff] }
 0x5b6   : > { %v4546_v27 = vadd.f32 %v4545_v25, %v4544_v54  ;;  %v3800_v55 = vmax.f32 %v3798_v52, %v3799_v3  ;;  %v3842_v12 = vmax.f32 %v3840_v6, %v3841_v23  ;;  %v3722_v56 = vmax.f32 %v3721_v2, %v9851_v28  ;;  %v9869_v54 = vpop.f32.mrb[189].mxu0  ;;  %v12082_v52 = vld [vmem:[#allocation18_spill] sm:$0xff]  ;;  %v12084_v3 = vld [vmem:[#allocation24_spill] sm:$0xff]  ;;  %v12085_v2 = vld [vmem:[#allocation17_spill] sm:$0xff] }
 0x5b7   : > { %12077 = vst [vmem:[#allocation131_spill] sm:$0xff] %v9859_v47  ;;  %v3780_v51 = vrot.slane %v3779_v57, 2  ;;  %v3822_v22 = vrot.slane %v3821_v36, 2  ;;  %v3743_v16 = vmax.f32 %v3742_v14, %v9859_v47  ;;  %v9867_v4 = vadd.f32 %v12067_v44, %v12079_v38  ;;  %12081 = vst [vmem:[#allocation134_spill] sm:$0xff] %v9869_v54  ;;  %v9875_v31 = vpop.f32.mrb[190].mxu0  ;;  %v12087_v48 = vld [vmem:[#allocation28_spill] sm:$0xff] }
 0x5b8   : > { %v4547_v58 = vrot.slane %v4546_v27, 1  ;;  %v3801_v18 = vrot.slane %v3800_v55, 2  ;;  %v3843_v39 = vrot.slane %v3842_v12, 2  ;;  %v4742_v6 = vsub.f32 %v12082_v52, %v4720_v9  ;;  %12086 = vst [vmem:[#allocation135_spill] sm:$0xff] %v9875_v31  ;;  %v12088_v38 = vld [vmem:[#allocation30_spill] sm:$0xff]  ;;  %v12089_v49 = vld [vmem:[#allocation32_spill] sm:$0xff] }
 0x5b9   : > { %12080 = vst [vmem:[#allocation133_spill] sm:$0xff] %v9867_v4  ;;  %v4748_v25 = vsub.f32 %v12083_v40, %v4720_v9  ;;  %v4754_v23 = vsub.f32 %v12084_v3, %v4720_v9  ;;  %v4760_v14 = vsub.f32 %v12085_v2, %v4720_v9  ;;  %v4766_v47 = vsub.f32 %v12087_v48, %v4720_v9  ;;  %v9881_v45 = vpop.f32.mrb[191].mxu0  ;;  %v12092_v40 = vld [vmem:[#allocation36_spill] sm:$0xff]  ;;  %v12093_v54 = vld [vmem:[#allocation38_spill] sm:$0xff] }
 0x5ba   : > { %v4772_v61 = vsub.f32 %v12088_v38, %v4720_v9  ;;  %v4778_v28 = vsub.f32 %v12089_v49, %v4720_v9  ;;  %v4784_v52 = vsub.f32 %v12090_v5, %v4720_v9  ;;  %12091 = vst [vmem:[#allocation136_spill] sm:$0xff] %v9881_v45  ;;  %v4790_v3 = vsub.f32 %v12092_v40, %v4720_v9  ;;  %v12094_v31 = vld [vmem:[#allocation40_spill] sm:$0xff]  ;;  %v12095_v30 = vld [vmem:[#allocation42_spill] sm:$0xff]  ;;  %v12098_v40 = vld [vmem:[#allocation49_spill] sm:$0xff] }
 0x5bb   : > { %v4796_v2 = vsub.f32 %v12093_v54, %v4720_v9  ;;  %v4802_v48 = vsub.f32 %v12094_v31, %v4720_v9  ;;  %v4808_v38 = vsub.f32 %v12095_v30, %v4720_v9  ;;  %4934 = vst [vmem:[%s9552_s30 + $0x8] sm:$0xff] %v4742_v6  ;;  %4940 = vst [vmem:[%s9552_s30 + $0x38] sm:$0xff] %v4748_v25  ;;  %v12096_v49 = vld [vmem:[#allocation44_spill] sm:$0xff]  ;;  %v12097_v45 = vld [vmem:[#allocation46_spill] sm:$0xff] }
 0x5bc   : > { %4946 = vst [vmem:[%s9552_s30 + $0x68] sm:$0xff] %v4754_v23  ;;  %4952 = vst [vmem:[%s9552_s30 + $0x98] sm:$0xff] %v4760_v14  ;;  %v4814_v5 = vsub.f32 %v12096_v49, %v4720_v9  ;;  %v4820_v0 = vsub.f32 %v12097_v45, %v4720_v9  ;;  %v4826_v29 = vsub.f32 %v12098_v40, %v4720_v9  ;;  %v12099_v54 = vld [vmem:[#allocation52_spill] sm:$0xff]  ;;  %v12107_v31 = vld [vmem:[#allocation139_spill] sm:$0xff] }
 0x5bd   : > { %v4832_v33 = vsub.f32 %v12099_v54, %v4720_v9  ;;  %4958 = vst [vmem:[%s9552_s30 + $0xc8] sm:$0xff] %v4766_v47  ;;  %4964 = vst [vmem:[%s9552_s30 + $0xf8] sm:$0xff] %v4772_v61  ;;  %v4548_v30 = vadd.f32 %v4547_v58, %v4546_v27  ;;  %v3781_v6 = vmax.f32 %v3779_v57, %v3780_v51  ;;  %v12100_v14 = vld [vmem:[#allocation108_spill] sm:$0xff]  ;;  %v12114_v40 = vld [vmem:[#allocation138_spill] sm:$0xff] }
 0x5be   : > { %4970 = vst [vmem:[%s9552_s30 + $0x128] sm:$0xff] %v4778_v28  ;;  %4976 = vst [vmem:[%s9552_s30 + $0x158] sm:$0xff] %v4784_v52  ;;  %v3823_v25 = vmax.f32 %v3821_v36, %v3822_v22  ;;  %v3802_v23 = vmax.f32 %v3800_v55, %v3801_v18  ;;  %v3844_v45 = vmax.f32 %v3842_v12, %v3843_v39  ;;  %v12102_v28 = vld [vmem:[#allocation111_spill] sm:$0xff]  ;;  %v12106_v39 = vld [vmem:[#allocation114_spill] sm:$0xff] }
 0x5bf   : > { %4982 = vst [vmem:[%s9552_s30 + $0x188] sm:$0xff] %v4790_v3  ;;  %4988 = vst [vmem:[%s9552_s30 + $0x1b8] sm:$0xff] %v4796_v2  ;;  %v3723_v9 = vmax.f32 %v3722_v56, %v9867_v4  ;;  %v9910_v61 = vadd.f32 %v12069_v63, %v12100_v14  ;;  %v9914_v47 = vadd.f32 %v12067_v44, %v12102_v28  ;;  %6574 = vlog2.f32 %v4548_v30  ;;  %v12108_v3 = vld [vmem:[#allocation54_spill] sm:$0xff]  ;;  %v12112_v49 = vld [vmem:[#allocation64_spill] sm:$0xff] }
 0x5c0   : > { %4994 = vst [vmem:[%s9552_s30 + $0x1e8] sm:$0xff] %v4802_v48  ;;  %5000 = vst [vmem:[%s9552_s30 + $0x218] sm:$0xff] %v4808_v38  ;;  %v3782_v27 = vrot.slane %v3781_v6, 1  ;;  %v3824_v57 = vrot.slane %v3823_v25, 1  ;;  %v3803_v36 = vrot.slane %v3802_v23, 1  ;;  %v3845_v55 = vrot.slane %v3844_v45, 1 }
 0x5c1   : > { %5006 = vst [vmem:[%s9552_s30 + $0x248] sm:$0xff] %v4814_v5  ;;  %5012 = vst [vmem:[%s9552_s30 + $0x278] sm:$0xff] %v4820_v0  ;;  %v3744_v0 = vmax.f32 %v3743_v16, %v9910_v61  ;;  %v9935_v16 = vadd.f32 %v12067_v44, %v12106_v39  ;;  %v9939_v52 = vadd.f32 %v12069_v63, %v12107_v31  ;;  %v12110_v48 = vld [vmem:[#allocation58_spill] sm:$0xff]  ;;  %v12131_v31 = vld [vmem:[#allocation59_spill] sm:$0xff] }
 0x5c2   : > { %5018 = vst [vmem:[%s9552_s30 + $0x2a8] sm:$0xff] %v4826_v29  ;;  %5024 = vst [vmem:[%s9552_s30 + $0x2d8] sm:$0xff] %v4832_v33  ;;  %v9918_v33 = vmax.f32 %v3723_v9, %v9914_v47  ;;  %v12104_v29 = vld [vmem:[#allocation112_spill] sm:$0xff]  ;;  %v3783_v56 = vmax.f32 %v3781_v6, %v3782_v27  ;;  %v9924_v51 = vmax.f32 %v3823_v25, %v3824_v57  ;;  %v12116_v30 = vld [vmem:[#allocation126_spill] sm:$0xff] }
 0x5c3   : > { %12101 = vst [vmem:[#allocation137_spill] sm:$0xff] %v9910_v61  ;;  %12103 = vst [vmem:[#allocation86_spill] sm:$0xff] %v9914_v47  ;;  %v9922_v12 = vadd.f32 %v12069_v63, %v12104_v29  ;;  %v9926_v22 = vmax.f32 %v3802_v23, %v3803_v36  ;;  %v9928_v58 = vmax.f32 %v3844_v45, %v3845_v55  ;;  %v12118_v25 = vld [vmem:[#allocation90_spill] sm:$0xff]  ;;  %v12120_v45 = vld [vmem:[#allocation101_spill] sm:$0xff] }
 0x5c4   : > { %v9942_v2 = vsub.f32 %v12108_v3, %v3783_v56  ;;  %v9945_v38 = vsub.f32 %v12110_v48, %v3783_v56  ;;  %v9948_v5 = vsub.f32 %v12112_v49, %v3783_v56  ;;  %v9951_v54 = vsub.f32 %v12114_v40, %v3783_v56  ;;  %v12135_v61 = vld [vmem:[#allocation26_spill] sm:$0xff] }
 0x5c5   : > { %12105 = vst [vmem:[#allocation87_spill] sm:$0xff] %v9922_v12  ;;  %v9931_v18 = vmax.f32 %v3744_v0, %v9922_v12  ;;  %v9954_v6 = vsub.f32 %v12116_v30, %v3783_v56  ;;  %v9957_v23 = vsub.f32 %v12118_v25, %v3783_v56  ;;  %v9960_v9 = vsub.f32 %v12120_v45, %v3783_v56 }
 0x5c6   : > { %12109 = vst [vmem:[#allocation88_spill] sm:$0xff] %v9942_v2  ;;  %12111 = vst [vmem:[#allocation89_spill] sm:$0xff] %v9945_v38  ;;  %v9963_v14 = vsub.f32 %v9501_v37, %v3783_v56  ;;  %v9966_v28 = vsub.f32 %v9591_v10, %v3783_v56  ;;  %v9969_v27 = vsub.f32 %v9622_v53, %v3783_v56  ;;  %v9989_v53 = vpop.f32.mrb[192].mxu0  ;;  %v4285_v29 = vmul.f32 1.442695, %v9945_v38  ;;  %v12150_v38 = vld [vmem:[#allocation50_spill] sm:$0xff] }
 0x5c7   : > { %12113 = vst [vmem:[#allocation92_spill] sm:$0xff] %v9948_v5  ;;  %12115 = vst [vmem:[#allocation93_spill] sm:$0xff] %v9951_v54  ;;  %v9972_v57 = vsub.f32 %v9647_v7, %v3783_v56  ;;  %v9975_v36 = vsub.f32 %v9671_v1, %v3783_v56  ;;  %v9978_v55 = vsub.f32 %v9695_v20, %v3783_v56  ;;  %v4273_v7 = vmul.f32 1.442695, %v9942_v2  ;;  %v12129_v20 = vld [vmem:[#allocation55_spill] sm:$0xff]  ;;  %v12151_v2 = vld [vmem:[#allocation53_spill] sm:$0xff] }
 0x5c8   : > { %12117 = vst [vmem:[#allocation94_spill] sm:$0xff] %v9954_v6  ;;  %12119 = vst [vmem:[#allocation97_spill] sm:$0xff] %v9957_v23  ;;  %v9981_v0 = vsub.f32 %v9764_v60, %v3783_v56  ;;  %v9984_v37 = vsub.f32 %v9781_v41, %v3783_v56  ;;  %v9987_v10 = vsub.f32 %v9803_v50, %v3783_v56  ;;  %v4297_v1 = vmul.f32 1.442695, %v9948_v5  ;;  %v12146_v5 = vld [vmem:[#allocation43_spill] sm:$0xff] }
 0x5c9   : > { %12121 = vst [vmem:[#allocation98_spill] sm:$0xff] %v9960_v9  ;;  %12122 = vst [vmem:[#allocation99_spill] sm:$0xff] %v9963_v14  ;;  %v9996_v39 = vsub.f32 %v12129_v20, %v9924_v51  ;;  %v4309_v60 = vmul.f32 1.442695, %v9951_v54  ;;  %v4321_v41 = vmul.f32 1.442695, %v9954_v6  ;;  %v10002_v50 = vsub.f32 %v12131_v31, %v9924_v51  ;;  %v6575_v3 = vpop.eup %6574 }
 0x5ca   : > { %12123 = vst [vmem:[#allocation102_spill] sm:$0xff] %v9966_v28  ;;  %12124 = vst [vmem:[#allocation103_spill] sm:$0xff] %v9969_v27  ;;  %v10006_v56 = vadd.f32 %v12067_v44, %v9577_v17  ;;  %6576 = vpow2.f32 %v4273_v7  ;;  %v4333_v48 = vmul.f32 1.442695, %v9957_v23  ;;  %v4345_v49 = vmul.f32 1.442695, %v9960_v9 }
 0x5cb   : > { %12125 = vst [vmem:[#allocation104_spill] sm:$0xff] %v9972_v57  ;;  %12126 = vst [vmem:[#allocation107_spill] sm:$0xff] %v9975_v36  ;;  %v10011_v40 = vmul.f32 1.442695, %v9963_v14  ;;  %v4724_v30 = vmul.f32 0.6931472, %v6575_v3  ;;  %6578 = vpow2.f32 %v4285_v29 }
 0x5cc   : > { %12127 = vst [vmem:[#allocation48_spill] sm:$0xff] %v9978_v55  ;;  %12128 = vst [vmem:[#allocation51_spill] sm:$0xff] %v9989_v53  ;;  %v10014_v25 = vmul.f32 1.442695, %v9966_v28  ;;  %v10017_v45 = vmul.f32 1.442695, %v9969_v27  ;;  %6580 = vpow2.f32 %v4297_v1 }
 0x5cd   : > { %12130 = vst [vmem:[#allocation62_spill] sm:$0xff] %v9996_v39  ;;  %12132 = vst [vmem:[#allocation63_spill] sm:$0xff] %v10002_v50  ;;  %v10020_v17 = vmul.f32 1.442695, %v9972_v57  ;;  %v10023_v7 = vmul.f32 1.442695, %v9975_v36  ;;  %v4756_v47 = vsub.f32 %v12135_v61, %v4724_v30  ;;  %6582 = vpow2.f32 %v4309_v60 }
 0x5ce   : > { %v10026_v20 = vmul.f32 1.442695, %v9978_v55  ;;  %v12133_v31 = vld [vmem:[#allocation22_spill] sm:$0xff]  ;;  %v12134_v3 = vld [vmem:[#allocation25_spill] sm:$0xff]  ;;  %v12136_v1 = vld [vmem:[#allocation27_spill] sm:$0xff]  ;;  %v10032_v53 = vpop.f32.mrb[193].mxu0  ;;  %6584 = vpow2.f32 %v4321_v41  ;;  %v10096_v41 = vsub.f32 %v9515_v62, %v9924_v51 }
 0x5cf   : > { %v4744_v29 = vsub.f32 %v12133_v31, %v4724_v30  ;;  %v4750_v12 = vsub.f32 %v12134_v3, %v4724_v30  ;;  %v4762_v4 = vsub.f32 %v12136_v1, %v4724_v30  ;;  %12137 = vst [vmem:[#allocation95_spill] sm:$0xff] %v10032_v53  ;;  %v12138_v57 = vld [vmem:[#allocation29_spill] sm:$0xff]  ;;  %v12139_v27 = vld [vmem:[#allocation31_spill] sm:$0xff]  ;;  %v10038_v31 = vpop.f32.mrb[194].mxu0  ;;  %4948 = vst [vmem:[%s9552_s30 + $0x78] sm:$0xff] %v4756_v47  ;;  %6586 = vpow2.f32 %v4333_v48 }
 0x5d0   : > { %v4768_v36 = vsub.f32 %v12138_v57, %v4724_v30  ;;  %v4774_v28 = vsub.f32 %v12139_v27, %v4724_v30  ;;  %v12140_v14 = vld [vmem:[#allocation33_spill] sm:$0xff]  ;;  %v12141_v9 = vld [vmem:[#allocation35_spill] sm:$0xff]  ;;  %12142 = vst [vmem:[#allocation105_spill] sm:$0xff] %v10038_v31  ;;  %v4810_v57 = vsub.f32 %v12146_v5, %v4724_v30  ;;  %12165 = vst [vmem:[#allocation38_spill] sm:$0xff] %v10096_v41  ;;  %6588 = vpow2.f32 %v4345_v49 }
 0x5d1   : > { %v4780_v55 = vsub.f32 %v12140_v14, %v4724_v30  ;;  %v4786_v23 = vsub.f32 %v12141_v9, %v4724_v30  ;;  %v12143_v3 = vld [vmem:[#allocation37_spill] sm:$0xff]  ;;  %v12144_v61 = vld [vmem:[#allocation39_spill] sm:$0xff]  ;;  %4936 = vst [vmem:[%s9552_s30 + $0x18] sm:$0xff] %v4744_v29  ;;  %4942 = vst [vmem:[%s9552_s30 + $0x48] sm:$0xff] %v4750_v12  ;;  %v10048_v9 = vpop.f32.mrb[195].mxu0  ;;  %6590 = vpow2.f32 %v10011_v40  ;;  %v10123_v49 = vsub.f32 %v9768_v26, %v9924_v51 }
 0x5d2   : > { %v4792_v6 = vsub.f32 %v12143_v3, %v4724_v30  ;;  %v4798_v1 = vsub.f32 %v12144_v61, %v4724_v30  ;;  %v12145_v54 = vld [vmem:[#allocation41_spill] sm:$0xff]  ;;  %4954 = vst [vmem:[%s9552_s30 + $0xa8] sm:$0xff] %v4762_v4  ;;  %12147 = vst [vmem:[#allocation18_spill] sm:$0xff] %v10048_v9  ;;  %v12149_v3 = vld [vmem:[#allocation47_spill] sm:$0xff]  ;;  %v4828_v61 = vsub.f32 %v12150_v38, %v4724_v30  ;;  %v10058_v47 = vpop.f32.mrb[196].mxu0  ;;  %6592 = vpow2.f32 %v10014_v25 }
 0x5d3   : > { %v4804_v53 = vsub.f32 %v12145_v54, %v4724_v30  ;;  %v12148_v14 = vld [vmem:[#allocation45_spill] sm:$0xff]  ;;  %v4822_v31 = vsub.f32 %v12149_v3, %v4724_v30  ;;  %v4834_v54 = vsub.f32 %v12151_v2, %v4724_v30  ;;  %4960 = vst [vmem:[%s9552_s30 + $0xd8] sm:$0xff] %v4768_v36  ;;  %4966 = vst [vmem:[%s9552_s30 + $0x108] sm:$0xff] %v4774_v28  ;;  %v4429_v4 = vmul.f32 1.442695, %v9981_v0  ;;  %v10070_v5 = vpop.f32.mrb[197].mxu0 }
 0x5d4   : > { %v4816_v27 = vsub.f32 %v12148_v14, %v4724_v30  ;;  %4972 = vst [vmem:[%s9552_s30 + $0x138] sm:$0xff] %v4780_v55  ;;  %4978 = vst [vmem:[%s9552_s30 + $0x168] sm:$0xff] %v4786_v23  ;;  %v4441_v12 = vmul.f32 1.442695, %v9984_v37  ;;  %v12153_v2 = vld [vmem:[#allocation65_spill] sm:$0xff]  ;;  %v12158_v28 = vld [vmem:[#allocation127_spill] sm:$0xff]  ;;  %v6577_v14 = vpop.eup %6576  ;;  %v10133_v40 = vsub.f32 %v9809_v59, %v9924_v51  ;;  %6594 = vpow2.f32 %v10017_v45 }
 0x5d5   : > { %12152 = vst [vmem:[#allocation23_spill] sm:$0xff] %v10058_v47  ;;  %4984 = vst [vmem:[%s9552_s30 + $0x198] sm:$0xff] %v4792_v6  ;;  %v10068_v38 = vsub.f32 %v12153_v2, %v9924_v51  ;;  %v12156_v6 = vld [vmem:[#allocation19_spill] sm:$0xff]  ;;  %v10082_v36 = vsub.f32 %v12158_v28, %v9924_v51  ;;  %v10088_v60 = vpop.f32.mrb[198].mxu0  ;;  %v12163_v30 = vld [vmem:[#allocation106_spill] sm:$0xff]  ;;  %v6579_v2 = vpop.eup %6578  ;;  %6596 = vpow2.f32 %v10020_v17 }
 0x5d6   : > { %4990 = vst [vmem:[%s9552_s30 + $0x1c8] sm:$0xff] %v4798_v1  ;;  %4996 = vst [vmem:[%s9552_s30 + $0x1f8] sm:$0xff] %v4804_v53  ;;  %v10078_v23 = vsub.f32 %v12156_v6, %v9924_v51  ;;  %v12160_v55 = vld [vmem:[#allocation91_spill] sm:$0xff]  ;;  %v10092_v29 = vsub.f32 %v12163_v30, %v9924_v51  ;;  %v6581_v30 = vpop.eup %6580  ;;  %v4289_v26 = vmul.f32 1.442695, %v10002_v50  ;;  %6598 = vpow2.f32 %v10023_v7 }
 0x5d7   : > { %5002 = vst [vmem:[%s9552_s30 + $0x228] sm:$0xff] %v4810_v57  ;;  %12154 = vst [vmem:[#allocation24_spill] sm:$0xff] %v10068_v38  ;;  %v10086_v53 = vsub.f32 %v12160_v55, %v9924_v51  ;;  %v10102_v57 = vpop.f32.mrb[199].mxu0  ;;  %v12171_v48 = vld [vmem:[#allocation79_spill] sm:$0xff]  ;;  %v10127_v55 = vsub.f32 %v9785_v15, %v9924_v51  ;;  %v4361_v45 = vmul.f32 1.442695, %v10096_v41  ;;  %6600 = vpow2.f32 %v10026_v20 }
 0x5d8   : > { %12155 = vst [vmem:[#allocation17_spill] sm:$0xff] %v10070_v5  ;;  %5008 = vst [vmem:[%s9552_s30 + $0x258] sm:$0xff] %v4816_v27  ;;  %v12169_v27 = vld [vmem:[#allocation76_spill] sm:$0xff]  ;;  %v12175_v6 = vld [vmem:[#allocation119_spill] sm:$0xff]  ;;  %v4313_v25 = vmul.f32 1.442695, %v10078_v23  ;;  %6602 = vpow2.f32 %v4429_v4 }
 0x5d9   : > { %5014 = vst [vmem:[%s9552_s30 + $0x288] sm:$0xff] %v4822_v31  ;;  %5020 = vst [vmem:[%s9552_s30 + $0x2b8] sm:$0xff] %v4828_v61  ;;  %v12166_v31 = vld [vmem:[#allocation68_spill] sm:$0xff]  ;;  %v10106_v3 = vsub.f32 %v12169_v27, %v9924_v51  ;;  %v10110_v61 = vsub.f32 %v12171_v48, %v9924_v51  ;;  %v10119_v28 = vsub.f32 %v12175_v6, %v9924_v51  ;;  %v4277_v48 = vmul.f32 1.442695, %v9996_v39 }
 0x5da   : > { %5026 = vst [vmem:[%s9552_s30 + $0x2e8] sm:$0xff] %v4834_v54  ;;  %12157 = vst [vmem:[#allocation28_spill] sm:$0xff] %v10078_v23  ;;  %v10100_v1 = vsub.f32 %v12166_v31, %v9924_v51  ;;  %v12173_v54 = vld [vmem:[#allocation83_spill] sm:$0xff]  ;;  %v4453_v31 = vmul.f32 1.442695, %v9987_v10  ;;  %v4591_v27 = vadd.f32 %v6579_v2, %v6577_v14  ;;  %v10142_v14 = vpop.f32.mrb[200].mxu0  ;;  %6604 = vpow2.f32 %v4441_v12 }
 0x5db   : > { %12159 = vst [vmem:[#allocation30_spill] sm:$0xff] %v10082_v36  ;;  %12161 = vst [vmem:[#allocation32_spill] sm:$0xff] %v10086_v53  ;;  %v10114_v62 = vsub.f32 %v12173_v54, %v9924_v51  ;;  %v4301_v54 = vmul.f32 1.442695, %v10068_v38  ;;  %v4325_v6 = vmul.f32 1.442695, %v10082_v36 }
 0x5dc   : > { %12162 = vst [vmem:[#allocation34_spill] sm:$0xff] %v10088_v60  ;;  %12164 = vst [vmem:[#allocation36_spill] sm:$0xff] %v10092_v29  ;;  %v4592_v15 = vadd.f32 %v6581_v30, %v4591_v27  ;;  %v4337_v59 = vmul.f32 1.442695, %v10086_v53  ;;  %v4349_v51 = vmul.f32 1.442695, %v10092_v29  ;;  %v6583_v27 = vpop.eup %6582  ;;  %6606 = vpow2.f32 %v4453_v31 }
 0x5dd   : > { %12167 = vst [vmem:[#allocation40_spill] sm:$0xff] %v10100_v1  ;;  %12168 = vst [vmem:[#allocation42_spill] sm:$0xff] %v10102_v57  ;;  %v10150_v2 = vmul.f32 1.442695, %v10100_v1  ;;  %v10153_v17 = vmul.f32 1.442695, %v10106_v3  ;;  %v6585_v20 = vpop.eup %6584  ;;  %6608 = vpow2.f32 %v4277_v48 }
 0x5de   : > { %12170 = vst [vmem:[#allocation44_spill] sm:$0xff] %v10106_v3  ;;  %12172 = vst [vmem:[#allocation46_spill] sm:$0xff] %v10110_v61  ;;  %v10156_v30 = vmul.f32 1.442695, %v10110_v61  ;;  %v10159_v7 = vmul.f32 1.442695, %v10114_v62  ;;  %v4593_v1 = vadd.f32 %v6583_v27, %v4592_v15  ;;  %6610 = vpow2.f32 %v4289_v26 }
 0x5df   : > { %12174 = vst [vmem:[#allocation49_spill] sm:$0xff] %v10114_v62  ;;  %12176 = vst [vmem:[#allocation52_spill] sm:$0xff] %v10119_v28  ;;  %v10162_v29 = vmul.f32 1.442695, %v10119_v28  ;;  %v10165_v41 = vmul.f32 1.442695, %v10123_v49  ;;  %v6587_v62 = vpop.eup %6586  ;;  %6612 = vpow2.f32 %v4301_v54 }
 0x5e0   : > { %12177 = vst [vmem:[#allocation108_spill] sm:$0xff] %v10123_v49  ;;  %12178 = vst [vmem:[#allocation111_spill] sm:$0xff] %v10127_v55  ;;  %v10168_v3 = vmul.f32 1.442695, %v10127_v55  ;;  %v12181_v61 = vld [vmem:[#allocation56_spill] sm:$0xff]  ;;  %v10174_v4 = vpop.f32.mrb[201].mxu0  ;;  %v4594_v55 = vadd.f32 %v6585_v20, %v4593_v1  ;;  %6614 = vpow2.f32 %v4313_v25  ;;  %v10240_v25 = vsub.f32 %v9795_v46, %v9926_v22 }
 0x5e1   : > { %12179 = vst [vmem:[#allocation112_spill] sm:$0xff] %v10133_v40  ;;  %12180 = vst [vmem:[#allocation114_spill] sm:$0xff] %v10142_v14  ;;  %v10172_v53 = vsub.f32 %v12181_v61, %v9926_v22  ;;  %v12184_v28 = vld [vmem:[#allocation60_spill] sm:$0xff]  ;;  %v12186_v49 = vld [vmem:[#allocation66_spill] sm:$0xff]  ;;  %v10188_v27 = vpop.f32.mrb[202].mxu0  ;;  %v6589_v61 = vpop.eup %6588  ;;  %6616 = vpow2.f32 %v4325_v6 }
 0x5e2   : > { %12183 = vst [vmem:[#allocation54_spill] sm:$0xff] %v10174_v4  ;;  %v10178_v36 = vsub.f32 %v12184_v28, %v9926_v22  ;;  %v10182_v23 = vsub.f32 %v12186_v49, %v9926_v22  ;;  %v12188_v12 = vld [vmem:[#allocation72_spill] sm:$0xff]  ;;  %12190 = vst [vmem:[#allocation126_spill] sm:$0xff] %v10188_v27  ;;  %v12191_v38 = vld [vmem:[#allocation73_spill] sm:$0xff]  ;;  %v10198_v39 = vpop.f32.mrb[203].mxu0  ;;  %v6591_v49 = vpop.eup %6590  ;;  %v4595_v14 = vadd.f32 %v6587_v62, %v4594_v55  ;;  %6618 = vpow2.f32 %v4337_v59 }
 0x5e3   : > { %12182 = vst [vmem:[#allocation139_spill] sm:$0xff] %v10172_v53  ;;  %v10186_v15 = vsub.f32 %v12188_v12, %v9926_v22  ;;  %v10192_v31 = vsub.f32 %v12191_v38, %v9926_v22  ;;  %v12193_v28 = vld [vmem:[#allocation96_spill] sm:$0xff]  ;;  %12195 = vst [vmem:[#allocation55_spill] sm:$0xff] %v10198_v39  ;;  %v12196_v12 = vld [vmem:[#allocation109_spill] sm:$0xff]  ;;  %v10212_v20 = vpop.f32.mrb[204].mxu0  ;;  %v10230_v62 = vsub.f32 %v9711_v11, %v9926_v22  ;;  %6620 = vpow2.f32 %v4349_v51 }
 0x5e4   : > { %12185 = vst [vmem:[#allocation58_spill] sm:$0xff] %v10178_v36  ;;  %12187 = vst [vmem:[#allocation64_spill] sm:$0xff] %v10182_v23  ;;  %v10196_v50 = vsub.f32 %v12193_v28, %v9926_v22  ;;  %v10202_v4 = vsub.f32 %v12196_v12, %v9926_v22  ;;  %v12198_v27 = vld [vmem:[#allocation113_spill] sm:$0xff]  ;;  %v12200_v48 = vld [vmem:[#allocation70_spill] sm:$0xff]  ;;  %v6593_v28 = vpop.eup %6592  ;;  %v10222_v60 = vpop.f32.mrb[205].mxu0  ;;  %6622 = vpow2.f32 %v4361_v45 }
 0x5e5   : > { %12189 = vst [vmem:[#allocation138_spill] sm:$0xff] %v10186_v15  ;;  %12192 = vst [vmem:[#allocation90_spill] sm:$0xff] %v10192_v31  ;;  %v10206_v1 = vsub.f32 %v12198_v27, %v9926_v22  ;;  %v10210_v38 = vsub.f32 %v12200_v48, %v9926_v22  ;;  %v12203_v39 = vld [vmem:[#allocation77_spill] sm:$0xff]  ;;  %v12205_v12 = vld [vmem:[#allocation80_spill] sm:$0xff]  ;;  %v6595_v27 = vpop.eup %6594  ;;  %v10236_v55 = vpop.f32.mrb[206].mxu0  ;;  %6624 = vpow2.f32 %v10150_v2 }
 0x5e6   : > { %12194 = vst [vmem:[#allocation101_spill] sm:$0xff] %v10196_v50  ;;  %12197 = vst [vmem:[#allocation59_spill] sm:$0xff] %v10202_v4  ;;  %v10216_v26 = vsub.f32 %v12203_v39, %v9926_v22  ;;  %v10220_v57 = vsub.f32 %v12205_v12, %v9926_v22  ;;  %v12208_v48 = vld [vmem:[#allocation85_spill] sm:$0xff]  ;;  %v10234_v39 = vsub.f32 %v9772_v21, %v9926_v22  ;;  %v6597_v54 = vpop.eup %6596  ;;  %v4457_v21 = vmul.f32 1.442695, %v10133_v40 }
 0x5e7   : > { %12199 = vst [vmem:[#allocation22_spill] sm:$0xff] %v10206_v1  ;;  %12201 = vst [vmem:[#allocation25_spill] sm:$0xff] %v10210_v38  ;;  %v10226_v5 = vsub.f32 %v12208_v48, %v9926_v22  ;;  %v4596_v12 = vadd.f32 %v6589_v61, %v4595_v14  ;;  %v10244_v48 = vsub.f32 %v9813_v8, %v9926_v22  ;;  %v6599_v11 = vpop.eup %6598  ;;  %v10252_v46 = vmul.f32 1.442695, %v10182_v23 }
 0x5e8   : > { %12202 = vst [vmem:[#allocation26_spill] sm:$0xff] %v10212_v20  ;;  %12204 = vst [vmem:[#allocation27_spill] sm:$0xff] %v10216_v26  ;;  %v4275_v20 = vmul.f32 1.442695, %v10172_v53  ;;  %v6601_v14 = vpop.eup %6600  ;;  %v10255_v61 = vmul.f32 1.442695, %v10186_v15  ;;  %6626 = vpow2.f32 %v10153_v17 }
 0x5e9   : > { %12206 = vst [vmem:[#allocation29_spill] sm:$0xff] %v10220_v57  ;;  %12207 = vst [vmem:[#allocation31_spill] sm:$0xff] %v10222_v60  ;;  %v10246_v60 = vpop.f32.mrb[207].mxu0  ;;  %v4597_v6 = vadd.f32 %v6591_v49, %v4596_v12  ;;  %v6603_v8 = vpop.eup %6602  ;;  %v10258_v22 = vmul.f32 1.442695, %v10192_v31  ;;  %6628 = vpow2.f32 %v10156_v30  ;;  %v12218_v30 = vld [vmem:[#allocation61_spill] sm:$0xff] }
 0x5ea   : > { %12209 = vst [vmem:[#allocation33_spill] sm:$0xff] %v10226_v5  ;;  %12210 = vst [vmem:[#allocation35_spill] sm:$0xff] %v10230_v62  ;;  %v10261_v59 = vmul.f32 1.442695, %v10196_v50  ;;  %v10270_v49 = vmul.f32 1.442695, %v10206_v1  ;;  %6630 = vpow2.f32 %v10159_v7 }
 0x5eb   : > { %12211 = vst [vmem:[#allocation37_spill] sm:$0xff] %v10234_v39  ;;  %12212 = vst [vmem:[#allocation39_spill] sm:$0xff] %v10236_v55  ;;  %v4287_v55 = vmul.f32 1.442695, %v10178_v36  ;;  %v10266_v36 = vpop.eup %6604  ;;  %v4598_v51 = vadd.f32 %v6593_v28, %v4597_v6  ;;  %v10273_v12 = vmul.f32 1.442695, %v10210_v38  ;;  %6632 = vpow2.f32 %v10162_v29 }
 0x5ec   : > { %12213 = vst [vmem:[#allocation41_spill] sm:$0xff] %v10240_v25  ;;  %12214 = vst [vmem:[#allocation43_spill] sm:$0xff] %v10246_v60  ;;  %v10264_v60 = vmul.f32 1.442695, %v10202_v4  ;;  %v10275_v45 = vpop.eup %6606  ;;  %v10279_v50 = vmul.f32 1.442695, %v10216_v26  ;;  %6634 = vpow2.f32 %v10165_v41 }
 0x5ed   : > { %v10282_v4 = vmul.f32 1.442695, %v10220_v57  ;;  %v10285_v28 = vmul.f32 1.442695, %v10226_v5  ;;  %v6609_v2 = vpop.eup %6608  ;;  %v4599_v6 = vadd.f32 %v6595_v27, %v4598_v51  ;;  %v10289_v38 = vmul.f32 1.442695, %v10230_v62 }
 0x5ee   : > { %v10292_v1 = vmul.f32 1.442695, %v10234_v39  ;;  %v10294_v17 = vpop.f32.mrb[208].mxu0  ;;  %v6611_v26 = vpop.eup %6610  ;;  %v10298_v57 = vmul.f32 1.442695, %v10240_v25  ;;  %v12216_v5 = vld [vmem:[#allocation57_spill] sm:$0xff]  ;;  %v10306_v27 = vsub.f32 %v12218_v30, %v9928_v58  ;;  %6636 = vpow2.f32 %v10168_v3 }
 0x5ef   : > { %12215 = vst [vmem:[#allocation45_spill] sm:$0xff] %v10294_v17  ;;  %v10302_v31 = vsub.f32 %v12216_v5, %v9928_v58  ;;  %v10308_v51 = vpop.f32.mrb[209].mxu0  ;;  %v6613_v39 = vpop.eup %6612  ;;  %v4600_v62 = vadd.f32 %v6597_v54, %v4599_v6  ;;  %v4633_v17 = vadd.f32 %v6611_v26, %v6609_v2  ;;  %v12221_v7 = vld [vmem:[#allocation67_spill] sm:$0xff]  ;;  %v12224_v5 = vld [vmem:[#allocation20_spill] sm:$0xff]  ;;  %v12231_v41 = vld [vmem:[#allocation110_spill] sm:$0xff]  ;;  %6638 = vpow2.f32 %v4457_v21 }
 0x5f0   : > { %12219 = vst [vmem:[#allocation50_spill] sm:$0xff] %v10306_v27  ;;  %12220 = vst [vmem:[#allocation53_spill] sm:$0xff] %v10308_v51  ;;  %v10313_v15 = vsub.f32 %v12221_v7, %v9928_v58  ;;  %v10315_v25 = vpop.f32.mrb[210].mxu0  ;;  %v6615_v23 = vpop.eup %6614  ;;  %v10320_v30 = vsub.f32 %v12224_v5, %v9928_v58  ;;  %v12226_v51 = vld [vmem:[#allocation21_spill] sm:$0xff]  ;;  %v12228_v29 = vld [vmem:[#allocation100_spill] sm:$0xff]  ;;  %6640 = vpow2.f32 %v4275_v20 }
 0x5f1   : > { %12217 = vst [vmem:[#allocation47_spill] sm:$0xff] %v10302_v31  ;;  %12223 = vst [vmem:[#allocation19_spill] sm:$0xff] %v10315_v25  ;;  %v10324_v53 = vsub.f32 %v12226_v51, %v9928_v58  ;;  %v10328_v26 = vsub.f32 %v12228_v29, %v9928_v58  ;;  %v10330_v54 = vpop.f32.mrb[211].mxu0  ;;  %v6617_v2 = vpop.eup %6616  ;;  %v4601_v6 = vadd.f32 %v6599_v11, %v4600_v62  ;;  %v12233_v51 = vld [vmem:[#allocation115_spill] sm:$0xff]  ;;  %v12235_v29 = vld [vmem:[#allocation74_spill] sm:$0xff]  ;;  %6642 = vpow2.f32 %v4287_v55 }
 0x5f2   : > { %12222 = vst [vmem:[#allocation65_spill] sm:$0xff] %v10313_v15  ;;  %12225 = vst [vmem:[#allocation127_spill] sm:$0xff] %v10320_v30  ;;  %v4634_v7 = vadd.f32 %v6613_v39, %v4633_v17  ;;  %v10335_v25 = vsub.f32 %v12231_v41, %v9928_v58  ;;  %v6619_v5 = vpop.eup %6618  ;;  %v10339_v40 = vsub.f32 %v12233_v51, %v9928_v58  ;;  %v12239_v17 = vld [vmem:[#allocation81_spill] sm:$0xff]  ;;  %6644 = vpow2.f32 %v10252_v46 }
 0x5f3   : > { %12227 = vst [vmem:[#allocation91_spill] sm:$0xff] %v10324_v53  ;;  %12229 = vst [vmem:[#allocation106_spill] sm:$0xff] %v10328_v26  ;;  %v10343_v47 = vsub.f32 %v12235_v29, %v9928_v58  ;;  %v6621_v3 = vpop.eup %6620  ;;  %v4602_v39 = vadd.f32 %v6601_v14, %v4601_v6  ;;  %v10351_v41 = vsub.f32 %v12239_v17, %v9928_v58  ;;  %v12241_v51 = vld [vmem:[#allocation117_spill] sm:$0xff]  ;;  %6646 = vpow2.f32 %v10255_v61 }
 0x5f4   : > { %12230 = vst [vmem:[#allocation68_spill] sm:$0xff] %v10330_v54  ;;  %12232 = vst [vmem:[#allocation76_spill] sm:$0xff] %v10335_v25  ;;  %v12237_v54 = vld [vmem:[#allocation78_spill] sm:$0xff]  ;;  %v4635_v11 = vadd.f32 %v6615_v23, %v4634_v7  ;;  %v6623_v21 = vpop.eup %6622  ;;  %v10355_v9 = vsub.f32 %v12241_v51, %v9928_v58  ;;  %v10359_v29 = vsub.f32 %v9717_v24, %v9928_v58  ;;  %v10365_v23 = vpop.f32.mrb[212].mxu0  ;;  %v10376_v24 = vmul.f32 1.442695, %v10244_v48 }
 0x5f5   : > { %12234 = vst [vmem:[#allocation79_spill] sm:$0xff] %v10339_v40  ;;  %12236 = vst [vmem:[#allocation83_spill] sm:$0xff] %v10343_v47  ;;  %v10347_v62 = vsub.f32 %v12237_v54, %v9928_v58  ;;  %v10363_v54 = vsub.f32 %v9776_v42, %v9928_v58  ;;  %v6625_v20 = vpop.eup %6624  ;;  %v4603_v14 = vadd.f32 %v6603_v8, %v4602_v39  ;;  %v10372_v7 = vpop.f32.mrb[213].mxu0  ;;  %v10383_v8 = vmul.f32 1.442695, %v10302_v31 }
 0x5f6   : > { %12240 = vst [vmem:[#allocation56_spill] sm:$0xff] %v10351_v41  ;;  %12242 = vst [vmem:[#allocation60_spill] sm:$0xff] %v10355_v9  ;;  %v4636_v6 = vadd.f32 %v6617_v2, %v4635_v11  ;;  %v10370_v55 = vsub.f32 %v9799_v43, %v9928_v58  ;;  %v6627_v17 = vpop.eup %6626  ;;  %v10380_v42 = vsub.f32 %v9821_v13, %v9928_v58  ;;  %v10385_v46 = vpop.f32.mrb[214].mxu0  ;;  %6648 = vpow2.f32 %v10258_v22 }
 0x5f7   : > { %12238 = vst [vmem:[#allocation119_spill] sm:$0xff] %v10347_v62  ;;  %12243 = vst [vmem:[#allocation66_spill] sm:$0xff] %v10359_v29  ;;  %v6629_v2 = vpop.eup %6628  ;;  %v4604_v43 = vadd.f32 %v10266_v36, %v4603_v14  ;;  %v10390_v61 = vmul.f32 1.442695, %v10306_v27  ;;  %v10392_v11 = vpop.f32.mrb[215].mxu0  ;;  %6650 = vpow2.f32 %v10261_v59 }
 0x5f8   : > { %12244 = vst [vmem:[#allocation72_spill] sm:$0xff] %v10363_v54  ;;  %12245 = vst [vmem:[#allocation73_spill] sm:$0xff] %v10370_v55  ;;  %v4637_v39 = vadd.f32 %v6619_v5, %v4636_v6  ;;  %v6631_v51 = vpop.eup %6630  ;;  %v10396_v13 = vmul.f32 1.442695, %v10313_v15  ;;  %v10399_v58 = vmul.f32 1.442695, %v10320_v30  ;;  %6652 = vpow2.f32 %v10264_v60 }
 0x5f9   : > { %12246 = vst [vmem:[#allocation96_spill] sm:$0xff] %v10380_v42  ;;  %12247 = vst [vmem:[#allocation109_spill] sm:$0xff] %v10392_v11  ;;  %v10402_v31 = vmul.f32 1.442695, %v10324_v53  ;;  %v10404_v36 = vpop.eup %6632  ;;  %v4605_v22 = vadd.f32 %v10275_v45, %v4604_v43  ;;  %v10409_v14 = vmul.f32 1.442695, %v10328_v26  ;;  %6654 = vpow2.f32 %v10270_v49 }
 0x5fa   : > { %v4638_v5 = vadd.f32 %v6621_v3, %v4637_v39  ;;  %v10411_v59 = vpop.eup %6634  ;;  %v10415_v6 = vmul.f32 1.442695, %v10335_v25  ;;  %v10418_v11 = vmul.f32 1.442695, %v10339_v40  ;;  %v10421_v53 = vmul.f32 1.442695, %v10343_v47 }
 0x5fb   : > { %v10423_v45 = vpop.eup %6636  ;;  %v4606_v3 = vrot.slane %v4605_v22, 4  ;;  %6656 = vpow2.f32 %v10273_v12  ;;  %v10427_v43 = vmul.f32 1.442695, %v10347_v62  ;;  %v10433_v49 = vmul.f32 1.442695, %v10351_v41  ;;  %v10445_v62 = vpop.f32.mrb[216].mxu0 }
 0x5fc   : > { %v4639_v60 = vadd.f32 %v6623_v21, %v4638_v5  ;;  %v10429_v39 = vpop.eup %6638  ;;  %6658 = vpow2.f32 %v10279_v50  ;;  %v10436_v40 = vmul.f32 1.442695, %v10355_v9  ;;  %v10439_v47 = vmul.f32 1.442695, %v10359_v29  ;;  %12248 = vst [vmem:[#allocation113_spill] sm:$0xff] %v10445_v62 }
 0x5fd   : > { %v6641_v25 = vpop.eup %6640  ;;  %v4607_v21 = vadd.f32 %v4606_v3, %v4605_v22  ;;  %6660 = vpow2.f32 %v10282_v4  ;;  %v10443_v12 = vmul.f32 1.442695, %v10363_v54  ;;  %v10449_v41 = vmul.f32 1.442695, %v10370_v55 }
 0x5fe   : > { %v4640_v5 = vadd.f32 %v6625_v20, %v4639_v60  ;;  %v6643_v50 = vpop.eup %6642  ;;  %6662 = vpow2.f32 %v10285_v28  ;;  %v3725_v29 = vmax.f32 %v9918_v33, %v9935_v16  ;;  %v3746_v22 = vmax.f32 %v9931_v18, %v9939_v52  ;;  %v10455_v20 = vpop.f32.mrb[217].mxu0  ;;  %v12251_v33 = vld [vmem:[#allocation69_spill] sm:$0xff]  ;;  %v12252_v18 = vld [vmem:[#allocation71_spill] sm:$0xff] }
 0x5ff   : > { %12249 = vst [vmem:[#allocation70_spill] sm:$0xff] %v10455_v20  ;;  %v6645_v4 = vpop.eup %6644  ;;  %v4608_v3 = vrot.slane %v4607_v21, 2  ;;  %v4612_v54 = vadd.f32 %v6643_v50, %v6641_v25  ;;  %v10458_v62 = vmul.f32 1.442695, %v10380_v42  ;;  %v10460_v9 = vpop.f32.mrb[218].mxu0  ;;  %6664 = vpow2.f32 %v10289_v38 }
 0x600   : > { %v4641_v60 = vadd.f32 %v6627_v17, %v4640_v5  ;;  %12250 = vst [vmem:[#allocation77_spill] sm:$0xff] %v10460_v9  ;;  %v6647_v28 = vpop.eup %6646  ;;  %v3726_v55 = vmax.f32 %v3725_v29, %v10006_v56  ;;  %v10466_v26 = vadd.f32 %v12069_v63, %v12251_v33  ;;  %v10470_v20 = vadd.f32 %v12067_v44, %v12252_v18  ;;  %v10472_v17 = vpop.f32.mrb[219].mxu0  ;;  %v12254_v33 = vld [vmem:[#allocation75_spill] sm:$0xff] }
 0x601   : > { %12253 = vst [vmem:[#allocation80_spill] sm:$0xff] %v10472_v17  ;;  %v6649_v25 = vpop.eup %6648  ;;  %v4609_v5 = vadd.f32 %v4608_v3, %v4607_v21  ;;  %6666 = vpow2.f32 %v10292_v1  ;;  %v4613_v9 = vadd.f32 %v6645_v4, %v4612_v54  ;;  %v10480_v30 = vadd.f32 %v12069_v63, %v12254_v33 }
 0x602   : > { %v4642_v50 = vadd.f32 %v6629_v2, %v4641_v60  ;;  %v6651_v42 = vpop.eup %6650  ;;  %6668 = vpow2.f32 %v10298_v57  ;;  %v3747_v38 = vmax.f32 %v3746_v22, %v10466_v26  ;;  %v3727_v29 = vmax.f32 %v3726_v55, %v10470_v20  ;;  %v12255_v57 = vld [vmem:[#allocation82_spill] sm:$0xff]  ;;  %v12256_v55 = vld [vmem:[#allocation84_spill] sm:$0xff]  ;;  %v10493_v22 = vpop.f32.mrb[220].mxu0 }
 0x603   : > { %v6653_v18 = vpop.eup %6652  ;;  %v4610_v15 = vrot.slane %v4609_v5, 1  ;;  %v4614_v27 = vadd.f32 %v6647_v28, %v4613_v9  ;;  %6670 = vpow2.f32 %v10383_v8  ;;  %v10487_v54 = vadd.f32 %v12067_v44, %v12255_v57 }
 0x604   : > { %v4643_v17 = vadd.f32 %v6631_v51, %v4642_v50  ;;  %v6655_v2 = vpop.eup %6654  ;;  %6672 = vpow2.f32 %v10390_v61  ;;  %v3748_v1 = vmax.f32 %v3747_v38, %v10480_v30  ;;  %v10491_v21 = vadd.f32 %v12069_v63, %v12256_v55  ;;  %v10497_v61 = vpop.f32.mrb[221].mxu0  ;;  %v12258_v50 = vld [vmem:[#allocation116_spill] sm:$0xff] }
 0x605   : > { %v6657_v4 = vpop.eup %6656  ;;  %v4611_v51 = vadd.f32 %v4610_v15, %v4609_v5  ;;  %6674 = vpow2.f32 %v10376_v24  ;;  %v4615_v8 = vadd.f32 %v6649_v25, %v4614_v27  ;;  %12257 = vst [vmem:[#allocation85_spill] sm:$0xff] %v10497_v61  ;;  %v3728_v60 = vmax.f32 %v3727_v29, %v10487_v54  ;;  %v10506_v33 = vpop.f32.mrb[222].mxu0  ;;  %v12262_v29 = vld [vmem:[#allocation120_spill] sm:$0xff] }
 0x606   : > { %v4644_v9 = vadd.f32 %v10404_v36, %v4643_v17  ;;  %v6659_v3 = vpop.eup %6658  ;;  %6676 = vpow2.f32 %v10396_v13  ;;  %v3749_v28 = vmax.f32 %v3748_v1, %v10491_v21  ;;  %v10504_v38 = vadd.f32 %v12067_v44, %v12258_v50  ;;  %12259 = vst [vmem:[#allocation57_spill] sm:$0xff] %v10506_v33  ;;  %v12260_v36 = vld [vmem:[#allocation118_spill] sm:$0xff]  ;;  %v10513_v13 = vpop.f32.mrb[223].mxu0  ;;  %v12278_v33 = vld [vmem:[#allocation107_spill] sm:$0xff] }
 0x607   : > { %v6661_v15 = vpop.eup %6660  ;;  %6678 = vlog2.f32 %v4611_v51  ;;  %v4616_v27 = vadd.f32 %v6651_v42, %v4615_v8  ;;  %v10511_v17 = vadd.f32 %v12069_v63, %v12260_v36  ;;  %12261 = vst [vmem:[#allocation61_spill] sm:$0xff] %v10513_v13  ;;  %v10519_v1 = vadd.f32 %v12067_v44, %v12262_v29  ;;  %v12265_v36 = vld [vmem:[#allocation128_spill] sm:$0xff] }
 0x608   : > { %v4645_v24 = vadd.f32 %v10411_v59, %v4644_v9  ;;  %v6663_v25 = vpop.eup %6662  ;;  %6680 = vpow2.f32 %v10399_v58  ;;  %v3729_v5 = vmax.f32 %v3728_v60, %v10504_v38  ;;  %v10523_v57 = vadd.f32 %v12069_v63, %v9737_v35  ;;  %v12277_v13 = vld [vmem:[#allocation104_spill] sm:$0xff] }
 0x609   : > { %v4617_v59 = vadd.f32 %v6653_v18, %v4616_v27  ;;  %6682 = vpow2.f32 %v10402_v31  ;;  %v3750_v55 = vmax.f32 %v3749_v28, %v10511_v17  ;;  %v10528_v51 = vpop.eup %6664  ;;  %v10534_v9 = vadd.f32 %v12067_v44, %v9747_v32  ;;  %v12264_v27 = vld [vmem:[#allocation124_spill] sm:$0xff] }
 0x60a   : > { %v4646_v42 = vadd.f32 %v10423_v45, %v4645_v24  ;;  %6684 = vpow2.f32 %v10409_v14  ;;  %v3730_v58 = vmax.f32 %v3729_v5, %v10519_v1  ;;  %v10538_v35 = vadd.f32 %v12069_v63, %v9756_v19  ;;  %v12263_v19 = vld [vmem:[#allocation121_spill] sm:$0xff] }
 0x60b   : > { %v10540_v45 = vpop.eup %6666  ;;  %v4618_v18 = vadd.f32 %v6655_v2, %v4617_v59  ;;  %6686 = vpow2.f32 %v10415_v6  ;;  %v3751_v8 = vmax.f32 %v3750_v55, %v10523_v57  ;;  %v10551_v60 = vadd.f32 %v12067_v44, %v9815_v34 }
 0x60c   : > { %v4647_v31 = vadd.f32 %v10429_v39, %v4646_v42  ;;  %v10545_v14 = vpop.eup %6668  ;;  %6688 = vpow2.f32 %v10418_v11  ;;  %v3731_v32 = vmax.f32 %v3730_v58, %v10534_v9  ;;  %v10555_v28 = vadd.f32 %v12069_v63, %v12263_v19  ;;  %v12266_v58 = vld [vmem:[#allocation132_spill] sm:$0xff] }
 0x60d   : > { %v6671_v39 = vpop.eup %6670  ;;  %v4619_v50 = vadd.f32 %v6657_v4, %v4618_v18  ;;  %6690 = vpow2.f32 %v10421_v53  ;;  %v3752_v6 = vmax.f32 %v3751_v8, %v10538_v35  ;;  %v10563_v34 = vadd.f32 %v12067_v44, %v12264_v27  ;;  %v12268_v27 = vld [vmem:[#allocation89_spill] sm:$0xff] }
 0x60e   : > { %v4648_v2 = vrot.slane %v4647_v31, 4  ;;  %v6673_v24 = vpop.eup %6672  ;;  %6692 = vpow2.f32 %v10427_v43  ;;  %v3732_v11 = vmax.f32 %v3731_v32, %v10551_v60  ;;  %v10567_v5 = vadd.f32 %v12069_v63, %v12265_v36 }
 0x60f   : > { %v10569_v29 = vpop.eup %6674  ;;  %v4620_v42 = vadd.f32 %v6659_v3, %v4619_v50  ;;  %6694 = vpow2.f32 %v10433_v49  ;;  %v4654_v53 = vadd.f32 %v6673_v24, %v6671_v39  ;;  %v10574_v43 = vmax.f32 %v3752_v6, %v10555_v28 }
 0x610   : > { %v4649_v4 = vadd.f32 %v4648_v2, %v4647_v31  ;;  %v6677_v59 = vpop.eup %6676  ;;  %6696 = vpow2.f32 %v10436_v40  ;;  %v3733_v55 = vmax.f32 %v3732_v11, %v10563_v34  ;;  %v10579_v18 = vadd.f32 %v12067_v44, %v12266_v58  ;;  %v12267_v11 = vld [vmem:[#allocation88_spill] sm:$0xff] }
 0x611   : > { %v6679_v8 = vpop.eup %6678  ;;  %v4621_v19 = vadd.f32 %v6661_v15, %v4620_v42  ;;  %6698 = vpow2.f32 %v10439_v47  ;;  %v4655_v3 = vadd.f32 %v6677_v59, %v4654_v53  ;;  %v3754_v40 = vmax.f32 %v10574_v43, %v10567_v5  ;;  %v12270_v53 = vld [vmem:[#allocation93_spill] sm:$0xff] }
 0x612   : > { %v4650_v32 = vrot.slane %v4649_v4, 2  ;;  %v6681_v49 = vpop.eup %6680  ;;  %v4730_v31 = vmul.f32 0.6931472, %v6679_v8  ;;  %6700 = vpow2.f32 %v10443_v12  ;;  %v3734_v39 = vmax.f32 %v3733_v55, %v10579_v18  ;;  %v12269_v12 = vld [vmem:[#allocation92_spill] sm:$0xff]  ;;  %v12271_v55 = vld [vmem:[#allocation94_spill] sm:$0xff] }
 0x613   : > { %v6683_v2 = vpop.eup %6682  ;;  %v4622_v6 = vadd.f32 %v6663_v25, %v4621_v19  ;;  %6702 = vpow2.f32 %v10449_v41  ;;  %v4656_v24 = vadd.f32 %v6681_v49, %v4655_v3  ;;  %v12272_v25 = vld [vmem:[#allocation97_spill] sm:$0xff]  ;;  %v12273_v41 = vld [vmem:[#allocation98_spill] sm:$0xff] }
 0x614   : > { %v4651_v50 = vadd.f32 %v4650_v32, %v4649_v4  ;;  %v6685_v15 = vpop.eup %6684  ;;  %v4837_v47 = vsub.f32 %v12267_v11, %v4730_v31  ;;  %v4843_v36 = vsub.f32 %v12268_v27, %v4730_v31  ;;  %v4849_v42 = vsub.f32 %v12269_v12, %v4730_v31  ;;  %v12274_v32 = vld [vmem:[#allocation99_spill] sm:$0xff]  ;;  %v12275_v49 = vld [vmem:[#allocation102_spill] sm:$0xff] }
 0x615   : > { %v4855_v59 = vsub.f32 %v12270_v53, %v4730_v31  ;;  %v6687_v43 = vpop.eup %6686  ;;  %v4861_v4 = vsub.f32 %v12271_v55, %v4730_v31  ;;  %v4867_v58 = vsub.f32 %v12272_v25, %v4730_v31  ;;  %v4873_v8 = vsub.f32 %v12273_v41, %v4730_v31  ;;  %v12276_v27 = vld [vmem:[#allocation103_spill] sm:$0xff]  ;;  %v12279_v41 = vld [vmem:[#allocation48_spill] sm:$0xff] }
 0x616   : > { %v4879_v19 = vsub.f32 %v12274_v32, %v4730_v31  ;;  %v6689_v3 = vpop.eup %6688  ;;  %v4885_v11 = vsub.f32 %v12275_v49, %v4730_v31  ;;  %v4891_v12 = vsub.f32 %v12276_v27, %v4730_v31  ;;  %v4897_v53 = vsub.f32 %v12277_v13, %v4730_v31  ;;  %5029 = vst [vmem:[%s9552_s30 + $0x300] sm:$0xff] %v4837_v47 }
 0x617   : > { %v4903_v55 = vsub.f32 %v12278_v33, %v4730_v31  ;;  %5035 = vst [vmem:[%s9552_s30 + $0x330] sm:$0xff] %v4843_v36  ;;  %5041 = vst [vmem:[%s9552_s30 + $0x360] sm:$0xff] %v4849_v42  ;;  %v6691_v25 = vpop.eup %6690  ;;  %v4909_v32 = vsub.f32 %v12279_v41, %v4730_v31  ;;  %v4915_v49 = vsub.f32 %v9981_v0, %v4730_v31  ;;  %v4652_v47 = vrot.slane %v4651_v50, 1 }
 0x618   : > { %5047 = vst [vmem:[%s9552_s30 + $0x390] sm:$0xff] %v4855_v59  ;;  %v4921_v61 = vsub.f32 %v9984_v37, %v4730_v31  ;;  %v4927_v13 = vsub.f32 %v9987_v10, %v4730_v31  ;;  %5053 = vst [vmem:[%s9552_s30 + $0x3c0] sm:$0xff] %v4861_v4  ;;  %v6693_v33 = vpop.eup %6692  ;;  %v4623_v0 = vadd.f32 %v10528_v51, %v4622_v6  ;;  %v12280_v37 = vld [vmem:[#allocation134_spill] sm:$0xff]  ;;  %v12281_v31 = vld [vmem:[#allocation135_spill] sm:$0xff] }
 0x619   : > { %5059 = vst [vmem:[%s9552_s30 + $0x3f0] sm:$0xff] %v4867_v58  ;;  %5065 = vst [vmem:[%s9552_s30 + $0x420] sm:$0xff] %v4873_v8  ;;  %v4657_v36 = vadd.f32 %v6683_v2, %v4656_v24  ;;  %v10618_v42 = vadd.f32 %v12069_v63, %v12280_v37  ;;  %v6695_v10 = vpop.eup %6694  ;;  %v10626_v59 = vadd.f32 %v12067_v44, %v12281_v31  ;;  %v12282_v4 = vld [vmem:[#allocation136_spill] sm:$0xff]  ;;  %v12283_v8 = vld [vmem:[#allocation51_spill] sm:$0xff] }
 0x61a   : > { %5071 = vst [vmem:[%s9552_s30 + $0x450] sm:$0xff] %v4879_v19  ;;  %5077 = vst [vmem:[%s9552_s30 + $0x480] sm:$0xff] %v4885_v11  ;;  %v10630_v58 = vadd.f32 %v12069_v63, %v12282_v4  ;;  %v10634_v51 = vadd.f32 %v12067_v44, %v12283_v8  ;;  %v12284_v2 = vld [vmem:[#allocation95_spill] sm:$0xff]  ;;  %v6697_v24 = vpop.eup %6696  ;;  %v4653_v19 = vadd.f32 %v4652_v47, %v4651_v50  ;;  %v12290_v31 = vld [vmem:[#allocation17_spill] sm:$0xff] }
 0x61b   : > { %5083 = vst [vmem:[%s9552_s30 + $0x4b0] sm:$0xff] %v4891_v12  ;;  %5089 = vst [vmem:[%s9552_s30 + $0x4e0] sm:$0xff] %v4897_v53  ;;  %v10638_v6 = vadd.f32 %v12069_v63, %v12284_v2  ;;  %v4658_v11 = vadd.f32 %v6685_v15, %v4657_v36  ;;  %v3755_v27 = vmax.f32 %v3754_v40, %v10618_v42  ;;  %v6699_v12 = vpop.eup %6698 }
 0x61c   : > { %5095 = vst [vmem:[%s9552_s30 + $0x510] sm:$0xff] %v4903_v55  ;;  %5101 = vst [vmem:[%s9552_s30 + $0x540] sm:$0xff] %v4909_v32  ;;  %v3735_v53 = vmax.f32 %v3734_v39, %v10626_v59  ;;  %v12286_v55 = vld [vmem:[#allocation105_spill] sm:$0xff]  ;;  %v12287_v32 = vld [vmem:[#allocation18_spill] sm:$0xff]  ;;  %v10655_v50 = vpop.eup %6700  ;;  %6704 = vlog2.f32 %v4653_v19  ;;  %v10667_v4 = vadd.f32 %v12069_v63, %v12290_v31 }
 0x61d   : > { %5107 = vst [vmem:[%s9552_s30 + $0x570] sm:$0xff] %v4915_v49  ;;  %5113 = vst [vmem:[%s9552_s30 + $0x5a0] sm:$0xff] %v4921_v61  ;;  %v4624_v61 = vadd.f32 %v10540_v45, %v4623_v0  ;;  %v10645_v41 = vadd.f32 %v12067_v44, %v12286_v55  ;;  %v10649_v49 = vadd.f32 %v12069_v63, %v12287_v32  ;;  %v10659_v15 = vpop.eup %6702  ;;  %v12294_v55 = vld [vmem:[#allocation42_spill] sm:$0xff]  ;;  %6706 = vpow2.f32 %v10458_v62 }
 0x61e   : > { %5119 = vst [vmem:[%s9552_s30 + $0x5d0] sm:$0xff] %v4927_v13  ;;  %12285 = vst [vmem:[#allocation67_spill] sm:$0xff] %v10638_v6  ;;  %v12289_v13 = vld [vmem:[#allocation23_spill] sm:$0xff]  ;;  %v4659_v40 = vadd.f32 %v6687_v43, %v4658_v11  ;;  %v3756_v39 = vmax.f32 %v3755_v27, %v10630_v58  ;;  %v3736_v47 = vrot.slane %v3735_v53, 4  ;;  %v12292_v43 = vld [vmem:[#allocation34_spill] sm:$0xff]  ;;  %v10678_v32 = vadd.f32 %v12069_v63, %v12294_v55 }
 0x61f   : > { %12288 = vst [vmem:[#allocation20_spill] sm:$0xff] %v10649_v49  ;;  %v10653_v37 = vadd.f32 %v12067_v44, %v12289_v13  ;;  %v4625_v45 = vadd.f32 %v10545_v14, %v4624_v61  ;;  %v3847_v0 = vmax.f32 %v10634_v51, %v10645_v41  ;;  %v3868_v36 = vmax.f32 %v10638_v6, %v10649_v49  ;;  %v12296_v6 = vld [vmem:[#allocation114_spill] sm:$0xff] }
 0x620   : > { %12291 = vst [vmem:[#allocation21_spill] sm:$0xff] %v10667_v4  ;;  %v4660_v2 = vadd.f32 %v6689_v3, %v4659_v40  ;;  %v3757_v14 = vrot.slane %v3756_v39, 4  ;;  %v10672_v19 = vadd.f32 %v12067_v44, %v12292_v43  ;;  %v3737_v61 = vmax.f32 %v3735_v53, %v3736_v47  ;;  %12295 = vst [vmem:[#allocation110_spill] sm:$0xff] %v10678_v32  ;;  %v12298_v40 = vld [vmem:[#allocation54_spill] sm:$0xff] }
 0x621   : > { %v4626_v8 = vadd.f32 %v10569_v29, %v4625_v45  ;;  %v3848_v11 = vmax.f32 %v3847_v0, %v10653_v37  ;;  %v3869_v27 = vmax.f32 %v3868_v36, %v10667_v4  ;;  %v10682_v29 = vadd.f32 %v12067_v44, %v12296_v6  ;;  %v12300_v55 = vld [vmem:[#allocation126_spill] sm:$0xff] }
 0x622   : > { %12293 = vst [vmem:[#allocation100_spill] sm:$0xff] %v10672_v19  ;;  %v4661_v31 = vadd.f32 %v6691_v25, %v4660_v2  ;;  %v3758_v49 = vmax.f32 %v3756_v39, %v3757_v14  ;;  %v3738_v3 = vrot.slane %v3737_v61, 2  ;;  %v10688_v47 = vadd.f32 %v12069_v63, %v12298_v40  ;;  %v12302_v14 = vld [vmem:[#allocation55_spill] sm:$0xff]  ;;  %v12304_v4 = vld [vmem:[#allocation26_spill] sm:$0xff] }
 0x623   : > { %v4627_v13 = vrot.slane %v4626_v8, 4  ;;  %12297 = vst [vmem:[#allocation115_spill] sm:$0xff] %v10682_v29  ;;  %v3849_v45 = vmax.f32 %v3848_v11, %v10672_v19  ;;  %v3870_v53 = vmax.f32 %v3869_v27, %v10678_v32  ;;  %v10692_v25 = vadd.f32 %v12067_v44, %v12300_v55 }
 0x624   : > { %12299 = vst [vmem:[#allocation74_spill] sm:$0xff] %v10688_v47  ;;  %v4662_v36 = vadd.f32 %v6693_v33, %v4661_v31  ;;  %v3759_v43 = vrot.slane %v3758_v49, 2  ;;  %v3739_v39 = vmax.f32 %v3737_v61, %v3738_v3  ;;  %v10698_v11 = vadd.f32 %v12069_v63, %v12302_v14  ;;  %v12306_v31 = vld [vmem:[#allocation31_spill] sm:$0xff] }
 0x625   : > { %v4628_v0 = vadd.f32 %v4627_v13, %v4626_v8  ;;  %12301 = vst [vmem:[#allocation78_spill] sm:$0xff] %v10692_v25  ;;  %v3850_v6 = vmax.f32 %v3849_v45, %v10682_v29  ;;  %v3871_v2 = vmax.f32 %v3870_v53, %v10688_v47  ;;  %v10702_v33 = vadd.f32 %v12067_v44, %v12304_v4 }
 0x626   : > { %12303 = vst [vmem:[#allocation81_spill] sm:$0xff] %v10698_v11  ;;  %v4663_v32 = vadd.f32 %v6695_v10, %v4662_v36  ;;  %v3760_v40 = vmax.f32 %v3758_v49, %v3759_v43  ;;  %v3740_v8 = vrot.slane %v3739_v39, 1  ;;  %v10708_v3 = vadd.f32 %v12069_v63, %v12306_v31  ;;  %v6705_v45 = vpop.eup %6704 }
 0x627   : > { %v4629_v27 = vrot.slane %v4628_v0, 2  ;;  %12305 = vst [vmem:[#allocation117_spill] sm:$0xff] %v10702_v33  ;;  %v3851_v13 = vmax.f32 %v3850_v6, %v10692_v25  ;;  %v3872_v61 = vmax.f32 %v3871_v2, %v10698_v11  ;;  %v4734_v49 = vmul.f32 0.6931472, %v6705_v45  ;;  %v12312_v11 = vld [vmem:[#allocation30_spill] sm:$0xff] }
 0x628   : > { %12307 = vst [vmem:[#allocation69_spill] sm:$0xff] %v10708_v3  ;;  %v4664_v55 = vadd.f32 %v6697_v24, %v4663_v32  ;;  %v3761_v10 = vrot.slane %v3760_v40, 1  ;;  %v3741_v2 = vmax.f32 %v3739_v39, %v3740_v8  ;;  %v12309_v24 = vld [vmem:[#allocation63_spill] sm:$0xff]  ;;  %v12315_v8 = vld [vmem:[#allocation38_spill] sm:$0xff] }
 0x629   : > { %v4630_v53 = vadd.f32 %v4629_v27, %v4628_v0  ;;  %v10712_v36 = vmax.f32 %v3851_v13, %v10702_v33  ;;  %v10715_v4 = vmax.f32 %v3872_v61, %v10708_v3  ;;  %v12308_v0 = vld [vmem:[#allocation62_spill] sm:$0xff]  ;;  %v4845_v32 = vsub.f32 %v12309_v24, %v4734_v49  ;;  %v12310_v27 = vld [vmem:[#allocation24_spill] sm:$0xff]  ;;  %v12319_v33 = vld [vmem:[#allocation49_spill] sm:$0xff] }
 0x62a   : > { %v4665_v6 = vadd.f32 %v6699_v12, %v4664_v55  ;;  %v10717_v14 = vmax.f32 %v3760_v40, %v3761_v10  ;;  %v4839_v62 = vsub.f32 %v12308_v0, %v4734_v49  ;;  %v4851_v31 = vsub.f32 %v12310_v27, %v4734_v49  ;;  %v12311_v13 = vld [vmem:[#allocation28_spill] sm:$0xff]  ;;  %v12318_v27 = vld [vmem:[#allocation46_spill] sm:$0xff] }
 0x62b   : > { %v4631_v43 = vrot.slane %v4630_v53, 1  ;;  %v4857_v45 = vsub.f32 %v12311_v13, %v4734_v49  ;;  %v4863_v61 = vsub.f32 %v12312_v11, %v4734_v49  ;;  %v12313_v3 = vld [vmem:[#allocation32_spill] sm:$0xff]  ;;  %v4881_v40 = vsub.f32 %v12315_v8, %v4734_v49  ;;  %5037 = vst [vmem:[%s9552_s30 + $0x340] sm:$0xff] %v4845_v32  ;;  %v12324_v32 = vld [vmem:[#allocation122_spill] sm:$0xff] }
 0x62c   : > { %v4869_v47 = vsub.f32 %v12313_v3, %v4734_v49  ;;  %v12314_v12 = vld [vmem:[#allocation36_spill] sm:$0xff]  ;;  %v4899_v13 = vsub.f32 %v12318_v27, %v4734_v49  ;;  %v4905_v11 = vsub.f32 %v12319_v33, %v4734_v49  ;;  %5031 = vst [vmem:[%s9552_s30 + $0x310] sm:$0xff] %v4839_v62  ;;  %5043 = vst [vmem:[%s9552_s30 + $0x370] sm:$0xff] %v4851_v31 }
 0x62d   : > { %v4875_v39 = vsub.f32 %v12314_v12, %v4734_v49  ;;  %v12316_v55 = vld [vmem:[#allocation40_spill] sm:$0xff]  ;;  %5049 = vst [vmem:[%s9552_s30 + $0x3a0] sm:$0xff] %v4857_v45  ;;  %5055 = vst [vmem:[%s9552_s30 + $0x3d0] sm:$0xff] %v4863_v61  ;;  %v4632_v33 = vadd.f32 %v4631_v43, %v4630_v53  ;;  %v4666_v62 = vadd.f32 %v10655_v50, %v4665_v6  ;;  %v12325_v45 = vld [vmem:[#allocation125_spill] sm:$0xff] }
 0x62e   : > { %v4887_v10 = vsub.f32 %v12316_v55, %v4734_v49  ;;  %v12317_v0 = vld [vmem:[#allocation44_spill] sm:$0xff]  ;;  %v12322_v55 = vld [vmem:[#allocation111_spill] sm:$0xff]  ;;  %5061 = vst [vmem:[%s9552_s30 + $0x400] sm:$0xff] %v4869_v47  ;;  %5073 = vst [vmem:[%s9552_s30 + $0x460] sm:$0xff] %v4881_v40  ;;  %v10749_v31 = vsub.f32 %v12324_v32, %v3741_v2  ;;  %v10752_v27 = vsub.f32 %v12325_v45, %v3741_v2 }
 0x62f   : > { %v4893_v24 = vsub.f32 %v12317_v0, %v4734_v49  ;;  %v12320_v3 = vld [vmem:[#allocation52_spill] sm:$0xff]  ;;  %v4923_v29 = vsub.f32 %v12322_v55, %v4734_v49  ;;  %5067 = vst [vmem:[%s9552_s30 + $0x430] sm:$0xff] %v4875_v39  ;;  %5091 = vst [vmem:[%s9552_s30 + $0x4f0] sm:$0xff] %v4899_v13  ;;  %v12327_v47 = vld [vmem:[#allocation130_spill] sm:$0xff]  ;;  %v10768_v50 = vsub.f32 %v9935_v16, %v3741_v2  ;;  %6708 = vlog2.f32 %v4632_v33 }
 0x630   : > { %v4911_v12 = vsub.f32 %v12320_v3, %v4734_v49  ;;  %v12321_v8 = vld [vmem:[#allocation108_spill] sm:$0xff]  ;;  %5079 = vst [vmem:[%s9552_s30 + $0x490] sm:$0xff] %v4887_v10  ;;  %5097 = vst [vmem:[%s9552_s30 + $0x520] sm:$0xff] %v4905_v11  ;;  %v12329_v61 = vld [vmem:[#allocation133_spill] sm:$0xff]  ;;  %v4667_v43 = vadd.f32 %v10659_v15, %v4666_v62  ;;  %v10772_v6 = vsub.f32 %v10006_v56, %v3741_v2 }
 0x631   : > { %v4917_v25 = vsub.f32 %v12321_v8, %v4734_v49  ;;  %v12323_v0 = vld [vmem:[#allocation112_spill] sm:$0xff]  ;;  %5085 = vst [vmem:[%s9552_s30 + $0x4c0] sm:$0xff] %v4893_v24  ;;  %12326 = vst [vmem:[#allocation71_spill] sm:$0xff] %v10752_v27  ;;  %v10762_v39 = vsub.f32 %v12329_v61, %v3741_v2  ;;  %v12331_v40 = vld [vmem:[#allocation86_spill] sm:$0xff]  ;;  %v10781_v10 = vsub.f32 %v10504_v38, %v3741_v2  ;;  %v4089_v38 = vmul.f32 1.442695, %v10749_v31 }
 0x632   : > { %v4929_v19 = vsub.f32 %v12323_v0, %v4734_v49  ;;  %5103 = vst [vmem:[%s9552_s30 + $0x550] sm:$0xff] %v4911_v12  ;;  %5115 = vst [vmem:[%s9552_s30 + $0x5b0] sm:$0xff] %v4923_v29  ;;  %v10759_v49 = vsub.f32 %v12327_v47, %v3741_v2  ;;  %v10765_v53 = vsub.f32 %v12331_v40, %v3741_v2  ;;  %v6707_v29 = vpop.eup %6706  ;;  %v12341_v3 = vld [vmem:[#allocation123_spill] sm:$0xff]  ;;  %v12342_v47 = vld [vmem:[#allocation129_spill] sm:$0xff] }
 0x633   : > { %5109 = vst [vmem:[%s9552_s30 + $0x580] sm:$0xff] %v4917_v25  ;;  %12330 = vst [vmem:[#allocation82_spill] sm:$0xff] %v10762_v39  ;;  %v10778_v25 = vsub.f32 %v10487_v54, %v3741_v2  ;;  %v10784_v24 = vsub.f32 %v10519_v1, %v3741_v2  ;;  %v10787_v16 = vsub.f32 %v10534_v9, %v3741_v2  ;;  %v4101_v1 = vmul.f32 1.442695, %v10752_v27  ;;  %v12343_v40 = vld [vmem:[#allocation131_spill] sm:$0xff]  ;;  %v12365_v27 = vld [vmem:[#allocation41_spill] sm:$0xff] }
 0x634   : > { %5121 = vst [vmem:[%s9552_s30 + $0x5e0] sm:$0xff] %v4929_v19  ;;  %12328 = vst [vmem:[#allocation75_spill] sm:$0xff] %v10759_v49  ;;  %v10775_v19 = vsub.f32 %v10470_v20, %v3741_v2  ;;  %v4668_v15 = vadd.f32 %v6707_v29, %v4667_v43  ;;  %v10790_v56 = vsub.f32 %v10551_v60, %v3741_v2  ;;  %v4113_v9 = vmul.f32 1.442695, %v10759_v49  ;;  %v12364_v49 = vld [vmem:[#allocation37_spill] sm:$0xff] }
 0x635   : > { %12332 = vst [vmem:[#allocation84_spill] sm:$0xff] %v10765_v53  ;;  %12333 = vst [vmem:[#allocation116_spill] sm:$0xff] %v10768_v50  ;;  %v10793_v20 = vsub.f32 %v10563_v34, %v3741_v2  ;;  %v10796_v13 = vsub.f32 %v10579_v18, %v3741_v2  ;;  %v10799_v54 = vsub.f32 %v10626_v59, %v3741_v2  ;;  %6710 = vpow2.f32 %v4089_v38  ;;  %v12344_v38 = vld [vmem:[#allocation137_spill] sm:$0xff] }
 0x636   : > { %12334 = vst [vmem:[#allocation118_spill] sm:$0xff] %v10772_v6  ;;  %12335 = vst [vmem:[#allocation120_spill] sm:$0xff] %v10775_v19  ;;  %v4669_v11 = vrot.slane %v4668_v15, 4  ;;  %v10806_v60 = vsub.f32 %v12341_v3, %v10717_v14  ;;  %v4125_v34 = vmul.f32 1.442695, %v10762_v39  ;;  %6712 = vpow2.f32 %v4101_v1  ;;  %v12362_v39 = vld [vmem:[#allocation33_spill] sm:$0xff] }
 0x637   : > { %12336 = vst [vmem:[#allocation121_spill] sm:$0xff] %v10778_v25  ;;  %12337 = vst [vmem:[#allocation124_spill] sm:$0xff] %v10781_v10  ;;  %v4137_v18 = vmul.f32 1.442695, %v10765_v53  ;;  %v4149_v59 = vmul.f32 1.442695, %v10768_v50  ;;  %6714 = vpow2.f32 %v4113_v9  ;;  %v10828_v61 = vsub.f32 %v12342_v47, %v10717_v14 }
 0x638   : > { %12338 = vst [vmem:[#allocation128_spill] sm:$0xff] %v10784_v24  ;;  %12339 = vst [vmem:[#allocation132_spill] sm:$0xff] %v10787_v16  ;;  %v4670_v12 = vadd.f32 %v4669_v11, %v4668_v15  ;;  %v4161_v2 = vmul.f32 1.442695, %v10772_v6  ;;  %v4173_v8 = vmul.f32 1.442695, %v10775_v19  ;;  %6716 = vpow2.f32 %v4125_v34 }
 0x639   : > { %12340 = vst [vmem:[#allocation88_spill] sm:$0xff] %v10790_v56  ;;  %v4185_v55 = vmul.f32 1.442695, %v10778_v25  ;;  %v10815_v0 = vmul.f32 1.442695, %v10781_v10  ;;  %v10832_v43 = vsub.f32 %v12343_v40, %v10717_v14  ;;  %v6709_v29 = vpop.eup %6708  ;;  %6718 = vpow2.f32 %v4137_v18  ;;  %v12346_v11 = vld [vmem:[#allocation87_spill] sm:$0xff] }
 0x63a   : > { %v4671_v33 = vrot.slane %v4670_v12, 2  ;;  %v10818_v62 = vmul.f32 1.442695, %v10784_v24  ;;  %v10821_v32 = vmul.f32 1.442695, %v10787_v16  ;;  %v10836_v1 = vsub.f32 %v12344_v38, %v10717_v14  ;;  %v12352_v40 = vld [vmem:[#allocation58_spill] sm:$0xff] }
 0x63b   : > { %v10824_v45 = vmul.f32 1.442695, %v10790_v56  ;;  %v10840_v9 = vsub.f32 %v12346_v11, %v10717_v14  ;;  %v4732_v3 = vmul.f32 0.6931472, %v6709_v29  ;;  %6720 = vpow2.f32 %v4149_v59  ;;  %v12351_v59 = vld [vmem:[#allocation139_spill] sm:$0xff]  ;;  %v12354_v11 = vld [vmem:[#allocation138_spill] sm:$0xff] }
 0x63c   : > { %v4672_v15 = vadd.f32 %v4671_v33, %v4670_v12  ;;  %12345 = vst [vmem:[#allocation89_spill] sm:$0xff] %v10836_v1  ;;  %v10844_v34 = vsub.f32 %v9939_v52, %v10717_v14  ;;  %v10848_v47 = vsub.f32 %v10466_v26, %v10717_v14  ;;  %6722 = vpow2.f32 %v4161_v2  ;;  %v12353_v26 = vld [vmem:[#allocation64_spill] sm:$0xff]  ;;  %v12355_v56 = vld [vmem:[#allocation90_spill] sm:$0xff]  ;;  %v12356_v24 = vld [vmem:[#allocation101_spill] sm:$0xff] }
 0x63d   : > { %12347 = vst [vmem:[#allocation92_spill] sm:$0xff] %v10840_v9  ;;  %v10852_v18 = vsub.f32 %v10480_v30, %v10717_v14  ;;  %v10856_v33 = vsub.f32 %v10491_v21, %v10717_v14  ;;  %v4838_v52 = vsub.f32 %v12351_v59, %v4732_v3  ;;  %v4844_v29 = vsub.f32 %v12352_v40, %v4732_v3  ;;  %v12357_v10 = vld [vmem:[#allocation59_spill] sm:$0xff]  ;;  %v12358_v19 = vld [vmem:[#allocation22_spill] sm:$0xff]  ;;  %v12359_v50 = vld [vmem:[#allocation25_spill] sm:$0xff] }
 0x63e   : > { %12348 = vst [vmem:[#allocation93_spill] sm:$0xff] %v10844_v34  ;;  %12349 = vst [vmem:[#allocation94_spill] sm:$0xff] %v10848_v47  ;;  %v4673_v12 = vrot.slane %v4672_v15, 1  ;;  %v4850_v38 = vsub.f32 %v12353_v26, %v4732_v3  ;;  %v4856_v2 = vsub.f32 %v12354_v11, %v4732_v3  ;;  %v4862_v16 = vsub.f32 %v12355_v56, %v4732_v3  ;;  %v12360_v53 = vld [vmem:[#allocation27_spill] sm:$0xff]  ;;  %v12361_v26 = vld [vmem:[#allocation29_spill] sm:$0xff] }
 0x63f   : > { %12350 = vst [vmem:[#allocation97_spill] sm:$0xff] %v10852_v18  ;;  %v4868_v30 = vsub.f32 %v12356_v24, %v4732_v3  ;;  %v4874_v25 = vsub.f32 %v12357_v10, %v4732_v3  ;;  %v4880_v21 = vsub.f32 %v12358_v19, %v4732_v3  ;;  %v6711_v6 = vpop.eup %6710  ;;  %v4886_v59 = vsub.f32 %v12359_v50, %v4732_v3  ;;  %v12363_v10 = vld [vmem:[#allocation35_spill] sm:$0xff] }
 0x640   : > { %v4892_v40 = vsub.f32 %v12360_v53, %v4732_v3  ;;  %v4898_v11 = vsub.f32 %v12361_v26, %v4732_v3  ;;  %v4904_v56 = vsub.f32 %v12362_v39, %v4732_v3  ;;  %5030 = vst [vmem:[%s9552_s30 + $0x308] sm:$0xff] %v4838_v52  ;;  %5036 = vst [vmem:[%s9552_s30 + $0x338] sm:$0xff] %v4844_v29  ;;  %v6713_v19 = vpop.eup %6712  ;;  %6724 = vpow2.f32 %v4173_v8  ;;  %v12366_v29 = vld [vmem:[#allocation39_spill] sm:$0xff] }
 0x641   : > { %5042 = vst [vmem:[%s9552_s30 + $0x368] sm:$0xff] %v4850_v38  ;;  %5048 = vst [vmem:[%s9552_s30 + $0x398] sm:$0xff] %v4856_v2  ;;  %v4910_v24 = vsub.f32 %v12363_v10, %v4732_v3  ;;  %v4916_v50 = vsub.f32 %v12364_v49, %v4732_v3  ;;  %v4922_v53 = vsub.f32 %v12365_v27, %v4732_v3  ;;  %v6715_v27 = vpop.eup %6714  ;;  %6726 = vpow2.f32 %v4185_v55 }
 0x642   : > { %v4928_v26 = vsub.f32 %v10244_v48, %v4732_v3  ;;  %5054 = vst [vmem:[%s9552_s30 + $0x3c8] sm:$0xff] %v4862_v16  ;;  %5060 = vst [vmem:[%s9552_s30 + $0x3f8] sm:$0xff] %v4868_v30  ;;  %v4674_v39 = vadd.f32 %v4673_v12, %v4672_v15  ;;  %v4549_v52 = vadd.f32 %v6713_v19, %v6711_v6  ;;  %v4257_v3 = vmul.f32 1.442695, %v10796_v13 }
 0x643   : > { %5066 = vst [vmem:[%s9552_s30 + $0x428] sm:$0xff] %v4874_v25  ;;  %5072 = vst [vmem:[%s9552_s30 + $0x458] sm:$0xff] %v4880_v21  ;;  %v10888_v49 = vsub.f32 %v10511_v17, %v10717_v14  ;;  %v10896_v48 = vsub.f32 %v10523_v57, %v10717_v14  ;;  %v10900_v25 = vsub.f32 %v10538_v35, %v10717_v14  ;;  %v6717_v17 = vpop.eup %6716  ;;  %v4245_v35 = vmul.f32 1.442695, %v10793_v20 }
 0x644   : > { %5078 = vst [vmem:[%s9552_s30 + $0x488] sm:$0xff] %v4886_v59  ;;  %5084 = vst [vmem:[%s9552_s30 + $0x4b8] sm:$0xff] %v4892_v40  ;;  %v10904_v6 = vsub.f32 %v10555_v28, %v10717_v14  ;;  %6728 = vlog2.f32 %v4674_v39  ;;  %v4550_v16 = vadd.f32 %v6715_v27, %v4549_v52  ;;  %v10908_v8 = vsub.f32 %v10567_v5, %v10717_v14  ;;  %v6719_v57 = vpop.eup %6718  ;;  %v12369_v39 = vld [vmem:[#allocation53_spill] sm:$0xff]  ;;  %v12370_v27 = vld [vmem:[#allocation19_spill] sm:$0xff] }
 0x645   : > { %5090 = vst [vmem:[%s9552_s30 + $0x4e8] sm:$0xff] %v4898_v11  ;;  %5096 = vst [vmem:[%s9552_s30 + $0x518] sm:$0xff] %v4904_v56  ;;  %v10912_v55 = vsub.f32 %v10618_v42, %v10717_v14  ;;  %6730 = vpow2.f32 %v10815_v0  ;;  %v10918_v28 = vsub.f32 %v10630_v58, %v10717_v14  ;;  %v6721_v15 = vpop.eup %6720  ;;  %v4091_v42 = vmul.f32 1.442695, %v10806_v60  ;;  %v12367_v14 = vld [vmem:[#allocation43_spill] sm:$0xff] }
 0x646   : > { %5102 = vst [vmem:[%s9552_s30 + $0x548] sm:$0xff] %v4910_v24  ;;  %5108 = vst [vmem:[%s9552_s30 + $0x578] sm:$0xff] %v4916_v50  ;;  %6732 = vpow2.f32 %v10818_v62  ;;  %v4551_v5 = vadd.f32 %v6717_v17, %v4550_v16  ;;  %v6723_v12 = vpop.eup %6722  ;;  %v10926_v0 = vadd.f32 %v12067_v44, %v12366_v29  ;;  %v4103_v58 = vmul.f32 1.442695, %v10828_v61  ;;  %v12368_v50 = vld [vmem:[#allocation45_spill] sm:$0xff] }
 0x647   : > { %5114 = vst [vmem:[%s9552_s30 + $0x5a8] sm:$0xff] %v4922_v53  ;;  %5120 = vst [vmem:[%s9552_s30 + $0x5d8] sm:$0xff] %v4928_v26  ;;  %6734 = vpow2.f32 %v10821_v32  ;;  %v10932_v62 = vadd.f32 %v12069_v63, %v12367_v14  ;;  %v10935_v2 = vmul.f32 1.442695, %v10799_v54  ;;  %v4115_v32 = vmul.f32 1.442695, %v10832_v43 }
 0x648   : > { %6736 = vpow2.f32 %v10824_v45  ;;  %v4552_v38 = vadd.f32 %v6719_v57, %v4551_v5  ;;  %v4127_v30 = vmul.f32 1.442695, %v10836_v1  ;;  %v4139_v59 = vmul.f32 1.442695, %v10840_v9  ;;  %v12386_v9 = vld [vmem:[#allocation73_spill] sm:$0xff]  ;;  %v12387_v1 = vld [vmem:[#allocation96_spill] sm:$0xff] }
 0x649   : > { %6738 = vpow2.f32 %v4245_v35  ;;  %v4151_v45 = vmul.f32 1.442695, %v10844_v34  ;;  %v10942_v40 = vmul.f32 1.442695, %v10848_v47  ;;  %v10945_v11 = vmul.f32 1.442695, %v10852_v18 }
 0x64a   : > { %6740 = vpow2.f32 %v4257_v3  ;;  %v4553_v21 = vadd.f32 %v6721_v15, %v4552_v38  ;;  %v3853_v56 = vmax.f32 %v10712_v36, %v10926_v0  ;;  %v6725_v19 = vpop.eup %6724  ;;  %v3874_v24 = vmax.f32 %v10715_v4, %v10932_v62  ;;  %v12371_v36 = vld [vmem:[#allocation68_spill] sm:$0xff] }
 0x64b   : > { %6742 = vpow2.f32 %v4091_v42  ;;  %v10953_v53 = vadd.f32 %v12067_v44, %v12368_v50  ;;  %v6727_v26 = vpop.eup %6726  ;;  %v10957_v52 = vadd.f32 %v12069_v63, %v12369_v39  ;;  %v10961_v17 = vadd.f32 %v12067_v44, %v12370_v27  ;;  %v12383_v47 = vld [vmem:[#allocation60_spill] sm:$0xff] }
 0x64c   : > { %v4554_v10 = vadd.f32 %v6723_v12, %v4553_v21  ;;  %6744 = vpow2.f32 %v4103_v58  ;;  %v10965_v16 = vadd.f32 %v12069_v63, %v12371_v36  ;;  %v10970_v15 = vadd.f32 %v12067_v44, %v10365_v23  ;;  %v12373_v21 = vld [vmem:[#allocation50_spill] sm:$0xff]  ;;  %v12379_v36 = vld [vmem:[#allocation79_spill] sm:$0xff] }
 0x64d   : > { %6746 = vpow2.f32 %v4115_v32  ;;  %v3854_v35 = vmax.f32 %v3853_v56, %v10953_v53  ;;  %v3875_v12 = vmax.f32 %v3874_v24, %v10957_v52  ;;  %v10975_v42 = vadd.f32 %v12069_v63, %v10372_v7  ;;  %v12372_v32 = vld [vmem:[#allocation47_spill] sm:$0xff]  ;;  %v12374_v56 = vld [vmem:[#allocation65_spill] sm:$0xff] }
 0x64e   : > { %v6729_v57 = vpop.eup %6728  ;;  %v4555_v4 = vadd.f32 %v6725_v19, %v4554_v10  ;;  %6748 = vpow2.f32 %v4127_v30  ;;  %v10980_v14 = vadd.f32 %v12067_v44, %v10385_v46  ;;  %v12375_v19 = vld [vmem:[#allocation127_spill] sm:$0xff]  ;;  %v12378_v46 = vld [vmem:[#allocation76_spill] sm:$0xff] }
 0x64f   : > { %v6731_v3 = vpop.eup %6730  ;;  %v4736_v5 = vmul.f32 0.6931472, %v6729_v57  ;;  %6750 = vpow2.f32 %v4139_v59  ;;  %v3855_v58 = vmax.f32 %v3854_v35, %v10961_v17  ;;  %v12376_v24 = vld [vmem:[#allocation91_spill] sm:$0xff] }
 0x650   : > { %v6733_v29 = vpop.eup %6732  ;;  %v4556_v38 = vadd.f32 %v6727_v26, %v4555_v4  ;;  %6752 = vpow2.f32 %v4151_v45  ;;  %v12377_v26 = vld [vmem:[#allocation106_spill] sm:$0xff]  ;;  %v12380_v35 = vld [vmem:[#allocation83_spill] sm:$0xff] }
 0x651   : > { %v6735_v23 = vpop.eup %6734  ;;  %v4840_v30 = vsub.f32 %v12372_v32, %v4736_v5  ;;  %v4846_v59 = vsub.f32 %v12373_v21, %v4736_v5  ;;  %v4852_v7 = vsub.f32 %v12374_v56, %v4736_v5  ;;  %v4858_v10 = vsub.f32 %v12375_v19, %v4736_v5  ;;  %v12381_v21 = vld [vmem:[#allocation119_spill] sm:$0xff]  ;;  %v12382_v19 = vld [vmem:[#allocation56_spill] sm:$0xff] }
 0x652   : > { %v6737_v45 = vpop.eup %6736  ;;  %v4864_v50 = vsub.f32 %v12376_v24, %v4736_v5  ;;  %v4870_v39 = vsub.f32 %v12377_v26, %v4736_v5  ;;  %v4876_v27 = vsub.f32 %v12378_v46, %v4736_v5  ;;  %v4882_v57 = vsub.f32 %v12379_v36, %v4736_v5  ;;  %v12384_v46 = vld [vmem:[#allocation66_spill] sm:$0xff] }
 0x653   : > { %v10990_v4 = vpop.eup %6738  ;;  %v4888_v32 = vsub.f32 %v12380_v35, %v4736_v5  ;;  %v4894_v56 = vsub.f32 %v12381_v21, %v4736_v5  ;;  %v4900_v18 = vsub.f32 %v12382_v19, %v4736_v5  ;;  %v4906_v24 = vsub.f32 %v12383_v47, %v4736_v5  ;;  %5032 = vst [vmem:[%s9552_s30 + $0x318] sm:$0xff] %v4840_v30  ;;  %v12385_v35 = vld [vmem:[#allocation72_spill] sm:$0xff] }
 0x654   : > { %5038 = vst [vmem:[%s9552_s30 + $0x348] sm:$0xff] %v4846_v59  ;;  %5044 = vst [vmem:[%s9552_s30 + $0x378] sm:$0xff] %v4852_v7  ;;  %v11000_v26 = vpop.eup %6740  ;;  %v4912_v36 = vsub.f32 %v12384_v46, %v4736_v5  ;;  %v4918_v34 = vsub.f32 %v12385_v35, %v4736_v5  ;;  %v4924_v21 = vsub.f32 %v12386_v9, %v4736_v5  ;;  %6754 = vpow2.f32 %v10935_v2  ;;  %v12388_v7 = vld [vmem:[#allocation109_spill] sm:$0xff] }
 0x655   : > { %5050 = vst [vmem:[%s9552_s30 + $0x3a8] sm:$0xff] %v4858_v10  ;;  %v4930_v19 = vsub.f32 %v12387_v1, %v4736_v5  ;;  %5056 = vst [vmem:[%s9552_s30 + $0x3d8] sm:$0xff] %v4864_v50  ;;  %v6743_v47 = vpop.eup %6742  ;;  %v4557_v30 = vadd.f32 %v6731_v3, %v4556_v38  ;;  %v3876_v9 = vmax.f32 %v3875_v12, %v10965_v16  ;;  %6756 = vpow2.f32 %v10942_v40  ;;  %v12389_v10 = vld [vmem:[#allocation113_spill] sm:$0xff] }
 0x656   : > { %5062 = vst [vmem:[%s9552_s30 + $0x408] sm:$0xff] %v4870_v39  ;;  %5068 = vst [vmem:[%s9552_s30 + $0x438] sm:$0xff] %v4876_v27  ;;  %v3856_v59 = vmax.f32 %v3855_v58, %v10970_v15  ;;  %v6745_v1 = vpop.eup %6744  ;;  %v4187_v5 = vmul.f32 1.442695, %v10856_v33  ;;  %v11029_v2 = vadd.f32 %v12067_v44, %v12389_v10  ;;  %6758 = vpow2.f32 %v10945_v11  ;;  %v12394_v10 = vld [vmem:[#allocation57_spill] sm:$0xff] }
 0x657   : > { %5074 = vst [vmem:[%s9552_s30 + $0x468] sm:$0xff] %v4882_v57  ;;  %5080 = vst [vmem:[%s9552_s30 + $0x498] sm:$0xff] %v4888_v32  ;;  %v6747_v3 = vpop.eup %6746  ;;  %v4558_v12 = vadd.f32 %v6733_v29, %v4557_v30  ;;  %v4570_v38 = vadd.f32 %v6745_v1, %v6743_v47  ;;  %v3877_v58 = vmax.f32 %v3876_v9, %v10975_v42  ;;  %v4199_v39 = vmul.f32 1.442695, %v10888_v49  ;;  %v12391_v57 = vld [vmem:[#allocation77_spill] sm:$0xff] }
 0x658   : > { %5086 = vst [vmem:[%s9552_s30 + $0x4c8] sm:$0xff] %v4894_v56  ;;  %5092 = vst [vmem:[%s9552_s30 + $0x4f8] sm:$0xff] %v4900_v18  ;;  %v11025_v18 = vadd.f32 %v12069_v63, %v12388_v7  ;;  %v6749_v40 = vpop.eup %6748  ;;  %v3857_v27 = vmax.f32 %v3856_v59, %v10980_v14  ;;  %v11041_v32 = vadd.f32 %v12067_v44, %v12391_v57  ;;  %6760 = vpow2.f32 %v4187_v5  ;;  %v12393_v59 = vld [vmem:[#allocation85_spill] sm:$0xff] }
 0x659   : > { %5098 = vst [vmem:[%s9552_s30 + $0x528] sm:$0xff] %v4906_v24  ;;  %5104 = vst [vmem:[%s9552_s30 + $0x558] sm:$0xff] %v4912_v36  ;;  %v6751_v56 = vpop.eup %6750  ;;  %v4559_v29 = vadd.f32 %v6735_v23, %v4558_v12  ;;  %v4571_v24 = vadd.f32 %v6747_v3, %v4570_v38  ;;  %v12392_v36 = vld [vmem:[#allocation80_spill] sm:$0xff]  ;;  %v4211_v11 = vmul.f32 1.442695, %v10896_v48  ;;  %v11052_v47 = vadd.f32 %v12067_v44, %v10493_v22  ;;  %v12395_v38 = vld [vmem:[#allocation61_spill] sm:$0xff] }
 0x65a   : > { %5110 = vst [vmem:[%s9552_s30 + $0x588] sm:$0xff] %v4918_v34  ;;  %5116 = vst [vmem:[%s9552_s30 + $0x5b8] sm:$0xff] %v4924_v21  ;;  %v12390_v34 = vld [vmem:[#allocation70_spill] sm:$0xff]  ;;  %v3878_v46 = vmax.f32 %v3877_v58, %v11025_v18  ;;  %v11046_v35 = vadd.f32 %v12069_v63, %v12392_v36  ;;  %v6753_v21 = vpop.eup %6752  ;;  %v11057_v1 = vadd.f32 %v12069_v63, %v12393_v59  ;;  %6762 = vpow2.f32 %v4199_v39 }
 0x65b   : > { %5122 = vst [vmem:[%s9552_s30 + $0x5e8] sm:$0xff] %v4930_v19  ;;  %v11034_v50 = vadd.f32 %v12069_v63, %v12390_v34  ;;  %v3858_v19 = vmax.f32 %v3857_v27, %v11029_v2  ;;  %v4560_v30 = vadd.f32 %v6737_v45, %v4559_v29  ;;  %v4572_v9 = vadd.f32 %v6749_v40, %v4571_v24 }
 0x65c   : > { %v4223_v7 = vmul.f32 1.442695, %v10900_v25  ;;  %v11063_v3 = vadd.f32 %v12067_v44, %v12394_v10  ;;  %v11069_v58 = vadd.f32 %v12069_v63, %v12395_v38  ;;  %6764 = vpow2.f32 %v4211_v11 }
 0x65d   : > { %v3879_v23 = vmax.f32 %v3878_v46, %v11034_v50  ;;  %v3859_v5 = vmax.f32 %v3858_v19, %v11041_v32  ;;  %v4561_v22 = vadd.f32 %v10990_v4, %v4560_v30  ;;  %v4573_v12 = vadd.f32 %v6751_v56, %v4572_v9 }
 0x65e   : > { %v4235_v34 = vmul.f32 1.442695, %v10904_v6  ;;  %v6755_v39 = vpop.eup %6754  ;;  %6766 = vpow2.f32 %v4223_v7  ;;  %v4247_v4 = vmul.f32 1.442695, %v10908_v8  ;;  %v4259_v11 = vmul.f32 1.442695, %v10912_v55 }
 0x65f   : > { %v3880_v45 = vmax.f32 %v3879_v23, %v11046_v35  ;;  %v3860_v40 = vmax.f32 %v3859_v5, %v11052_v47  ;;  %v4562_v27 = vadd.f32 %v11000_v26, %v4561_v22  ;;  %v4574_v57 = vadd.f32 %v6753_v21, %v4573_v12  ;;  %v6757_v29 = vpop.eup %6756 }
 0x660   : > { %v6759_v36 = vpop.eup %6758  ;;  %6768 = vpow2.f32 %v4235_v34  ;;  %v4271_v23 = vmul.f32 1.442695, %v10918_v28 }
 0x661   : > { %v3881_v44 = vmax.f32 %v3880_v45, %v11057_v1  ;;  %v3861_v56 = vmax.f32 %v3860_v40, %v11063_v3  ;;  %v4563_v24 = vadd.f32 %v6755_v39, %v4562_v27  ;;  %v4575_v63 = vadd.f32 %v6757_v29, %v4574_v57 }
 0x662   : > { %v6761_v9 = vpop.eup %6760  ;;  %6770 = vpow2.f32 %v4247_v4 }
 0x663   : > { %v3882_v46 = vmax.f32 %v3881_v44, %v11069_v58  ;;  %v3862_v19 = vrot.slane %v3861_v56, 4  ;;  %v4564_v30 = vrot.slane %v4563_v24, 4  ;;  %v4576_v26 = vadd.f32 %v6759_v36, %v4575_v63 }
 0x664   : > { %v6763_v22 = vpop.eup %6762  ;;  %6772 = vpow2.f32 %v4259_v11 }
 0x665   : > { %v3883_v21 = vrot.slane %v3882_v46, 4  ;;  %v3863_v59 = vmax.f32 %v3861_v56, %v3862_v19  ;;  %v4565_v7 = vadd.f32 %v4564_v30, %v4563_v24  ;;  %v4577_v5 = vadd.f32 %v6761_v9, %v4576_v26 }
 0x666   : > { %v6765_v40 = vpop.eup %6764  ;;  %6774 = vpow2.f32 %v4271_v23  ;;  %v12397_v23 = vld [vmem:[#allocation100_spill] sm:$0xff] }
 0x667   : > { %v3884_v10 = vmax.f32 %v3882_v46, %v3883_v21  ;;  %v3864_v12 = vrot.slane %v3863_v59, 2  ;;  %v4566_v45 = vrot.slane %v4565_v7, 2  ;;  %v4578_v38 = vadd.f32 %v6763_v22, %v4577_v5  ;;  %v12399_v5 = vld [vmem:[#allocation115_spill] sm:$0xff]  ;;  %v12401_v22 = vld [vmem:[#allocation78_spill] sm:$0xff] }
 0x668   : > { %v6767_v29 = vpop.eup %6766 }
 0x669   : > { %v3885_v34 = vrot.slane %v3884_v10, 2  ;;  %v3865_v39 = vmax.f32 %v3863_v59, %v3864_v12  ;;  %v4567_v27 = vadd.f32 %v4566_v45, %v4565_v7  ;;  %v4579_v57 = vadd.f32 %v6765_v40, %v4578_v38 }
 0x66a   : > { %v6769_v56 = vpop.eup %6768 }
 0x66b   : > { %v3886_v44 = vmax.f32 %v3884_v10, %v3885_v34  ;;  %v3866_v4 = vrot.slane %v3865_v39, 1  ;;  %v4568_v63 = vrot.slane %v4567_v27, 1  ;;  %v4580_v36 = vadd.f32 %v6767_v29, %v4579_v57 }
 0x66c   : > { %v6771_v11 = vpop.eup %6770 }
 0x66d   : > { %v3867_v24 = vmax.f32 %v3865_v39, %v3866_v4  ;;  %v4569_v19 = vadd.f32 %v4568_v63, %v4567_v27  ;;  %v4581_v46 = vadd.f32 %v6769_v56, %v4580_v36  ;;  %v3887_v30 = vrot.slane %v3886_v44, 1 }
 0x66e   : > { %v6773_v45 = vpop.eup %6772 }
 0x66f   : > { %v11081_v26 = vsub.f32 %v10634_v51, %v3867_v24  ;;  %v11084_v21 = vsub.f32 %v10645_v41, %v3867_v24  ;;  %v11087_v9 = vsub.f32 %v10653_v37, %v3867_v24  ;;  %v11090_v59 = vsub.f32 %v12397_v23, %v3867_v24  ;;  %v12403_v51 = vld [vmem:[#allocation117_spill] sm:$0xff] }
 0x670   : > { %6776 = vlog2.f32 %v4569_v19  ;;  %v4582_v7 = vadd.f32 %v6771_v11, %v4581_v46  ;;  %v11093_v10 = vsub.f32 %v12399_v5, %v3867_v24  ;;  %v11096_v12 = vsub.f32 %v12401_v22, %v3867_v24  ;;  %v6775_v29 = vpop.eup %6774  ;;  %v12412_v5 = vld [vmem:[#allocation67_spill] sm:$0xff] }
 0x671   : > { %12396 = vst [vmem:[#allocation98_spill] sm:$0xff] %v11087_v9  ;;  %12398 = vst [vmem:[#allocation99_spill] sm:$0xff] %v11090_v59  ;;  %v11099_v38 = vsub.f32 %v12403_v51, %v3867_v24  ;;  %v11102_v41 = vsub.f32 %v10926_v0, %v3867_v24  ;;  %v11105_v37 = vsub.f32 %v10953_v53, %v3867_v24  ;;  %v4281_v4 = vmul.f32 1.442695, %v11081_v26 }
 0x672   : > { %12400 = vst [vmem:[#allocation102_spill] sm:$0xff] %v11093_v10  ;;  %12402 = vst [vmem:[#allocation103_spill] sm:$0xff] %v11096_v12  ;;  %v11108_v34 = vsub.f32 %v10961_v17, %v3867_v24  ;;  %v4583_v40 = vadd.f32 %v6773_v45, %v4582_v7  ;;  %v11111_v39 = vsub.f32 %v10970_v15, %v3867_v24  ;;  %v4293_v63 = vmul.f32 1.442695, %v11084_v21 }
 0x673   : > { %12404 = vst [vmem:[#allocation104_spill] sm:$0xff] %v11099_v38  ;;  %12405 = vst [vmem:[#allocation107_spill] sm:$0xff] %v11102_v41  ;;  %v11114_v27 = vsub.f32 %v10980_v14, %v3867_v24  ;;  %v11117_v57 = vsub.f32 %v11029_v2, %v3867_v24  ;;  %v11120_v0 = vsub.f32 %v11041_v32, %v3867_v24  ;;  %v4305_v14 = vmul.f32 1.442695, %v11087_v9 }
 0x674   : > { %12406 = vst [vmem:[#allocation48_spill] sm:$0xff] %v11105_v37  ;;  %12407 = vst [vmem:[#allocation134_spill] sm:$0xff] %v11108_v34  ;;  %v11123_v53 = vsub.f32 %v11052_v47, %v3867_v24  ;;  %v11126_v17 = vsub.f32 %v11063_v3, %v3867_v24  ;;  %v4584_v15 = vadd.f32 %v6775_v29, %v4583_v40  ;;  %6778 = vpow2.f32 %v4281_v4  ;;  %v12413_v40 = vld [vmem:[#allocation20_spill] sm:$0xff]  ;;  %v12414_v4 = vld [vmem:[#allocation21_spill] sm:$0xff] }
 0x675   : > { %12408 = vst [vmem:[#allocation135_spill] sm:$0xff] %v11111_v39  ;;  %12409 = vst [vmem:[#allocation136_spill] sm:$0xff] %v11114_v27  ;;  %v4317_v2 = vmul.f32 1.442695, %v11090_v59  ;;  %v11132_v36 = vmax.f32 %v3886_v44, %v3887_v30  ;;  %6780 = vpow2.f32 %v4293_v63  ;;  %v4329_v47 = vmul.f32 1.442695, %v11093_v10 }
 0x676   : > { %12410 = vst [vmem:[#allocation51_spill] sm:$0xff] %v11117_v57  ;;  %12411 = vst [vmem:[#allocation95_spill] sm:$0xff] %v11120_v0  ;;  %v4585_v32 = vrot.slane %v4584_v15, 4  ;;  %v4341_v56 = vmul.f32 1.442695, %v11096_v12  ;;  %6782 = vpow2.f32 %v4305_v14  ;;  %v12415_v14 = vld [vmem:[#allocation110_spill] sm:$0xff] }
 0x677   : > { %v4353_v3 = vmul.f32 1.442695, %v11099_v38  ;;  %v4365_v24 = vmul.f32 1.442695, %v11102_v41  ;;  %v4377_v19 = vmul.f32 1.442695, %v11105_v37  ;;  %6784 = vpow2.f32 %v4317_v2 }
 0x678   : > { %v4586_v46 = vadd.f32 %v4585_v32, %v4584_v15  ;;  %v11140_v11 = vmul.f32 1.442695, %v11108_v34  ;;  %v11143_v44 = vmul.f32 1.442695, %v11111_v39  ;;  %v11146_v30 = vmul.f32 1.442695, %v11114_v27 }
 0x679   : > { %v11149_v23 = vmul.f32 1.442695, %v11117_v57  ;;  %v11152_v7 = vmul.f32 1.442695, %v11120_v0  ;;  %v11156_v22 = vsub.f32 %v12412_v5, %v11132_v36  ;;  %6786 = vpow2.f32 %v4329_v47  ;;  %v12416_v32 = vld [vmem:[#allocation74_spill] sm:$0xff]  ;;  %v12417_v47 = vld [vmem:[#allocation81_spill] sm:$0xff] }
 0x67a   : > { %v6777_v45 = vpop.eup %6776  ;;  %v4587_v51 = vrot.slane %v4586_v46, 2  ;;  %v11160_v29 = vsub.f32 %v12413_v40, %v11132_v36  ;;  %v11164_v15 = vsub.f32 %v12414_v4, %v11132_v36  ;;  %6788 = vpow2.f32 %v4341_v56  ;;  %v12418_v4 = vld [vmem:[#allocation69_spill] sm:$0xff]  ;;  %v12423_v34 = vld [vmem:[#allocation116_spill] sm:$0xff]  ;;  %v12424_v37 = vld [vmem:[#allocation118_spill] sm:$0xff] }
 0x67b   : > { %v4726_v63 = vmul.f32 0.6931472, %v6777_v45  ;;  %v11168_v2 = vsub.f32 %v12415_v14, %v11132_v36  ;;  %v11172_v5 = vsub.f32 %v12416_v32, %v11132_v36  ;;  %6790 = vpow2.f32 %v4353_v3  ;;  %v12419_v14 = vld [vmem:[#allocation71_spill] sm:$0xff]  ;;  %v12425_v38 = vld [vmem:[#allocation120_spill] sm:$0xff]  ;;  %v12426_v10 = vld [vmem:[#allocation121_spill] sm:$0xff] }
 0x67c   : > { %v4588_v0 = vadd.f32 %v4587_v51, %v4586_v46  ;;  %v11176_v40 = vsub.f32 %v12417_v47, %v11132_v36  ;;  %v11180_v45 = vsub.f32 %v12418_v4, %v11132_v36  ;;  %v12420_v32 = vld [vmem:[#allocation75_spill] sm:$0xff]  ;;  %v12421_v46 = vld [vmem:[#allocation82_spill] sm:$0xff]  ;;  %v12422_v51 = vld [vmem:[#allocation84_spill] sm:$0xff]  ;;  %6792 = vpow2.f32 %v4365_v24 }
 0x67d   : > { %v4745_v56 = vsub.f32 %v10749_v31, %v4726_v63  ;;  %v4751_v57 = vsub.f32 %v12419_v14, %v4726_v63  ;;  %v4757_v27 = vsub.f32 %v12420_v32, %v4726_v63  ;;  %v4763_v3 = vsub.f32 %v12421_v46, %v4726_v63  ;;  %v12427_v59 = vld [vmem:[#allocation124_spill] sm:$0xff] }
 0x67e   : > { %v4769_v39 = vsub.f32 %v12422_v51, %v4726_v63  ;;  %v4775_v47 = vsub.f32 %v12423_v34, %v4726_v63  ;;  %v4781_v41 = vsub.f32 %v12424_v37, %v4726_v63  ;;  %v4787_v4 = vsub.f32 %v12425_v38, %v4726_v63  ;;  %v6779_v12 = vpop.eup %6778  ;;  %v12428_v32 = vld [vmem:[#allocation128_spill] sm:$0xff] }
 0x67f   : > { %v4793_v31 = vsub.f32 %v12426_v10, %v4726_v63  ;;  %v4799_v14 = vsub.f32 %v12427_v59, %v4726_v63  ;;  %v4805_v9 = vsub.f32 %v12428_v32, %v4726_v63  ;;  %v12429_v46 = vld [vmem:[#allocation132_spill] sm:$0xff]  ;;  %4937 = vst [vmem:[%s9552_s30 + $0x20] sm:$0xff] %v4745_v56  ;;  %4943 = vst [vmem:[%s9552_s30 + $0x50] sm:$0xff] %v4751_v57  ;;  %v6781_v38 = vpop.eup %6780  ;;  %6794 = vpow2.f32 %v4377_v19 }
 0x680   : > { %v4811_v51 = vsub.f32 %v12429_v46, %v4726_v63  ;;  %4949 = vst [vmem:[%s9552_s30 + $0x80] sm:$0xff] %v4757_v27  ;;  %4955 = vst [vmem:[%s9552_s30 + $0xb0] sm:$0xff] %v4763_v3  ;;  %v12430_v37 = vld [vmem:[#allocation88_spill] sm:$0xff]  ;;  %v4823_v10 = vsub.f32 %v10793_v20, %v4726_v63  ;;  %v4829_v59 = vsub.f32 %v10796_v13, %v4726_v63  ;;  %v6783_v57 = vpop.eup %6782  ;;  %v4589_v27 = vrot.slane %v4588_v0, 1 }
 0x681   : > { %v4817_v34 = vsub.f32 %v12430_v37, %v4726_v63  ;;  %v4835_v32 = vsub.f32 %v10799_v54, %v4726_v63  ;;  %4961 = vst [vmem:[%s9552_s30 + $0xe0] sm:$0xff] %v4769_v39  ;;  %4967 = vst [vmem:[%s9552_s30 + $0x110] sm:$0xff] %v4775_v47  ;;  %v4675_v20 = vadd.f32 %v6781_v38, %v6779_v12  ;;  %6796 = vpow2.f32 %v11140_v11 }
 0x682   : > { %4973 = vst [vmem:[%s9552_s30 + $0x140] sm:$0xff] %v4781_v41  ;;  %4979 = vst [vmem:[%s9552_s30 + $0x170] sm:$0xff] %v4787_v4  ;;  %v11212_v13 = vsub.f32 %v10932_v62, %v11132_v36  ;;  %v11220_v54 = vsub.f32 %v10957_v52, %v11132_v36  ;;  %v11228_v12 = vsub.f32 %v10975_v42, %v11132_v36  ;;  %v6785_v41 = vpop.eup %6784  ;;  %6798 = vpow2.f32 %v11143_v44 }
 0x683   : > { %4985 = vst [vmem:[%s9552_s30 + $0x1a0] sm:$0xff] %v4793_v31  ;;  %4991 = vst [vmem:[%s9552_s30 + $0x1d0] sm:$0xff] %v4799_v14  ;;  %v4590_v62 = vadd.f32 %v4589_v27, %v4588_v0  ;;  %v4676_v39 = vadd.f32 %v6783_v57, %v4675_v20  ;;  %v11233_v24 = vsub.f32 %v11025_v18, %v11132_v36  ;;  %v6787_v19 = vpop.eup %6786  ;;  %v4449_v18 = vmul.f32 1.442695, %v11123_v53 }
 0x684   : > { %4997 = vst [vmem:[%s9552_s30 + $0x200] sm:$0xff] %v4805_v9  ;;  %5003 = vst [vmem:[%s9552_s30 + $0x230] sm:$0xff] %v4811_v51  ;;  %v11224_v9 = vsub.f32 %v10965_v16, %v11132_v36  ;;  %v11238_v52 = vsub.f32 %v11034_v50, %v11132_v36  ;;  %v11242_v16 = vsub.f32 %v11046_v35, %v11132_v36  ;;  %v6789_v0 = vpop.eup %6788  ;;  %v4283_v50 = vmul.f32 1.442695, %v11156_v22 }
 0x685   : > { %5009 = vst [vmem:[%s9552_s30 + $0x260] sm:$0xff] %v4817_v34  ;;  %5015 = vst [vmem:[%s9552_s30 + $0x290] sm:$0xff] %v4823_v10  ;;  %v11246_v42 = vsub.f32 %v11057_v1, %v11132_v36  ;;  %6800 = vlog2.f32 %v4590_v62  ;;  %v4677_v11 = vadd.f32 %v6785_v41, %v4676_v39  ;;  %v11251_v44 = vsub.f32 %v11069_v58, %v11132_v36  ;;  %v6791_v63 = vpop.eup %6790 }
 0x686   : > { %5021 = vst [vmem:[%s9552_s30 + $0x2c0] sm:$0xff] %v4829_v59  ;;  %5027 = vst [vmem:[%s9552_s30 + $0x2f0] sm:$0xff] %v4835_v32  ;;  %6802 = vpow2.f32 %v11146_v30  ;;  %v4295_v1 = vmul.f32 1.442695, %v11160_v29  ;;  %v4461_v56 = vmul.f32 1.442695, %v11126_v17  ;;  %v6793_v36 = vpop.eup %6792 }
 0x687   : > { %6804 = vpow2.f32 %v11149_v23  ;;  %v4678_v35 = vadd.f32 %v6787_v19, %v4677_v11  ;;  %v4307_v47 = vmul.f32 1.442695, %v11164_v15  ;;  %v4319_v58 = vmul.f32 1.442695, %v11168_v2  ;;  %v12431_v19 = vld [vmem:[#allocation89_spill] sm:$0xff]  ;;  %v12432_v11 = vld [vmem:[#allocation92_spill] sm:$0xff] }
 0x688   : > { %6806 = vpow2.f32 %v11152_v7  ;;  %v4331_v4 = vmul.f32 1.442695, %v11172_v5  ;;  %v4343_v31 = vmul.f32 1.442695, %v11176_v40  ;;  %v4355_v46 = vmul.f32 1.442695, %v11180_v45 }
 0x689   : > { %6808 = vpow2.f32 %v4449_v18  ;;  %v4679_v3 = vadd.f32 %v6789_v0, %v4678_v35  ;;  %v6795_v23 = vpop.eup %6794  ;;  %v4367_v57 = vmul.f32 1.442695, %v11212_v13  ;;  %v4379_v27 = vmul.f32 1.442695, %v11220_v54 }
 0x68a   : > { %6810 = vpow2.f32 %v4283_v50  ;;  %v12433_v50 = vld [vmem:[#allocation93_spill] sm:$0xff] }
 0x68b   : > { %v4680_v30 = vadd.f32 %v6791_v63, %v4679_v3  ;;  %6812 = vpow2.f32 %v4295_v1  ;;  %v6797_v14 = vpop.eup %6796  ;;  %v12434_v1 = vld [vmem:[#allocation94_spill] sm:$0xff]  ;;  %v12435_v3 = vld [vmem:[#allocation97_spill] sm:$0xff] }
 0x68c   : > { %6814 = vpow2.f32 %v4461_v56  ;;  %v6799_v51 = vpop.eup %6798 }
 0x68d   : > { %v4681_v7 = vadd.f32 %v6793_v36, %v4680_v30  ;;  %6816 = vpow2.f32 %v4307_v47 }
 0x68e   : > { %6818 = vpow2.f32 %v4319_v58 }
 0x68f   : > { %v6801_v38 = vpop.eup %6800  ;;  %v4682_v37 = vadd.f32 %v6795_v23, %v4681_v7  ;;  %6820 = vpow2.f32 %v4331_v4 }
 0x690   : > { %v6803_v34 = vpop.eup %6802  ;;  %v4728_v10 = vmul.f32 0.6931472, %v6801_v38  ;;  %6822 = vpow2.f32 %v4343_v31 }
 0x691   : > { %v6805_v59 = vpop.eup %6804  ;;  %v4683_v32 = vadd.f32 %v6797_v14, %v4682_v37  ;;  %6824 = vpow2.f32 %v4355_v46  ;;  %v4403_v46 = vmul.f32 1.442695, %v11228_v12 }
 0x692   : > { %v6807_v20 = vpop.eup %6806  ;;  %v4746_v41 = vsub.f32 %v10806_v60, %v4728_v10  ;;  %v4752_v62 = vsub.f32 %v10828_v61, %v4728_v10  ;;  %v4758_v39 = vsub.f32 %v10832_v43, %v4728_v10  ;;  %v4764_v0 = vsub.f32 %v12431_v19, %v4728_v10 }
 0x693   : > { %v6809_v18 = vpop.eup %6808  ;;  %v4770_v63 = vsub.f32 %v12432_v11, %v4728_v10  ;;  %v4776_v35 = vsub.f32 %v12433_v50, %v4728_v10  ;;  %v4782_v56 = vsub.f32 %v12434_v1, %v4728_v10  ;;  %v4788_v47 = vsub.f32 %v12435_v3, %v4728_v10 }
 0x694   : > { %v6811_v60 = vpop.eup %6810  ;;  %v4794_v61 = vsub.f32 %v10856_v33, %v4728_v10  ;;  %v4800_v43 = vsub.f32 %v10888_v49, %v4728_v10  ;;  %v4806_v58 = vsub.f32 %v10896_v48, %v4728_v10  ;;  %v4812_v36 = vsub.f32 %v10900_v25, %v4728_v10  ;;  %4938 = vst [vmem:[%s9552_s30 + $0x28] sm:$0xff] %v4746_v41 }
 0x695   : > { %4944 = vst [vmem:[%s9552_s30 + $0x58] sm:$0xff] %v4752_v62  ;;  %4950 = vst [vmem:[%s9552_s30 + $0x88] sm:$0xff] %v4758_v39  ;;  %v6813_v30 = vpop.eup %6812  ;;  %v4818_v4 = vsub.f32 %v10904_v6, %v4728_v10  ;;  %v4824_v33 = vsub.f32 %v10908_v8, %v4728_v10  ;;  %v4830_v49 = vsub.f32 %v10912_v55, %v4728_v10  ;;  %6826 = vpow2.f32 %v4367_v57 }
 0x696   : > { %4956 = vst [vmem:[%s9552_s30 + $0xb8] sm:$0xff] %v4764_v0  ;;  %v4836_v48 = vsub.f32 %v10918_v28, %v4728_v10  ;;  %4962 = vst [vmem:[%s9552_s30 + $0xe8] sm:$0xff] %v4770_v63  ;;  %v6815_v25 = vpop.eup %6814  ;;  %v4684_v6 = vadd.f32 %v6799_v51, %v4683_v32  ;;  %v4696_v23 = vadd.f32 %v6813_v30, %v6811_v60  ;;  %v4391_v8 = vmul.f32 1.442695, %v11224_v9 }
 0x697   : > { %4968 = vst [vmem:[%s9552_s30 + $0x118] sm:$0xff] %v4776_v35  ;;  %4974 = vst [vmem:[%s9552_s30 + $0x148] sm:$0xff] %v4782_v56  ;;  %v6817_v31 = vpop.eup %6816  ;;  %6828 = vpow2.f32 %v4379_v27  ;;  %v4415_v32 = vmul.f32 1.442695, %v11233_v24  ;;  %v4427_v57 = vmul.f32 1.442695, %v11238_v52 }
 0x698   : > { %4980 = vst [vmem:[%s9552_s30 + $0x178] sm:$0xff] %v4788_v47  ;;  %4986 = vst [vmem:[%s9552_s30 + $0x1a8] sm:$0xff] %v4794_v61  ;;  %v6819_v55 = vpop.eup %6818  ;;  %v4685_v28 = vadd.f32 %v6803_v34, %v4684_v6  ;;  %v4697_v14 = vadd.f32 %v6817_v31, %v4696_v23  ;;  %6830 = vpow2.f32 %v4391_v8  ;;  %v4439_v34 = vmul.f32 1.442695, %v11242_v16 }
 0x699   : > { %4992 = vst [vmem:[%s9552_s30 + $0x1d8] sm:$0xff] %v4800_v43  ;;  %4998 = vst [vmem:[%s9552_s30 + $0x208] sm:$0xff] %v4806_v58  ;;  %v6821_v7 = vpop.eup %6820  ;;  %6832 = vpow2.f32 %v4403_v46 }
 0x69a   : > { %5004 = vst [vmem:[%s9552_s30 + $0x238] sm:$0xff] %v4812_v36  ;;  %5010 = vst [vmem:[%s9552_s30 + $0x268] sm:$0xff] %v4818_v4  ;;  %v6823_v38 = vpop.eup %6822  ;;  %v4686_v37 = vadd.f32 %v6805_v59, %v4685_v28  ;;  %v4698_v10 = vadd.f32 %v6819_v55, %v4697_v14  ;;  %6834 = vpow2.f32 %v4415_v32  ;;  %v4451_v59 = vmul.f32 1.442695, %v11246_v42 }
 0x69b   : > { %5016 = vst [vmem:[%s9552_s30 + $0x298] sm:$0xff] %v4824_v33  ;;  %5022 = vst [vmem:[%s9552_s30 + $0x2c8] sm:$0xff] %v4830_v49  ;;  %v6825_v51 = vpop.eup %6824  ;;  %6836 = vpow2.f32 %v4427_v57  ;;  %v12438_v57 = vld [vmem:[#allocation102_spill] sm:$0xff] }
 0x69c   : > { %5028 = vst [vmem:[%s9552_s30 + $0x2f8] sm:$0xff] %v4836_v48  ;;  %v4687_v41 = vadd.f32 %v6807_v20, %v4686_v37  ;;  %v4699_v62 = vadd.f32 %v6821_v7, %v4698_v10  ;;  %6838 = vpow2.f32 %v4439_v34  ;;  %v4463_v20 = vmul.f32 1.442695, %v11251_v44 }
 0x69d   : > { %6840 = vpow2.f32 %v4451_v59 }
 0x69e   : > { %v4688_v39 = vadd.f32 %v6809_v18, %v4687_v41  ;;  %v4700_v19 = vadd.f32 %v6823_v38, %v4699_v62  ;;  %6842 = vpow2.f32 %v4463_v20  ;;  %v12437_v41 = vld [vmem:[#allocation99_spill] sm:$0xff] }
 0x69f   : > { %v6827_v11 = vpop.eup %6826 }
 0x6a0   : > { %v4689_v27 = vadd.f32 %v6815_v25, %v4688_v39  ;;  %v4701_v0 = vadd.f32 %v6825_v51, %v4700_v19  ;;  %v12436_v51 = vld [vmem:[#allocation98_spill] sm:$0xff]  ;;  %v12439_v19 = vld [vmem:[#allocation103_spill] sm:$0xff] }
 0x6a1   : > { %v6829_v35 = vpop.eup %6828 }
 0x6a2   : > { %v4690_v63 = vrot.slane %v4689_v27, 4  ;;  %v4702_v50 = vadd.f32 %v6827_v11, %v4701_v0  ;;  %v6831_v3 = vpop.eup %6830  ;;  %v12441_v11 = vld [vmem:[#allocation107_spill] sm:$0xff] }
 0x6a3   : > { %v6833_v60 = vpop.eup %6832 }
 0x6a4   : > { %v4691_v1 = vadd.f32 %v4690_v63, %v4689_v27  ;;  %v4703_v56 = vadd.f32 %v6829_v35, %v4702_v50  ;;  %v6835_v58 = vpop.eup %6834  ;;  %v12440_v27 = vld [vmem:[#allocation104_spill] sm:$0xff]  ;;  %v12443_v50 = vld [vmem:[#allocation134_spill] sm:$0xff]  ;;  %v12444_v35 = vld [vmem:[#allocation135_spill] sm:$0xff] }
 0x6a5   : > { %v6837_v4 = vpop.eup %6836  ;;  %v12442_v63 = vld [vmem:[#allocation48_spill] sm:$0xff] }
 0x6a6   : > { %v4692_v18 = vrot.slane %v4691_v1, 2  ;;  %v4704_v47 = vadd.f32 %v6831_v3, %v4703_v56  ;;  %v6839_v48 = vpop.eup %6838  ;;  %v12446_v3 = vld [vmem:[#allocation51_spill] sm:$0xff] }
 0x6a7   : > { %v6841_v6 = vpop.eup %6840 }
 0x6a8   : > { %v4693_v61 = vadd.f32 %v4692_v18, %v4691_v1  ;;  %v4705_v43 = vadd.f32 %v6833_v60, %v4704_v47  ;;  %v6843_v31 = vpop.eup %6842  ;;  %v12445_v1 = vld [vmem:[#allocation136_spill] sm:$0xff]  ;;  %v12447_v47 = vld [vmem:[#allocation95_spill] sm:$0xff] }
 0x6aa   : > { %v4694_v36 = vrot.slane %v4693_v61, 1  ;;  %v4706_v30 = vadd.f32 %v6835_v58, %v4705_v43 }
 0x6ac   : > { %v4695_v33 = vadd.f32 %v4694_v36, %v4693_v61  ;;  %v4707_v49 = vadd.f32 %v6837_v4, %v4706_v30 }
 0x6ae   : > { %6844 = vlog2.f32 %v4695_v33  ;;  %v4708_v25 = vadd.f32 %v6839_v48, %v4707_v49 }
 0x6b0   : > { %v4709_v23 = vadd.f32 %v6841_v6, %v4708_v25 }
 0x6b2   : > { %v4710_v8 = vadd.f32 %v6843_v31, %v4709_v23 }
 0x6b4   : > { %v4711_v55 = vrot.slane %v4710_v8, 4 }
 0x6b6   : > { %v4712_v28 = vadd.f32 %v4711_v55, %v4710_v8 }
 0x6b8   : > { %v6845_v14 = vpop.eup %6844  ;;  %v4713_v7 = vrot.slane %v4712_v28, 2 }
 0x6b9   : > { %v4738_v46 = vmul.f32 0.6931472, %v6845_v14 }
 0x6ba   : > { %v4714_v38 = vadd.f32 %v4713_v7, %v4712_v28 }
 0x6bb   : > { %v4841_v37 = vsub.f32 %v11081_v26, %v4738_v46  ;;  %v4847_v10 = vsub.f32 %v11084_v21, %v4738_v46  ;;  %v4853_v32 = vsub.f32 %v12436_v51, %v4738_v46  ;;  %v4859_v62 = vsub.f32 %v12437_v41, %v4738_v46 }
 0x6bc   : > { %v4865_v39 = vsub.f32 %v12438_v57, %v4738_v46  ;;  %v4871_v34 = vsub.f32 %v12439_v19, %v4738_v46  ;;  %v4877_v0 = vsub.f32 %v12440_v27, %v4738_v46  ;;  %v4883_v59 = vsub.f32 %v12441_v11, %v4738_v46 }
 0x6bd   : > { %v4889_v26 = vsub.f32 %v12442_v63, %v4738_v46  ;;  %v4895_v21 = vsub.f32 %v12443_v50, %v4738_v46  ;;  %v4901_v20 = vsub.f32 %v12444_v35, %v4738_v46  ;;  %v4907_v56 = vsub.f32 %v12445_v1, %v4738_v46  ;;  %5033 = vst [vmem:[%s9552_s30 + $0x320] sm:$0xff] %v4841_v37 }
 0x6be   : > { %5039 = vst [vmem:[%s9552_s30 + $0x350] sm:$0xff] %v4847_v10  ;;  %5045 = vst [vmem:[%s9552_s30 + $0x380] sm:$0xff] %v4853_v32  ;;  %v4913_v18 = vsub.f32 %v12446_v3, %v4738_v46  ;;  %v4919_v60 = vsub.f32 %v12447_v47, %v4738_v46  ;;  %v4925_v61 = vsub.f32 %v11123_v53, %v4738_v46  ;;  %v4715_v58 = vrot.slane %v4714_v38, 1 }
 0x6bf   : > { %5051 = vst [vmem:[%s9552_s30 + $0x3b0] sm:$0xff] %v4859_v62  ;;  %v4931_v43 = vsub.f32 %v11126_v17, %v4738_v46  ;;  %5057 = vst [vmem:[%s9552_s30 + $0x3e0] sm:$0xff] %v4865_v39 }
 0x6c0   : > { %5063 = vst [vmem:[%s9552_s30 + $0x410] sm:$0xff] %v4871_v34  ;;  %5069 = vst [vmem:[%s9552_s30 + $0x440] sm:$0xff] %v4877_v0  ;;  %v4716_v36 = vadd.f32 %v4715_v58, %v4714_v38 }
 0x6c1   : > { %5075 = vst [vmem:[%s9552_s30 + $0x470] sm:$0xff] %v4883_v59  ;;  %5081 = vst [vmem:[%s9552_s30 + $0x4a0] sm:$0xff] %v4889_v26 }
 0x6c2   : > { %5087 = vst [vmem:[%s9552_s30 + $0x4d0] sm:$0xff] %v4895_v21  ;;  %5093 = vst [vmem:[%s9552_s30 + $0x500] sm:$0xff] %v4901_v20  ;;  %6846 = vlog2.f32 %v4716_v36 }
 0x6c3   : > { %5099 = vst [vmem:[%s9552_s30 + $0x530] sm:$0xff] %v4907_v56  ;;  %5105 = vst [vmem:[%s9552_s30 + $0x560] sm:$0xff] %v4913_v18 }
 0x6c4   : > { %5111 = vst [vmem:[%s9552_s30 + $0x590] sm:$0xff] %v4919_v60  ;;  %5117 = vst [vmem:[%s9552_s30 + $0x5c0] sm:$0xff] %v4925_v61 }
 0x6c5   : > { %5123 = vst [vmem:[%s9552_s30 + $0x5f0] sm:$0xff] %v4931_v43 }
 0x6cc   : > { %v6847_v53 = vpop.eup %6846 }
 0x6cd   : > { %v4740_v17 = vmul.f32 0.6931472, %v6847_v53 }
 0x6cf   : > { %v4842_v30 = vsub.f32 %v11156_v22, %v4740_v17  ;;  %v4848_v4 = vsub.f32 %v11160_v29, %v4740_v17  ;;  %v4854_v33 = vsub.f32 %v11164_v15, %v4740_v17  ;;  %v4860_v49 = vsub.f32 %v11168_v2, %v4740_v17 }
 0x6d0   : > { %v4866_v48 = vsub.f32 %v11172_v5, %v4740_v17  ;;  %v4872_v25 = vsub.f32 %v11176_v40, %v4740_v17  ;;  %v4878_v6 = vsub.f32 %v11180_v45, %v4740_v17  ;;  %v4884_v23 = vsub.f32 %v11212_v13, %v4740_v17 }
 0x6d1   : > { %v4890_v22 = vsub.f32 %v11220_v54, %v4740_v17  ;;  %v4896_v29 = vsub.f32 %v11224_v9, %v4740_v17  ;;  %v4902_v15 = vsub.f32 %v11228_v12, %v4740_v17  ;;  %v4908_v2 = vsub.f32 %v11233_v24, %v4740_v17  ;;  %5034 = vst [vmem:[%s9552_s30 + $0x328] sm:$0xff] %v4842_v30 }
 0x6d2   : > { %5040 = vst [vmem:[%s9552_s30 + $0x358] sm:$0xff] %v4848_v4  ;;  %5046 = vst [vmem:[%s9552_s30 + $0x388] sm:$0xff] %v4854_v33  ;;  %v4914_v5 = vsub.f32 %v11238_v52, %v4740_v17  ;;  %v4920_v40 = vsub.f32 %v11242_v16, %v4740_v17  ;;  %v4926_v45 = vsub.f32 %v11246_v42, %v4740_v17 }
 0x6d3   : > { %5052 = vst [vmem:[%s9552_s30 + $0x3b8] sm:$0xff] %v4860_v49  ;;  %v4932_v13 = vsub.f32 %v11251_v44, %v4740_v17  ;;  %5058 = vst [vmem:[%s9552_s30 + $0x3e8] sm:$0xff] %v4866_v48 }
 0x6d4   : > { %5064 = vst [vmem:[%s9552_s30 + $0x418] sm:$0xff] %v4872_v25  ;;  %5070 = vst [vmem:[%s9552_s30 + $0x448] sm:$0xff] %v4878_v6 }
 0x6d5   : > { %5076 = vst [vmem:[%s9552_s30 + $0x478] sm:$0xff] %v4884_v23  ;;  %5082 = vst [vmem:[%s9552_s30 + $0x4a8] sm:$0xff] %v4890_v22 }
 0x6d6   : > { %5088 = vst [vmem:[%s9552_s30 + $0x4d8] sm:$0xff] %v4896_v29  ;;  %5094 = vst [vmem:[%s9552_s30 + $0x508] sm:$0xff] %v4902_v15 }
 0x6d7   : > { %5100 = vst [vmem:[%s9552_s30 + $0x538] sm:$0xff] %v4908_v2  ;;  %5106 = vst [vmem:[%s9552_s30 + $0x568] sm:$0xff] %v4914_v5 }
 0x6d8   : > { %5112 = vst [vmem:[%s9552_s30 + $0x598] sm:$0xff] %v4920_v40  ;;  %5118 = vst [vmem:[%s9552_s30 + $0x5c8] sm:$0xff] %v4926_v45 }
 0x6d9   : > { %5124 = vst [vmem:[%s9552_s30 + $0x5f8] sm:$0xff] %v4932_v13 }
 0x6da   : > { %7005 = shalt.err (!%p7002_p4)
}
 0x6db   : > { %s7006_s5 = scalar_lea.hbm %s11358_s10, 24576  ;;  %s7010_s15 = scalar_lea.hbm %s11426_s6, 49152 }
 0x6dc   : > { %p7007_p0 = scmp.ne.s32.totalorder %s11358_s10, %s7006_s5  ;;  %p7011_p8 = scmp.lt.u32.totalorder %s11358_s10, %s11426_s6 }
 0x6dd   : > { %p7012_p3 = scmp.lt.u32.totalorder %s7010_s15, %s7006_s5  ;;  %p7014_p10 = scmp.lt.u32.totalorder %s7006_s5, %s11358_s10 }
 0x6de   : > { %p7008_p12 = pnand %p7007_p0, %p7262_p6 }
 0x6df   : > { %p7013_p7 = por %p7012_p3, %p7011_p8 }
 0x6e0   : > { %p7009_p11 = pneg %p7008_p12 }
 0x6e1   : > { %p7015_p13 = por %p7014_p10, %p7013_p7 }
 0x6e3   : > { %p7016_p5 = pnand %p7015_p13, %p7009_p11 }
 0x6e5   : > { %7019 = shalt.err (!%p7016_p5)
}
 0x6e6   : > { %s7084_s29 = smov 768   ;;  %s7085_s20 = smov 48  }
 0x6e7   : > { %6101 = dma.vmem_to_hbm [thread:$0]  (%p7262_p6), %s11368_s9, 24576, %s11358_s10, %s5126_s27, %s7084_s29, %s7084_s29, %s7085_s20  }
 0x6e8 PF: > { %s5155_s30 = sand.u32 1, %s7058_s21   ;;  %p12448_p9 = scmp.ne.s32.totalorder %s11709_s28, 0 }
 0x6e9   : > { %p12449_p2 = scmp.ge.s32.totalorder %s7070_s24, 2  ;;  %s5156_s8 = scalar_lea.sflag [#allocation4], %s5155_s30 }
 0x6eb   : > { %p6121_p1 = pnand %p12449_p2, %p12448_p9 }
 0x6ed   : > { %7053 = dma.done.wait (!%p6121_p1), %s5156_s8, 24576  }
 0x6ee   : > { %7055 = vsyncadd (!%p6121_p1), %s5156_s8, 4294942720  ;;  %p23_p4 = scmp.ge.s32.totalorder %s7248_s18, 4   ;;  %s12450_s21 = smov %s7062_s22 }
 0x6ef   : > { %s12451_s22 = smov %s7066_s23  ;;  %s12452_s23 = smov %s7258_s13 }
 0x6f0   : > { %s12453_s24 = smov %s7248_s18  ;;  %25 = sbr.rel (!%p23_p4) target bundleno = 13 (0xd), region = 114 }
 0x6f7   :  { %5161 = vsyncpa [#allocation3], 1 }
 0x6f8   :  { %5163 = vsyncpa [#allocation3 + $0x1], 1 }
 0x6f9   :  { %5164 = vsyncpa [#allocation6], 1 }
 0x6fa   :  { %5166 = vsyncpa [#allocation6 + $0x1], 1 }
 0x6fb   :  { %5167 = vsyncpa [#allocation9], 1 }
 0x6fc   :  { %5168 = vsyncpa [#allocation4], 1 }
 0x6fd   :  { %5170 = vsyncpa [#allocation4 + $0x1], 1 }

</bundles_post_ra>
